<compile_context>
chip_gen: v5e
topology: v5e:2x2
jax: 0.10.0
libtpu: 0.0.40
codegen_flags: <defaults>
</compile_context>

<pallas_src>
import functools
import math

import jax
import jax.numpy as jnp
from jax.experimental import pallas as pl
from jax.experimental.pallas import tpu as pltpu


# ----------------------------- numerics helpers -----------------------------

def _layernorm(x, g, b, eps=1e-12):
    # torch.nn.LayerNorm: biased variance, eps inside sqrt.  Kept in f32.
    mu = jnp.mean(x, axis=-1, keepdims=True)
    var = jnp.mean(jnp.square(x - mu), axis=-1, keepdims=True)
    return (x - mu) * jax.lax.rsqrt(var + eps) * g + b


def _erf(x):
    # Abramowitz & Stegun 7.1.26, |err| <= 1.5e-7.  Uses only exp/mul/div/where
    # so it lowers on Mosaic without relying on a lax.erf lowering rule.
    p = 0.3275911
    a1, a2, a3, a4, a5 = (0.254829592, -0.284496736, 1.421413741,
                          -1.453152027, 1.061405429)
    ax = jnp.abs(x)
    t = 1.0 / (1.0 + p * ax)
    poly = ((((a5 * t + a4) * t + a3) * t + a2) * t + a1) * t
    y = 1.0 - poly * jnp.exp(-ax * ax)
    return jnp.where(x >= 0, y, -y)


def _gelu_exact(x):
    # Matches torch.nn.GELU() (erf formulation) to ~1e-7 absolute.
    return 0.5 * x * (1.0 + _erf(x * (1.0 / math.sqrt(2.0))))


def _vmem_limit_bytes(default=48 * 1024 * 1024):
    # Re-derive the scoped VMEM limit per TPU generation (v5e/v6e: 128 MiB,
    # v7x: 64 MiB physical); fall back to a safe constant if the query fails.
    try:
        cap = pltpu.get_tpu_info().vmem_capacity_bytes
        return int(min(cap * 3 // 4, 112 * 1024 * 1024))
    except Exception:
        return default


# ----------------------------- embedding LayerNorm -----------------------------

def embed_ln_kernel(x_ref, g_ref, b_ref, o_ref):
    o_ref[...] = _layernorm(x_ref[...], g_ref[...], b_ref[...]).astype(o_ref.dtype)


def _pick_row_tile(n, max_tile=1024):
    for cand in (1024, 512, 256, 128, 64, 32, 16, 8):
        if cand <= max_tile and n % cand == 0:
            return cand
    return n


def embed_layernorm(x2, g, b):
    """(B*S, H) f32 -> bf16 LayerNorm (mem-bound; large row tiles)."""
    n, h = x2.shape
    tile = _pick_row_tile(n)
    return pl.pallas_call(
        embed_ln_kernel,
        out_shape=jax.ShapeDtypeStruct((n, h), jnp.bfloat16),
        grid=(n // tile,),
        in_specs=[pl.BlockSpec((tile, h), lambda i: (i, 0)),
                  pl.BlockSpec((1, h), lambda i: (0, 0)),
                  pl.BlockSpec((1, h), lambda i: (0, 0))],
        out_specs=pl.BlockSpec((tile, h), lambda i: (i, 0)),
        compiler_params=pltpu.CompilerParams(
            dimension_semantics=("parallel",)),
    )(x2, g, b)


# ----------------------------- fused BERT encoder -----------------------------

def encoder_kernel(emb_hbm, mask_ref,
                   wqkv_ref, bqkv_ref, wo_ref, bo_ref, g1_ref, b1_ref,
                   wi_ref, bi_ref, wf_ref, bf_ref, g2_ref, b2_ref,
                   out_ref, q_scr, k_scr, v_scr, copy_sem,
                   *, num_heads, seq_tile):
    b = pl.program_id(0)          # batch-block index (parallel axis)
    l = pl.program_id(1)          # layer index
    t = pl.program_id(2)          # sequence tile index
    BB, S, H = out_ref.shape
    ts = seq_tile
    nh = num_heads
    hd = H // nh
    inv_scale = 1.0 / math.sqrt(hd)

    # Seed the resident bf16 activation from the HBM embeddings exactly once per
    # batch block (the embeddings live in HBM via memory_space=pl.ANY; nothing
    # is double-buffered in VMEM for the rest of the grid).
    @pl.when(jnp.logical_and(l == 0, t == 0))
    def _():
        cp = pltpu.make_async_copy(emb_hbm.at[pl.ds(b * BB, BB)], out_ref, copy_sem)
        cp.start()
        cp.wait()

    # First tile of every layer: fused full-sequence QKV projection from the
    # previous layer's activation (one big-N matmul per layer) into bf16 scratch.
    @pl.when(t == 0)
    def _():
        prev = out_ref[...].reshape(BB * S, H)                        # bf16
        qkv = jnp.dot(prev, wqkv_ref[0],
                      preferred_element_type=jnp.float32) + bqkv_ref[0]
        q_scr[...] = qkv[:, :H].reshape(BB, S, H).astype(jnp.bfloat16)
        k_scr[...] = qkv[:, H:2 * H].reshape(BB, S, H).astype(jnp.bfloat16)
        v_scr[...] = qkv[:, 2 * H:].reshape(BB, S, H).astype(jnp.bfloat16)
        # TODO(synk): tile this snapshot over the sequence for very long S.

    # ---- per-tile attention + output proj + LN1 + MLP + LN2 ----
    row0 = pl.multiple_of(t * ts, ts)
    x2 = out_ref[:, pl.ds(row0, ts), :].astype(jnp.float32).reshape(BB * ts, H)

    # Mask broadcast hoisted out of the head loop (JAX does not CSE broadcasts).
    mask_b = jnp.broadcast_to(mask_ref[...], (BB, ts, S))            # (BB, ts, S)

    # Per-head attention: ref-level Q/K/V slices, single batched (leading batch
    # dim) einsums per head, heads lane-concatenated once into a full-width
    # context (no 64-lane masked stores, no ctx scratch).
    # TODO(synk): Mosaic dot_general only supports a single leading batch dim,
    #             so heads stay a static loop rather than one 4-D batched einsum.
    ctx_parts = []
    for h_i in range(nh):
        lo = h_i * hd
        qh = q_scr[:, pl.ds(row0, ts), lo:lo + hd]                    # (BB, ts, hd)
        kh = k_scr[:, :, lo:lo + hd]                                  # (BB, S,  hd)
        vh = v_scr[:, :, lo:lo + hd]
        scores = jnp.einsum('bqd,bkd->bqk', qh, kh,
                            preferred_element_type=jnp.float32)
        scores = scores * inv_scale + mask_b
        m = jnp.max(scores, axis=-1, keepdims=True)
        p = jnp.exp(scores - m)
        denom = jnp.sum(p, axis=-1, keepdims=True)
        probs = (p * pl.reciprocal(denom, approx=True)).astype(jnp.bfloat16)
        ctx_h = jnp.einsum('bqk,bkd->bqd', probs, vh,
                           preferred_element_type=jnp.float32)
        ctx_parts.append(ctx_h.astype(jnp.bfloat16))
    ctx = jnp.concatenate(ctx_parts, axis=-1).reshape(BB * ts, H)     # bf16

    attn = jnp.dot(ctx, wo_ref[0], preferred_element_type=jnp.float32) + bo_ref[0]
    h1 = _layernorm(attn + x2, g1_ref[0], b1_ref[0])

    inter = jnp.dot(h1.astype(jnp.bfloat16), wi_ref[0],
                    preferred_element_type=jnp.float32) + bi_ref[0]
    inter = _gelu_exact(inter)                       # exact GELU == torch nn.GELU()
    mlp = jnp.dot(inter.astype(jnp.bfloat16), wf_ref[0],
                  preferred_element_type=jnp.float32) + bf_ref[0]
    y = _layernorm(mlp + h1, g2_ref[0], b2_ref[0])

    out_ref[:, pl.ds(row0, ts), :] = y.reshape(BB, ts, H).astype(jnp.bfloat16)


def encoder_forward(emb, add_mask3, ep, *, num_heads, seq_tile, batch_block):
    """emb: (B, S, H) bf16 embedding-LN output; add_mask3: (B, 1, S) f32."""
    B, S, H = emb.shape
    L = ep['wqkv'].shape[0]
    I = ep['wi'].shape[-1]
    bb = batch_block
    assert B % bb == 0 and S % seq_tile == 0 and H % num_heads == 0
    nb = B // bb
    n_tiles = S // seq_tile

    per_layer = lambda b, l, t: (l, 0, 0)
    per_batch3 = lambda b, l, t: (b, 0, 0)

    kernel = functools.partial(encoder_kernel, num_heads=num_heads,
                               seq_tile=seq_tile)
    return pl.pallas_call(
        kernel,
        out_shape=jax.ShapeDtypeStruct((B, S, H), jnp.bfloat16),
        grid=(nb, L, n_tiles),
        in_specs=[
            pl.BlockSpec(memory_space=pl.ANY),        # embeddings (HBM, DMA'd once)
            pl.BlockSpec((bb, 1, S), per_batch3),     # additive attention mask
            pl.BlockSpec((1, H, 3 * H), per_layer),   # wqkv (bf16)
            pl.BlockSpec((1, 1, 3 * H), per_layer),   # bqkv
            pl.BlockSpec((1, H, H), per_layer),       # wo (bf16)
            pl.BlockSpec((1, 1, H), per_layer),       # bo
            pl.BlockSpec((1, 1, H), per_layer),       # ln1 gamma
            pl.BlockSpec((1, 1, H), per_layer),       # ln1 beta
            pl.BlockSpec((1, H, I), per_layer),       # wi (bf16)
            pl.BlockSpec((1, 1, I), per_layer),       # bi
            pl.BlockSpec((1, I, H), per_layer),       # wf (bf16)
            pl.BlockSpec((1, 1, H), per_layer),       # bf
            pl.BlockSpec((1, 1, H), per_layer),       # ln2 gamma
            pl.BlockSpec((1, 1, H), per_layer),       # ln2 beta
        ],
        out_specs=pl.BlockSpec((bb, S, H), per_batch3),   # resident activation
        scratch_shapes=[pltpu.VMEM((bb, S, H), jnp.bfloat16),   # Q
                        pltpu.VMEM((bb, S, H), jnp.bfloat16),   # K
                        pltpu.VMEM((bb, S, H), jnp.bfloat16),   # V
                        pltpu.SemaphoreType.DMA(())],
        compiler_params=pltpu.CompilerParams(
            # Batch blocks are independent ("parallel" -> both v7x TensorCores);
            # the layer/tile axes MUST stay "arbitrary": the resident activation
            # and Q/K/V scratch carry state sequentially across them.
            dimension_semantics=("parallel", "arbitrary", "arbitrary"),
            vmem_limit_bytes=_vmem_limit_bytes()),
    )(emb, add_mask3, ep['wqkv'], ep['bqkv'], ep['wo'], ep['bo'],
      ep['ln1_g'], ep['ln1_b'], ep['wi'], ep['bi'], ep['wf'], ep['bf'],
      ep['ln2_g'], ep['ln2_b'])


# ----------------------------- QA / reasoning heads -----------------------------

def heads_kernel(seq_ref, qaw_ref, qab_ref, pw_ref, pb_ref, rw_ref, rb_ref,
                 qa_ref, reason_ref):
    B, ts, H = seq_ref.shape
    P = qa_ref.shape[-1]
    x = seq_ref[...]                                    # (B, ts, H) bf16
    xb = x.reshape(B * ts, H)

    # Lane-dense padded qa_outputs (col 0 = start, col 1 = end; rest zero-pad).
    qa = jnp.dot(xb, qaw_ref[...], preferred_element_type=jnp.float32) + qab_ref[...]
    qa_ref[...] = qa.reshape(B, ts, P)

    # CLS pooling + reasoning head only at tile 0; the constant-index output
    # block keeps the value resident in VMEM until the final writeback.
    @pl.when(pl.program_id(0) == 0)
    def _():
        cls = x[:, 0, :]                                # (B, H) bf16, CLS token
        pooled = jnp.tanh(jnp.dot(cls, pw_ref[...],
                                  preferred_element_type=jnp.float32) + pb_ref[...])
        reason_ref[...] = jnp.dot(pooled.astype(jnp.bfloat16), rw_ref[...],
                                  preferred_element_type=jnp.float32) + rb_ref[...]


def qa_heads(seq, hp, *, seq_tile=128):
    B, S, H = seq.shape
    P = hp['qa_w'].shape[1]
    assert S % seq_tile == 0
    qa_out, reason_out = pl.pallas_call(
        heads_kernel,
        out_shape=(jax.ShapeDtypeStruct((B, S, P), jnp.float32),
                   jax.ShapeDtypeStruct((B, P), jnp.float32)),
        grid=(S // seq_tile,),
        in_specs=[pl.BlockSpec((B, seq_tile, H), lambda i: (0, i, 0)),
                  pl.BlockSpec((H, P), lambda i: (0, 0)),
                  pl.BlockSpec((1, P), lambda i: (0, 0)),
                  pl.BlockSpec((H, H), lambda i: (0, 0)),
                  pl.BlockSpec((1, H), lambda i: (0, 0)),
                  pl.BlockSpec((H, P), lambda i: (0, 0)),
                  pl.BlockSpec((1, P), lambda i: (0, 0))],
        out_specs=(pl.BlockSpec((B, seq_tile, P), lambda i: (0, i, 0)),
                   pl.BlockSpec((B, P), lambda i: (0, 0))),
        compiler_params=pltpu.CompilerParams(
            dimension_semantics=("arbitrary",),
            vmem_limit_bytes=_vmem_limit_bytes()),
    )(seq, hp['qa_w'], hp['qa_b'], hp['pool_w'], hp['pool_b'],
      hp['reason_w'], hp['reason_b'])
    # Preserve column ordering: col 0 = start, col 1 = end.
    start_logits = qa_out[..., 0]
    end_logits = qa_out[..., 1]
    reasoning_logits = reason_out[:, :hp['reason_dim']]
    return start_logits, end_logits, reasoning_logits


# ----------------------------- parameters -----------------------------

def init_params(key, *, vocab_size, hidden_size, num_layers, num_heads,
                intermediate_size, max_position, type_vocab, reasoning_vocab,
                pad_lanes=128):
    H, I, L = hidden_size, intermediate_size, num_layers
    std = 0.02
    keys = iter(jax.random.split(key, 12))
    bf16 = jnp.bfloat16

    def nrm(shape, dtype=jnp.float32):
        return (std * jax.random.normal(next(keys), shape, jnp.float32)).astype(dtype)

    encoder = {
        # Q|K|V fused along output columns (equivalent to three separate Linears).
        'wqkv': nrm((L, H, 3 * H), bf16),
        'bqkv': jnp.zeros((L, 1, 3 * H), jnp.float32),
        'wo': nrm((L, H, H), bf16),
        'bo': jnp.zeros((L, 1, H), jnp.float32),
        'ln1_g': jnp.ones((L, 1, H), jnp.float32),
        'ln1_b': jnp.zeros((L, 1, H), jnp.float32),
        'wi': nrm((L, H, I), bf16),
        'bi': jnp.zeros((L, 1, I), jnp.float32),
        'wf': nrm((L, I, H), bf16),
        'bf': jnp.zeros((L, 1, H), jnp.float32),
        'ln2_g': jnp.ones((L, 1, H), jnp.float32),
        'ln2_b': jnp.zeros((L, 1, H), jnp.float32),
    }

    P = pad_lanes
    qa_w = jnp.concatenate(
        [nrm((H, 2)), jnp.zeros((H, P - 2), jnp.float32)], axis=1).astype(bf16)
    reason_w = jnp.concatenate(
        [nrm((H, reasoning_vocab)),
         jnp.zeros((H, P - reasoning_vocab), jnp.float32)], axis=1).astype(bf16)
    heads = {
        'pool_w': nrm((H, H), bf16),
        'pool_b': jnp.zeros((1, H), jnp.float32),
        'qa_w': qa_w,
        'qa_b': jnp.zeros((1, P), jnp.float32),
        'reason_w': reason_w,
        'reason_b': jnp.zeros((1, P), jnp.float32),
        'reason_dim': reasoning_vocab,
    }

    return {
        'num_heads': num_heads,
        'word_emb': nrm((vocab_size, H)),
        'pos_emb': nrm((max_position, H)),
        'type_emb': nrm((type_vocab, H)),
        'emb_ln_g': jnp.ones((1, H), jnp.float32),
        'emb_ln_b': jnp.zeros((1, H), jnp.float32),
        'encoder': encoder,
        'heads': heads,
    }


# ----------------------------- forward pass -----------------------------

def bert_qa_forward(params, input_ids, attention_mask=None, token_type_ids=None,
                    *, seq_tile=128, batch_block=None):
    """Inference forward equivalent to BertForQuestionAnsweringWithReasoning."""
    B, S = input_ids.shape
    H = params['word_emb'].shape[1]
    if token_type_ids is None:
        token_type_ids = jnp.zeros_like(input_ids)
    if batch_block is None:
        # Expose a "parallel" batch axis (2 blocks) when possible -> both v7x TCs.
        batch_block = B // 2 if B % 2 == 0 else B

    # Embedding gathers (host-side glue) + gridded LayerNorm kernel (-> bf16).
    words = params['word_emb'][input_ids]                        # (B, S, H)
    positions = params['pos_emb'][:S][None, :, :]                # (1, S, H)
    types = params['type_emb'][token_type_ids]                   # (B, S, H)
    emb_sum = (words + positions + types).astype(jnp.float32).reshape(B * S, H)
    emb = embed_layernorm(emb_sum, params['emb_ln_g'], params['emb_ln_b'])
    emb = emb.reshape(B, S, H)                                   # bf16
    # TODO(synk): dropout layers are identity (inference semantics; p not applied).

    # Extended additive mask (1 - mask) * -10000, broadcast over heads/queries in-kernel.
    if attention_mask is None:
        add_mask = jnp.zeros((B, 1, S), jnp.float32)
    else:
        add_mask = ((1.0 - attention_mask.astype(jnp.float32)) * -10000.0
                    ).reshape(B, 1, S)

    seq = encoder_forward(emb, add_mask, params['encoder'],
                          num_heads=params['num_heads'], seq_tile=seq_tile,
                          batch_block=batch_block)

    # TODO(synk): CrossEntropyLoss training branch (start/end/reasoning labels)
    #             not implemented (inference only).
    return qa_heads(seq, params['heads'], seq_tile=seq_tile)


# ----------------------------- main -----------------------------

if __name__ == "__main__":
    # Small, lane/sublane-friendly config consistent with BertConfigCustom.
    VOCAB = 100
    HIDDEN = 128        # multiple of 128 lanes
    LAYERS = 2
    HEADS = 2           # head_dim = 64 (same as real BERT)
    INTER = 256
    MAX_POS = 128
    TYPE_VOCAB = 2
    REASON_VOCAB = 3
    B, S = 2, 128
    SEQ_TILE = 128      # per-tile matmul M = batch_block * SEQ_TILE
    BATCH_BLOCK = 1     # 2 parallel batch blocks (exercises the v7x dual-TC path)

    key = jax.random.PRNGKey(0)
    k_param, k_ids, k_types = jax.random.split(key, 3)

    params = init_params(k_param,
                         vocab_size=VOCAB, hidden_size=HIDDEN, num_layers=LAYERS,
                         num_heads=HEADS, intermediate_size=INTER,
                         max_position=MAX_POS, type_vocab=TYPE_VOCAB,
                         reasoning_vocab=REASON_VOCAB)

    input_ids = jax.random.randint(k_ids, (B, S), 0, VOCAB, dtype=jnp.int32)
    token_type_ids = jax.random.randint(k_types, (B, S), 0, TYPE_VOCAB, dtype=jnp.int32)
    attention_mask = jnp.ones((B, S), jnp.float32).at[1, S - 16:].set(0.0)  # padding

    fwd = jax.jit(functools.partial(bert_qa_forward, params,
                                    seq_tile=SEQ_TILE, batch_block=BATCH_BLOCK))
    start_logits, end_logits, reasoning_logits = fwd(
        input_ids, attention_mask, token_type_ids)

    jax.block_until_ready((start_logits, end_logits, reasoning_logits))
    assert start_logits.shape == (B, S)
    assert end_logits.shape == (B, S)
    assert reasoning_logits.shape == (B, REASON_VOCAB)
    assert bool(jnp.all(jnp.isfinite(start_logits)))
    assert bool(jnp.all(jnp.isfinite(end_logits)))
    assert bool(jnp.all(jnp.isfinite(reasoning_logits)))
    print("KERNEL_OK")
</pallas_src>

<mosaic_0001>
module attributes {stable_mosaic.version = 11 : i64} {
  func.func @embed_ln_kernel(%arg0: i32, %arg1: memref<256x128xf32, #tpu.memory_space<vmem>>, %arg2: memref<1x128xf32, #tpu.memory_space<vmem>>, %arg3: memref<1x128xf32, #tpu.memory_space<vmem>>, %arg4: memref<256x128xbf16, #tpu.memory_space<vmem>>) attributes {dimension_semantics = [#tpu.dimension_semantics<parallel>], iteration_bounds = array<i64: 1>, scalar_prefetch = 0 : i64, scratch_operands = 0 : i64, tpu.core_type = #tpu.core_type<tc>, window_params = [{transform_indices = @transform_0, window_bounds = array<i64: 256, 128>}, {pipeline_mode = #tpu.pipeline_mode<synchronous>, transform_indices = @transform_1, window_bounds = array<i64: 1, 128>}, {pipeline_mode = #tpu.pipeline_mode<synchronous>, transform_indices = @transform_2, window_bounds = array<i64: 1, 128>}, {transform_indices = @transform_3, window_bounds = array<i64: 256, 128>}]} {
    %c0 = arith.constant 0 : index
    %c0_0 = arith.constant 0 : index
    %0 = vector.load %arg1[%c0, %c0_0] : memref<256x128xf32, #tpu.memory_space<vmem>>, vector<256x128xf32>
    %c0_1 = arith.constant 0 : index
    %c0_2 = arith.constant 0 : index
    %1 = vector.load %arg2[%c0_1, %c0_2] : memref<1x128xf32, #tpu.memory_space<vmem>>, vector<1x128xf32>
    %c0_3 = arith.constant 0 : index
    %c0_4 = arith.constant 0 : index
    %2 = vector.load %arg3[%c0_3, %c0_4] : memref<1x128xf32, #tpu.memory_space<vmem>>, vector<1x128xf32>
    %cst = arith.constant dense<0.000000e+00> : vector<256xf32>
    %3 = vector.multi_reduction <add>, %0, %cst [1] : vector<256x128xf32> to vector<256xf32>
    %4 = vector.shape_cast %3 : vector<256xf32> to vector<256x1xf32>
    %cst_5 = arith.constant 1.280000e+02 : f32
    %5 = vector.broadcast %cst_5 : f32 to vector<256x1xf32>
    %6 = arith.divf %4, %5 : vector<256x1xf32>
    %7 = vector.broadcast %6 : vector<256x1xf32> to vector<256x128xf32>
    %8 = arith.subf %0, %7 : vector<256x128xf32>
    %9 = arith.mulf %8, %8 : vector<256x128xf32>
    %cst_6 = arith.constant dense<0.000000e+00> : vector<256xf32>
    %10 = vector.multi_reduction <add>, %9, %cst_6 [1] : vector<256x128xf32> to vector<256xf32>
    %11 = vector.shape_cast %10 : vector<256xf32> to vector<256x1xf32>
    %cst_7 = arith.constant 1.280000e+02 : f32
    %12 = vector.broadcast %cst_7 : f32 to vector<256x1xf32>
    %13 = arith.divf %11, %12 : vector<256x1xf32>
    %14 = vector.broadcast %6 : vector<256x1xf32> to vector<256x128xf32>
    %15 = arith.subf %0, %14 : vector<256x128xf32>
    %cst_8 = arith.constant 9.99999996E-13 : f32
    %16 = vector.broadcast %cst_8 : f32 to vector<256x1xf32>
    %17 = arith.addf %13, %16 : vector<256x1xf32>
    %18 = math.rsqrt %17 : vector<256x1xf32>
    %19 = vector.broadcast %18 : vector<256x1xf32> to vector<256x128xf32>
    %20 = arith.mulf %15, %19 : vector<256x128xf32>
    %21 = vector.broadcast %1 : vector<1x128xf32> to vector<256x128xf32>
    %22 = arith.mulf %20, %21 : vector<256x128xf32>
    %23 = vector.broadcast %2 : vector<1x128xf32> to vector<256x128xf32>
    %24 = arith.addf %22, %23 : vector<256x128xf32>
    %25 = arith.truncf %24 : vector<256x128xf32> to vector<256x128xbf16>
    %c0_9 = arith.constant 0 : index
    %c0_10 = arith.constant 0 : index
    %26 = vector.load %arg4[%c0_9, %c0_10] : memref<256x128xbf16, #tpu.memory_space<vmem>>, vector<256x128xbf16>
    tpu.vector_store %arg4[%c0_9, %c0_10], %25 {strides = array<i32>} : memref<256x128xbf16, #tpu.memory_space<vmem>>, vector<256x128xbf16>,
    return
  }
  func.func @transform_0(%arg0: i32) -> (i32, i32) {
    %c0_i32 = arith.constant 0 : i32
    %c0_i32_0 = arith.constant 0 : i32
    return %arg0, %c0_i32 : i32, i32
  }
  func.func @transform_1(%arg0: i32) -> (i32, i32) {
    %c0_i32 = arith.constant 0 : i32
    %c0_i32_0 = arith.constant 0 : i32
    %c0_i32_1 = arith.constant 0 : i32
    return %c0_i32, %c0_i32_0 : i32, i32
  }
  func.func @transform_2(%arg0: i32) -> (i32, i32) {
    %c0_i32 = arith.constant 0 : i32
    %c0_i32_0 = arith.constant 0 : i32
    %c0_i32_1 = arith.constant 0 : i32
    return %c0_i32, %c0_i32_0 : i32, i32
  }
  func.func @transform_3(%arg0: i32) -> (i32, i32) {
    %c0_i32 = arith.constant 0 : i32
    %c0_i32_0 = arith.constant 0 : i32
    return %arg0, %c0_i32 : i32, i32
  }
}

module attributes {stable_mosaic.version = 11 : i64} {
  func.func @encoder_kernel(%arg0: i32, %arg1: i32, %arg2: i32, %arg3: memref<2x128x128xbf16, #tpu.memory_space<any>>, %arg4: memref<1x1x128xf32, #tpu.memory_space<vmem>>, %arg5: memref<1x128x384xbf16, #tpu.memory_space<vmem>>, %arg6: memref<1x1x384xf32, #tpu.memory_space<vmem>>, %arg7: memref<1x128x128xbf16, #tpu.memory_space<vmem>>, %arg8: memref<1x1x128xf32, #tpu.memory_space<vmem>>, %arg9: memref<1x1x128xf32, #tpu.memory_space<vmem>>, %arg10: memref<1x1x128xf32, #tpu.memory_space<vmem>>, %arg11: memref<1x128x256xbf16, #tpu.memory_space<vmem>>, %arg12: memref<1x1x256xf32, #tpu.memory_space<vmem>>, %arg13: memref<1x256x128xbf16, #tpu.memory_space<vmem>>, %arg14: memref<1x1x128xf32, #tpu.memory_space<vmem>>, %arg15: memref<1x1x128xf32, #tpu.memory_space<vmem>>, %arg16: memref<1x1x128xf32, #tpu.memory_space<vmem>>, %arg17: memref<1x128x128xbf16, #tpu.memory_space<vmem>>, %arg18: memref<1x128x128xbf16, #tpu.memory_space<vmem>>, %arg19: memref<1x128x128xbf16, #tpu.memory_space<vmem>>, %arg20: memref<1x128x128xbf16, #tpu.memory_space<vmem>>, %arg21: memref<!tpu.dma_semaphore, #tpu.memory_space<semaphore_mem>>) attributes {dimension_semantics = [#tpu.dimension_semantics<parallel>, #tpu.dimension_semantics<arbitrary>, #tpu.dimension_semantics<arbitrary>], iteration_bounds = array<i64: 2, 2, 1>, scalar_prefetch = 0 : i64, scratch_operands = 4 : i64, tpu.core_type = #tpu.core_type<tc>, window_params = [{}, {transform_indices = @transform_1, window_bounds = array<i64: 1, 1, 128>}, {transform_indices = @transform_2, window_bounds = array<i64: 1, 128, 384>}, {transform_indices = @transform_3, window_bounds = array<i64: 1, 1, 384>}, {transform_indices = @transform_4, window_bounds = array<i64: 1, 128, 128>}, {transform_indices = @transform_5, window_bounds = array<i64: 1, 1, 128>}, {transform_indices = @transform_6, window_bounds = array<i64: 1, 1, 128>}, {transform_indices = @transform_7, window_bounds = array<i64: 1, 1, 128>}, {transform_indices = @transform_8, window_bounds = array<i64: 1, 128, 256>}, {transform_indices = @transform_9, window_bounds = array<i64: 1, 1, 256>}, {transform_indices = @transform_10, window_bounds = array<i64: 1, 256, 128>}, {transform_indices = @transform_11, window_bounds = array<i64: 1, 1, 128>}, {transform_indices = @transform_12, window_bounds = array<i64: 1, 1, 128>}, {transform_indices = @transform_13, window_bounds = array<i64: 1, 1, 128>}, {transform_indices = @transform_14, window_bounds = array<i64: 1, 128, 128>}]} {
    %c0_i32 = arith.constant 0 : i32
    %0 = arith.cmpi eq, %arg1, %c0_i32 : i32
    %c0_i32_0 = arith.constant 0 : i32
    %1 = arith.cmpi eq, %arg2, %c0_i32_0 : i32
    %2 = arith.andi %0, %1 : i1
    %3 = arith.extui %2 : i1 to i32
    %c0_i32_1 = arith.constant 0 : i32
    %4 = arith.cmpi ne, %3, %c0_i32_1 : i32
    scf.if %4 {
      %c1_i32 = arith.constant 1 : i32
      %182 = arith.muli %arg0, %c1_i32 : i32
      %c0_i32_92 = arith.constant 0 : i32
      %c0_i32_93 = arith.constant 0 : i32
      %183 = tpu.memref_slice %arg3[%182, %c0_i32_92, %c0_i32_93] : memref<2x128x128xbf16, #tpu.memory_space<any>> -> memref<1x128x128xbf16, #tpu.memory_space<any>>
      tpu.enqueue_dma source(%183 : memref<1x128x128xbf16, #tpu.memory_space<any>>) target(%arg17 : memref<1x128x128xbf16, #tpu.memory_space<vmem>>) target_semaphore(%arg21 : memref<!tpu.dma_semaphore, #tpu.memory_space<semaphore_mem>>)
      %c0_i32_94 = arith.constant 0 : i32
      %c0_i32_95 = arith.constant 0 : i32
      %184 = tpu.memref_slice %arg3[%182, %c0_i32_94, %c0_i32_95] : memref<2x128x128xbf16, #tpu.memory_space<any>> -> memref<1x128x128xbf16, #tpu.memory_space<any>>
      tpu.wait_dma2 semaphore(%arg21 : memref<!tpu.dma_semaphore, #tpu.memory_space<semaphore_mem>>) src(%184 : memref<1x128x128xbf16, #tpu.memory_space<any>>) dst(%arg17 : memref<1x128x128xbf16, #tpu.memory_space<vmem>>)
    } else {
    }
    %c0_i32_2 = arith.constant 0 : i32
    %5 = arith.cmpi eq, %arg2, %c0_i32_2 : i32
    %6 = arith.extui %5 : i1 to i32
    %c0_i32_3 = arith.constant 0 : i32
    %7 = arith.cmpi ne, %6, %c0_i32_3 : i32
    scf.if %7 {
      %c0_92 = arith.constant 0 : index
      %c0_93 = arith.constant 0 : index
      %c0_94 = arith.constant 0 : index
      %182 = vector.load %arg17[%c0_92, %c0_93, %c0_94] : memref<1x128x128xbf16, #tpu.memory_space<vmem>>, vector<1x128x128xbf16>
      %183 = vector.shape_cast %182 : vector<1x128x128xbf16> to vector<128x128xbf16>
      %c0_95 = arith.constant 0 : index
      %c0_96 = arith.constant 0 : index
      %c0_97 = arith.constant 0 : index
      %184 = vector.load %arg5[%c0_95, %c0_96, %c0_97] : memref<1x128x384xbf16, #tpu.memory_space<vmem>>, vector<1x128x384xbf16>
      %185 = vector.shape_cast %184 : vector<1x128x384xbf16> to vector<128x384xbf16>
      %cst_98 = arith.constant dense<0.000000e+00> : vector<128x384xf32>
      %186 = tpu.matmul %183, %185, %cst_98 {dimension_numbers = #tpu.dot_dimension_numbers<[1], [0], [0], [1], [0, 0, 1, 1], [], []>} : vector<128x128xbf16>, vector<128x384xbf16>, vector<128x384xf32> -> vector<128x384xf32>
      %c0_99 = arith.constant 0 : index
      %c0_100 = arith.constant 0 : index
      %c0_101 = arith.constant 0 : index
      %187 = vector.load %arg6[%c0_99, %c0_100, %c0_101] : memref<1x1x384xf32, #tpu.memory_space<vmem>>, vector<1x1x384xf32>
      %188 = vector.shape_cast %187 : vector<1x1x384xf32> to vector<1x384xf32>
      %189 = vector.broadcast %188 : vector<1x384xf32> to vector<128x384xf32>
      %190 = arith.addf %186, %189 : vector<128x384xf32>
      %191 = vector.extract_strided_slice %190 {offsets = [0, 0], sizes = [128, 128], strides = [1, 1]} : vector<128x384xf32> to vector<128x128xf32>
      %192 = vector.shape_cast %191 : vector<128x128xf32> to vector<1x128x128xf32>
      %193 = arith.truncf %192 : vector<1x128x128xf32> to vector<1x128x128xbf16>
      %c0_102 = arith.constant 0 : index
      %c0_103 = arith.constant 0 : index
      %c0_104 = arith.constant 0 : index
      %194 = vector.load %arg18[%c0_102, %c0_103, %c0_104] : memref<1x128x128xbf16, #tpu.memory_space<vmem>>, vector<1x128x128xbf16>
      tpu.vector_store %arg18[%c0_102, %c0_103, %c0_104], %193 {strides = array<i32>} : memref<1x128x128xbf16, #tpu.memory_space<vmem>>, vector<1x128x128xbf16>,
      %195 = vector.extract_strided_slice %190 {offsets = [0, 128], sizes = [128, 128], strides = [1, 1]} : vector<128x384xf32> to vector<128x128xf32>
      %196 = vector.shape_cast %195 : vector<128x128xf32> to vector<1x128x128xf32>
      %197 = arith.truncf %196 : vector<1x128x128xf32> to vector<1x128x128xbf16>
      %c0_105 = arith.constant 0 : index
      %c0_106 = arith.constant 0 : index
      %c0_107 = arith.constant 0 : index
      %198 = vector.load %arg19[%c0_105, %c0_106, %c0_107] : memref<1x128x128xbf16, #tpu.memory_space<vmem>>, vector<1x128x128xbf16>
      tpu.vector_store %arg19[%c0_105, %c0_106, %c0_107], %197 {strides = array<i32>} : memref<1x128x128xbf16, #tpu.memory_space<vmem>>, vector<1x128x128xbf16>,
      %199 = vector.extract_strided_slice %190 {offsets = [0, 256], sizes = [128, 128], strides = [1, 1]} : vector<128x384xf32> to vector<128x128xf32>
      %200 = vector.shape_cast %199 : vector<128x128xf32> to vector<1x128x128xf32>
      %201 = arith.truncf %200 : vector<1x128x128xf32> to vector<1x128x128xbf16>
      %c0_108 = arith.constant 0 : index
      %c0_109 = arith.constant 0 : index
      %c0_110 = arith.constant 0 : index
      %202 = vector.load %arg20[%c0_108, %c0_109, %c0_110] : memref<1x128x128xbf16, #tpu.memory_space<vmem>>, vector<1x128x128xbf16>
      tpu.vector_store %arg20[%c0_108, %c0_109, %c0_110], %201 {strides = array<i32>} : memref<1x128x128xbf16, #tpu.memory_space<vmem>>, vector<1x128x128xbf16>,
    } else {
    }
    %c128_i32 = arith.constant 128 : i32
    %8 = arith.muli %arg2, %c128_i32 : i32
    %9 = tpu.assume_multiple %8, 128 : i32
    %c0 = arith.constant 0 : index
    %10 = arith.index_cast %9 : i32 to index
    %c0_4 = arith.constant 0 : index
    %11 = vector.load %arg17[%c0, %10, %c0_4] : memref<1x128x128xbf16, #tpu.memory_space<vmem>>, vector<1x128x128xbf16>
    %12 = arith.extf %11 : vector<1x128x128xbf16> to vector<1x128x128xf32>
    %13 = vector.shape_cast %12 : vector<1x128x128xf32> to vector<128x128xf32>
    %c0_5 = arith.constant 0 : index
    %c0_6 = arith.constant 0 : index
    %c0_7 = arith.constant 0 : index
    %14 = vector.load %arg4[%c0_5, %c0_6, %c0_7] : memref<1x1x128xf32, #tpu.memory_space<vmem>>, vector<1x1x128xf32>
    %15 = vector.shape_cast %14 : vector<1x1x128xf32> to vector<1x1x128xf32>
    %16 = vector.broadcast %15 : vector<1x1x128xf32> to vector<1x128x128xf32>
    %c0_8 = arith.constant 0 : index
    %17 = arith.index_cast %9 : i32 to index
    %c0_9 = arith.constant 0 : index
    %18 = vector.load %arg18[%c0_8, %17, %c0_9] : memref<1x128x128xbf16, #tpu.memory_space<vmem>>, vector<1x128x64xbf16>
    %c0_10 = arith.constant 0 : index
    %c0_11 = arith.constant 0 : index
    %c0_12 = arith.constant 0 : index
    %19 = vector.load %arg19[%c0_10, %c0_11, %c0_12] : memref<1x128x128xbf16, #tpu.memory_space<vmem>>, vector<1x128x64xbf16>
    %c0_13 = arith.constant 0 : index
    %c0_14 = arith.constant 0 : index
    %c0_15 = arith.constant 0 : index
    %20 = vector.load %arg20[%c0_13, %c0_14, %c0_15] : memref<1x128x128xbf16, #tpu.memory_space<vmem>>, vector<1x128x64xbf16>
    "tpu.trace_start"() <{level = 10 : i32, message = "bqd,bkd->bqk"}> : () -> ()
    %cst = arith.constant dense<0.000000e+00> : vector<1x128x128xf32>
    %21 = tpu.matmul %18, %19, %cst {dimension_numbers = #tpu.dot_dimension_numbers<[2], [2], [1], [1], [0, 0, 0, 1, 1, 1], [0], [0]>} : vector<1x128x64xbf16>, vector<1x128x64xbf16>, vector<1x128x128xf32> -> vector<1x128x128xf32>
    "tpu.trace_stop"() : () -> ()
    %cst_16 = arith.constant 1.250000e-01 : f32
    %22 = vector.broadcast %cst_16 : f32 to vector<1x128x128xf32>
    %23 = arith.mulf %21, %22 : vector<1x128x128xf32>
    %24 = arith.addf %23, %16 : vector<1x128x128xf32>
    %cst_17 = arith.constant dense<0xFF800000> : vector<1x128xf32>
    %25 = vector.multi_reduction <maximumf>, %24, %cst_17 [2] : vector<1x128x128xf32> to vector<1x128xf32>
    %26 = vector.shape_cast %25 : vector<1x128xf32> to vector<1x128x1xf32>
    %27 = vector.broadcast %26 : vector<1x128x1xf32> to vector<1x128x128xf32>
    %28 = arith.subf %24, %27 : vector<1x128x128xf32>
    %29 = math.exp %28 : vector<1x128x128xf32>
    %cst_18 = arith.constant dense<0.000000e+00> : vector<1x128xf32>
    %30 = vector.multi_reduction <add>, %29, %cst_18 [2] : vector<1x128x128xf32> to vector<1x128xf32>
    %31 = vector.shape_cast %30 : vector<1x128xf32> to vector<1x128x1xf32>
    %32 = tpu.reciprocal %31 {approx = true} : vector<1x128x1xf32> -> vector<1x128x1xf32>
    %33 = vector.broadcast %32 : vector<1x128x1xf32> to vector<1x128x128xf32>
    %34 = arith.mulf %29, %33 : vector<1x128x128xf32>
    %35 = arith.truncf %34 : vector<1x128x128xf32> to vector<1x128x128xbf16>
    "tpu.trace_start"() <{level = 10 : i32, message = "bqk,bkd->bqd"}> : () -> ()
    %cst_19 = arith.constant dense<0.000000e+00> : vector<1x128x64xf32>
    %36 = tpu.matmul %35, %20, %cst_19 {dimension_numbers = #tpu.dot_dimension_numbers<[2], [1], [1], [2], [0, 0, 0, 1, 1, 2], [0], [0]>} : vector<1x128x128xbf16>, vector<1x128x64xbf16>, vector<1x128x64xf32> -> vector<1x128x64xf32>
    "tpu.trace_stop"() : () -> ()
    %37 = arith.truncf %36 : vector<1x128x64xf32> to vector<1x128x64xbf16>
    %c0_20 = arith.constant 0 : index
    %38 = arith.index_cast %9 : i32 to index
    %c64 = arith.constant 64 : index
    %39 = vector.load %arg18[%c0_20, %38, %c64] : memref<1x128x128xbf16, #tpu.memory_space<vmem>>, vector<1x128x64xbf16>
    %c0_21 = arith.constant 0 : index
    %c0_22 = arith.constant 0 : index
    %c64_23 = arith.constant 64 : index
    %40 = vector.load %arg19[%c0_21, %c0_22, %c64_23] : memref<1x128x128xbf16, #tpu.memory_space<vmem>>, vector<1x128x64xbf16>
    %c0_24 = arith.constant 0 : index
    %c0_25 = arith.constant 0 : index
    %c64_26 = arith.constant 64 : index
    %41 = vector.load %arg20[%c0_24, %c0_25, %c64_26] : memref<1x128x128xbf16, #tpu.memory_space<vmem>>, vector<1x128x64xbf16>
    "tpu.trace_start"() <{level = 10 : i32, message = "bqd,bkd->bqk"}> : () -> ()
    %cst_27 = arith.constant dense<0.000000e+00> : vector<1x128x128xf32>
    %42 = tpu.matmul %39, %40, %cst_27 {dimension_numbers = #tpu.dot_dimension_numbers<[2], [2], [1], [1], [0, 0, 0, 1, 1, 1], [0], [0]>} : vector<1x128x64xbf16>, vector<1x128x64xbf16>, vector<1x128x128xf32> -> vector<1x128x128xf32>
    "tpu.trace_stop"() : () -> ()
    %cst_28 = arith.constant 1.250000e-01 : f32
    %43 = vector.broadcast %cst_28 : f32 to vector<1x128x128xf32>
    %44 = arith.mulf %42, %43 : vector<1x128x128xf32>
    %45 = arith.addf %44, %16 : vector<1x128x128xf32>
    %cst_29 = arith.constant dense<0xFF800000> : vector<1x128xf32>
    %46 = vector.multi_reduction <maximumf>, %45, %cst_29 [2] : vector<1x128x128xf32> to vector<1x128xf32>
    %47 = vector.shape_cast %46 : vector<1x128xf32> to vector<1x128x1xf32>
    %48 = vector.broadcast %47 : vector<1x128x1xf32> to vector<1x128x128xf32>
    %49 = arith.subf %45, %48 : vector<1x128x128xf32>
    %50 = math.exp %49 : vector<1x128x128xf32>
    %cst_30 = arith.constant dense<0.000000e+00> : vector<1x128xf32>
    %51 = vector.multi_reduction <add>, %50, %cst_30 [2] : vector<1x128x128xf32> to vector<1x128xf32>
    %52 = vector.shape_cast %51 : vector<1x128xf32> to vector<1x128x1xf32>
    %53 = tpu.reciprocal %52 {approx = true} : vector<1x128x1xf32> -> vector<1x128x1xf32>
    %54 = vector.broadcast %53 : vector<1x128x1xf32> to vector<1x128x128xf32>
    %55 = arith.mulf %50, %54 : vector<1x128x128xf32>
    %56 = arith.truncf %55 : vector<1x128x128xf32> to vector<1x128x128xbf16>
    "tpu.trace_start"() <{level = 10 : i32, message = "bqk,bkd->bqd"}> : () -> ()
    %cst_31 = arith.constant dense<0.000000e+00> : vector<1x128x64xf32>
    %57 = tpu.matmul %56, %41, %cst_31 {dimension_numbers = #tpu.dot_dimension_numbers<[2], [1], [1], [2], [0, 0, 0, 1, 1, 2], [0], [0]>} : vector<1x128x128xbf16>, vector<1x128x64xbf16>, vector<1x128x64xf32> -> vector<1x128x64xf32>
    "tpu.trace_stop"() : () -> ()
    %58 = arith.truncf %57 : vector<1x128x64xf32> to vector<1x128x64xbf16>
    %59 = tpu.concatenate %37, %58 in 2 : vector<1x128x64xbf16>, vector<1x128x64xbf16> -> vector<1x128x128xbf16>
    %60 = vector.shape_cast %59 : vector<1x128x128xbf16> to vector<128x128xbf16>
    %c0_32 = arith.constant 0 : index
    %c0_33 = arith.constant 0 : index
    %c0_34 = arith.constant 0 : index
    %61 = vector.load %arg7[%c0_32, %c0_33, %c0_34] : memref<1x128x128xbf16, #tpu.memory_space<vmem>>, vector<1x128x128xbf16>
    %62 = vector.shape_cast %61 : vector<1x128x128xbf16> to vector<128x128xbf16>
    %cst_35 = arith.constant dense<0.000000e+00> : vector<128x128xf32>
    %63 = tpu.matmul %60, %62, %cst_35 {dimension_numbers = #tpu.dot_dimension_numbers<[1], [0], [0], [1], [0, 0, 1, 1], [], []>} : vector<128x128xbf16>, vector<128x128xbf16>, vector<128x128xf32> -> vector<128x128xf32>
    %c0_36 = arith.constant 0 : index
    %c0_37 = arith.constant 0 : index
    %c0_38 = arith.constant 0 : index
    %64 = vector.load %arg8[%c0_36, %c0_37, %c0_38] : memref<1x1x128xf32, #tpu.memory_space<vmem>>, vector<1x1x128xf32>
    %65 = vector.shape_cast %64 : vector<1x1x128xf32> to vector<1x128xf32>
    %66 = vector.broadcast %65 : vector<1x128xf32> to vector<128x128xf32>
    %67 = arith.addf %63, %66 : vector<128x128xf32>
    %68 = arith.addf %67, %13 : vector<128x128xf32>
    %c0_39 = arith.constant 0 : index
    %c0_40 = arith.constant 0 : index
    %c0_41 = arith.constant 0 : index
    %69 = vector.load %arg9[%c0_39, %c0_40, %c0_41] : memref<1x1x128xf32, #tpu.memory_space<vmem>>, vector<1x1x128xf32>
    %70 = vector.shape_cast %69 : vector<1x1x128xf32> to vector<1x128xf32>
    %c0_42 = arith.constant 0 : index
    %c0_43 = arith.constant 0 : index
    %c0_44 = arith.constant 0 : index
    %71 = vector.load %arg10[%c0_42, %c0_43, %c0_44] : memref<1x1x128xf32, #tpu.memory_space<vmem>>, vector<1x1x128xf32>
    %72 = vector.shape_cast %71 : vector<1x1x128xf32> to vector<1x128xf32>
    %cst_45 = arith.constant dense<0.000000e+00> : vector<128xf32>
    %73 = vector.multi_reduction <add>, %68, %cst_45 [1] : vector<128x128xf32> to vector<128xf32>
    %74 = vector.shape_cast %73 : vector<128xf32> to vector<128x1xf32>
    %cst_46 = arith.constant 1.280000e+02 : f32
    %75 = vector.broadcast %cst_46 : f32 to vector<128x1xf32>
    %76 = arith.divf %74, %75 : vector<128x1xf32>
    %77 = vector.broadcast %76 : vector<128x1xf32> to vector<128x128xf32>
    %78 = arith.subf %68, %77 : vector<128x128xf32>
    %79 = arith.mulf %78, %78 : vector<128x128xf32>
    %cst_47 = arith.constant dense<0.000000e+00> : vector<128xf32>
    %80 = vector.multi_reduction <add>, %79, %cst_47 [1] : vector<128x128xf32> to vector<128xf32>
    %81 = vector.shape_cast %80 : vector<128xf32> to vector<128x1xf32>
    %cst_48 = arith.constant 1.280000e+02 : f32
    %82 = vector.broadcast %cst_48 : f32 to vector<128x1xf32>
    %83 = arith.divf %81, %82 : vector<128x1xf32>
    %84 = vector.broadcast %76 : vector<128x1xf32> to vector<128x128xf32>
    %85 = arith.subf %68, %84 : vector<128x128xf32>
    %cst_49 = arith.constant 9.99999996E-13 : f32
    %86 = vector.broadcast %cst_49 : f32 to vector<128x1xf32>
    %87 = arith.addf %83, %86 : vector<128x1xf32>
    %88 = math.rsqrt %87 : vector<128x1xf32>
    %89 = vector.broadcast %88 : vector<128x1xf32> to vector<128x128xf32>
    %90 = arith.mulf %85, %89 : vector<128x128xf32>
    %91 = vector.broadcast %70 : vector<1x128xf32> to vector<128x128xf32>
    %92 = arith.mulf %90, %91 : vector<128x128xf32>
    %93 = vector.broadcast %72 : vector<1x128xf32> to vector<128x128xf32>
    %94 = arith.addf %92, %93 : vector<128x128xf32>
    %95 = arith.truncf %94 : vector<128x128xf32> to vector<128x128xbf16>
    %c0_50 = arith.constant 0 : index
    %c0_51 = arith.constant 0 : index
    %c0_52 = arith.constant 0 : index
    %96 = vector.load %arg11[%c0_50, %c0_51, %c0_52] : memref<1x128x256xbf16, #tpu.memory_space<vmem>>, vector<1x128x256xbf16>
    %97 = vector.shape_cast %96 : vector<1x128x256xbf16> to vector<128x256xbf16>
    %cst_53 = arith.constant dense<0.000000e+00> : vector<128x256xf32>
    %98 = tpu.matmul %95, %97, %cst_53 {dimension_numbers = #tpu.dot_dimension_numbers<[1], [0], [0], [1], [0, 0, 1, 1], [], []>} : vector<128x128xbf16>, vector<128x256xbf16>, vector<128x256xf32> -> vector<128x256xf32>
    %c0_54 = arith.constant 0 : index
    %c0_55 = arith.constant 0 : index
    %c0_56 = arith.constant 0 : index
    %99 = vector.load %arg12[%c0_54, %c0_55, %c0_56] : memref<1x1x256xf32, #tpu.memory_space<vmem>>, vector<1x1x256xf32>
    %100 = vector.shape_cast %99 : vector<1x1x256xf32> to vector<1x256xf32>
    %101 = vector.broadcast %100 : vector<1x256xf32> to vector<128x256xf32>
    %102 = arith.addf %98, %101 : vector<128x256xf32>
    %cst_57 = arith.constant 5.000000e-01 : f32
    %103 = vector.broadcast %cst_57 : f32 to vector<128x256xf32>
    %104 = arith.mulf %103, %102 : vector<128x256xf32>
    %cst_58 = arith.constant 0.707106769 : f32
    %105 = vector.broadcast %cst_58 : f32 to vector<128x256xf32>
    %106 = arith.mulf %102, %105 : vector<128x256xf32>
    %107 = math.absf %106 : vector<128x256xf32>
    %cst_59 = arith.constant 0.327591091 : f32
    %108 = vector.broadcast %cst_59 : f32 to vector<128x256xf32>
    %109 = arith.mulf %108, %107 : vector<128x256xf32>
    %cst_60 = arith.constant 1.000000e+00 : f32
    %110 = vector.broadcast %cst_60 : f32 to vector<128x256xf32>
    %111 = arith.addf %110, %109 : vector<128x256xf32>
    %cst_61 = arith.constant 1.000000e+00 : f32
    %112 = vector.broadcast %cst_61 : f32 to vector<128x256xf32>
    %113 = arith.divf %112, %111 : vector<128x256xf32>
    %cst_62 = arith.constant 1.06140542 : f32
    %114 = vector.broadcast %cst_62 : f32 to vector<128x256xf32>
    %115 = arith.mulf %114, %113 : vector<128x256xf32>
    %cst_63 = arith.constant -1.45315206 : f32
    %116 = vector.broadcast %cst_63 : f32 to vector<128x256xf32>
    %117 = arith.addf %115, %116 : vector<128x256xf32>
    %118 = arith.mulf %117, %113 : vector<128x256xf32>
    %cst_64 = arith.constant 1.42141378 : f32
    %119 = vector.broadcast %cst_64 : f32 to vector<128x256xf32>
    %120 = arith.addf %118, %119 : vector<128x256xf32>
    %121 = arith.mulf %120, %113 : vector<128x256xf32>
    %cst_65 = arith.constant -0.284496725 : f32
    %122 = vector.broadcast %cst_65 : f32 to vector<128x256xf32>
    %123 = arith.addf %121, %122 : vector<128x256xf32>
    %124 = arith.mulf %123, %113 : vector<128x256xf32>
    %cst_66 = arith.constant 0.254829586 : f32
    %125 = vector.broadcast %cst_66 : f32 to vector<128x256xf32>
    %126 = arith.addf %124, %125 : vector<128x256xf32>
    %127 = arith.mulf %126, %113 : vector<128x256xf32>
    %cst_67 = arith.constant 0.000000e+00 : f32
    %128 = vector.broadcast %cst_67 : f32 to vector<128x256xf32>
    %129 = arith.subf %128, %107 : vector<128x256xf32>
    %130 = arith.mulf %129, %107 : vector<128x256xf32>
    %131 = math.exp %130 : vector<128x256xf32>
    %132 = arith.mulf %127, %131 : vector<128x256xf32>
    %cst_68 = arith.constant 1.000000e+00 : f32
    %133 = vector.broadcast %cst_68 : f32 to vector<128x256xf32>
    %134 = arith.subf %133, %132 : vector<128x256xf32>
    %cst_69 = arith.constant 0.000000e+00 : f32
    %135 = vector.broadcast %cst_69 : f32 to vector<128x256xf32>
    %136 = arith.cmpf oge, %106, %135 : vector<128x256xf32>
    %cst_70 = arith.constant 0.000000e+00 : f32
    %137 = vector.broadcast %cst_70 : f32 to vector<128x256xf32>
    %138 = arith.subf %137, %134 : vector<128x256xf32>
    %139 = arith.select %136, %134, %138 : vector<128x256xi1>, vector<128x256xf32>
    %cst_71 = arith.constant 1.000000e+00 : f32
    %140 = vector.broadcast %cst_71 : f32 to vector<128x256xf32>
    %141 = arith.addf %140, %139 : vector<128x256xf32>
    %142 = arith.mulf %104, %141 : vector<128x256xf32>
    %143 = arith.truncf %142 : vector<128x256xf32> to vector<128x256xbf16>
    %c0_72 = arith.constant 0 : index
    %c0_73 = arith.constant 0 : index
    %c0_74 = arith.constant 0 : index
    %144 = vector.load %arg13[%c0_72, %c0_73, %c0_74] : memref<1x256x128xbf16, #tpu.memory_space<vmem>>, vector<1x256x128xbf16>
    %145 = vector.shape_cast %144 : vector<1x256x128xbf16> to vector<256x128xbf16>
    %cst_75 = arith.constant dense<0.000000e+00> : vector<128x128xf32>
    %146 = tpu.matmul %143, %145, %cst_75 {dimension_numbers = #tpu.dot_dimension_numbers<[1], [0], [0], [1], [0, 0, 1, 1], [], []>} : vector<128x256xbf16>, vector<256x128xbf16>, vector<128x128xf32> -> vector<128x128xf32>
    %c0_76 = arith.constant 0 : index
    %c0_77 = arith.constant 0 : index
    %c0_78 = arith.constant 0 : index
    %147 = vector.load %arg14[%c0_76, %c0_77, %c0_78] : memref<1x1x128xf32, #tpu.memory_space<vmem>>, vector<1x1x128xf32>
    %148 = vector.shape_cast %147 : vector<1x1x128xf32> to vector<1x128xf32>
    %149 = vector.broadcast %148 : vector<1x128xf32> to vector<128x128xf32>
    %150 = arith.addf %146, %149 : vector<128x128xf32>
    %151 = arith.addf %150, %94 : vector<128x128xf32>
    %c0_79 = arith.constant 0 : index
    %c0_80 = arith.constant 0 : index
    %c0_81 = arith.constant 0 : index
    %152 = vector.load %arg15[%c0_79, %c0_80, %c0_81] : memref<1x1x128xf32, #tpu.memory_space<vmem>>, vector<1x1x128xf32>
    %153 = vector.shape_cast %152 : vector<1x1x128xf32> to vector<1x128xf32>
    %c0_82 = arith.constant 0 : index
    %c0_83 = arith.constant 0 : index
    %c0_84 = arith.constant 0 : index
    %154 = vector.load %arg16[%c0_82, %c0_83, %c0_84] : memref<1x1x128xf32, #tpu.memory_space<vmem>>, vector<1x1x128xf32>
    %155 = vector.shape_cast %154 : vector<1x1x128xf32> to vector<1x128xf32>
    %cst_85 = arith.constant dense<0.000000e+00> : vector<128xf32>
    %156 = vector.multi_reduction <add>, %151, %cst_85 [1] : vector<128x128xf32> to vector<128xf32>
    %157 = vector.shape_cast %156 : vector<128xf32> to vector<128x1xf32>
    %cst_86 = arith.constant 1.280000e+02 : f32
    %158 = vector.broadcast %cst_86 : f32 to vector<128x1xf32>
    %159 = arith.divf %157, %158 : vector<128x1xf32>
    %160 = vector.broadcast %159 : vector<128x1xf32> to vector<128x128xf32>
    %161 = arith.subf %151, %160 : vector<128x128xf32>
    %162 = arith.mulf %161, %161 : vector<128x128xf32>
    %cst_87 = arith.constant dense<0.000000e+00> : vector<128xf32>
    %163 = vector.multi_reduction <add>, %162, %cst_87 [1] : vector<128x128xf32> to vector<128xf32>
    %164 = vector.shape_cast %163 : vector<128xf32> to vector<128x1xf32>
    %cst_88 = arith.constant 1.280000e+02 : f32
    %165 = vector.broadcast %cst_88 : f32 to vector<128x1xf32>
    %166 = arith.divf %164, %165 : vector<128x1xf32>
    %167 = vector.broadcast %159 : vector<128x1xf32> to vector<128x128xf32>
    %168 = arith.subf %151, %167 : vector<128x128xf32>
    %cst_89 = arith.constant 9.99999996E-13 : f32
    %169 = vector.broadcast %cst_89 : f32 to vector<128x1xf32>
    %170 = arith.addf %166, %169 : vector<128x1xf32>
    %171 = math.rsqrt %170 : vector<128x1xf32>
    %172 = vector.broadcast %171 : vector<128x1xf32> to vector<128x128xf32>
    %173 = arith.mulf %168, %172 : vector<128x128xf32>
    %174 = vector.broadcast %153 : vector<1x128xf32> to vector<128x128xf32>
    %175 = arith.mulf %173, %174 : vector<128x128xf32>
    %176 = vector.broadcast %155 : vector<1x128xf32> to vector<128x128xf32>
    %177 = arith.addf %175, %176 : vector<128x128xf32>
    %178 = vector.shape_cast %177 : vector<128x128xf32> to vector<1x128x128xf32>
    %179 = arith.truncf %178 : vector<1x128x128xf32> to vector<1x128x128xbf16>
    %c0_90 = arith.constant 0 : index
    %180 = arith.index_cast %9 : i32 to index
    %c0_91 = arith.constant 0 : index
    %181 = vector.load %arg17[%c0_90, %180, %c0_91] : memref<1x128x128xbf16, #tpu.memory_space<vmem>>, vector<1x128x128xbf16>
    tpu.vector_store %arg17[%c0_90, %180, %c0_91], %179 {strides = array<i32>} : memref<1x128x128xbf16, #tpu.memory_space<vmem>>, vector<1x128x128xbf16>,
    return
  }
  func.func @transform_1(%arg0: i32, %arg1: i32, %arg2: i32) -> (i32, i32, i32) {
    %c0_i32 = arith.constant 0 : i32
    %c0_i32_0 = arith.constant 0 : i32
    %c0_i32_1 = arith.constant 0 : i32
    return %arg0, %c0_i32, %c0_i32_0 : i32, i32, i32
  }
  func.func @transform_2(%arg0: i32, %arg1: i32, %arg2: i32) -> (i32, i32, i32) {
    %c0_i32 = arith.constant 0 : i32
    %c0_i32_0 = arith.constant 0 : i32
    %c0_i32_1 = arith.constant 0 : i32
    return %arg1, %c0_i32, %c0_i32_0 : i32, i32, i32
  }
  func.func @transform_3(%arg0: i32, %arg1: i32, %arg2: i32) -> (i32, i32, i32) {
    %c0_i32 = arith.constant 0 : i32
    %c0_i32_0 = arith.constant 0 : i32
    %c0_i32_1 = arith.constant 0 : i32
    return %arg1, %c0_i32, %c0_i32_0 : i32, i32, i32
  }
  func.func @transform_4(%arg0: i32, %arg1: i32, %arg2: i32) -> (i32, i32, i32) {
    %c0_i32 = arith.constant 0 : i32
    %c0_i32_0 = arith.constant 0 : i32
    %c0_i32_1 = arith.constant 0 : i32
    return %arg1, %c0_i32, %c0_i32_0 : i32, i32, i32
  }
  func.func @transform_5(%arg0: i32, %arg1: i32, %arg2: i32) -> (i32, i32, i32) {
    %c0_i32 = arith.constant 0 : i32
    %c0_i32_0 = arith.constant 0 : i32
    %c0_i32_1 = arith.constant 0 : i32
    return %arg1, %c0_i32, %c0_i32_0 : i32, i32, i32
  }
  func.func @transform_6(%arg0: i32, %arg1: i32, %arg2: i32) -> (i32, i32, i32) {
    %c0_i32 = arith.constant 0 : i32
    %c0_i32_0 = arith.constant 0 : i32
    %c0_i32_1 = arith.constant 0 : i32
    return %arg1, %c0_i32, %c0_i32_0 : i32, i32, i32
  }
  func.func @transform_7(%arg0: i32, %arg1: i32, %arg2: i32) -> (i32, i32, i32) {
    %c0_i32 = arith.constant 0 : i32
    %c0_i32_0 = arith.constant 0 : i32
    %c0_i32_1 = arith.constant 0 : i32
    return %arg1, %c0_i32, %c0_i32_0 : i32, i32, i32
  }
  func.func @transform_8(%arg0: i32, %arg1: i32, %arg2: i32) -> (i32, i32, i32) {
    %c0_i32 = arith.constant 0 : i32
    %c0_i32_0 = arith.constant 0 : i32
    %c0_i32_1 = arith.constant 0 : i32
    return %arg1, %c0_i32, %c0_i32_0 : i32, i32, i32
  }
  func.func @transform_9(%arg0: i32, %arg1: i32, %arg2: i32) -> (i32, i32, i32) {
    %c0_i32 = arith.constant 0 : i32
    %c0_i32_0 = arith.constant 0 : i32
    %c0_i32_1 = arith.constant 0 : i32
    return %arg1, %c0_i32, %c0_i32_0 : i32, i32, i32
  }
  func.func @transform_10(%arg0: i32, %arg1: i32, %arg2: i32) -> (i32, i32, i32) {
    %c0_i32 = arith.constant 0 : i32
    %c0_i32_0 = arith.constant 0 : i32
    %c0_i32_1 = arith.constant 0 : i32
    return %arg1, %c0_i32, %c0_i32_0 : i32, i32, i32
  }
  func.func @transform_11(%arg0: i32, %arg1: i32, %arg2: i32) -> (i32, i32, i32) {
    %c0_i32 = arith.constant 0 : i32
    %c0_i32_0 = arith.constant 0 : i32
    %c0_i32_1 = arith.constant 0 : i32
    return %arg1, %c0_i32, %c0_i32_0 : i32, i32, i32
  }
  func.func @transform_12(%arg0: i32, %arg1: i32, %arg2: i32) -> (i32, i32, i32) {
    %c0_i32 = arith.constant 0 : i32
    %c0_i32_0 = arith.constant 0 : i32
    %c0_i32_1 = arith.constant 0 : i32
    return %arg1, %c0_i32, %c0_i32_0 : i32, i32, i32
  }
  func.func @transform_13(%arg0: i32, %arg1: i32, %arg2: i32) -> (i32, i32, i32) {
    %c0_i32 = arith.constant 0 : i32
    %c0_i32_0 = arith.constant 0 : i32
    %c0_i32_1 = arith.constant 0 : i32
    return %arg1, %c0_i32, %c0_i32_0 : i32, i32, i32
  }
  func.func @transform_14(%arg0: i32, %arg1: i32, %arg2: i32) -> (i32, i32, i32) {
    %c0_i32 = arith.constant 0 : i32
    %c0_i32_0 = arith.constant 0 : i32
    %c0_i32_1 = arith.constant 0 : i32
    return %arg0, %c0_i32, %c0_i32_0 : i32, i32, i32
  }
}

module attributes {stable_mosaic.version = 11 : i64} {
  func.func @heads_kernel(%arg0: i32, %arg1: memref<2x128x128xbf16, #tpu.memory_space<vmem>>, %arg2: memref<128x128xbf16, #tpu.memory_space<vmem>>, %arg3: memref<1x128xf32, #tpu.memory_space<vmem>>, %arg4: memref<128x128xbf16, #tpu.memory_space<vmem>>, %arg5: memref<1x128xf32, #tpu.memory_space<vmem>>, %arg6: memref<128x128xbf16, #tpu.memory_space<vmem>>, %arg7: memref<1x128xf32, #tpu.memory_space<vmem>>, %arg8: memref<2x128x128xf32, #tpu.memory_space<vmem>>, %arg9: memref<2x128xf32, #tpu.memory_space<vmem>>) attributes {dimension_semantics = [#tpu.dimension_semantics<arbitrary>], iteration_bounds = array<i64: 1>, scalar_prefetch = 0 : i64, scratch_operands = 0 : i64, tpu.core_type = #tpu.core_type<tc>, window_params = [{transform_indices = @transform_0, window_bounds = array<i64: 2, 128, 128>}, {pipeline_mode = #tpu.pipeline_mode<synchronous>, transform_indices = @transform_1, window_bounds = array<i64: 128, 128>}, {pipeline_mode = #tpu.pipeline_mode<synchronous>, transform_indices = @transform_2, window_bounds = array<i64: 1, 128>}, {pipeline_mode = #tpu.pipeline_mode<synchronous>, transform_indices = @transform_3, window_bounds = array<i64: 128, 128>}, {pipeline_mode = #tpu.pipeline_mode<synchronous>, transform_indices = @transform_4, window_bounds = array<i64: 1, 128>}, {pipeline_mode = #tpu.pipeline_mode<synchronous>, transform_indices = @transform_5, window_bounds = array<i64: 128, 128>}, {pipeline_mode = #tpu.pipeline_mode<synchronous>, transform_indices = @transform_6, window_bounds = array<i64: 1, 128>}, {transform_indices = @transform_7, window_bounds = array<i64: 2, 128, 128>}, {pipeline_mode = #tpu.pipeline_mode<synchronous>, transform_indices = @transform_8, window_bounds = array<i64: 2, 128>}]} {
    %c0 = arith.constant 0 : index
    %c0_0 = arith.constant 0 : index
    %c0_1 = arith.constant 0 : index
    %0 = vector.load %arg1[%c0, %c0_0, %c0_1] : memref<2x128x128xbf16, #tpu.memory_space<vmem>>, vector<2x128x128xbf16>
    %1 = vector.shape_cast %0 : vector<2x128x128xbf16> to vector<256x128xbf16>
    %c0_2 = arith.constant 0 : index
    %c0_3 = arith.constant 0 : index
    %2 = vector.load %arg2[%c0_2, %c0_3] : memref<128x128xbf16, #tpu.memory_space<vmem>>, vector<128x128xbf16>
    %cst = arith.constant dense<0.000000e+00> : vector<256x128xf32>
    %3 = tpu.matmul %1, %2, %cst {dimension_numbers = #tpu.dot_dimension_numbers<[1], [0], [0], [1], [0, 0, 1, 1], [], []>} : vector<256x128xbf16>, vector<128x128xbf16>, vector<256x128xf32> -> vector<256x128xf32>
    %c0_4 = arith.constant 0 : index
    %c0_5 = arith.constant 0 : index
    %4 = vector.load %arg3[%c0_4, %c0_5] : memref<1x128xf32, #tpu.memory_space<vmem>>, vector<1x128xf32>
    %5 = vector.broadcast %4 : vector<1x128xf32> to vector<256x128xf32>
    %6 = arith.addf %3, %5 : vector<256x128xf32>
    %7 = vector.shape_cast %6 : vector<256x128xf32> to vector<2x128x128xf32>
    %c0_6 = arith.constant 0 : index
    %c0_7 = arith.constant 0 : index
    %c0_8 = arith.constant 0 : index
    %8 = vector.load %arg8[%c0_6, %c0_7, %c0_8] : memref<2x128x128xf32, #tpu.memory_space<vmem>>, vector<2x128x128xf32>
    tpu.vector_store %arg8[%c0_6, %c0_7, %c0_8], %7 {strides = array<i32>} : memref<2x128x128xf32, #tpu.memory_space<vmem>>, vector<2x128x128xf32>,
    %c0_i32 = arith.constant 0 : i32
    %9 = arith.cmpi eq, %arg0, %c0_i32 : i32
    %10 = arith.extui %9 : i1 to i32
    %c0_i32_9 = arith.constant 0 : i32
    %11 = arith.cmpi ne, %10, %c0_i32_9 : i32
    scf.if %11 {
      %12 = vector.extract_strided_slice %0 {offsets = [0, 0, 0], sizes = [2, 1, 128], strides = [1, 1, 1]} : vector<2x128x128xbf16> to vector<2x1x128xbf16>
      %13 = vector.shape_cast %12 : vector<2x1x128xbf16> to vector<2x128xbf16>
      %c0_10 = arith.constant 0 : index
      %c0_11 = arith.constant 0 : index
      %14 = vector.load %arg4[%c0_10, %c0_11] : memref<128x128xbf16, #tpu.memory_space<vmem>>, vector<128x128xbf16>
      %cst_12 = arith.constant dense<0.000000e+00> : vector<2x128xf32>
      %15 = tpu.matmul %13, %14, %cst_12 {dimension_numbers = #tpu.dot_dimension_numbers<[1], [0], [0], [1], [0, 0, 1, 1], [], []>} : vector<2x128xbf16>, vector<128x128xbf16>, vector<2x128xf32> -> vector<2x128xf32>
      %c0_13 = arith.constant 0 : index
      %c0_14 = arith.constant 0 : index
      %16 = vector.load %arg5[%c0_13, %c0_14] : memref<1x128xf32, #tpu.memory_space<vmem>>, vector<1x128xf32>
      %17 = vector.broadcast %16 : vector<1x128xf32> to vector<2x128xf32>
      %18 = arith.addf %15, %17 : vector<2x128xf32>
      %19 = math.tanh %18 : vector<2x128xf32>
      %20 = arith.truncf %19 : vector<2x128xf32> to vector<2x128xbf16>
      %c0_15 = arith.constant 0 : index
      %c0_16 = arith.constant 0 : index
      %21 = vector.load %arg6[%c0_15, %c0_16] : memref<128x128xbf16, #tpu.memory_space<vmem>>, vector<128x128xbf16>
      %cst_17 = arith.constant dense<0.000000e+00> : vector<2x128xf32>
      %22 = tpu.matmul %20, %21, %cst_17 {dimension_numbers = #tpu.dot_dimension_numbers<[1], [0], [0], [1], [0, 0, 1, 1], [], []>} : vector<2x128xbf16>, vector<128x128xbf16>, vector<2x128xf32> -> vector<2x128xf32>
      %c0_18 = arith.constant 0 : index
      %c0_19 = arith.constant 0 : index
      %23 = vector.load %arg7[%c0_18, %c0_19] : memref<1x128xf32, #tpu.memory_space<vmem>>, vector<1x128xf32>
      %24 = vector.broadcast %23 : vector<1x128xf32> to vector<2x128xf32>
      %25 = arith.addf %22, %24 : vector<2x128xf32>
      %c0_20 = arith.constant 0 : index
      %c0_21 = arith.constant 0 : index
      %26 = vector.load %arg9[%c0_20, %c0_21] : memref<2x128xf32, #tpu.memory_space<vmem>>, vector<2x128xf32>
      tpu.vector_store %arg9[%c0_20, %c0_21], %25 {strides = array<i32>} : memref<2x128xf32, #tpu.memory_space<vmem>>, vector<2x128xf32>,
    } else {
    }
    return
  }
  func.func @transform_0(%arg0: i32) -> (i32, i32, i32) {
    %c0_i32 = arith.constant 0 : i32
    %c0_i32_0 = arith.constant 0 : i32
    %c0_i32_1 = arith.constant 0 : i32
    return %c0_i32, %arg0, %c0_i32_0 : i32, i32, i32
  }
  func.func @transform_1(%arg0: i32) -> (i32, i32) {
    %c0_i32 = arith.constant 0 : i32
    %c0_i32_0 = arith.constant 0 : i32
    %c0_i32_1 = arith.constant 0 : i32
    return %c0_i32, %c0_i32_0 : i32, i32
  }
  func.func @transform_2(%arg0: i32) -> (i32, i32) {
    %c0_i32 = arith.constant 0 : i32
    %c0_i32_0 = arith.constant 0 : i32
    %c0_i32_1 = arith.constant 0 : i32
    return %c0_i32, %c0_i32_0 : i32, i32
  }
  func.func @transform_3(%arg0: i32) -> (i32, i32) {
    %c0_i32 = arith.constant 0 : i32
    %c0_i32_0 = arith.constant 0 : i32
    %c0_i32_1 = arith.constant 0 : i32
    return %c0_i32, %c0_i32_0 : i32, i32
  }
  func.func @transform_4(%arg0: i32) -> (i32, i32) {
    %c0_i32 = arith.constant 0 : i32
    %c0_i32_0 = arith.constant 0 : i32
    %c0_i32_1 = arith.constant 0 : i32
    return %c0_i32, %c0_i32_0 : i32, i32
  }
  func.func @transform_5(%arg0: i32) -> (i32, i32) {
    %c0_i32 = arith.constant 0 : i32
    %c0_i32_0 = arith.constant 0 : i32
    %c0_i32_1 = arith.constant 0 : i32
    return %c0_i32, %c0_i32_0 : i32, i32
  }
  func.func @transform_6(%arg0: i32) -> (i32, i32) {
    %c0_i32 = arith.constant 0 : i32
    %c0_i32_0 = arith.constant 0 : i32
    %c0_i32_1 = arith.constant 0 : i32
    return %c0_i32, %c0_i32_0 : i32, i32
  }
  func.func @transform_7(%arg0: i32) -> (i32, i32, i32) {
    %c0_i32 = arith.constant 0 : i32
    %c0_i32_0 = arith.constant 0 : i32
    %c0_i32_1 = arith.constant 0 : i32
    return %c0_i32, %arg0, %c0_i32_0 : i32, i32, i32
  }
  func.func @transform_8(%arg0: i32) -> (i32, i32) {
    %c0_i32 = arith.constant 0 : i32
    %c0_i32_0 = arith.constant 0 : i32
    %c0_i32_1 = arith.constant 0 : i32
    return %c0_i32, %c0_i32_0 : i32, i32
  }
}

</mosaic_0001>

<bundles_post_ra>
// kernel: bert_qa_forward.3
= control target key start
LH: loop header
LB: loop body
LE: loop exit
PB: predicated region body
PF: predicated region fallthrough
CT: control target
= control target key end

     0   :  { %v997_v32 = vmov 128.0   ;;  %s2013_s0 = inlined_call_operand.vmem [shape: f32[256,128], index: 0, kind: input, shape index: {}]   ;;  %s2014_s1 = inlined_call_operand.vmem [shape: f32[1,128], index: 1, kind: input, shape index: {}]   ;;  %s2015_s2 = inlined_call_operand.vmem [shape: f32[1,128], index: 2, kind: input, shape index: {}]   ;;  %s2016_s3 = inlined_call_operand.vmem [shape: bf16[256,128], index: 3, kind: output, shape index: {}]  }
   0x1   :  { %v1021_v0 = vld [vmem:[%s2013_s0 + $0x20] sm:$0xff]  ;;  %v1026_v1 = vld [vmem:[%s2013_s0 + $0x10] sm:$0xff]  ;;  %v1039_v3 = vld [vmem:[%s2013_s0 + $0x28] sm:$0xff]  ;;  %931 = vrcp.f32 %v997_v32 }
   0x2   :  { %v1031_v2 = vld [vmem:[%s2013_s0] sm:$0xff]  ;;  %56 = vadd.xlane.f32.xlu2 %v1021_v0  ;;  %52 = vadd.xlane.f32.xlu1 %v1026_v1  ;;  %v1044_v4 = vld [vmem:[%s2013_s0 + $0x18] sm:$0xff]  ;;  %v1049_v5 = vld [vmem:[%s2013_s0 + $0x8] sm:$0xff] }
   0x3   :  { %48 = vadd.xlane.f32.xlu0 %v1031_v2  ;;  %v1057_v6 = vld [vmem:[%s2013_s0 + $0x40] sm:$0xff]  ;;  %v1062_v7 = vld [vmem:[%s2013_s0 + $0x38] sm:$0xff]  ;;  %v1067_v8 = vld [vmem:[%s2013_s0 + $0x30] sm:$0xff] }
   0x4   :  { %v1075_v9 = vld [vmem:[%s2013_s0 + $0x58] sm:$0xff]  ;;  %v1080_v10 = vld [vmem:[%s2013_s0 + $0x50] sm:$0xff]  ;;  %v1085_v11 = vld [vmem:[%s2013_s0 + $0x48] sm:$0xff] }
   0x5   :  { %v1093_v12 = vld [vmem:[%s2013_s0 + $0x70] sm:$0xff]  ;;  %v1098_v13 = vld [vmem:[%s2013_s0 + $0x68] sm:$0xff]  ;;  %v1103_v14 = vld [vmem:[%s2013_s0 + $0x60] sm:$0xff] }
   0x6   :  { %v1111_v15 = vld [vmem:[%s2013_s0 + $0x88] sm:$0xff]  ;;  %v1116_v16 = vld [vmem:[%s2013_s0 + $0x80] sm:$0xff]  ;;  %v1121_v17 = vld [vmem:[%s2013_s0 + $0x78] sm:$0xff] }
   0x7   :  { %v1129_v18 = vld [vmem:[%s2013_s0 + $0xa0] sm:$0xff]  ;;  %v1134_v19 = vld [vmem:[%s2013_s0 + $0x98] sm:$0xff]  ;;  %v1139_v20 = vld [vmem:[%s2013_s0 + $0x90] sm:$0xff]  ;;  %v932_v33 = vpop.eup %931 }
   0x8   :  { %v1147_v21 = vld [vmem:[%s2013_s0 + $0xb8] sm:$0xff]  ;;  %v1152_v22 = vld [vmem:[%s2013_s0 + $0xb0] sm:$0xff]  ;;  %v1157_v23 = vld [vmem:[%s2013_s0 + $0xa8] sm:$0xff]  ;;  %v113_v34 = vmul.f32 128.0, %v932_v33  ;;  %vm117_vm0 = vweird.f32 %v932_v33 }
   0x9   :  { %v1165_v24 = vld [vmem:[%s2013_s0 + $0xd0] sm:$0xff]  ;;  %v1170_v25 = vld [vmem:[%s2013_s0 + $0xc8] sm:$0xff]  ;;  %v1175_v26 = vld [vmem:[%s2013_s0 + $0xc0] sm:$0xff] }
   0xa   :  { %58 = vadd.xlane.f32.xlu2 %v1039_v3  ;;  %54 = vadd.xlane.f32.xlu1 %v1044_v4  ;;  %v1183_v27 = vld [vmem:[%s2013_s0 + $0xe8] sm:$0xff]  ;;  %v1188_v28 = vld [vmem:[%s2013_s0 + $0xe0] sm:$0xff]  ;;  %v1193_v29 = vld [vmem:[%s2013_s0 + $0xd8] sm:$0xff]  ;;  %v114_v35 = vsub.f32 1.0, %v113_v34 }
   0xb   :  { %50 = vadd.xlane.f32.xlu0 %v1049_v5  ;;  %v1201_v30 = vld [vmem:[%s2013_s0 + $0xf8] sm:$0xff]  ;;  %v1206_v31 = vld [vmem:[%s2013_s0 + $0xf0] sm:$0xff] }
   0xc   :  { %v115_v36 = vmul.f32 %v932_v33, %v114_v35 }
   0xe   :  { %v116_v37 = vadd.f32 %v932_v33, %v115_v36 }
  0x10   :  { %v1210_v38 = vsel %vm117_vm0, %v932_v33, %v116_v37 }
  0x12   :  { %64 = vadd.xlane.f32.xlu2 %v1057_v6  ;;  %62 = vadd.xlane.f32.xlu1 %v1062_v7 }
  0x13   :  { %60 = vadd.xlane.f32.xlu0 %v1067_v8 }
  0x1a   :  { %70 = vadd.xlane.f32.xlu2 %v1075_v9  ;;  %68 = vadd.xlane.f32.xlu1 %v1080_v10 }
  0x1b   :  { %66 = vadd.xlane.f32.xlu0 %v1085_v11 }
  0x22   :  { %76 = vadd.xlane.f32.xlu2 %v1093_v12  ;;  %74 = vadd.xlane.f32.xlu1 %v1098_v13 }
  0x23   :  { %72 = vadd.xlane.f32.xlu0 %v1103_v14 }
  0x2a   :  { %82 = vadd.xlane.f32.xlu2 %v1111_v15  ;;  %80 = vadd.xlane.f32.xlu1 %v1116_v16 }
  0x2b   :  { %78 = vadd.xlane.f32.xlu0 %v1121_v17 }
  0x32   :  { %88 = vadd.xlane.f32.xlu2 %v1129_v18  ;;  %86 = vadd.xlane.f32.xlu1 %v1134_v19 }
  0x33   :  { %84 = vadd.xlane.f32.xlu0 %v1139_v20 }
  0x3a   :  { %94 = vadd.xlane.f32.xlu2 %v1147_v21  ;;  %92 = vadd.xlane.f32.xlu1 %v1152_v22 }
  0x3b   :  { %90 = vadd.xlane.f32.xlu0 %v1157_v23 }
  0x42   :  { %100 = vadd.xlane.f32.xlu2 %v1165_v24  ;;  %98 = vadd.xlane.f32.xlu1 %v1170_v25 }
  0x43   :  { %96 = vadd.xlane.f32.xlu0 %v1175_v26 }
  0x4a   :  { %106 = vadd.xlane.f32.xlu2 %v1183_v27  ;;  %104 = vadd.xlane.f32.xlu1 %v1188_v28 }
  0x4b   :  { %102 = vadd.xlane.f32.xlu0 %v1193_v29 }
  0x52   :  { %110 = vadd.xlane.f32.xlu1 %v1201_v30 }
  0x53   :  { %108 = vadd.xlane.f32.xlu0 %v1206_v31 }
  0x75   :  { %v57_v39 = vpop.xlane.xlu2 %56  ;;  %v53_v40 = vpop.xlane.xlu1 %52 }
  0x76   :  { %v121_v41 = vmul.f32 %v1210_v38, %v53_v40  ;;  %v49_v42 = vpop.xlane.xlu0 %48  ;;  %v123_v56 = vmul.f32 %v1210_v38, %v57_v39 }
  0x77   :  { %v119_v43 = vmul.f32 %v1210_v38, %v49_v42 }
  0x78   :  { %v1215_v44 = vsub.f32 %v1026_v1, %v121_v41  ;;  %v1244_v61 = vsub.f32 %v1021_v0, %v123_v56 }
  0x79   :  { %v1218_v45 = vsub.f32 %v1031_v2, %v119_v43 }
  0x7a   :  { %v185_v46 = vmul.f32 %v1215_v44, %v1215_v44  ;;  %v187_v32 = vmul.f32 %v1244_v61, %v1244_v61 }
  0x7b   :  { %v183_v47 = vmul.f32 %v1218_v45, %v1218_v45 }
  0x7c   :  { %219 = vadd.xlane.f32.xlu1 %v185_v46 }
  0x7d   :  { %215 = vadd.xlane.f32.xlu2 %v183_v47  ;;  %v59_v48 = vpop.xlane.xlu2 %58  ;;  %v55_v49 = vpop.xlane.xlu1 %54 }
  0x7e   :  { %v124_v50 = vmul.f32 %v1210_v38, %v59_v48  ;;  %v122_v51 = vmul.f32 %v1210_v38, %v55_v49  ;;  %v51_v52 = vpop.xlane.xlu0 %50 }
  0x7f   :  { %v120_v53 = vmul.f32 %v1210_v38, %v51_v52 }
  0x80   :  { %v1228_v54 = vsub.f32 %v1039_v3, %v124_v50  ;;  %v1231_v55 = vsub.f32 %v1044_v4, %v122_v51 }
  0x81   :  { %v1235_v57 = vsub.f32 %v1049_v5, %v120_v53 }
  0x82   :  { %v188_v58 = vmul.f32 %v1228_v54, %v1228_v54  ;;  %v186_v59 = vmul.f32 %v1231_v55, %v1231_v55 }
  0x83   :  { %v184_v60 = vmul.f32 %v1235_v57, %v1235_v57 }
  0x84   :  { %225 = vadd.xlane.f32.xlu1 %v188_v58 }
  0x85   :  { %221 = vadd.xlane.f32.xlu2 %v186_v59  ;;  %217 = vadd.xlane.f32.xlu0 %v184_v60  ;;  %v65_v62 = vpop.xlane.xlu2 %64  ;;  %v63_v63 = vpop.xlane.xlu1 %62 }
  0x86   :  { %v127_v1 = vmul.f32 %v1210_v38, %v65_v62  ;;  %v61_v2 = vpop.xlane.xlu0 %60  ;;  %v126_v0 = vmul.f32 %v1210_v38, %v63_v63 }
  0x87   :  { %v125_v3 = vmul.f32 %v1210_v38, %v61_v2 }
  0x88   :  { %v1249_v4 = vsub.f32 %v1057_v6, %v127_v1  ;;  %v1262_v6 = vsub.f32 %v1062_v7, %v126_v0 }
  0x89   :  { %v1252_v5 = vsub.f32 %v1067_v8, %v125_v3 }
  0x8a   :  { %v191_v33 = vmul.f32 %v1249_v4, %v1249_v4  ;;  %v190_v42 = vmul.f32 %v1262_v6, %v1262_v6 }
  0x8b   :  { %v189_v34 = vmul.f32 %v1252_v5, %v1252_v5 }
  0x8c   :  { %231 = vadd.xlane.f32.xlu1 %v191_v33 }
  0x8d   :  { %223 = vadd.xlane.f32.xlu0 %v187_v32  ;;  %227 = vadd.xlane.f32.xlu2 %v189_v34  ;;  %v71_v35 = vpop.xlane.xlu2 %70  ;;  %v69_v8 = vpop.xlane.xlu1 %68 }
  0x8e   :  { %v130_v36 = vmul.f32 %v1210_v38, %v71_v35  ;;  %v67_v37 = vpop.xlane.xlu0 %66  ;;  %v129_v43 = vmul.f32 %v1210_v38, %v69_v8 }
  0x8f   :  { %v128_v39 = vmul.f32 %v1210_v38, %v67_v37 }
  0x90   :  { %v1267_v40 = vsub.f32 %v1075_v9, %v130_v36  ;;  %v1280_v9 = vsub.f32 %v1080_v10, %v129_v43 }
  0x91   :  { %v1270_v41 = vsub.f32 %v1085_v11, %v128_v39 }
  0x92   :  { %v194_v7 = vmul.f32 %v1267_v40, %v1267_v40  ;;  %v193_v53 = vmul.f32 %v1280_v9, %v1280_v9 }
  0x93   :  { %v192_v46 = vmul.f32 %v1270_v41, %v1270_v41 }
  0x94   :  { %237 = vadd.xlane.f32.xlu1 %v194_v7 }
  0x95   :  { %229 = vadd.xlane.f32.xlu0 %v190_v42  ;;  %233 = vadd.xlane.f32.xlu2 %v192_v46  ;;  %v77_v47 = vpop.xlane.xlu2 %76  ;;  %v75_v11 = vpop.xlane.xlu1 %74 }
  0x96   :  { %v133_v48 = vmul.f32 %v1210_v38, %v77_v47  ;;  %v73_v49 = vpop.xlane.xlu0 %72  ;;  %v132_v56 = vmul.f32 %v1210_v38, %v75_v11 }
  0x97   :  { %v131_v50 = vmul.f32 %v1210_v38, %v73_v49 }
  0x98   :  { %v1285_v51 = vsub.f32 %v1093_v12, %v133_v48  ;;  %v1298_v12 = vsub.f32 %v1098_v13, %v132_v56 }
  0x99   :  { %v1288_v52 = vsub.f32 %v1103_v14, %v131_v50 }
  0x9a   :  { %v197_v10 = vmul.f32 %v1285_v51, %v1285_v51  ;;  %v196_v3 = vmul.f32 %v1298_v12, %v1298_v12 }
  0x9b   :  { %v195_v58 = vmul.f32 %v1288_v52, %v1288_v52 }
  0x9c   :  { %243 = vadd.xlane.f32.xlu1 %v197_v10 }
  0x9d   :  { %235 = vadd.xlane.f32.xlu0 %v193_v53  ;;  %239 = vadd.xlane.f32.xlu2 %v195_v58  ;;  %v83_v59 = vpop.xlane.xlu2 %82  ;;  %v81_v14 = vpop.xlane.xlu1 %80 }
  0x9e   :  { %v136_v60 = vmul.f32 %v1210_v38, %v83_v59  ;;  %v79_v62 = vpop.xlane.xlu0 %78  ;;  %v135_v32 = vmul.f32 %v1210_v38, %v81_v14 }
  0x9f   :  { %v134_v63 = vmul.f32 %v1210_v38, %v79_v62 }
  0xa0   :  { %v1303_v1 = vsub.f32 %v1111_v15, %v136_v60  ;;  %v1316_v15 = vsub.f32 %v1116_v16, %v135_v32 }
  0xa1   :  { %v1306_v2 = vsub.f32 %v1121_v17, %v134_v63 }
  0xa2   :  { %v200_v13 = vmul.f32 %v1303_v1, %v1303_v1  ;;  %v199_v39 = vmul.f32 %v1316_v15, %v1316_v15 }
  0xa3   :  { %v198_v0 = vmul.f32 %v1306_v2, %v1306_v2 }
  0xa4   :  { %249 = vadd.xlane.f32.xlu1 %v200_v13 }
  0xa5   :  { %241 = vadd.xlane.f32.xlu0 %v196_v3  ;;  %245 = vadd.xlane.f32.xlu2 %v198_v0  ;;  %v89_v33 = vpop.xlane.xlu2 %88  ;;  %v87_v17 = vpop.xlane.xlu1 %86 }
  0xa6   :  { %v139_v34 = vmul.f32 %v1210_v38, %v89_v33  ;;  %v85_v35 = vpop.xlane.xlu0 %84  ;;  %v138_v42 = vmul.f32 %v1210_v38, %v87_v17 }
  0xa7   :  { %v137_v8 = vmul.f32 %v1210_v38, %v85_v35 }
  0xa8   :  { %v1321_v36 = vsub.f32 %v1129_v18, %v139_v34  ;;  %v1334_v18 = vsub.f32 %v1134_v19, %v138_v42 }
  0xa9   :  { %v1324_v37 = vsub.f32 %v1139_v20, %v137_v8 }
  0xaa   :  { %v203_v16 = vmul.f32 %v1321_v36, %v1321_v36  ;;  %v202_v50 = vmul.f32 %v1334_v18, %v1334_v18 }
  0xab   :  { %v201_v43 = vmul.f32 %v1324_v37, %v1324_v37 }
  0xac   :  { %255 = vadd.xlane.f32.xlu1 %v203_v16 }
  0xad   :  { %247 = vadd.xlane.f32.xlu0 %v199_v39  ;;  %251 = vadd.xlane.f32.xlu2 %v201_v43  ;;  %v95_v7 = vpop.xlane.xlu2 %94  ;;  %v93_v20 = vpop.xlane.xlu1 %92 }
  0xae   :  { %v142_v46 = vmul.f32 %v1210_v38, %v95_v7  ;;  %v91_v47 = vpop.xlane.xlu0 %90  ;;  %v141_v53 = vmul.f32 %v1210_v38, %v93_v20 }
  0xaf   :  { %v140_v11 = vmul.f32 %v1210_v38, %v91_v47 }
  0xb0   :  { %v1339_v48 = vsub.f32 %v1147_v21, %v142_v46  ;;  %v1352_v21 = vsub.f32 %v1152_v22, %v141_v53 }
  0xb1   :  { %v1342_v49 = vsub.f32 %v1157_v23, %v140_v11 }
  0xb2   :  { %v206_v19 = vmul.f32 %v1339_v48, %v1339_v48  ;;  %v205_v63 = vmul.f32 %v1352_v21, %v1352_v21 }
  0xb3   :  { %v204_v56 = vmul.f32 %v1342_v49, %v1342_v49 }
  0xb4   :  { %261 = vadd.xlane.f32.xlu1 %v206_v19 }
  0xb5   :  { %253 = vadd.xlane.f32.xlu0 %v202_v50  ;;  %257 = vadd.xlane.f32.xlu2 %v204_v56  ;;  %v101_v10 = vpop.xlane.xlu2 %100  ;;  %v99_v23 = vpop.xlane.xlu1 %98 }
  0xb6   :  { %v145_v58 = vmul.f32 %v1210_v38, %v101_v10  ;;  %v97_v59 = vpop.xlane.xlu0 %96  ;;  %v144_v3 = vmul.f32 %v1210_v38, %v99_v23 }
  0xb7   :  { %v143_v14 = vmul.f32 %v1210_v38, %v97_v59 }
  0xb8   :  { %v1357_v60 = vsub.f32 %v1165_v24, %v145_v58  ;;  %v1370_v24 = vsub.f32 %v1170_v25, %v144_v3 }
  0xb9   :  { %v1360_v62 = vsub.f32 %v1175_v26, %v143_v14 }
  0xba   :  { %v209_v22 = vmul.f32 %v1357_v60, %v1357_v60  ;;  %v208_v8 = vmul.f32 %v1370_v24, %v1370_v24 }
  0xbb   :  { %v207_v32 = vmul.f32 %v1360_v62, %v1360_v62 }
  0xbc   :  { %267 = vadd.xlane.f32.xlu1 %v209_v22 }
  0xbd   :  { %259 = vadd.xlane.f32.xlu0 %v205_v63  ;;  %263 = vadd.xlane.f32.xlu2 %v207_v32  ;;  %v107_v13 = vpop.xlane.xlu2 %106  ;;  %v105_v26 = vpop.xlane.xlu1 %104 }
  0xbe   :  { %v148_v0 = vmul.f32 %v1210_v38, %v107_v13  ;;  %v103_v33 = vpop.xlane.xlu0 %102  ;;  %v147_v39 = vmul.f32 %v1210_v38, %v105_v26 }
  0xbf   :  { %v146_v17 = vmul.f32 %v1210_v38, %v103_v33 }
  0xc0   :  { %v1375_v34 = vsub.f32 %v1183_v27, %v148_v0  ;;  %v1388_v27 = vsub.f32 %v1188_v28, %v147_v39 }
  0xc1   :  { %v1378_v35 = vsub.f32 %v1193_v29, %v146_v17 }
  0xc2   :  { %v212_v25 = vmul.f32 %v1375_v34, %v1375_v34  ;;  %v211_v20 = vmul.f32 %v1388_v27, %v1388_v27 }
  0xc3   :  { %v210_v42 = vmul.f32 %v1378_v35, %v1378_v35 }
  0xc4   :  { %273 = vadd.xlane.f32.xlu1 %v212_v25 }
  0xc5   :  { %265 = vadd.xlane.f32.xlu0 %v208_v8  ;;  %269 = vadd.xlane.f32.xlu2 %v210_v42  ;;  %v111_v29 = vpop.xlane.xlu1 %110 }
  0xc6   :  { %v109_v16 = vpop.xlane.xlu0 %108  ;;  %v150_v46 = vmul.f32 %v1210_v38, %v111_v29 }
  0xc7   :  { %v149_v43 = vmul.f32 %v1210_v38, %v109_v16 }
  0xc8   :  { %v1400_v28 = vsub.f32 %v1201_v30, %v150_v46 }
  0xc9   :  { %v1392_v7 = vsub.f32 %v1206_v31, %v149_v43 }
  0xca   :  { %v214_v11 = vmul.f32 %v1400_v28, %v1400_v28 }
  0xcb   :  { %v213_v47 = vmul.f32 %v1392_v7, %v1392_v7 }
  0xcd   :  { %271 = vadd.xlane.f32.xlu0 %v211_v20  ;;  %275 = vadd.xlane.f32.xlu2 %v213_v47 }
  0xd5   :  { %277 = vadd.xlane.f32.xlu0 %v214_v11 }
  0xef   :  { %v220_v50 = vpop.xlane.xlu1 %219 }
  0xf0   :  { %v281_v31 = vmul.f32 %v220_v50, %v1210_v38  ;;  %v216_v53 = vpop.xlane.xlu2 %215 }
  0xf1   :  { %v279_v19 = vmul.f32 %v216_v53, %v1210_v38 }
  0xf2   :  { %v313_v56 = vadd.f32 1e-12, %v281_v31 }
  0xf3   :  { %v311_v10 = vadd.f32 1e-12, %v279_v19 }
  0xf4   :  { %933 = vrsqrt.f32 %v313_v56  ;;  %vm369_vm1 = vweird.f32 %v313_v56 }
  0xf5   :  { %935 = vrsqrt.f32 %v311_v10  ;;  %vm349_vm4 = vweird.f32 %v311_v10 }
  0xf7   :  { %v226_v23 = vpop.xlane.xlu1 %225 }
  0xf8   :  { %v284_v58 = vmul.f32 %v226_v23, %v1210_v38  ;;  %v222_v59 = vpop.xlane.xlu2 %221  ;;  %v218_v30 = vpop.xlane.xlu0 %217 }
  0xf9   :  { %v282_v14 = vmul.f32 %v222_v59, %v1210_v38  ;;  %v280_v63 = vmul.f32 %v218_v30, %v1210_v38 }
  0xfa   :  { %v934_v3 = vpop.eup %933  ;;  %v1409_v22 = vadd.f32 1e-12, %v284_v58 }
  0xfb   :  { %v936_v32 = vpop.eup %935  ;;  %v364_v13 = vmul.f32 %v934_v3, %v313_v56  ;;  %v1411_v26 = vadd.f32 1e-12, %v282_v14  ;;  %v1413_v0 = vadd.f32 1e-12, %v280_v63  ;;  %vm370_vm2 = vweird.f32 %v934_v3 }
  0xfc   :  { %v344_v33 = vmul.f32 %v936_v32, %v311_v10  ;;  %937 = vrsqrt.f32 %v1409_v22  ;;  %vm350_vm3 = vweird.f32 %v936_v32  ;;  %vm1430_vm5 = vmor %vm369_vm1, %vm370_vm2  ;;  %vm399_vm7 = vweird.f32 %v1409_v22 }
  0xfd   :  { %v365_v17 = vmul.f32 %v934_v3, %v364_v13  ;;  %939 = vrsqrt.f32 %v1411_v26  ;;  %vm351_vm6 = vmor %vm349_vm4, %vm350_vm3  ;;  %vm379_vm9 = vweird.f32 %v1411_v26  ;;  %vm359_vm11 = vweird.f32 %v1413_v0 }
  0xfe   :  { %v345_v8 = vmul.f32 %v936_v32, %v344_v33  ;;  %941 = vrsqrt.f32 %v1413_v0 }
  0xff   :  { %v366_v39 = vmul.f32 0.5, %v365_v17  ;;  %v232_v25 = vpop.xlane.xlu1 %231 }
 0x100   :  { %v346_v42 = vmul.f32 0.5, %v345_v8  ;;  %v287_v16 = vmul.f32 %v232_v25, %v1210_v38  ;;  %v228_v29 = vpop.xlane.xlu2 %227  ;;  %v224_v46 = vpop.xlane.xlu0 %223 }
 0x101   :  { %v367_v43 = vsub.f32 1.5, %v366_v39  ;;  %v285_v20 = vmul.f32 %v228_v29, %v1210_v38  ;;  %v283_v14 = vmul.f32 %v224_v46, %v1210_v38 }
 0x102   :  { %v1420_v47 = vpop.eup %937  ;;  %v347_v11 = vsub.f32 1.5, %v346_v42  ;;  %v1422_v50 = vadd.f32 1e-12, %v287_v16 }
 0x103   :  { %v940_v31 = vpop.eup %939  ;;  %v368_v53 = vmul.f32 %v934_v3, %v367_v43  ;;  %v394_v19 = vmul.f32 %v1420_v47, %v1409_v22  ;;  %v1426_v23 = vadd.f32 1e-12, %v285_v20  ;;  %vm400_vm8 = vweird.f32 %v1420_v47 }
 0x104   :  { %v1428_v58 = vpop.eup %941  ;;  %v348_v59 = vmul.f32 %v936_v32, %v347_v11  ;;  %v374_v30 = vmul.f32 %v940_v31, %v1411_v26  ;;  %943 = vrsqrt.f32 %v1422_v50  ;;  %vm380_vm10 = vweird.f32 %v940_v31  ;;  %vm1474_vm13 = vmor %vm399_vm7, %vm400_vm8 }
 0x105   :  { %v372_v10 = vsel %vm1430_vm5, %v934_v3, %v368_v53  ;;  %v395_v63 = vmul.f32 %v1420_v47, %v394_v19  ;;  %v354_v13 = vmul.f32 %v1428_v58, %v1413_v0  ;;  %945 = vrsqrt.f32 %v1426_v23  ;;  %v1448_v3 = vld [vmem:[%s2014_s1] ss:$0 sm:$0xff]  ;;  %vm381_vm15 = vmor %vm379_vm9, %vm380_vm10 }
 0x106   :  { %v352_v33 = vsel %vm351_vm6, %v936_v32, %v348_v59  ;;  %v375_v17 = vmul.f32 %v940_v31, %v374_v30  ;;  %v665_v42 = vmul.f32 %v372_v10, %v1215_v44  ;;  %v1452_v32 = vadd.f32 1e-12, %v283_v14  ;;  %v1467_v59 = vld [vmem:[%s2015_s2] ss:$0 sm:$0xff] }
 0x107   :  { %v396_v8 = vmul.f32 0.5, %v395_v63  ;;  %v355_v39 = vmul.f32 %v1428_v58, %v354_v13  ;;  %v238_v25 = vpop.xlane.xlu1 %237  ;;  %v663_v29 = vmul.f32 %v352_v33, %v1218_v45  ;;  %vm360_vm12 = vweird.f32 %v1428_v58 }
 0x108   :  { %v376_v16 = vmul.f32 0.5, %v375_v17  ;;  %v290_v46 = vmul.f32 %v238_v25, %v1210_v38  ;;  %v234_v11 = vpop.xlane.xlu2 %233  ;;  %947 = vrsqrt.f32 %v1452_v32  ;;  %v230_v56 = vpop.xlane.xlu0 %229  ;;  %v700_v30 = vmul.f32 %v1448_v3, %v665_v42  ;;  %vm361_vm1 = vmor %vm359_vm11, %vm360_vm12 }
 0x109   :  { %v397_v43 = vsub.f32 1.5, %v396_v8  ;;  %v356_v20 = vmul.f32 0.5, %v355_v39  ;;  %vm429_vm14 = vweird.f32 %v1422_v50  ;;  %v698_v33 = vmul.f32 %v1448_v3, %v663_v29 }
 0x10a   :  { %v1456_v53 = vpop.eup %943  ;;  %v377_v19 = vsub.f32 1.5, %v376_v16  ;;  %v1479_v63 = vadd.f32 1e-12, %v290_v46  ;;  %vm409_vm0 = vweird.f32 %v1426_v23  ;;  %v288_v42 = vmul.f32 %v234_v11, %v1210_v38 }
 0x10b   :  { %v357_v44 = vsub.f32 1.5, %v356_v20  ;;  %v424_v45 = vmul.f32 %v1456_v53, %v1422_v50  ;;  %v1481_v13 = vpop.eup %945  ;;  %v398_v17 = vmul.f32 %v1420_v47, %v397_v43  ;;  %v286_v26 = vmul.f32 %v230_v56, %v1210_v38 }
 0x10c   :  { %v378_v10 = vmul.f32 %v940_v31, %v377_v19  ;;  %v404_v25 = vmul.f32 %v1481_v13, %v1426_v23  ;;  %949 = vrsqrt.f32 %v1479_v63  ;;  %v735_v46 = vadd.f32 %v1467_v59, %v700_v30 }
 0x10d   :  { %v358_v22 = vmul.f32 %v1428_v58, %v357_v44  ;;  %v425_v8 = vmul.f32 %v1456_v53, %v424_v45  ;;  %vm430_vm2 = vweird.f32 %v1456_v53  ;;  %v402_v11 = vsel %vm1474_vm13, %v1420_v47, %v398_v17 }
 0x10e   :  { %v382_v39 = vsel %vm381_vm15, %v940_v31, %v378_v10  ;;  %v948_v20 = vpop.eup %947  ;;  %v405_v19 = vmul.f32 %v1481_v13, %v404_v25  ;;  %v733_v45 = vadd.f32 %v1467_v59, %v698_v33  ;;  %v1513_v10 = vadd.f32 1e-12, %v288_v42  ;;  %vm1525_vm3 = vmor %vm429_vm14, %vm430_vm2 }
 0x10f   :  { %v666_v16 = vmul.f32 %v382_v39, %v1231_v55  ;;  %v362_v29 = vsel %vm361_vm1, %v1428_v58, %v358_v22  ;;  %v426_v43 = vmul.f32 0.5, %v425_v8  ;;  %v244_v31 = vpop.xlane.xlu1 %243  ;;  %v384_v44 = vmul.f32 %v948_v20, %v1452_v32 }
 0x110   :  { %v664_v0 = vmul.f32 %v362_v29, %v1235_v57  ;;  %v406_v30 = vmul.f32 0.5, %v405_v19  ;;  %v1517_v39 = vadd.f32 1e-12, %v286_v26  ;;  %v240_v47 = vpop.xlane.xlu2 %239  ;;  %v668_v14 = vmul.f32 %v402_v11, %v1228_v54  ;;  %v236_v54 = vpop.xlane.xlu0 %235 }
 0x111   :  { %v701_v55 = vmul.f32 %v1448_v3, %v666_v16  ;;  %v427_v58 = vsub.f32 1.5, %v426_v43  ;;  %v385_v8 = vmul.f32 %v948_v20, %v384_v44  ;;  %951 = vrsqrt.f32 %v1513_v10 }
 0x112   :  { %v699_v56 = vmul.f32 %v1448_v3, %v664_v0  ;;  %v407_v25 = vsub.f32 1.5, %v406_v30  ;;  %v1530_v42 = vpop.eup %949  ;;  %vm410_vm4 = vweird.f32 %v1481_v13  ;;  %953 = vrsqrt.f32 %v1517_v39 }
 0x113   :  { %v736_v57 = vadd.f32 %v1467_v59, %v701_v55  ;;  %v428_v22 = vmul.f32 %v1456_v53, %v427_v58  ;;  %v386_v16 = vmul.f32 0.5, %v385_v8  ;;  %v454_v50 = vmul.f32 %v1530_v42, %v1479_v63  ;;  %vm1550_vm6 = vmor %vm409_vm0, %vm410_vm4 }
 0x114   :  { %v734_v17 = vadd.f32 %v1467_v59, %v699_v56  ;;  %v408_v43 = vmul.f32 %v1481_v13, %v407_v25  ;;  %vm390_vm5 = vweird.f32 %v948_v20  ;;  %v293_v19 = vmul.f32 %v244_v31, %v1210_v38 }
 0x115   :  { %v841_v26 = vpack.c.bf16 %v736_v57, %v735_v46  ;;  %v432_v46 = vsel %vm1525_vm3, %v1456_v53, %v428_v22  ;;  %v387_v0 = vsub.f32 1.5, %v386_v16  ;;  %v703_v11 = vmul.f32 %v1448_v3, %v668_v14 }
 0x116   :  { %v836_v29 = vpack.c.bf16 %v734_v17, %v733_v45  ;;  %v455_v58 = vmul.f32 %v1530_v42, %v454_v50  ;;  %v291_v53 = vmul.f32 %v240_v47, %v1210_v38  ;;  %v412_v31 = vsel %vm1550_vm6, %v1481_v13, %v408_v43 }
 0x117   :  { %913 = vst [vmem:[%s2016_s3 + $0x8] sm:$0xff] %v841_v26   ;;  %v250_v44 = vpop.xlane.xlu1 %249  ;;  %v388_v45 = vmul.f32 %v948_v20, %v387_v0  ;;  %vm389_vm7 = vweird.f32 %v1452_v32  ;;  %v1560_v56 = vadd.f32 1e-12, %v293_v19  ;;  %v952_v30 = vpop.eup %951  ;;  %v671_v23 = vmul.f32 %v432_v46, %v1249_v4 }
 0x118   :  { %837 = vst [vmem:[%s2016_s3] sm:$0xff] %v836_v29   ;;  %vm391_vm8 = vmor %vm389_vm7, %vm390_vm5  ;;  %vm459_vm9 = vweird.f32 %v1479_v63  ;;  %v1564_v57 = vadd.f32 1e-12, %v291_v53  ;;  %v289_v22 = vmul.f32 %v236_v54, %v1210_v38  ;;  %v954_v8 = vpop.eup %953  ;;  %v456_v14 = vmul.f32 0.5, %v455_v58  ;;  %v242_v46 = vpop.xlane.xlu0 %241 }
 0x119   :  { %v392_v47 = vsel %vm391_vm8, %v948_v20, %v388_v45  ;;  %v434_v13 = vmul.f32 %v952_v30, %v1513_v10  ;;  %v296_v17 = vmul.f32 %v250_v44, %v1210_v38  ;;  %v738_v32 = vadd.f32 %v1467_v59, %v703_v11  ;;  %v246_v20 = vpop.xlane.xlu2 %245 }
 0x11a   :  { %v669_v33 = vmul.f32 %v412_v31, %v1252_v5  ;;  %v667_v4 = vmul.f32 %v392_v47, %v1244_v61  ;;  %v414_v25 = vmul.f32 %v954_v8, %v1517_v39  ;;  %vm460_vm10 = vweird.f32 %v1530_v42 }
 0x11b   :  { %v435_v26 = vmul.f32 %v952_v30, %v434_v13  ;;  %vm439_vm11 = vweird.f32 %v1513_v10  ;;  %955 = vrsqrt.f32 %v1560_v56  ;;  %v706_v16 = vmul.f32 %v1448_v3, %v671_v23  ;;  %vm1596_vm15 = vmor %vm459_vm9, %vm460_vm10 }
 0x11c   :  { %v702_v54 = vmul.f32 %v1448_v3, %v667_v4  ;;  %v415_v29 = vmul.f32 %v954_v8, %v414_v25  ;;  %957 = vrsqrt.f32 %v1564_v57  ;;  %v457_v5 = vsub.f32 1.5, %v456_v14 }
 0x11d   :  { %v436_v43 = vmul.f32 0.5, %v435_v26  ;;  %v1579_v61 = vadd.f32 1e-12, %v289_v22  ;;  %v1581_v50 = vadd.f32 1e-12, %v296_v17  ;;  %v704_v0 = vmul.f32 %v1448_v3, %v669_v33 }
 0x11e   :  { %v737_v19 = vadd.f32 %v1467_v59, %v702_v54  ;;  %v416_v11 = vmul.f32 0.5, %v415_v29  ;;  %v294_v55 = vmul.f32 %v246_v20, %v1210_v38  ;;  %vm440_vm12 = vweird.f32 %v952_v30 }
 0x11f   :  { %v437_v58 = vsub.f32 1.5, %v436_v43  ;;  %vm419_vm13 = vweird.f32 %v1517_v39  ;;  %959 = vrsqrt.f32 %v1579_v61  ;;  %vm420_vm14 = vweird.f32 %v954_v8  ;;  %vm441_vm0 = vmor %vm439_vm11, %vm440_vm12  ;;  %v256_v26 = vpop.xlane.xlu1 %255 }
 0x120   :  { %v846_v53 = vpack.c.bf16 %v738_v32, %v737_v19  ;;  %v417_v44 = vsub.f32 1.5, %v416_v11  ;;  %961 = vrsqrt.f32 %v1581_v50  ;;  %v458_v45 = vmul.f32 %v1530_v42, %v457_v5  ;;  %vm421_vm1 = vmor %vm419_vm13, %vm420_vm14 }
 0x121   :  { %v1589_v31 = vpop.eup %955  ;;  %v438_v22 = vmul.f32 %v952_v30, %v437_v58  ;;  %v1600_v47 = vadd.f32 1e-12, %v294_v55  ;;  %v292_v14 = vmul.f32 %v242_v46, %v1210_v38  ;;  %v741_v17 = vadd.f32 %v1467_v59, %v706_v16  ;;  %v252_v11 = vpop.xlane.xlu2 %251 }
 0x122   :  { %v1603_v13 = vpop.eup %957  ;;  %v739_v32 = vadd.f32 %v1467_v59, %v704_v0  ;;  %914 = vst [vmem:[%s2016_s3 + $0x10] sm:$0xff] %v846_v53   ;;  %v418_v63 = vmul.f32 %v954_v8, %v417_v44  ;;  %v484_v33 = vmul.f32 %v1589_v31, %v1560_v56  ;;  %vm489_vm2 = vweird.f32 %v1560_v56  ;;  %v1641_v55 = vpop.xlane.xlu0 %247 }
 0x123   :  { %v442_v4 = vsel %vm441_vm0, %v952_v30, %v438_v22  ;;  %v464_v25 = vmul.f32 %v1603_v13, %v1564_v57  ;;  %vm469_vm3 = vweird.f32 %v1564_v57  ;;  %963 = vrsqrt.f32 %v1600_v47 }
 0x124   :  { %v672_v10 = vmul.f32 %v442_v4, %v1270_v41  ;;  %v422_v20 = vsel %vm421_vm1, %v954_v8, %v418_v63  ;;  %v485_v16 = vmul.f32 %v1589_v31, %v484_v33  ;;  %v462_v39 = vsel %vm1596_vm15, %v1530_v42, %v458_v45 }
 0x125   :  { %v960_v30 = vpop.eup %959  ;;  %v670_v54 = vmul.f32 %v422_v20, %v1262_v6  ;;  %v465_v29 = vmul.f32 %v1603_v13, %v464_v25  ;;  %v1630_v5 = vadd.f32 1e-12, %v292_v14  ;;  %v299_v0 = vmul.f32 %v256_v26, %v1210_v38 }
 0x126   :  { %v1632_v43 = vpop.eup %961  ;;  %v707_v41 = vmul.f32 %v1448_v3, %v672_v10  ;;  %v486_v8 = vmul.f32 0.5, %v485_v16  ;;  %v444_v46 = vmul.f32 %v960_v30, %v1579_v61  ;;  %vm490_vm4 = vweird.f32 %v1589_v31 }
 0x127   :  { %v705_v19 = vmul.f32 %v1448_v3, %v670_v54  ;;  %v466_v42 = vmul.f32 0.5, %v465_v29  ;;  %v514_v6 = vmul.f32 %v1632_v43, %v1581_v50  ;;  %965 = vrsqrt.f32 %v1630_v5  ;;  %vm1653_vm5 = vmor %vm489_vm2, %vm490_vm4 }
 0x128   :  { %v742_v58 = vadd.f32 %v1467_v59, %v707_v41  ;;  %v487_v53 = vsub.f32 1.5, %v486_v8  ;;  %v445_v44 = vmul.f32 %v960_v30, %v444_v46  ;;  %v674_v45 = vmul.f32 %v462_v39, %v1267_v40 }
 0x129   :  { %v740_v23 = vadd.f32 %v1467_v59, %v705_v19  ;;  %v467_v22 = vsub.f32 1.5, %v466_v42  ;;  %v515_v14 = vmul.f32 %v1632_v43, %v514_v6  ;;  %v964_v63 = vpop.eup %963  ;;  %v1657_v10 = vadd.f32 1e-12, %v299_v0  ;;  %v262_v19 = vpop.xlane.xlu1 %261 }
 0x12a   :  { %v856_v33 = vpack.c.bf16 %v742_v58, %v741_v17  ;;  %v488_v4 = vmul.f32 %v1589_v31, %v487_v53  ;;  %v446_v26 = vmul.f32 0.5, %v445_v44  ;;  %vm470_vm6 = vweird.f32 %v1603_v13  ;;  %v258_v44 = vpop.xlane.xlu2 %257 }
 0x12b   :  { %v851_v40 = vpack.c.bf16 %v740_v23, %v739_v32  ;;  %v516_v20 = vmul.f32 0.5, %v515_v14  ;;  %v494_v16 = vmul.f32 %v964_v63, %v1600_v47  ;;  %v468_v17 = vmul.f32 %v1603_v13, %v467_v22  ;;  %vm1678_vm9 = vmor %vm469_vm3, %vm470_vm6 }
 0x12c   :  { %916 = vst [vmem:[%s2016_s3 + $0x20] sm:$0xff] %v856_v33   ;;  %v447_v56 = vsub.f32 1.5, %v446_v26  ;;  %vm450_vm7 = vweird.f32 %v960_v30  ;;  %967 = vrsqrt.f32 %v1657_v10  ;;  %v492_v32 = vsel %vm1653_vm5, %v1589_v31, %v488_v4 }
 0x12d   :  { %915 = vst [vmem:[%s2016_s3 + $0x18] sm:$0xff] %v851_v40   ;;  %vm449_vm8 = vweird.f32 %v1579_v61  ;;  %v495_v39 = vmul.f32 %v964_v63, %v494_v16  ;;  %v1673_v54 = vpop.eup %965  ;;  %v709_v29 = vmul.f32 %v1448_v3, %v674_v45  ;;  %v517_v46 = vsub.f32 1.5, %v516_v20  ;;  %v254_v45 = vpop.xlane.xlu0 %253 }
 0x12e   :  { %v448_v8 = vmul.f32 %v960_v30, %v447_v56  ;;  %v297_v0 = vmul.f32 %v252_v11, %v1210_v38  ;;  %vm451_vm10 = vmor %vm449_vm8, %vm450_vm7  ;;  %vm519_vm11 = vweird.f32 %v1581_v50  ;;  %vm520_vm12 = vweird.f32 %v1632_v43 }
 0x12f   :  { %v496_v61 = vmul.f32 0.5, %v495_v39  ;;  %v474_v31 = vmul.f32 %v1673_v54, %v1630_v5  ;;  %v677_v57 = vmul.f32 %v492_v32, %v1285_v51  ;;  %v472_v42 = vsel %vm1678_vm9, %v1603_v13, %v468_v17  ;;  %vm1707_vm15 = vmor %vm519_vm11, %vm520_vm12 }
 0x130   :  { %v452_v6 = vsel %vm451_vm10, %v960_v30, %v448_v8  ;;  %v1691_v58 = vadd.f32 1e-12, %v297_v0  ;;  %vm499_vm13 = vweird.f32 %v1600_v47  ;;  %vm500_vm14 = vweird.f32 %v964_v63 }
 0x131   :  { %v673_v11 = vmul.f32 %v452_v6, %v1280_v9  ;;  %v497_v53 = vsub.f32 1.5, %v496_v61  ;;  %v744_v22 = vadd.f32 %v1467_v59, %v709_v29  ;;  %v518_v51 = vmul.f32 %v1632_v43, %v517_v46  ;;  %vm501_vm0 = vmor %vm499_vm13, %vm500_vm14  ;;  %v268_v61 = vpop.xlane.xlu1 %267 }
 0x132   :  { %v1695_v23 = vpop.eup %967  ;;  %v475_v14 = vmul.f32 %v1673_v54, %v474_v31  ;;  %969 = vrsqrt.f32 %v1691_v58  ;;  %v675_v13 = vmul.f32 %v472_v42, %v1288_v52  ;;  %v712_v25 = vmul.f32 %v1448_v3, %v677_v57 }
 0x133   :  { %v708_v9 = vmul.f32 %v1448_v3, %v673_v11  ;;  %v498_v33 = vmul.f32 %v964_v63, %v497_v53  ;;  %v544_v4 = vmul.f32 %v1695_v23, %v1657_v10  ;;  %vm480_vm1 = vweird.f32 %v1673_v54 }
 0x134   :  { %v476_v52 = vmul.f32 0.5, %v475_v14  ;;  %v295_v26 = vmul.f32 %v1641_v55, %v1210_v38  ;;  %v302_v16 = vmul.f32 %v262_v19, %v1210_v38  ;;  %v522_v17 = vsel %vm1707_vm15, %v1632_v43, %v518_v51 }
 0x135   :  { %v743_v50 = vadd.f32 %v1467_v59, %v708_v9  ;;  %v502_v40 = vsel %vm501_vm0, %v964_v63, %v498_v33  ;;  %v545_v20 = vmul.f32 %v1695_v23, %v544_v4  ;;  %v300_v55 = vmul.f32 %v258_v44, %v1210_v38  ;;  %v264_v44 = vpop.xlane.xlu2 %263 }
 0x136   :  { %v678_v47 = vmul.f32 %v502_v40, %v1306_v2  ;;  %v477_v56 = vsub.f32 1.5, %v476_v52  ;;  %v1726_v32 = vadd.f32 1e-12, %v295_v26  ;;  %v1728_v41 = vadd.f32 1e-12, %v302_v16 }
 0x137   :  { %v861_v39 = vpack.c.bf16 %v744_v22, %v743_v50  ;;  %v546_v29 = vmul.f32 0.5, %v545_v20  ;;  %vm479_vm2 = vweird.f32 %v1630_v5  ;;  %v747_v2 = vadd.f32 %v1467_v59, %v712_v25  ;;  %v260_v22 = vpop.xlane.xlu0 %259 }
 0x138   :  { %v1731_v63 = vpop.eup %969  ;;  %v713_v8 = vmul.f32 %v1448_v3, %v678_v47  ;;  %v478_v46 = vmul.f32 %v1673_v54, %v477_v56  ;;  %971 = vrsqrt.f32 %v1726_v32  ;;  %v710_v43 = vmul.f32 %v1448_v3, %v675_v13  ;;  %vm481_vm3 = vmor %vm479_vm2, %vm480_vm1 }
 0x139   :  { %917 = vst [vmem:[%s2016_s3 + $0x28] sm:$0xff] %v861_v39   ;;  %v524_v0 = vmul.f32 %v1731_v63, %v1691_v58  ;;  %973 = vrsqrt.f32 %v1728_v41  ;;  %v680_v5 = vmul.f32 %v522_v17, %v1303_v1  ;;  %v1750_v57 = vadd.f32 1e-12, %v300_v55 }
 0x13a   :  { %v748_v31 = vadd.f32 %v1467_v59, %v713_v8  ;;  %v482_v19 = vsel %vm481_vm3, %v1673_v54, %v478_v46  ;;  %v547_v6 = vsub.f32 1.5, %v546_v29  ;;  %v298_v53 = vmul.f32 %v254_v45, %v1210_v38  ;;  %v274_v46 = vpop.xlane.xlu1 %273 }
 0x13b   :  { %v676_v42 = vmul.f32 %v482_v19, %v1298_v12  ;;  %v525_v11 = vmul.f32 %v1731_v63, %v524_v0  ;;  %vm549_vm4 = vweird.f32 %v1657_v10  ;;  %975 = vrsqrt.f32 %v1750_v57 }
 0x13c   :  { %v871_v51 = vpack.c.bf16 %v748_v31, %v747_v2  ;;  %v305_v1 = vmul.f32 %v268_v61, %v1210_v38  ;;  %vm550_vm5 = vweird.f32 %v1695_v23  ;;  %v1760_v12 = vadd.f32 1e-12, %v298_v53 }
 0x13d   :  { %v711_v54 = vmul.f32 %v1448_v3, %v676_v42  ;;  %v526_v14 = vmul.f32 0.5, %v525_v11  ;;  %v745_v9 = vadd.f32 %v1467_v59, %v710_v43  ;;  %v715_v45 = vmul.f32 %v1448_v3, %v680_v5  ;;  %vm1776_vm6 = vmor %vm549_vm4, %vm550_vm5  ;;  %v270_v31 = vpop.xlane.xlu2 %269 }
 0x13e   :  { %v972_v13 = vpop.eup %971  ;;  %919 = vst [vmem:[%s2016_s3 + $0x38] sm:$0xff] %v871_v51   ;;  %v1767_v30 = vadd.f32 1e-12, %v305_v1  ;;  %v548_v25 = vmul.f32 %v1695_v23, %v547_v6  ;;  %977 = vrsqrt.f32 %v1760_v12  ;;  %v303_v20 = vmul.f32 %v264_v44, %v1210_v38 }
 0x13f   :  { %v1769_v33 = vpop.eup %973  ;;  %v746_v4 = vadd.f32 %v1467_v59, %v711_v54  ;;  %v527_v52 = vsub.f32 1.5, %v526_v14  ;;  %v504_v26 = vmul.f32 %v972_v13, %v1726_v32  ;;  %v301_v16 = vmul.f32 %v260_v22, %v1210_v38  ;;  %v1809_v19 = vpop.xlane.xlu0 %265 }
 0x140   :  { %v574_v40 = vmul.f32 %v1769_v33, %v1728_v41  ;;  %vm529_vm7 = vweird.f32 %v1691_v58  ;;  %vm530_vm8 = vweird.f32 %v1731_v63  ;;  %979 = vrsqrt.f32 %v1767_v30 }
 0x141   :  { %v866_v17 = vpack.c.bf16 %v746_v4, %v745_v9  ;;  %v505_v47 = vmul.f32 %v972_v13, %v504_v26  ;;  %v1785_v56 = vpop.eup %975  ;;  %v552_v39 = vsel %vm1776_vm6, %v1695_v23, %v548_v25  ;;  %v528_v29 = vmul.f32 %v1731_v63, %v527_v52  ;;  %vm1816_vm11 = vmor %vm529_vm7, %vm530_vm8 }
 0x142   :  { %v575_v10 = vmul.f32 %v1769_v33, %v574_v40  ;;  %v554_v8 = vmul.f32 %v1785_v56, %v1750_v57  ;;  %v1801_v2 = vadd.f32 %v1467_v59, %v715_v45  ;;  %v1803_v0 = vadd.f32 1e-12, %v303_v20 }
 0x143   :  { %918 = vst [vmem:[%s2016_s3 + $0x30] sm:$0xff] %v866_v17   ;;  %v506_v55 = vmul.f32 0.5, %v505_v47  ;;  %v1805_v61 = vadd.f32 1e-12, %v301_v16  ;;  %vm509_vm9 = vweird.f32 %v1726_v32  ;;  %vm510_vm10 = vweird.f32 %v972_v13 }
 0x144   :  { %v576_v43 = vmul.f32 0.5, %v575_v10  ;;  %v555_v23 = vmul.f32 %v1785_v56, %v554_v8  ;;  %v978_v42 = vpop.eup %977  ;;  %v683_v6 = vmul.f32 %v552_v39, %v1321_v36  ;;  %vm559_vm12 = vweird.f32 %v1750_v57  ;;  %vm511_vm13 = vmor %vm509_vm9, %vm510_vm10 }
 0x145   :  { %v507_v5 = vsub.f32 1.5, %v506_v55  ;;  %981 = vrsqrt.f32 %v1803_v0  ;;  %v308_v53 = vmul.f32 %v274_v46, %v1210_v38  ;;  %v532_v44 = vsel %vm1816_vm11, %v1731_v63, %v528_v29 }
 0x146   :  { %v556_v36 = vmul.f32 0.5, %v555_v23  ;;  %v534_v51 = vmul.f32 %v978_v42, %v1760_v12  ;;  %v1827_v1 = vpop.eup %979  ;;  %v577_v58 = vsub.f32 1.5, %v576_v43  ;;  %vm560_vm14 = vweird.f32 %v1785_v56 }
 0x147   :  { %v508_v22 = vmul.f32 %v972_v13, %v507_v5  ;;  %983 = vrsqrt.f32 %v1805_v61  ;;  %v306_v54 = vmul.f32 %v270_v31, %v1210_v38  ;;  %v604_v45 = vmul.f32 %v1827_v1, %v1767_v30  ;;  %vm561_vm1 = vmor %vm559_vm12, %vm560_vm14  ;;  %v272_v43 = vpop.xlane.xlu0 %271 }
 0x148   :  { %v557_v9 = vsub.f32 1.5, %v556_v36  ;;  %v535_v63 = vmul.f32 %v978_v42, %v534_v51  ;;  %vm579_vm15 = vweird.f32 %v1728_v41  ;;  %vm580_vm0 = vweird.f32 %v1769_v33 }
 0x149   :  { %v512_v14 = vsel %vm511_vm13, %v972_v13, %v508_v22  ;;  %v1840_v32 = vadd.f32 1e-12, %v308_v53  ;;  %v681_v25 = vmul.f32 %v532_v44, %v1324_v37  ;;  %v605_v13 = vmul.f32 %v1827_v1, %v604_v45  ;;  %vm1863_vm3 = vmor %vm579_vm15, %vm580_vm0  ;;  %v276_v22 = vpop.xlane.xlu2 %275 }
 0x14a   :  { %v679_v4 = vmul.f32 %v512_v14, %v1316_v15  ;;  %v558_v52 = vmul.f32 %v1785_v56, %v557_v9  ;;  %v536_v26 = vmul.f32 0.5, %v535_v63  ;;  %v718_v40 = vmul.f32 %v1448_v3, %v683_v6 }
 0x14b   :  { %v1845_v50 = vpop.eup %981  ;;  %vm540_vm2 = vweird.f32 %v978_v42  ;;  %985 = vrsqrt.f32 %v1840_v32  ;;  %v578_v15 = vmul.f32 %v1769_v33, %v577_v58  ;;  %v1856_v17 = vadd.f32 1e-12, %v306_v54 }
 0x14c   :  { %v714_v20 = vmul.f32 %v1448_v3, %v679_v4  ;;  %v562_v37 = vsel %vm561_vm1, %v1785_v56, %v558_v52  ;;  %v537_v16 = vsub.f32 1.5, %v536_v26  ;;  %v606_v29 = vmul.f32 0.5, %v605_v13 }
 0x14d   :  { %v984_v47 = vpop.eup %983  ;;  %v684_v39 = vmul.f32 %v562_v37, %v1342_v49  ;;  %v584_v56 = vmul.f32 %v1845_v50, %v1803_v0  ;;  %v716_v55 = vmul.f32 %v1448_v3, %v681_v25  ;;  %vm539_vm4 = vweird.f32 %v1760_v12 }
 0x14e   :  { %v749_v10 = vadd.f32 %v1467_v59, %v714_v20  ;;  %v538_v8 = vmul.f32 %v978_v42, %v537_v16  ;;  %v564_v46 = vmul.f32 %v984_v47, %v1805_v61  ;;  %v753_v41 = vadd.f32 %v1467_v59, %v718_v40  ;;  %vm541_vm5 = vmor %vm539_vm4, %vm540_vm2 }
 0x14f   :  { %v719_v23 = vmul.f32 %v1448_v3, %v684_v39  ;;  %v582_v49 = vsel %vm1863_vm3, %v1769_v33, %v578_v15  ;;  %987 = vrsqrt.f32 %v1856_v17  ;;  %v607_v53 = vsub.f32 1.5, %v606_v29  ;;  %v278_v37 = vpop.xlane.xlu0 %277 }
 0x150   :  { %v876_v5 = vpack.c.bf16 %v1801_v2, %v749_v10  ;;  %v542_v31 = vsel %vm541_vm5, %v978_v42, %v538_v8  ;;  %v565_v6 = vmul.f32 %v984_v47, %v564_v46  ;;  %v585_v44 = vmul.f32 %v1845_v50, %v584_v56 }
 0x151   :  { %v1881_v12 = vpop.eup %985  ;;  %v754_v2 = vadd.f32 %v1467_v59, %v719_v23  ;;  %v682_v11 = vmul.f32 %v542_v31, %v1334_v18  ;;  %v751_v33 = vadd.f32 %v1467_v59, %v716_v55  ;;  %vm609_vm6 = vweird.f32 %v1767_v30 }
 0x152   :  { %920 = vst [vmem:[%s2016_s3 + $0x40] sm:$0xff] %v876_v5   ;;  %v566_v42 = vmul.f32 0.5, %v565_v6  ;;  %v634_v36 = vmul.f32 %v1881_v12, %v1840_v32  ;;  %v686_v51 = vmul.f32 %v582_v49, %v1339_v48  ;;  %vm610_vm7 = vweird.f32 %v1827_v1 }
 0x153   :  { %v886_v58 = vpack.c.bf16 %v754_v2, %v753_v41  ;;  %v717_v54 = vmul.f32 %v1448_v3, %v682_v11  ;;  %vm570_vm8 = vweird.f32 %v984_v47  ;;  %v304_v14 = vmul.f32 %v1809_v19, %v1210_v38  ;;  %vm1907_vm10 = vmor %vm609_vm6, %vm610_vm7 }
 0x154   :  { %v567_v18 = vsub.f32 1.5, %v566_v42  ;;  %v309_v9 = vmul.f32 %v276_v22, %v1210_v38  ;;  %v608_v48 = vmul.f32 %v1827_v1, %v607_v53  ;;  %v586_v45 = vmul.f32 0.5, %v585_v44 }
 0x155   :  { %922 = vst [vmem:[%s2016_s3 + $0x50] sm:$0xff] %v886_v58   ;;  %v752_v63 = vadd.f32 %v1467_v59, %v717_v54  ;;  %vm569_vm9 = vweird.f32 %v1805_v61  ;;  %v988_v4 = vpop.eup %987  ;;  %v635_v52 = vmul.f32 %v1881_v12, %v634_v36  ;;  %v1912_v26 = vadd.f32 1e-12, %v304_v14 }
 0x156   :  { %v568_v19 = vmul.f32 %v984_v47, %v567_v18  ;;  %v1914_v13 = vadd.f32 1e-12, %v309_v9  ;;  %vm571_vm11 = vmor %vm569_vm9, %vm570_vm8  ;;  %v614_v20 = vmul.f32 %v988_v4, %v1856_v17  ;;  %v307_v61 = vmul.f32 %v272_v43, %v1210_v38 }
 0x157   :  { %v881_v40 = vpack.c.bf16 %v752_v63, %v751_v33  ;;  %v721_v30 = vmul.f32 %v1448_v3, %v686_v51  ;;  %v612_v16 = vsel %vm1907_vm10, %v1827_v1, %v608_v48  ;;  %989 = vrsqrt.f32 %v1912_v26 }
 0x158   :  { %v572_v15 = vsel %vm571_vm11, %v984_v47, %v568_v19  ;;  %v615_v57 = vmul.f32 %v988_v4, %v614_v20  ;;  %v587_v39 = vsub.f32 1.5, %v586_v45  ;;  %v636_v29 = vmul.f32 0.5, %v635_v52 }
 0x159   :  { %921 = vst [vmem:[%s2016_s3 + $0x48] sm:$0xff] %v881_v40   ;;  %v685_v10 = vmul.f32 %v572_v15, %v1352_v21  ;;  %991 = vrsqrt.f32 %v1914_v13  ;;  %v1930_v55 = vadd.f32 1e-12, %v307_v61  ;;  %v310_v8 = vmul.f32 %v278_v37, %v1210_v38 }
 0x15a   :  { %v616_v56 = vmul.f32 0.5, %v615_v57  ;;  %v756_v46 = vadd.f32 %v1467_v59, %v721_v30  ;;  %v689_v1 = vmul.f32 %v612_v16, %v1357_v60  ;;  %vm619_vm12 = vweird.f32 %v1856_v17 }
 0x15b   :  { %v720_v47 = vmul.f32 %v1448_v3, %v685_v10  ;;  %vm620_vm13 = vweird.f32 %v988_v4  ;;  %993 = vrsqrt.f32 %v1930_v55  ;;  %v588_v41 = vmul.f32 %v1845_v50, %v587_v39 }
 0x15c   :  { %v617_v43 = vsub.f32 1.5, %v616_v56  ;;  %vm589_vm14 = vweird.f32 %v1803_v0  ;;  %vm590_vm15 = vweird.f32 %v1845_v50  ;;  %v1941_v5 = vadd.f32 1e-12, %v310_v8  ;;  %vm621_vm1 = vmor %vm619_vm12, %vm620_vm13 }
 0x15d   :  { %v755_v21 = vadd.f32 %v1467_v59, %v720_v47  ;;  %v990_v38 = vpop.eup %989  ;;  %v637_v49 = vsub.f32 1.5, %v636_v29  ;;  %vm639_vm0 = vweird.f32 %v1840_v32  ;;  %v724_v0 = vmul.f32 %v1448_v3, %v689_v1  ;;  %vm1949_vm2 = vmor %vm589_vm14, %vm590_vm15 }
 0x15e   :  { %v618_v60 = vmul.f32 %v988_v4, %v617_v43  ;;  %v594_v6 = vmul.f32 %v990_v38, %v1912_v26  ;;  %995 = vrsqrt.f32 %v1941_v5  ;;  %vm640_vm3 = vweird.f32 %v1881_v12 }
 0x15f   :  { %v891_v23 = vpack.c.bf16 %v756_v46, %v755_v21  ;;  %v992_v31 = vpop.eup %991  ;;  %v592_v53 = vsel %vm1949_vm2, %v1845_v50, %v588_v41  ;;  %v638_v42 = vmul.f32 %v1881_v12, %v637_v49  ;;  %vm1965_vm4 = vmor %vm639_vm0, %vm640_vm3  ;;  %v759_v50 = vadd.f32 %v1467_v59, %v724_v0 }
 0x160   :  { %v622_v11 = vsel %vm621_vm1, %v988_v4, %v618_v60  ;;  %v644_v17 = vmul.f32 %v992_v31, %v1914_v13  ;;  %v595_v22 = vmul.f32 %v990_v38, %v594_v6  ;;  %vm649_vm5 = vweird.f32 %v1914_v13 }
 0x161   :  { %923 = vst [vmem:[%s2016_s3 + $0x58] sm:$0xff] %v891_v23   ;;  %v690_v44 = vmul.f32 %v622_v11, %v1378_v35  ;;  %v994_v33 = vpop.eup %993  ;;  %v687_v35 = vmul.f32 %v592_v53, %v1360_v62  ;;  %vm600_vm6 = vweird.f32 %v990_v38  ;;  %v642_v45 = vsel %vm1965_vm4, %v1881_v12, %v638_v42 }
 0x162   :  { %v645_v36 = vmul.f32 %v992_v31, %v644_v17  ;;  %v596_v54 = vmul.f32 0.5, %v595_v22  ;;  %v624_v18 = vmul.f32 %v994_v33, %v1930_v55  ;;  %vm650_vm7 = vweird.f32 %v992_v31 }
 0x163   :  { %v725_v58 = vmul.f32 %v1448_v3, %v690_v44  ;;  %vm599_vm8 = vweird.f32 %v1912_v26  ;;  %v722_v40 = vmul.f32 %v1448_v3, %v687_v35  ;;  %v692_v30 = vmul.f32 %v642_v45, %v1375_v34  ;;  %vm651_vm10 = vmor %vm649_vm5, %vm650_vm7 }
 0x164   :  { %v646_v14 = vmul.f32 0.5, %v645_v36  ;;  %v996_v9 = vpop.eup %995  ;;  %v597_v32 = vsub.f32 1.5, %v596_v54  ;;  %v625_v48 = vmul.f32 %v994_v33, %v624_v18  ;;  %vm601_vm9 = vmor %vm599_vm8, %vm600_vm6  ;;  %vm630_vm11 = vweird.f32 %v994_v33 }
 0x165   :  { %v760_v63 = vadd.f32 %v1467_v59, %v725_v58  ;;  %v654_v25 = vmul.f32 %v996_v9, %v1941_v5  ;;  %vm629_vm12 = vweird.f32 %v1930_v55  ;;  %vm660_vm14 = vweird.f32 %v996_v9 }
 0x166   :  { %v647_v4 = vsub.f32 1.5, %v646_v14  ;;  %v598_v52 = vmul.f32 %v990_v38, %v597_v32  ;;  %v626_v62 = vmul.f32 0.5, %v625_v48  ;;  %vm631_vm13 = vmor %vm629_vm12, %vm630_vm11  ;;  %v757_v39 = vadd.f32 %v1467_v59, %v722_v40 }
 0x167   :  { %v901_v19 = vpack.c.bf16 %v760_v63, %v759_v50  ;;  %v655_v61 = vmul.f32 %v996_v9, %v654_v25  ;;  %v727_v29 = vmul.f32 %v1448_v3, %v692_v30  ;;  %vm659_vm15 = vweird.f32 %v1941_v5 }
 0x168   :  { %v648_v20 = vmul.f32 %v992_v31, %v647_v4  ;;  %v602_v12 = vsel %vm601_vm9, %v990_v38, %v598_v52  ;;  %v627_v15 = vsub.f32 1.5, %v626_v62  ;;  %vm661_vm0 = vmor %vm659_vm15, %vm660_vm14 }
 0x169   :  { %925 = vst [vmem:[%s2016_s3 + $0x68] sm:$0xff] %v901_v19   ;;  %v688_v26 = vmul.f32 %v602_v12, %v1370_v24  ;;  %v656_v16 = vmul.f32 0.5, %v655_v61  ;;  %v762_v41 = vadd.f32 %v1467_v59, %v727_v29 }
 0x16a   :  { %v652_v37 = vsel %vm651_vm10, %v992_v31, %v648_v20  ;;  %v628_v10 = vmul.f32 %v994_v33, %v627_v15 }
 0x16b   :  { %v723_v57 = vmul.f32 %v1448_v3, %v688_v26  ;;  %v657_v34 = vsub.f32 1.5, %v656_v16  ;;  %v693_v13 = vmul.f32 %v652_v37, %v1392_v7 }
 0x16c   :  { %v632_v47 = vsel %vm631_vm13, %v994_v33, %v628_v10 }
 0x16d   :  { %v758_v56 = vadd.f32 %v1467_v59, %v723_v57  ;;  %v691_v24 = vmul.f32 %v632_v47, %v1388_v27  ;;  %v658_v8 = vmul.f32 %v996_v9, %v657_v34  ;;  %v728_v21 = vmul.f32 %v1448_v3, %v693_v13 }
 0x16f   :  { %v896_v55 = vpack.c.bf16 %v758_v56, %v757_v39  ;;  %v726_v46 = vmul.f32 %v1448_v3, %v691_v24  ;;  %v662_v1 = vsel %vm661_vm0, %v996_v9, %v658_v8  ;;  %v763_v38 = vadd.f32 %v1467_v59, %v728_v21 }
 0x170   :  { %v694_v43 = vmul.f32 %v662_v1, %v1400_v28 }
 0x171   :  { %924 = vst [vmem:[%s2016_s3 + $0x60] sm:$0xff] %v896_v55   ;;  %v761_v27 = vadd.f32 %v1467_v59, %v726_v46 }
 0x172   :  { %v729_v7 = vmul.f32 %v1448_v3, %v694_v43 }
 0x173   :  { %v906_v5 = vpack.c.bf16 %v762_v41, %v761_v27 }
 0x174   :  { %v764_v23 = vadd.f32 %v1467_v59, %v729_v7 }
 0x175   :  { %926 = vst [vmem:[%s2016_s3 + $0x70] sm:$0xff] %v906_v5  }
 0x176   :  { %v911_v28 = vpack.c.bf16 %v764_v23, %v763_v38 }
 0x178   :  { %927 = vst [vmem:[%s2016_s3 + $0x78] sm:$0xff] %v911_v28  }

// kernel: bert_qa_forward.5
= control target key start
LH: loop header
LB: loop body
LE: loop exit
PB: predicated region body
PF: predicated region fallthrough
CT: control target
= control target key end

     0   :  { %s1109_s0 = inlined_call_operand.vmem [shape: bf16[2,128,128], index: 0, kind: input, shape index: {}]   ;;  %s1110_s1 = inlined_call_operand.vmem [shape: bf16[128,128], index: 1, kind: input, shape index: {}]   ;;  %s1111_s2 = inlined_call_operand.vmem [shape: f32[1,128], index: 2, kind: input, shape index: {}, may-alias: {2,4,6}]   ;;  %s1112_s3 = inlined_call_operand.vmem [shape: bf16[128,128], index: 3, kind: input, shape index: {}]   ;;  %s1113_s4 = inlined_call_operand.vmem [shape: f32[1,128], index: 4, kind: input, shape index: {}, may-alias: {2,4,6}]   ;;  %s1114_s5 = inlined_call_operand.vmem [shape: bf16[128,128], index: 5, kind: input, shape index: {}]   ;;  %s1115_s6 = inlined_call_operand.vmem [shape: f32[1,128], index: 6, kind: input, shape index: {}, may-alias: {2,4,6}]   ;;  %s1116_s7 = inlined_call_operand.vmem [shape: f32[2,128,128], index: 7, kind: output, shape index: {0}]   ;;  %s1117_s8 = inlined_call_operand.hbm [shape: f32[2,128], index: 8, kind: output, shape index: {1}]  }
   0x1   :  { %v719_v0 = vld [vmem:[%s1110_s1 + $0x38] sm:$0xff]  ;;  %v718_v1 = vld [vmem:[%s1110_s1 + $0x30] sm:$0xff] }
   0x2   :  { %745 = vmatpush.bf16.msra.mxu1 %v719_v0  ;;  %747 = vmatpush.bf16.msra.mxu3 %v719_v0 }
   0x3   :  { %746 = vmatpush.bf16.msra.mxu2 %v719_v0  ;;  %225 = vmatpush.bf16.msra.mxu0 %v719_v0 }
   0x4   :  { %14 = vsyncpa [#allocation3], 0  ;;  %v717_v2 = vld [vmem:[%s1110_s1 + $0x28] sm:$0xff]  ;;  %v716_v3 = vld [vmem:[%s1110_s1 + $0x20] sm:$0xff]  ;;  %vm375_vm0 = vcmask 1041409   ;;  %s801_s25 = smov [#allocation2]  }
   0x5   :  { %v715_v4 = vld [vmem:[%s1110_s1 + $0x18] sm:$0xff]  ;;  %v714_v5 = vld [vmem:[%s1110_s1 + $0x10] sm:$0xff]  ;;  %v713_v6 = vld [vmem:[%s1110_s1 + $0x8] sm:$0xff]  ;;  %s531_s26 = sshll.u32 %s801_s25, 4  ;;  %s533_s28 = sshll.u32 %s1117_s8, 4  ;;  %s532_s26 = int_to_ptr.vmem [resolvable:$true] %s531_s26  ;;  %s534_s28 = int_to_ptr.hbm [resolvable:$true] %s533_s28 }
   0x6   :  { %748 = vmatpush.bf16.msra.mxu1 %v718_v1  ;;  %750 = vmatpush.bf16.msra.mxu3 %v718_v1  ;;  %v712_v7 = vld [vmem:[%s1110_s1] sm:$0xff]  ;;  %v727_v8 = vld [vmem:[%s1112_s3 + $0x38] sm:$0xff]  ;;  %v702_v9 = vld [vmem:[%s1109_s0 + $0x28] sm:$0xff] }
   0x7   :  { %749 = vmatpush.bf16.msra.mxu2 %v718_v1  ;;  %226 = vmatpush.bf16.msra.mxu0 %v718_v1  ;;  %v726_v10 = vld [vmem:[%s1112_s3 + $0x30] sm:$0xff]  ;;  %v707_v11 = vld [vmem:[%s1109_s0 + $0x58] sm:$0xff]  ;;  %v725_v14 = vld [vmem:[%s1112_s3 + $0x28] sm:$0xff] }
   0x8   :  { %v704_v12 = vld [vmem:[%s1109_s0 + $0x38] sm:$0xff]  ;;  %v737_v15 = vld [vmem:[%s1109_s0] sm:$0xff]   ;;  %v734_v16 = vld [vmem:[%s1114_s5 + $0x30] sm:$0xff] }
   0x9   :  { %v735_v13 = vld [vmem:[%s1114_s5 + $0x38] sm:$0xff]  ;;  %v724_v17 = vld [vmem:[%s1112_s3 + $0x20] sm:$0xff]  ;;  %v733_v18 = vld [vmem:[%s1114_s5 + $0x28] sm:$0xff]  ;;  %v738_v26 = vunpack.c.l.b16 %v737_v15 }
   0xa   :  { %751 = vmatpush.bf16.msra.mxu1 %v717_v2  ;;  %753 = vmatpush.bf16.msra.mxu3 %v717_v2  ;;  %v723_v19 = vld [vmem:[%s1112_s3 + $0x18] sm:$0xff]  ;;  %v744_v20 = vld [vmem:[%s1109_s0 + $0x40] sm:$0xff]   ;;  %v703_v21 = vld [vmem:[%s1109_s0 + $0x30] sm:$0xff] }
   0xb   :  { %752 = vmatpush.bf16.msra.mxu2 %v717_v2  ;;  %227 = vmatpush.bf16.msra.mxu0 %v717_v2  ;;  %v742_v22 = vunpack.c.l.b16 %v744_v20  ;;  %v722_v23 = vld [vmem:[%s1112_s3 + $0x10] sm:$0xff]  ;;  %v708_v24 = vld [vmem:[%s1109_s0 + $0x60] sm:$0xff]  ;;  %v698_v25 = vld [vmem:[%s1109_s0 + $0x8] sm:$0xff]  ;;  %v632_v29 = vunpack.i.l.s16 %v738_v26 }
   0xc   :  { %v721_v28 = vld [vmem:[%s1112_s3 + $0x8] sm:$0xff]  ;;  %v720_v31 = vld [vmem:[%s1112_s3] sm:$0xff]  ;;  %v699_v37 = vld [vmem:[%s1109_s0 + $0x10] sm:$0xff] }
   0xd   :  { %v633_v27 = vunpack.i.l.s16 %v742_v22  ;;  %v709_v34 = vld [vmem:[%s1109_s0 + $0x68] sm:$0xff]  ;;  %v732_v36 = vld [vmem:[%s1114_s5 + $0x20] sm:$0xff]  ;;  %v731_v38 = vld [vmem:[%s1114_s5 + $0x18] sm:$0xff] }
   0xe   :  { %754 = vmatpush.bf16.msra.mxu1 %v716_v3  ;;  %756 = vmatpush.bf16.msra.mxu3 %v716_v3  ;;  %v705_v35 = vld [vmem:[%s1109_s0 + $0x48] sm:$0xff]  ;;  %v710_v39 = vld [vmem:[%s1109_s0 + $0x70] sm:$0xff]  ;;  %v700_v42 = vld [vmem:[%s1109_s0 + $0x18] sm:$0xff] }
   0xf   :  { %755 = vmatpush.bf16.msra.mxu2 %v716_v3  ;;  %228 = vmatpush.bf16.msra.mxu0 %v716_v3  ;;  %v374_v30 = vrot.slane %v633_v27, 7  ;;  %v706_v40 = vld [vmem:[%s1109_s0 + $0x50] sm:$0xff]  ;;  %v729_v43 = vld [vmem:[%s1114_s5 + $0x8] sm:$0xff]  ;;  %v961_v44 = vld [vmem:[%s1111_s2] ss:$0 sm:$0xff] }
  0x10   :  { %v730_v41 = vld [vmem:[%s1114_s5 + $0x10] sm:$0xff]  ;;  %v711_v45 = vld [vmem:[%s1109_s0 + $0x78] sm:$0xff]  ;;  %v701_v48 = vld [vmem:[%s1109_s0 + $0x20] sm:$0xff] }
  0x11   :  { %v376_v32 = vsel %vm375_vm0, %v374_v30, %v632_v29  ;;  %v728_v49 = vld [vmem:[%s1114_s5] sm:$0xff] }
  0x12   :  { %757 = vmatpush.bf16.msra.mxu1 %v715_v4  ;;  %759 = vmatpush.bf16.msra.mxu3 %v715_v4  ;;  %v377_v33 = vpack.c.b16 %v376_v32, %v376_v32 }
  0x13   :  { %758 = vmatpush.bf16.msra.mxu2 %v715_v4  ;;  %229 = vmatpush.bf16.msra.mxu0 %v715_v4 }
  0x16   :  { %760 = vmatpush.bf16.msra.mxu1 %v714_v5  ;;  %762 = vmatpush.bf16.msra.mxu3 %v714_v5 }
  0x17   :  { %761 = vmatpush.bf16.msra.mxu2 %v714_v5  ;;  %230 = vmatpush.bf16.msra.mxu0 %v714_v5 }
  0x1a   :  { %763 = vmatpush.bf16.msra.mxu1 %v713_v6  ;;  %765 = vmatpush.bf16.msra.mxu3 %v713_v6 }
  0x1b   :  { %764 = vmatpush.bf16.msra.mxu2 %v713_v6  ;;  %231 = vmatpush.bf16.msra.mxu0 %v713_v6  ;;  %v771_v6 = vld [vmem:[%s1113_s4] ss:$0 sm:$0xff] }
  0x1e   :  { %766 = vmatpush.bf16.msra.mxu1 %v712_v7  ;;  %768 = vmatpush.bf16.msra.mxu3 %v712_v7 }
  0x1f   :  { %767 = vmatpush.bf16.msra.mxu2 %v712_v7  ;;  %232 = vmatpush.bf16.msra.mxu0 %v712_v7 }
  0x21   :  { %258 = vmatmul.bf16.vlgmr.msra.gmra.mxu1 %v702_v9  ;;  %288 = vmatmul.bf16.vlgmr.msra.gmra.mxu3 %v707_v11 }
  0x22   :  { %427 = vmatpush.bf16.msrb.mxu1 %v727_v8  ;;  %268 = vmatmul.bf16.vlgmr.msra.gmra.mxu2 %v704_v12 }
  0x23   :  { %233 = vmatmul.bf16.vlgmr.msra.gmra.mxu0 %v737_v15  ;;  %510 = vmatpush.bf16.msrb.mxu2 %v735_v13 }
  0x26   :  { %428 = vmatpush.bf16.msrb.mxu1 %v726_v10 }
  0x27   :  { %511 = vmatpush.bf16.msrb.mxu2 %v734_v16 }
  0x2a   :  { %429 = vmatpush.bf16.msrb.mxu1 %v725_v14 }
  0x2b   :  { %512 = vmatpush.bf16.msrb.mxu2 %v733_v18 }
  0x2e   :  { %430 = vmatpush.bf16.msrb.mxu1 %v724_v17 }
  0x2f   :  { %513 = vmatpush.bf16.msrb.mxu2 %v732_v36 }
  0x31   :  { %263 = vmatmul.bf16.gmra.mxu1 %v703_v21  ;;  %293 = vmatmul.bf16.gmra.mxu3 %v708_v24 }
  0x32   :  { %431 = vmatpush.bf16.msrb.mxu1 %v723_v19  ;;  %273 = vmatmul.bf16.gmra.mxu2 %v744_v20 }
  0x33   :  { %238 = vmatmul.bf16.gmra.mxu0 %v698_v25  ;;  %514 = vmatpush.bf16.msrb.mxu2 %v731_v38 }
  0x36   :  { %432 = vmatpush.bf16.msrb.mxu1 %v722_v23 }
  0x37   :  { %515 = vmatpush.bf16.msrb.mxu2 %v730_v41 }
  0x3a   :  { %433 = vmatpush.bf16.msrb.mxu1 %v721_v28 }
  0x3b   :  { %516 = vmatpush.bf16.msrb.mxu2 %v729_v43 }
  0x3e   :  { %434 = vmatpush.bf16.msrb.mxu1 %v720_v31 }
  0x3f   :  { %517 = vmatpush.bf16.msrb.mxu2 %v728_v49 }
  0x41   :  { %435 = vmatmul.bf16.vlgmr.msrb.gmra.mxu1 %v377_v33  ;;  %298 = vmatmul.bf16.gmra.mxu3 %v709_v34 }
  0x42   :  { %278 = vmatmul.bf16.gmra.mxu2 %v705_v35 }
  0x43   :  { %243 = vmatmul.bf16.gmra.mxu0 %v699_v37 }
  0x51   :  { %303 = vmatmul.bf16.gmra.mxu3 %v710_v39 }
  0x52   :  { %283 = vmatmul.bf16.gmra.mxu2 %v706_v40 }
  0x53   :  { %248 = vmatmul.bf16.gmra.mxu0 %v700_v42 }
  0x61   :  { %308 = vmatmul.bf16.gmra.mxu3 %v711_v45 }
  0x63   :  { %253 = vmatmul.bf16.gmra.mxu0 %v701_v48 }
  0x9e   :  { %v259_v46 = vpop.f32.mrf.mxu1 }
  0x9f   :  { %v260_v47 = vadd.f32 %v961_v44, %v259_v46 }
  0xa0   :  { %v234_v52 = vpop.f32.mrf.mxu0 }
  0xa1   :  { %324 = vst [vmem:[%s1116_s7 + $0x50] sm:$0xff] %v260_v47  ;;  %v235_v54 = vadd.f32 %v961_v44, %v234_v52 }
  0xa3   :  { %314 = vst [vmem:[%s1116_s7] sm:$0xff] %v235_v54 }
  0xa4   :  { %v289_v53 = vpop.f32.mrf.mxu3 }
  0xa5   :  { %v290_v55 = vadd.f32 %v961_v44, %v289_v53  ;;  %v269_v56 = vpop.f32.mrf.mxu2 }
  0xa6   :  { %v261_v50 = vpop.f32.mrf.mxu1  ;;  %v270_v57 = vadd.f32 %v961_v44, %v269_v56 }
  0xa7   :  { %v262_v51 = vadd.f32 %v961_v44, %v261_v50  ;;  %336 = vst [vmem:[%s1116_s7 + $0xb0] sm:$0xff] %v290_v55  ;;  %v772_v55 = vld [vmem:[%s1115_s6] ss:$0 sm:$0xff] }
  0xa8   :  { %328 = vst [vmem:[%s1116_s7 + $0x70] sm:$0xff] %v270_v57  ;;  %v236_v60 = vpop.f32.mrf.mxu0 }
  0xa9   :  { %325 = vst [vmem:[%s1116_s7 + $0x58] sm:$0xff] %v262_v51  ;;  %v237_v62 = vadd.f32 %v961_v44, %v236_v60 }
  0xab   :  { %315 = vst [vmem:[%s1116_s7 + $0x8] sm:$0xff] %v237_v62 }
  0xac   :  { %v291_v61 = vpop.f32.mrf.mxu3 }
  0xad   :  { %v292_v63 = vadd.f32 %v961_v44, %v291_v61  ;;  %v271_v0 = vpop.f32.mrf.mxu2 }
  0xae   :  { %v264_v58 = vpop.f32.mrf.mxu1  ;;  %v272_v1 = vadd.f32 %v961_v44, %v271_v0 }
  0xaf   :  { %v265_v59 = vadd.f32 %v961_v44, %v264_v58  ;;  %337 = vst [vmem:[%s1116_s7 + $0xb8] sm:$0xff] %v292_v63 }
  0xb0   :  { %329 = vst [vmem:[%s1116_s7 + $0x78] sm:$0xff] %v272_v1  ;;  %v239_v4 = vpop.f32.mrf.mxu0 }
  0xb1   :  { %326 = vst [vmem:[%s1116_s7 + $0x60] sm:$0xff] %v265_v59  ;;  %v240_v7 = vadd.f32 %v961_v44, %v239_v4 }
  0xb3   :  { %316 = vst [vmem:[%s1116_s7 + $0x10] sm:$0xff] %v240_v7 }
  0xb4   :  { %v294_v5 = vpop.f32.mrf.mxu3 }
  0xb5   :  { %v295_v8 = vadd.f32 %v961_v44, %v294_v5  ;;  %v274_v9 = vpop.f32.mrf.mxu2 }
  0xb6   :  { %v266_v2 = vpop.f32.mrf.mxu1  ;;  %v275_v10 = vadd.f32 %v961_v44, %v274_v9 }
  0xb7   :  { %v267_v3 = vadd.f32 %v961_v44, %v266_v2  ;;  %338 = vst [vmem:[%s1116_s7 + $0xc0] sm:$0xff] %v295_v8 }
  0xb8   :  { %330 = vst [vmem:[%s1116_s7 + $0x80] sm:$0xff] %v275_v10  ;;  %v241_v13 = vpop.f32.mrf.mxu0 }
  0xb9   :  { %327 = vst [vmem:[%s1116_s7 + $0x68] sm:$0xff] %v267_v3  ;;  %v242_v15 = vadd.f32 %v961_v44, %v241_v13 }
  0xbb   :  { %317 = vst [vmem:[%s1116_s7 + $0x18] sm:$0xff] %v242_v15 }
  0xbc   :  { %v296_v14 = vpop.f32.mrf.mxu3 }
  0xbd   :  { %v297_v16 = vadd.f32 %v961_v44, %v296_v14  ;;  %v276_v17 = vpop.f32.mrf.mxu2 }
  0xbe   :  { %v436_v11 = vpop.f32.mrf.mxu1  ;;  %v277_v18 = vadd.f32 %v961_v44, %v276_v17 }
  0xbf   :  { %v437_v12 = vadd.f32 %v771_v6, %v436_v11  ;;  %339 = vst [vmem:[%s1116_s7 + $0xc8] sm:$0xff] %v297_v16 }
  0xc0   :  { %331 = vst [vmem:[%s1116_s7 + $0x88] sm:$0xff] %v277_v18  ;;  %v244_v22 = vpop.f32.mrf.mxu0 }
  0xc1   :  { %773 = vtanh.f32 %v437_v12  ;;  %v245_v23 = vadd.f32 %v961_v44, %v244_v22 }
  0xc3   :  { %318 = vst [vmem:[%s1116_s7 + $0x20] sm:$0xff] %v245_v23 }
  0xc4   :  { %v299_v24 = vpop.f32.mrf.mxu3 }
  0xc5   :  { %v300_v25 = vadd.f32 %v961_v44, %v299_v24  ;;  %v279_v26 = vpop.f32.mrf.mxu2 }
  0xc6   :  { %v438_v19 = vpop.f32.mrf.mxu1  ;;  %v280_v27 = vadd.f32 %v961_v44, %v279_v26 }
  0xc7   :  { %v774_v20 = vpop.eup %773  ;;  %340 = vst [vmem:[%s1116_s7 + $0xd0] sm:$0xff] %v300_v25 }
  0xc8   :  { %v441_v21 = vpack.c.bf16 %v774_v20, %v774_v20  ;;  %332 = vst [vmem:[%s1116_s7 + $0x90] sm:$0xff] %v280_v27  ;;  %v246_v28 = vpop.f32.mrf.mxu0 }
  0xc9   :  { %v247_v29 = vadd.f32 %v961_v44, %v246_v28 }
  0xca   :  { %518 = vmatmul.bf16.vlgmr.msrb.gmra.mxu2 %v441_v21 }
  0xcb   :  { %319 = vst [vmem:[%s1116_s7 + $0x28] sm:$0xff] %v247_v29 }
  0xcc   :  { %v301_v30 = vpop.f32.mrf.mxu3 }
  0xcd   :  { %v302_v31 = vadd.f32 %v961_v44, %v301_v30  ;;  %v281_v32 = vpop.f32.mrf.mxu2 }
  0xce   :  { %v282_v33 = vadd.f32 %v961_v44, %v281_v32 }
  0xcf   :  { %341 = vst [vmem:[%s1116_s7 + $0xd8] sm:$0xff] %v302_v31 }
  0xd0   :  { %333 = vst [vmem:[%s1116_s7 + $0x98] sm:$0xff] %v282_v33  ;;  %v249_v34 = vpop.f32.mrf.mxu0 }
  0xd1   :  { %v250_v35 = vadd.f32 %v961_v44, %v249_v34 }
  0xd3   :  { %320 = vst [vmem:[%s1116_s7 + $0x30] sm:$0xff] %v250_v35 }
  0xd4   :  { %v304_v36 = vpop.f32.mrf.mxu3 }
  0xd5   :  { %v305_v37 = vadd.f32 %v961_v44, %v304_v36  ;;  %v284_v38 = vpop.f32.mrf.mxu2 }
  0xd6   :  { %v285_v39 = vadd.f32 %v961_v44, %v284_v38 }
  0xd7   :  { %342 = vst [vmem:[%s1116_s7 + $0xe0] sm:$0xff] %v305_v37 }
  0xd8   :  { %334 = vst [vmem:[%s1116_s7 + $0xa0] sm:$0xff] %v285_v39  ;;  %v251_v40 = vpop.f32.mrf.mxu0 }
  0xd9   :  { %v252_v41 = vadd.f32 %v961_v44, %v251_v40 }
  0xdb   :  { %321 = vst [vmem:[%s1116_s7 + $0x38] sm:$0xff] %v252_v41 }
  0xdc   :  { %v306_v42 = vpop.f32.mrf.mxu3 }
  0xdd   :  { %v307_v43 = vadd.f32 %v961_v44, %v306_v42  ;;  %v286_v45 = vpop.f32.mrf.mxu2 }
  0xde   :  { %v287_v46 = vadd.f32 %v961_v44, %v286_v45 }
  0xdf   :  { %343 = vst [vmem:[%s1116_s7 + $0xe8] sm:$0xff] %v307_v43 }
  0xe0   :  { %335 = vst [vmem:[%s1116_s7 + $0xa8] sm:$0xff] %v287_v46  ;;  %v254_v47 = vpop.f32.mrf.mxu0 }
  0xe1   :  { %v255_v49 = vadd.f32 %v961_v44, %v254_v47 }
  0xe3   :  { %322 = vst [vmem:[%s1116_s7 + $0x40] sm:$0xff] %v255_v49 }
  0xe4   :  { %v309_v48 = vpop.f32.mrf.mxu3 }
  0xe5   :  { %v310_v50 = vadd.f32 %v961_v44, %v309_v48 }
  0xe7   :  { %344 = vst [vmem:[%s1116_s7 + $0xf0] sm:$0xff] %v310_v50 }
  0xe8   :  { %v256_v51 = vpop.f32.mrf.mxu0 }
  0xe9   :  { %v257_v53 = vadd.f32 %v961_v44, %v256_v51 }
  0xeb   :  { %323 = vst [vmem:[%s1116_s7 + $0x48] sm:$0xff] %v257_v53 }
  0xec   :  { %v311_v52 = vpop.f32.mrf.mxu3 }
  0xed   :  { %v312_v54 = vadd.f32 %v961_v44, %v311_v52 }
  0xef   :  { %345 = vst [vmem:[%s1116_s7 + $0xf8] sm:$0xff] %v312_v54 }
 0x14d   :  { %v519_v56 = vpop.f32.mrf.mxu2 }
 0x14e   :  { %v520_v44 = vadd.f32 %v772_v55, %v519_v56 }
 0x150   :  { %523 = vst [vmem:[#allocation2] sm:$0x3] %v520_v44 }
 0x151   :  { %536 = dma.vmem_to_hbm [thread:$0]  %s532_s26, 32, %s534_s28, [#allocation3]  }
 0x155   :  { %v521_v57 = vpop.f32.mrf.mxu2 }
 0x156   :  { %799 = dma.done.wait [#allocation3], 32  }
 0x157   :  { %800 = vsyncadd [#allocation3], 4294967264 }
 0x158   :  { %543 = vsyncpa [#allocation3], 1 }

// kernel: bert_qa_forward.4
= control target key start
LH: loop header
LB: loop body
LE: loop exit
PB: predicated region body
PF: predicated region fallthrough
CT: control target
= control target key end

     0   :  { %s6776_s29 = smov 0   ;;  %s6778_s30 = smov 0   ;;  %s9361_s0 = inlined_call_operand.vmem [shape: bf16[2,128,128], index: 0, kind: input, shape index: {}]   ;;  %s9362_s1 = inlined_call_operand.vmem [shape: f32[2,1,128], index: 1, kind: input, shape index: {}]   ;;  %s9363_s2 = inlined_call_operand.vmem [shape: bf16[2,128,384], index: 2, kind: input, shape index: {}]   ;;  %s9364_s3 = inlined_call_operand.vmem [shape: f32[2,1,384], index: 3, kind: input, shape index: {}]   ;;  %s9365_s4 = inlined_call_operand.vmem [shape: bf16[2,128,128], index: 4, kind: input, shape index: {}]   ;;  %s9366_s5 = inlined_call_operand.vmem [shape: f32[2,1,128], index: 5, kind: input, shape index: {}, may-alias: {5,7,11,13}]   ;;  %s9367_s6 = inlined_call_operand.vmem [shape: f32[2,1,128], index: 6, kind: input, shape index: {}, may-alias: {6,12}]   ;;  %s9368_s7 = inlined_call_operand.vmem [shape: f32[2,1,128], index: 7, kind: input, shape index: {}, may-alias: {5,7,11,13}]   ;;  %s9369_s8 = inlined_call_operand.vmem [shape: bf16[2,128,256], index: 8, kind: input, shape index: {}]   ;;  %s9370_s9 = inlined_call_operand.vmem [shape: f32[2,1,256], index: 9, kind: input, shape index: {}]   ;;  %s9371_s10 = inlined_call_operand.vmem [shape: bf16[2,256,128], index: 10, kind: input, shape index: {}]   ;;  %s9372_s11 = inlined_call_operand.vmem [shape: f32[2,1,128], index: 11, kind: input, shape index: {}, may-alias: {5,7,11,13}]   ;;  %s9373_s12 = inlined_call_operand.vmem [shape: f32[2,1,128], index: 12, kind: input, shape index: {}, may-alias: {6,12}]   ;;  %s9374_s13 = inlined_call_operand.vmem [shape: f32[2,1,128], index: 13, kind: input, shape index: {}, may-alias: {5,7,11,13}]   ;;  %s9375_s14 = inlined_call_operand.vmem [shape: bf16[2,128,128], index: 14, kind: output, shape index: {}]  }
   0x1   :  { %9392 = sst [smem:[#allocation26_spill]] %s9361_s0  ;;  %s6780_s15 = smov 0  }
   0x2   :  { %9393 = sst [smem:[#allocation27_spill]] %s9362_s1  ;;  %s6782_s16 = smov 0  }
   0x3   :  { %9394 = sst [smem:[#allocation28_spill]] %s9363_s2  ;;  %s6784_s17 = smov 0  }
   0x4   :  { %9395 = sst [smem:[#allocation29_spill]] %s9364_s3 }
   0x5   :  { %9396 = sst [smem:[#allocation30_spill]] %s9365_s4 }
   0x6   :  { %9397 = sst [smem:[#allocation31_spill]] %s9367_s6 }
   0x7   :  { %9398 = sst [smem:[#allocation32_spill]] %s9368_s7 }
   0x8   :  { %9399 = sst [smem:[#allocation33_spill]] %s9369_s8 }
   0x9   :  { %9400 = sst [smem:[#allocation34_spill]] %s9370_s9 }
   0xa   :  { %9401 = sst [smem:[#allocation35_spill]] %s9375_s14 }
   0xb LB: > { %9402 = sst [smem:[#allocation8_spill]] %s6681_s29  ;;  %s39_s18 = sadd.s32 1, %s6689_s15  ;;  %s6697_s17 = sphi %s6784_s17, %s24_s17   ;;  %s6693_s16 = sphi %s6782_s16, %s9483_s16   ;;  %s6689_s15 = sphi %s6780_s15, %s9482_s15   ;;  %s6685_s30 = sphi %s6778_s30, %s9481_s30   ;;  %s6681_s29 = sphi %s6776_s29, %s9480_s29  }
   0xc   : > { %9403 = sst [smem:[#allocation9_spill]] %s6685_s30  ;;  %s43_s19 = sadd.s32 1, %s6693_s16 }
   0xd   : > { %9404 = sst [smem:[#allocation10_spill]] %s6689_s15  ;;  %p41_p0 = scmp.ge.s32.totalorder %s39_s18, 2 }
   0xe   : > { %9405 = sst [smem:[#allocation11_spill]] %s6693_s16  ;;  %p5407_p1 = scmp.ge.s32.totalorder %s6697_s17, 1 }
   0xf   : > { %9406 = sst [smem:[#allocation12_spill]] %s6697_s17  ;;  %p511_p2 = scmp.lt.s32.totalorder %s6697_s17, 5 }
  0x10   : > { %s9485_s18 = smov (%p41_p0, %s39_s18), 0  ;;  %s9487_s19 = smov (!%p41_p0, %s43_s19), %s6693_s16 }
  0x11   : > { %9407 = sst [smem:[#allocation13_spill]] %s9485_s18  ;;  %p512_p3 = pnand %p5407_p1, %p511_p2 }
  0x12   : > { %p45_p4 = scmp.ge.s32.totalorder %s9487_s19, 2 }
  0x13   : > { %515 = sbr.rel (%p512_p3) target bundleno = 2491 (0x9bb), region = 72 }
  0x14   : > { %s9489_s19 = smov (%p45_p4, %s9487_s19), 0 }
  0x15   : > { %9408 = sst [smem:[#allocation14_spill]] %s9489_s19 }
  0x18   : > { %p599_p5 = scmp.lt.s32.totalorder %s6685_s30, 1  ;;  %p602_p6 = scmp.lt.s32.totalorder %s6681_s29, 1 }
  0x19   : > { %p653_p7 = scmp.eq.s32.totalorder %s6681_s29, 0  ;;  %s9411_s4 = sld [smem:[#allocation30_spill]] }
  0x1a   : > { %s6814_s20 = scalar_select %p599_p5, %s6685_s30, 1 }
  0x1b   : > { %s6817_s21 = scalar_select %p602_p6, %s6681_s29, 1 }
  0x1c   : > { %9409 = sst [smem:[#allocation15_spill]] %s6814_s20  ;;  %s5923_s25 = sshll.u32 %s6814_s20, 6 }
  0x1d   : > { %s6281_s26 = smul.u32 192, %s6817_s21  ;;  %s5920_s27 = sshll.u32 %s6817_s21, 6 }
  0x1e   : > { %s6282_s28 = smul.u32 3, %s6817_s21  ;;  %s9412_s2 = sld [smem:[#allocation28_spill]] }
  0x1f   : > { %s6830_s22 = scalar_lea.vmem %s9411_s4, %s5920_s27  ;;  %s9413_s3 = sld [smem:[#allocation29_spill]] }
  0x20   : > { %s9414_s6 = sld [smem:[#allocation31_spill]]  ;;  %s5413_s17 = sshll.u32 %s6817_s21, 1 }
  0x21   : > { %s9415_s7 = sld [smem:[#allocation32_spill]]  ;;  %s644_s23 = scalar_lea.vmem %s9373_s12, %s6817_s21 }
  0x22   : > { %s9416_s8 = sld [smem:[#allocation33_spill]]  ;;  %s647_s1 = scalar_lea.vmem %s9374_s13, %s6817_s21 }
  0x23   : > { %s9417_s9 = sld [smem:[#allocation34_spill]] }
  0x24   : > { %s6835_s15 = scalar_lea.vmem %s9412_s2, %s6281_s26  ;;  %s5921_s26 = sshll.u32 %s6817_s21, 7 }
  0x25   : > { %s6844_s30 = scalar_lea.vmem %s9413_s3, %s6282_s28  ;;  %s6873_s24 = scalar_lea.vmem %s9371_s10, %s5921_s26 }
  0x26   : > { %s6850_s18 = scalar_lea.vmem %s9414_s6, %s6817_s21  ;;  %s6879_s3 = scalar_lea.vmem %s9372_s11, %s6817_s21 }
  0x27   : > { %s6856_s16 = scalar_lea.vmem %s9415_s7, %s6817_s21  ;;  %s9420_s14 = sld [smem:[#allocation9_spill]] (%p653_p7) }
  0x28   : > { %s6862_s0 = scalar_lea.vmem %s9416_s8, %s5921_s26  ;;  %s9418_s8 = sld [smem:[#allocation35_spill]] }
  0x29   : > { %s6868_s28 = scalar_lea.vmem %s9417_s9, %s5413_s17  ;;  %s9421_s6 = sld [smem:[#allocation26_spill]] (%p653_p7) }
  0x2a   : > { %658 = sbr.rel (!%p653_p7) target bundleno = 60 (0x3c), region = 76 }
  0x2d   : > { %s5925_s4 = sshll.u32 (%p653_p7), %s9420_s14, 6 }
  0x2e   : > { %s6892_s9 = scalar_lea.vmem %s9418_s8, %s5923_s25 }
  0x2f   : > { %s661_s7 = scalar_lea.vmem %s9421_s6, %s5925_s4 }
  0x30   : > { %v672_v0 = vld [vmem:[%s661_s7] sm:$0xff]  ;;  %v674_v1 = vld [vmem:[%s661_s7 + $0x8] sm:$0xff]  ;;  %v676_v2 = vld [vmem:[%s661_s7 + $0x10] sm:$0xff] }
  0x31   : > { %673 = vst [vmem:[%s6892_s9] sm:$0xff] %v672_v0  ;;  %v678_v3 = vld [vmem:[%s661_s7 + $0x18] sm:$0xff]  ;;  %v680_v4 = vld [vmem:[%s661_s7 + $0x20] sm:$0xff]  ;;  %v682_v5 = vld [vmem:[%s661_s7 + $0x28] sm:$0xff] }
  0x32   : > { %675 = vst [vmem:[%s6892_s9 + $0x8] sm:$0xff] %v674_v1  ;;  %v684_v6 = vld [vmem:[%s661_s7 + $0x30] sm:$0xff]  ;;  %v686_v7 = vld [vmem:[%s661_s7 + $0x38] sm:$0xff] }
  0x33   : > { %677 = vst [vmem:[%s6892_s9 + $0x10] sm:$0xff] %v676_v2 }
  0x34   : > { %679 = vst [vmem:[%s6892_s9 + $0x18] sm:$0xff] %v678_v3 }
  0x35   : > { %681 = vst [vmem:[%s6892_s9 + $0x20] sm:$0xff] %v680_v4 }
  0x36   : > { %683 = vst [vmem:[%s6892_s9 + $0x28] sm:$0xff] %v682_v5 }
  0x37   : > { %685 = vst [vmem:[%s6892_s9 + $0x30] sm:$0xff] %v684_v6 }
  0x38   : > { %687 = vst [vmem:[%s6892_s9 + $0x38] sm:$0xff] %v686_v7 }
  0x39   : > { %693 = vsyncadd [#allocation5], 1024 }
  0x3a   : > { %6677 = dma.done.wait [#allocation5], 1024 }
  0x3b   : > { %6678 = vsyncadd [#allocation5], 4294966272 }
  0x3c PF: > { %v5955_v8 = vld [vmem:[%s6835_s15 + $0xac] sm:$0xf]  ;;  %v5541_v9 = vld [vmem:[%s6835_s15 + $0xb4] sm:$0xf0]  ;;  %v5952_v10 = vld [vmem:[%s6835_s15 + $0x94] sm:$0xf]  ;;  %s9425_s20 = scalar_lea.vmem %s9366_s5, %s6817_s21 }
  0x3d   : > { %v5544_v11 = vor.u32 %v5955_v8, %v5541_v9  ;;  %v5529_v12 = vld [vmem:[%s6835_s15 + $0x9c] sm:$0xf0]  ;;  %v5949_v14 = vld [vmem:[%s6835_s15 + $0x7c] sm:$0xf]  ;;  %v5517_v15 = vld [vmem:[%s6835_s15 + $0x84] sm:$0xf0] }
  0x3e   : > { %v5532_v13 = vor.u32 %v5952_v10, %v5529_v12  ;;  %v5520_v16 = vor.u32 %v5949_v14, %v5517_v15  ;;  %v5946_v17 = vld [vmem:[%s6835_s15 + $0x64] sm:$0xf]  ;;  %v5505_v18 = vld [vmem:[%s6835_s15 + $0x6c] sm:$0xf0]  ;;  %v5943_v20 = vld [vmem:[%s6835_s15 + $0x4c] sm:$0xf] }
  0x3f   : > { %983 = vmatpush.bf16.msra.mxu1 %v5544_v11  ;;  %v5508_v19 = vor.u32 %v5946_v17, %v5505_v18  ;;  %v5493_v21 = vld [vmem:[%s6835_s15 + $0x54] sm:$0xf0]  ;;  %v5940_v23 = vld [vmem:[%s6835_s15 + $0x34] sm:$0xf]  ;;  %v5481_v24 = vld [vmem:[%s6835_s15 + $0x3c] sm:$0xf0] }
  0x40   : > { %v5496_v22 = vor.u32 %v5943_v20, %v5493_v21  ;;  %v5484_v25 = vor.u32 %v5940_v23, %v5481_v24  ;;  %v5937_v26 = vld [vmem:[%s6835_s15 + $0x1c] sm:$0xf]  ;;  %v5469_v27 = vld [vmem:[%s6835_s15 + $0x24] sm:$0xf0]  ;;  %v5934_v29 = vld [vmem:[%s6835_s15 + $0x4] sm:$0xf] }
  0x41   : > { %v5472_v28 = vor.u32 %v5937_v26, %v5469_v27  ;;  %v5457_v30 = vld [vmem:[%s6835_s15 + $0xc] sm:$0xf0]  ;;  %v6925_v32 = vld [vmem:[%s6892_s9] sm:$0xff]  ;;  %v6929_v33 = vld [vmem:[%s6892_s9 + $0x8] sm:$0xff]  ;;  %s6699_s8 = smov 64   ;;  %vm1348_vm0 = vcmask 523264  }
  0x42   : > { %v5460_v31 = vor.u32 %v5934_v29, %v5457_v30  ;;  %v6933_v34 = vld [vmem:[%s6892_s9 + $0x10] sm:$0xff]  ;;  %v6937_v35 = vld [vmem:[%s6892_s9 + $0x18] sm:$0xff]  ;;  %v5954_v40 = vld [vmem:[%s6835_s15 + $0xa0] sm:$0xf0]  ;;  %s9423_s27 = sld [smem:[#allocation27_spill]] }
  0x43   : > { %984 = vmatpush.bf16.msra.mxu1 %v5532_v13  ;;  %v5547_v36 = vld [vmem:[%s6835_s15 + $0xb0] sm:$0xf]  ;;  %v5957_v37 = vld [vmem:[%s6835_s15 + $0xb8] sm:$0xf0]  ;;  %v5535_v39 = vld [vmem:[%s6835_s15 + $0x98] sm:$0xf] }
  0x44   : > { %v5548_v38 = vor.u32 %v5957_v37, %v5547_v36  ;;  %v5536_v41 = vor.u32 %v5954_v40, %v5535_v39  ;;  %v5539_v42 = vld [vmem:[%s6835_s15 + $0xa8] sm:$0xf]  ;;  %v5956_v43 = vld [vmem:[%s6835_s15 + $0xb0] sm:$0xf0]  ;;  %v5523_v45 = vld [vmem:[%s6835_s15 + $0x80] sm:$0xf] }
  0x45   : > { %v5540_v44 = vor.u32 %v5956_v43, %v5539_v42  ;;  %v5951_v46 = vld [vmem:[%s6835_s15 + $0x88] sm:$0xf0]  ;;  %v5527_v48 = vld [vmem:[%s6835_s15 + $0x90] sm:$0xf]  ;;  %v5953_v49 = vld [vmem:[%s6835_s15 + $0x98] sm:$0xf0] }
  0x46   : > { %1032 = vmatpush.bf16.msra.mxu2 %v5548_v38  ;;  %v5524_v47 = vor.u32 %v5951_v46, %v5523_v45  ;;  %v5528_v50 = vor.u32 %v5953_v49, %v5527_v48  ;;  %v5511_v51 = vld [vmem:[%s6835_s15 + $0x68] sm:$0xf]  ;;  %v5948_v52 = vld [vmem:[%s6835_s15 + $0x70] sm:$0xf0]  ;;  %v6953_v53 = vld [vmem:[%s6892_s9 + $0x20] sm:$0xff] }
  0x47   : > { %985 = vmatpush.bf16.msra.mxu1 %v5520_v16  ;;  %934 = vmatpush.bf16.msra.mxu0 %v5540_v44  ;;  %v5512_v54 = vor.u32 %v5948_v52, %v5511_v51  ;;  %v5515_v55 = vld [vmem:[%s6835_s15 + $0x78] sm:$0xf]  ;;  %v5950_v56 = vld [vmem:[%s6835_s15 + $0x80] sm:$0xf0]  ;;  %v5499_v58 = vld [vmem:[%s6835_s15 + $0x50] sm:$0xf] }
  0x48   : > { %v5516_v57 = vor.u32 %v5950_v56, %v5515_v55  ;;  %v5945_v59 = vld [vmem:[%s6835_s15 + $0x58] sm:$0xf0]  ;;  %v5503_v61 = vld [vmem:[%s6835_s15 + $0x60] sm:$0xf]  ;;  %v5947_v62 = vld [vmem:[%s6835_s15 + $0x68] sm:$0xf0] }
  0x49   : > { %v5500_v60 = vor.u32 %v5945_v59, %v5499_v58  ;;  %v5504_v63 = vor.u32 %v5947_v62, %v5503_v61  ;;  %v5487_v0 = vld [vmem:[%s6835_s15 + $0x38] sm:$0xf]  ;;  %v5942_v1 = vld [vmem:[%s6835_s15 + $0x40] sm:$0xf0]  ;;  %v5491_v3 = vld [vmem:[%s6835_s15 + $0x48] sm:$0xf] }
  0x4a   : > { %1033 = vmatpush.bf16.msra.mxu2 %v5536_v41  ;;  %v5488_v2 = vor.u32 %v5942_v1, %v5487_v0  ;;  %v5944_v4 = vld [vmem:[%s6835_s15 + $0x50] sm:$0xf0]  ;;  %v5475_v6 = vld [vmem:[%s6835_s15 + $0x20] sm:$0xf]  ;;  %v5939_v7 = vld [vmem:[%s6835_s15 + $0x28] sm:$0xf0] }
  0x4b   : > { %986 = vmatpush.bf16.msra.mxu1 %v5508_v19  ;;  %935 = vmatpush.bf16.msra.mxu0 %v5528_v50  ;;  %v5492_v5 = vor.u32 %v5944_v4, %v5491_v3  ;;  %v5476_v8 = vor.u32 %v5939_v7, %v5475_v6  ;;  %v5479_v9 = vld [vmem:[%s6835_s15 + $0x30] sm:$0xf]  ;;  %v5941_v10 = vld [vmem:[%s6835_s15 + $0x38] sm:$0xf0]  ;;  %v5463_v12 = vld [vmem:[%s6835_s15 + $0x8] sm:$0xf] }
  0x4c   : > { %v5480_v11 = vor.u32 %v5941_v10, %v5479_v9  ;;  %v5936_v13 = vld [vmem:[%s6835_s15 + $0x10] sm:$0xf0]  ;;  %v5931_v14 = vld [vmem:[%s6892_s9 + $0x28] sm:$0xff]  ;;  %v5467_v16 = vld [vmem:[%s6835_s15 + $0x18] sm:$0xf] }
  0x4d   : > { %v5464_v15 = vor.u32 %v5936_v13, %v5463_v12  ;;  %v5938_v17 = vld [vmem:[%s6835_s15 + $0x20] sm:$0xf0]  ;;  %v5455_v19 = vld [vmem:[%s6835_s15] sm:$0xf]  ;;  %v5935_v20 = vld [vmem:[%s6835_s15 + $0x8] sm:$0xf0] }
  0x4e   : > { %1034 = vmatpush.bf16.msra.mxu2 %v5524_v47  ;;  %v5468_v18 = vor.u32 %v5938_v17, %v5467_v16  ;;  %v5456_v21 = vor.u32 %v5935_v20, %v5455_v19  ;;  %v5933_v23 = vld [vmem:[%s6892_s9 + $0x38] sm:$0xff] }
  0x4f   : > { %987 = vmatpush.bf16.msra.mxu1 %v5496_v22  ;;  %936 = vmatpush.bf16.msra.mxu0 %v5516_v57  ;;  %v5932_v22 = vld [vmem:[%s6892_s9 + $0x30] sm:$0xff] }
  0x52   : > { %1035 = vmatpush.bf16.msra.mxu2 %v5512_v54 }
  0x53   : > { %988 = vmatpush.bf16.msra.mxu1 %v5484_v25  ;;  %937 = vmatpush.bf16.msra.mxu0 %v5504_v63  ;;  %v6986_v25 = vld [vmem:[%s6844_s30] sm:$0x7]  ;;  %s9422_s30 = sld [smem:[#allocation15_spill]] }
  0x54   : > { %v6990_v26 = vperm.slane %v6986_v25, 1 }
  0x56   : > { %1036 = vmatpush.bf16.msra.mxu2 %v5500_v60 }
  0x57   : > { %989 = vmatpush.bf16.msra.mxu1 %v5472_v28  ;;  %938 = vmatpush.bf16.msra.mxu0 %v5492_v5  ;;  %v7013_v5 = vperm.slane %v6986_v25, 0 }
  0x59   : > { %s9424_s2 = scalar_lea.vmem %s9423_s27, %s9422_s30 }
  0x5a   : > { %1037 = vmatpush.bf16.msra.mxu2 %v5488_v2 }
  0x5b   : > { %990 = vmatpush.bf16.msra.mxu1 %v5460_v31  ;;  %939 = vmatpush.bf16.msra.mxu0 %v5480_v11 }
  0x5e   : > { %991 = vmatmul.bf16.vlgmr.msra.gmra.mxu1 %v6925_v32  ;;  %1038 = vmatpush.bf16.msra.mxu2 %v5476_v8 }
  0x5f   : > { %940 = vmatpush.bf16.msra.mxu0 %v5468_v18 }
  0x62   : > { %1039 = vmatpush.bf16.msra.mxu2 %v5464_v15 }
  0x63   : > { %941 = vmatpush.bf16.msra.mxu0 %v5456_v21  ;;  %v7022_v21 = vperm.slane %v6986_v25, 2 }
  0x65   : > { %1040 = vmatmul.bf16.vlgmr.msra.gmra.mxu2 %v6925_v32 }
  0x66   : > { %942 = vmatmul.bf16.vlgmr.msra.gmra.mxu0 %v6925_v32 }
  0x6e   : > { %996 = vmatmul.bf16.gmra.mxu1 %v6929_v33 }
  0x75   : > { %1045 = vmatmul.bf16.gmra.mxu2 %v6929_v33 }
  0x76   : > { %947 = vmatmul.bf16.gmra.mxu0 %v6929_v33 }
  0x7e   : > { %1001 = vmatmul.bf16.gmra.mxu1 %v6933_v34 }
  0x85   : > { %1050 = vmatmul.bf16.gmra.mxu2 %v6933_v34 }
  0x86   : > { %952 = vmatmul.bf16.gmra.mxu0 %v6933_v34 }
  0x8e   : > { %1006 = vmatmul.bf16.gmra.mxu1 %v6937_v35 }
  0x95   : > { %1055 = vmatmul.bf16.gmra.mxu2 %v6937_v35 }
  0x96   : > { %957 = vmatmul.bf16.gmra.mxu0 %v6937_v35 }
  0x9e   : > { %1011 = vmatmul.bf16.gmra.mxu1 %v6953_v53 }
  0xa5   : > { %1060 = vmatmul.bf16.gmra.mxu2 %v6953_v53 }
  0xa6   : > { %962 = vmatmul.bf16.gmra.mxu0 %v6953_v53 }
  0xae   : > { %1016 = vmatmul.bf16.gmra.mxu1 %v5931_v14 }
  0xb5   : > { %1065 = vmatmul.bf16.gmra.mxu2 %v5931_v14 }
  0xb6   : > { %967 = vmatmul.bf16.gmra.mxu0 %v5931_v14 }
  0xbe   : > { %1021 = vmatmul.bf16.gmra.mxu1 %v5932_v22 }
  0xc5   : > { %1070 = vmatmul.bf16.gmra.mxu2 %v5932_v22 }
  0xc6   : > { %972 = vmatmul.bf16.gmra.mxu0 %v5932_v22 }
  0xce   : > { %1026 = vmatmul.bf16.gmra.mxu1 %v5933_v23 }
  0xd5   : > { %1075 = vmatmul.bf16.gmra.mxu2 %v5933_v23 }
  0xd6   : > { %977 = vmatmul.bf16.gmra.mxu0 %v5933_v23 }
  0xdb   : > { %v992_v24 = vpop.f32.mrf.mxu1 }
  0xdc   : > { %v993_v28 = vadd.f32 %v992_v24, %v6990_v26 }
  0xe3   : > { %v994_v27 = vpop.f32.mrf.mxu1  ;;  %v943_v54 = vpop.f32.mrf.mxu0 }
  0xe4   : > { %v995_v29 = vadd.f32 %v994_v27, %v6990_v26  ;;  %v944_v8 = vadd.f32 %v943_v54, %v7013_v5 }
  0xe6   : > { %v6089_v30 = vpack.c.bf16 %v995_v29, %v993_v28 }
  0xe8   : > { %6090 = vst [vmem:[#allocation3] sm:$0xff] %v6089_v30   ;;  %v1041_v55 = vpop.f32.mrf.mxu2 }
  0xe9   : > { %v1042_v23 = vadd.f32 %v1041_v55, %v7022_v21 }
  0xeb   : > { %v997_v31 = vpop.f32.mrf.mxu1  ;;  %v945_v60 = vpop.f32.mrf.mxu0 }
  0xec   : > { %v998_v33 = vadd.f32 %v997_v31, %v6990_v26  ;;  %v946_v9 = vadd.f32 %v945_v60, %v7013_v5 }
  0xee   : > { %v6049_v13 = vpack.c.bf16 %v946_v9, %v944_v8 }
  0xef   : > { %v5990_v14 = vld [vmem:[#allocation3] sm:$0xff] }
  0xf0   : > { %v1043_v61 = vpop.f32.mrf.mxu2  ;;  %6050 = vst [vmem:[#allocation2 + $0x30] sm:$0xff] %v6049_v13  }
  0xf1   : > { %v1044_v29 = vadd.f32 %v1043_v61, %v7022_v21 }
  0xf3   : > { %v999_v32 = vpop.f32.mrf.mxu1  ;;  %v948_v0 = vpop.f32.mrf.mxu0  ;;  %v6129_v31 = vpack.c.bf16 %v1044_v29, %v1042_v23 }
  0xf4   : > { %v1000_v34 = vadd.f32 %v999_v32, %v6990_v26  ;;  %v949_v22 = vadd.f32 %v948_v0, %v7013_v5 }
  0xf5   : > { %6130 = vst [vmem:[#allocation4 + $0x28] sm:$0xff] %v6129_v31  }
  0xf6   : > { %v6094_v36 = vpack.c.bf16 %v1000_v34, %v998_v33 }
  0xf7   : > { %v5982_v13 = vld [vmem:[#allocation2 + $0x30] sm:$0xff] }
  0xf8   : > { %6245 = vst [vmem:[#allocation3 + $0x18] sm:$0xff] %v6094_v36   ;;  %v1046_v1 = vpop.f32.mrf.mxu2 }
  0xfb   : > { %v1002_v37 = vpop.f32.mrf.mxu1  ;;  %v950_v10 = vpop.f32.mrf.mxu0 }
  0xfc   : > { %v1003_v39 = vadd.f32 %v1002_v37, %v6990_v26  ;;  %v951_v28 = vadd.f32 %v950_v10, %v7013_v5 }
  0xfe   : > { %v6054_v30 = vpack.c.bf16 %v951_v28, %v949_v22 }
 0x100   : > { %v1048_v11 = vpop.f32.mrf.mxu2  ;;  %6238 = vst [vmem:[#allocation2] sm:$0xff] %v6054_v30   ;;  %v5958_v30 = vld [vmem:[#allocation2 + $0x30] sm:$0xff] }
 0x103   : > { %v1004_v38 = vpop.f32.mrf.mxu1  ;;  %v953_v15 = vpop.f32.mrf.mxu0 }
 0x104   : > { %v1005_v35 = vadd.f32 %v1004_v38, %v6990_v26  ;;  %v954_v38 = vadd.f32 %v953_v15, %v7013_v5 }
 0x106   : > { %v6099_v40 = vpack.c.bf16 %v1005_v35, %v1003_v39  ;;  %v1047_v39 = vadd.f32 %v1046_v1, %v7022_v21 }
 0x108   : > { %6246 = vst [vmem:[#allocation3 + $0x10] sm:$0xff] %v6099_v40   ;;  %v1051_v16 = vpop.f32.mrf.mxu2 }
 0x10b   : > { %v1007_v41 = vpop.f32.mrf.mxu1  ;;  %v955_v24 = vpop.f32.mrf.mxu0 }
 0x10c   : > { %v1008_v43 = vadd.f32 %v1007_v41, %v6990_v26  ;;  %v956_v40 = vadd.f32 %v955_v24, %v7013_v5  ;;  %v1049_v41 = vadd.f32 %v1048_v11, %v7022_v21 }
 0x10f   : > { %v5992_v52 = vld [vmem:[#allocation3 + $0x10] sm:$0xff] }
 0x110   : > { %v1053_v27 = vpop.f32.mrf.mxu2  ;;  %v5968_v9 = vld [vmem:[#allocation3 + $0x10] sm:$0xff] }
 0x111   : > { %v1380_v10 = vsel %vm1348_vm0, %v5968_v9, 0 }
 0x113   : > { %v1009_v42 = vpop.f32.mrf.mxu1 }
 0x114   : > { %v1010_v44 = vadd.f32 %v1009_v42, %v6990_v26 }
 0x116   : > { %v6104_v45 = vpack.c.bf16 %v1010_v44, %v1008_v43  ;;  %v6059_v44 = vpack.c.bf16 %v956_v40, %v954_v38 }
 0x118   : > { %6247 = vst [vmem:[#allocation3 + $0x20] sm:$0xff] %v6104_v45   ;;  %v1056_v34 = vpop.f32.mrf.mxu2  ;;  %v6134_v45 = vpack.c.bf16 %v1049_v41, %v1047_v39 }
 0x119   : > { %6239 = vst [vmem:[#allocation2 + $0x18] sm:$0xff] %v6059_v44   ;;  %v1057_v0 = vadd.f32 %v1056_v34, %v7022_v21 }
 0x11a   : > { %6252 = vst [vmem:[#allocation4 + $0x20] sm:$0xff] %v6134_v45   ;;  %v5959_v45 = vld [vmem:[#allocation2] sm:$0xff] }
 0x11b   : > { %v1012_v46 = vpop.f32.mrf.mxu1 }
 0x11c   : > { %v1013_v49 = vadd.f32 %v1012_v46, %v6990_v26 }
 0x11f   : > { %v5993_v47 = vld [vmem:[#allocation3 + $0x20] sm:$0xff] }
 0x120   : > { %1949 = vrot.lane.b32.xlu2 %v5993_v47, %s6699_s8  ;;  %v1058_v43 = vpop.f32.mrf.mxu2  ;;  %v5991_v47 = vld [vmem:[#allocation3 + $0x18] sm:$0xff] }
 0x121   : > { %v5984_v29 = vld [vmem:[#allocation2 + $0x18] sm:$0xff] }
 0x123   : > { %v1014_v48 = vpop.f32.mrf.mxu1 }
 0x124   : > { %v1015_v50 = vadd.f32 %v1014_v48, %v6990_v26 }
 0x126   : > { %v6109_v51 = vpack.c.bf16 %v1015_v50, %v1013_v49 }
 0x128   : > { %6248 = vst [vmem:[#allocation3 + $0x28] sm:$0xff] %v6109_v51   ;;  %1947 = vrot.lane.b32.xlu2 %v5992_v52, %s6699_s8  ;;  %v1061_v50 = vpop.f32.mrf.mxu2 }
 0x129   : > { %v1062_v22 = vadd.f32 %v1061_v50, %v7022_v21 }
 0x12b   : > { %v1017_v53 = vpop.f32.mrf.mxu1 }
 0x12c   : > { %v1018_v57 = vadd.f32 %v1017_v53, %v6990_v26  ;;  %v1052_v53 = vadd.f32 %v1051_v16, %v7022_v21 }
 0x12f   : > { %v5994_v7 = vld [vmem:[#allocation3 + $0x28] sm:$0xff] }
 0x130   : > { %v5970_v51 = vld [vmem:[#allocation3 + $0x28] sm:$0xff]  ;;  %1887 = vrot.lane.b32.xlu2 %v5982_v13, %s6699_s8 }
 0x131   : > { %v1386_v54 = vsel %vm1348_vm0, %v5970_v51, 0 }
 0x133   : > { %v1019_v56 = vpop.f32.mrf.mxu1 }
 0x134   : > { %v1020_v58 = vadd.f32 %v1019_v56, %v6990_v26  ;;  %v1054_v56 = vadd.f32 %v1053_v27, %v7022_v21 }
 0x136   : > { %v6114_v59 = vpack.c.bf16 %v1020_v58, %v1018_v57  ;;  %v1063_v58 = vpop.f32.mrf.mxu2  ;;  %v6139_v61 = vpack.c.bf16 %v1054_v56, %v1052_v53 }
 0x137   : > { %v1064_v28 = vadd.f32 %v1063_v58, %v7022_v21 }
 0x138   : > { %6249 = vst [vmem:[#allocation3 + $0x8] sm:$0xff] %v6114_v59   ;;  %v5969_v59 = vld [vmem:[#allocation3 + $0x20] sm:$0xff] }
 0x139   : > { %6253 = vst [vmem:[#allocation4 + $0x38] sm:$0xff] %v6139_v61  }
 0x13b   : > { %v1022_v62 = vpop.f32.mrf.mxu1 }
 0x13c   : > { %v1023_v3 = vadd.f32 %v1022_v62, %v6990_v26  ;;  %v1383_v62 = vsel %vm1348_vm0, %v5969_v59, 0 }
 0x13f   : > { %v5995_v63 = vld [vmem:[#allocation3 + $0x8] sm:$0xff] }
 0x140   : > { %1953 = vrot.lane.b32.xlu1 %v5995_v63, %s6699_s8  ;;  %v5971_v46 = vld [vmem:[#allocation3 + $0x8] sm:$0xff] }
 0x141   : > { %v1389_v48 = vsel %vm1348_vm0, %v5971_v46, 0 }
 0x143   : > { %v1024_v2 = vpop.f32.mrf.mxu1 }
 0x144   : > { %v1025_v4 = vadd.f32 %v1024_v2, %v6990_v26  ;;  %v1059_v2 = vadd.f32 %v1058_v43, %v7022_v21 }
 0x146   : > { %v6119_v6 = vpack.c.bf16 %v1025_v4, %v1023_v3  ;;  %v5983_v3 = vld [vmem:[#allocation2] sm:$0xff]  ;;  %v6144_v8 = vpack.c.bf16 %v1059_v2, %v1057_v0  ;;  %v5974_v2 = vld [vmem:[#allocation4 + $0x28] sm:$0xff] }
 0x147   : > { %v5975_v0 = vld [vmem:[#allocation4 + $0x20] sm:$0xff] }
 0x148   : > { %6250 = vst [vmem:[#allocation3 + $0x30] sm:$0xff] %v6119_v6   ;;  %1951 = vrot.lane.b32.xlu1 %v5994_v7, %s6699_s8  ;;  %v1066_v6 = vpop.f32.mrf.mxu2 }
 0x149   : > { %6254 = vst [vmem:[#allocation4 + $0x10] sm:$0xff] %v6144_v8   ;;  %v1067_v34 = vadd.f32 %v1066_v6, %v7022_v21 }
 0x14b   : > { %v1027_v12 = vpop.f32.mrf.mxu1 }
 0x14c   : > { %v1028_v18 = vadd.f32 %v1027_v12, %v6990_v26 }
 0x14f   : > { %v5972_v36 = vld [vmem:[#allocation3 + $0x30] sm:$0xff] }
 0x150   : > { %1943 = vrot.lane.b32.xlu1 %v5990_v14, %s6699_s8  ;;  %v5996_v37 = vld [vmem:[#allocation3 + $0x30] sm:$0xff]  ;;  %v1392_v35 = vsel %vm1348_vm0, %v5972_v36, 0  ;;  %v1068_v12 = vpop.f32.mrf.mxu2  ;;  %v5967_v14 = vld [vmem:[#allocation3 + $0x18] sm:$0xff] }
 0x151   : > { %v1377_v15 = vsel %vm1348_vm0, %v5967_v14, 0 }
 0x153   : > { %v1029_v17 = vpop.f32.mrf.mxu1 }
 0x154   : > { %v1030_v19 = vadd.f32 %v1029_v17, %v6990_v26  ;;  %v958_v26 = vpop.f32.mrf.mxu0 }
 0x155   : > { %v959_v52 = vadd.f32 %v958_v26, %v7013_v5 }
 0x156   : > { %v6124_v20 = vpack.c.bf16 %v1030_v19, %v1028_v18  ;;  %v5966_v18 = vld [vmem:[#allocation3] sm:$0xff] }
 0x157   : > { %v1374_v19 = vsel %vm1348_vm0, %v5966_v18, 0  ;;  %v6000_v18 = vld [vmem:[#allocation4 + $0x38] sm:$0xff] }
 0x158   : > { %6251 = vst [vmem:[#allocation3 + $0x38] sm:$0xff] %v6124_v20   ;;  %v1071_v17 = vpop.f32.mrf.mxu2  ;;  %1891 = vrot.lane.b32.xlu1 %v5984_v29, %s6699_s8 }
 0x15c   : > { %v960_v42 = vpop.f32.mrf.mxu0 }
 0x15d   : > { %v961_v55 = vadd.f32 %v960_v42, %v7013_v5 }
 0x15f   : > { %v5997_v32 = vld [vmem:[#allocation3 + $0x38] sm:$0xff]  ;;  %v6064_v60 = vpack.c.bf16 %v961_v55, %v959_v52  ;;  %v6001_v55 = vld [vmem:[#allocation4 + $0x10] sm:$0xff] }
 0x160   : > { %v5973_v33 = vld [vmem:[#allocation3 + $0x38] sm:$0xff]  ;;  %1957 = vrot.lane.b32.xlu0 %v5997_v32, %s6699_s8  ;;  %v1073_v24 = vpop.f32.mrf.mxu2  ;;  %v6149_v32 = vpack.c.bf16 %v1064_v28, %v1062_v22 }
 0x161   : > { %v1395_v25 = vsel %vm1348_vm0, %v5973_v33, 0  ;;  %6240 = vst [vmem:[#allocation2 + $0x10] sm:$0xff] %v6064_v60   ;;  %v1074_v50 = vadd.f32 %v1073_v24, %v7022_v21  ;;  %v5977_v60 = vld [vmem:[#allocation4 + $0x10] sm:$0xff] }
 0x162   : > { %1397 = vmatpush.bf16.xpose.msra.mxu3 %v1395_v25  ;;  %6255 = vst [vmem:[#allocation4 + $0x8] sm:$0xff] %v6149_v32   ;;  %v7100_v32 = vld [vmem:[%s9424_s2] ss:$0 sm:$0xff] }
 0x164   : > { %v963_v49 = vpop.f32.mrf.mxu0 }
 0x165   : > { %v964_v63 = vadd.f32 %v963_v49, %v7013_v5  ;;  %v1072_v49 = vadd.f32 %v1071_v17, %v7022_v21 }
 0x167   : > { %v6159_v51 = vpack.c.bf16 %v1074_v50, %v1072_v49 }
 0x168   : > { %1955 = vrot.lane.b32.xlu0 %v5996_v37, %s6699_s8  ;;  %v1076_v25 = vpop.f32.mrf.mxu2  ;;  %v1069_v37 = vadd.f32 %v1068_v12, %v7022_v21  ;;  %v5985_v58 = vld [vmem:[#allocation2 + $0x10] sm:$0xff] }
 0x169   : > { %v1077_v43 = vadd.f32 %v1076_v25, %v7022_v21  ;;  %6257 = vst [vmem:[#allocation4 + $0x18] sm:$0xff] %v6159_v51   ;;  %1893 = vrot.lane.b32.xlu2 %v5985_v58, %s6699_s8 }
 0x16a   : > { %1398 = vmatpush.bf16.xpose.msra.mxu3 %v1392_v35  ;;  %v6154_v39 = vpack.c.bf16 %v1069_v37, %v1067_v34 }
 0x16c   : > { %v965_v57 = vpop.f32.mrf.mxu0  ;;  %6256 = vst [vmem:[#allocation4 + $0x30] sm:$0xff] %v6154_v39  }
 0x16d   : > { %v966_v1 = vadd.f32 %v965_v57, %v7013_v5  ;;  %v5978_v57 = vld [vmem:[#allocation4 + $0x8] sm:$0xff] }
 0x16f   : > { %v6069_v7 = vpack.c.bf16 %v966_v1, %v964_v63  ;;  %v5961_v63 = vld [vmem:[#allocation2 + $0x10] sm:$0xff]  ;;  %v6002_v1 = vld [vmem:[#allocation4 + $0x8] sm:$0xff] }
 0x170   : > { %1945 = vrot.lane.b32.xlu0 %v5991_v47, %s6699_s8  ;;  %v1078_v40 = vpop.f32.mrf.mxu2  ;;  %v5980_v53 = vld [vmem:[#allocation4 + $0x18] sm:$0xff] }
 0x171   : > { %6241 = vst [vmem:[#allocation2 + $0x8] sm:$0xff] %v6069_v7   ;;  %v1079_v44 = vadd.f32 %v1078_v40, %v7022_v21  ;;  %v6004_v61 = vld [vmem:[#allocation4 + $0x18] sm:$0xff] }
 0x172   : > { %1399 = vmatpush.bf16.xpose.msra.mxu3 %v1389_v48 }
 0x173   : > { %v6164_v47 = vpack.c.bf16 %v1079_v44, %v1077_v43  ;;  %v5979_v56 = vld [vmem:[#allocation4 + $0x30] sm:$0xff] }
 0x174   : > { %v968_v4 = vpop.f32.mrf.mxu0  ;;  %v6003_v13 = vld [vmem:[#allocation4 + $0x30] sm:$0xff] }
 0x175   : > { %v969_v20 = vadd.f32 %v968_v4, %v7013_v5  ;;  %6258 = vst [vmem:[#allocation4] sm:$0xff] %v6164_v47  }
 0x178   : > { %1889 = vrot.lane.b32.xlu0 %v5983_v3, %s6699_s8  ;;  %v5986_v48 = vld [vmem:[#allocation2 + $0x8] sm:$0xff] }
 0x179   : > { %v5962_v8 = vld [vmem:[#allocation2 + $0x8] sm:$0xff] }
 0x17a   : > { %1400 = vmatpush.bf16.xpose.msra.mxu3 %v1386_v54  ;;  %v5960_v54 = vld [vmem:[#allocation2 + $0x18] sm:$0xff]  ;;  %v1950_v17 = vpop.permute.xlu2 %1949 }
 0x17c   : > { %v970_v11 = vpop.f32.mrf.mxu0  ;;  %v5981_v52 = vld [vmem:[#allocation4] sm:$0xff] }
 0x17d   : > { %v971_v27 = vadd.f32 %v970_v11, %v7013_v5  ;;  %1734 = vmatpush.bf16.msrb.mxu0 %v5981_v52  ;;  %v6005_v59 = vld [vmem:[#allocation4] sm:$0xff] }
 0x17e   : > { %v5999_v11 = vld [vmem:[#allocation4 + $0x20] sm:$0xff] }
 0x17f   : > { %v6074_v31 = vpack.c.bf16 %v971_v27, %v969_v20 }
 0x180   : > { %1895 = vrot.lane.b32.xlu0 %v5986_v48, %s6699_s8 }
 0x181   : > { %6242 = vst [vmem:[#allocation2 + $0x20] sm:$0xff] %v6074_v31   ;;  %1735 = vmatpush.bf16.msrb.mxu0 %v5980_v53 }
 0x182   : > { %1401 = vmatpush.bf16.xpose.msra.mxu3 %v1383_v62  ;;  %v5976_v62 = vld [vmem:[#allocation4 + $0x38] sm:$0xff]  ;;  %v1948_v20 = vpop.permute.xlu2 %1947 }
 0x183   : > { %v1990_v22 = vsel %vm1348_vm0, %v1948_v20, 0 }
 0x184   : > { %v973_v16 = vpop.f32.mrf.mxu0 }
 0x185   : > { %v974_v26 = vadd.f32 %v973_v16, %v7013_v5  ;;  %1736 = vmatpush.bf16.msrb.mxu0 %v5979_v56 }
 0x188   : > { %v5987_v21 = vld [vmem:[#allocation2 + $0x20] sm:$0xff] }
 0x189   : > { %1897 = vrot.lane.b32.xlu1 %v5987_v21, %s6699_s8  ;;  %1737 = vmatpush.bf16.msrb.mxu0 %v5978_v57  ;;  %v5963_v16 = vld [vmem:[#allocation2 + $0x20] sm:$0xff] }
 0x18a   : > { %1402 = vmatpush.bf16.xpose.msra.mxu3 %v1380_v10  ;;  %v1888_v29 = vpop.permute.xlu2 %1887 }
 0x18c   : > { %v975_v23 = vpop.f32.mrf.mxu0 }
 0x18d   : > { %v976_v36 = vadd.f32 %v975_v23, %v7013_v5  ;;  %1738 = vmatpush.bf16.msrb.mxu0 %v5977_v60 }
 0x18f   : > { %v6079_v38 = vpack.c.bf16 %v976_v36, %v974_v26 }
 0x191   : > { %6243 = vst [vmem:[#allocation2 + $0x28] sm:$0xff] %v6079_v38   ;;  %2348 = vrot.lane.b32.xlu1 %v6004_v61, %s6699_s8  ;;  %1739 = vmatpush.bf16.msrb.mxu0 %v5976_v62 }
 0x192   : > { %1403 = vmatpush.bf16.xpose.msra.mxu3 %v1377_v15 }
 0x194   : > { %v978_v33 = vpop.f32.mrf.mxu0 }
 0x195   : > { %v979_v41 = vadd.f32 %v978_v33, %v7013_v5  ;;  %1740 = vmatpush.bf16.msrb.mxu0 %v5975_v0 }
 0x198   : > { %v5988_v9 = vld [vmem:[#allocation2 + $0x28] sm:$0xff] }
 0x199   : > { %2344 = vrot.lane.b32.xlu1 %v6002_v1, %s6699_s8  ;;  %1741 = vmatpush.bf16.msrb.mxu0 %v5974_v2 }
 0x19a   : > { %1404 = vmatpush.bf16.xpose.msra.mxu3 %v1374_v19  ;;  %1899 = vrot.lane.b32.xlu2 %v5988_v9, %s6699_s8  ;;  %v1993_v19 = vsel %vm1348_vm0, %v1950_v17, 0 }
 0x19c   : > { %v980_v35 = vpop.f32.mrf.mxu0 }
 0x19d   : > { %v981_v42 = vadd.f32 %v980_v35, %v7013_v5 }
 0x19f   : > { %v6084_v46 = vpack.c.bf16 %v981_v42, %v979_v41  ;;  %v5964_v41 = vld [vmem:[#allocation2 + $0x28] sm:$0xff] }
 0x1a1   : > { %5613 = vmatmul.msk.bf16.vlgmr.msra.gmra.mxu3 %vm1348_vm0, %v5958_v30  ;;  %6244 = vst [vmem:[#allocation2 + $0x38] sm:$0xff] %v6084_v46   ;;  %2338 = vrot.lane.b32.xlu1 %v5999_v11, %s6699_s8 }
 0x1a2   : > { %2346 = vrot.lane.b32.xlu2 %v6003_v13, %s6699_s8 }
 0x1a8   : > { %v5989_v5 = vld [vmem:[#allocation2 + $0x38] sm:$0xff] }
 0x1a9   : > { %1901 = vrot.lane.b32.xlu0 %v5989_v5, %s6699_s8  ;;  %v5965_v5 = vld [vmem:[#allocation2 + $0x38] sm:$0xff] }
 0x1aa   : > { %2340 = vrot.lane.b32.xlu2 %v6000_v18, %s6699_s8 }
 0x1b1   : > { %5614 = vmatmul.msk.bf16.gmra.mxu3 %vm1348_vm0, %v5959_v45  ;;  %2342 = vrot.lane.b32.xlu0 %v6001_v55, %s6699_s8 }
 0x1b2   : > { %v1954_v10 = vpop.permute.xlu1 %1953 }
 0x1b3   : > { %v1999_v12 = vsel %vm1348_vm0, %v1954_v10, 0 }
 0x1b9   : > { %2350 = vrot.lane.b32.xlu0 %v6005_v59, %s6699_s8 }
 0x1ba   : > { %v1952_v14 = vpop.permute.xlu1 %1951 }
 0x1bb   : > { %v1996_v15 = vsel %vm1348_vm0, %v1952_v14, 0 }
 0x1c1   : > { %5615 = vmatmul.msk.bf16.gmra.mxu3 %vm1348_vm0, %v5960_v54 }
 0x1c2   : > { %v1944_v27 = vpop.permute.xlu1 %1943 }
 0x1c3   : > { %v1984_v28 = vsel %vm1348_vm0, %v1944_v27, 0  ;;  %v1894_v35 = vpop.permute.xlu2 %1893 }
 0x1ca   : > { %v1892_v38 = vpop.permute.xlu1 %1891 }
 0x1d1   : > { %5616 = vmatmul.msk.bf16.gmra.mxu3 %vm1348_vm0, %v5961_v63 }
 0x1d2   : > { %v1958_v3 = vpop.permute.xlu0 %1957 }
 0x1d3   : > { %v2005_v4 = vsel %vm1348_vm0, %v1958_v3, 0 }
 0x1d4   : > { %2007 = vmatpush.bf16.xpose.msrb.mxu1 %v2005_v4 }
 0x1da   : > { %v1956_v6 = vpop.permute.xlu0 %1955 }
 0x1db   : > { %v2002_v7 = vsel %vm1348_vm0, %v1956_v6, 0 }
 0x1dc   : > { %2008 = vmatpush.bf16.xpose.msrb.mxu1 %v2002_v7 }
 0x1e1   : > { %5617 = vmatmul.msk.bf16.gmra.mxu3 %vm1348_vm0, %v5962_v8 }
 0x1e2   : > { %v1946_v23 = vpop.permute.xlu0 %1945 }
 0x1e3   : > { %v1987_v24 = vsel %vm1348_vm0, %v1946_v23, 0  ;;  %v5998_v23 = vld [vmem:[#allocation4 + $0x28] sm:$0xff] }
 0x1e4   : > { %2009 = vmatpush.bf16.xpose.msrb.mxu1 %v1999_v12 }
 0x1ea   : > { %v1890_v30 = vpop.permute.xlu0 %1889 }
 0x1ec   : > { %2010 = vmatpush.bf16.xpose.msrb.mxu1 %v1996_v15 }
 0x1f1   : > { %5618 = vmatmul.msk.bf16.gmra.mxu3 %vm1348_vm0, %v5963_v16 }
 0x1f2   : > { %v1896_v31 = vpop.permute.xlu0 %1895 }
 0x1f4   : > { %2011 = vmatpush.bf16.xpose.msrb.mxu1 %v1993_v19  ;;  %v1900_v47 = vpop.permute.xlu2 %1899 }
 0x1fb   : > { %v1898_v44 = vpop.permute.xlu1 %1897 }
 0x1fc   : > { %2012 = vmatpush.bf16.xpose.msrb.mxu1 %v1990_v22  ;;  %v2347_v49 = vpop.permute.xlu2 %2346 }
 0x201   : > { %5619 = vmatmul.msk.bf16.gmra.mxu3 %vm1348_vm0, %v5964_v41 }
 0x203   : > { %v2349_v48 = vpop.permute.xlu1 %2348 }
 0x204   : > { %2013 = vmatpush.bf16.xpose.msrb.mxu1 %v1987_v24  ;;  %v2341_v51 = vpop.permute.xlu2 %2340 }
 0x20b   : > { %v2345_v50 = vpop.permute.xlu1 %2344 }
 0x20c   : > { %2014 = vmatpush.bf16.xpose.msrb.mxu1 %v1984_v28 }
 0x211   : > { %5620 = vmatmul.msk.bf16.gmra.mxu3 %vm1348_vm0, %v5965_v5 }
 0x213   : > { %5717 = vmatmul.msk.bf16.vlgmr.msrb.gmra.mxu1 %vm1348_vm0, %v1888_v29  ;;  %v2339_v52 = vpop.permute.xlu1 %2338 }
 0x21b   : > { %v1902_v34 = vpop.permute.xlu0 %1901 }
 0x223   : > { %5718 = vmatmul.msk.bf16.gmra.mxu1 %vm1348_vm0, %v1890_v30  ;;  %v2343_v40 = vpop.permute.xlu0 %2342 }
 0x224   : > { %v1406_v33 = vpop.f32.mrf.mxu3 }
 0x225   : > { %v1446_v25 = vmul.f32 0.125, %v1406_v33 }
 0x227   : > { %v7104_v26 = vadd.f32 %v7100_v32, %v1446_v25 }
 0x229   : > { %1478 = vmax.xlane.f32.xlu0 %v7104_v26 }
 0x22b   : > { %v2351_v46 = vpop.permute.xlu0 %2350 }
 0x22c   : > { %v1408_v36 = vpop.f32.mrf.mxu3  ;;  %2360 = vmatpush.bf16.msrb.mxu2 %v2351_v46 }
 0x22d   : > { %v1447_v37 = vmul.f32 0.125, %v1408_v36 }
 0x22f   : > { %v7108_v39 = vadd.f32 %v7100_v32, %v1447_v37 }
 0x230   : > { %2361 = vmatpush.bf16.msrb.mxu2 %v2349_v48 }
 0x231   : > { %1480 = vmax.xlane.f32.xlu1 %v7108_v39 }
 0x233   : > { %5719 = vmatmul.msk.bf16.gmra.mxu1 %vm1348_vm0, %v1892_v38 }
 0x234   : > { %v1411_v42 = vpop.f32.mrf.mxu3  ;;  %2362 = vmatpush.bf16.msrb.mxu2 %v2347_v49 }
 0x235   : > { %v1448_v43 = vmul.f32 0.125, %v1411_v42 }
 0x237   : > { %v7114_v45 = vadd.f32 %v7100_v32, %v1448_v43 }
 0x238   : > { %2363 = vmatpush.bf16.msrb.mxu2 %v2345_v50 }
 0x239   : > { %1482 = vmax.xlane.f32.xlu0 %v7114_v45 }
 0x23c   : > { %2364 = vmatpush.bf16.msrb.mxu2 %v2343_v40  ;;  %v1413_v55 = vpop.f32.mrf.mxu3 }
 0x23d   : > { %v1449_v21 = vmul.f32 0.125, %v1413_v55 }
 0x23f   : > { %v7131_v61 = vadd.f32 %v7100_v32, %v1449_v21 }
 0x240   : > { %2365 = vmatpush.bf16.msrb.mxu2 %v2341_v51 }
 0x243   : > { %5720 = vmatmul.msk.bf16.gmra.mxu1 %vm1348_vm0, %v1894_v35 }
 0x244   : > { %2366 = vmatpush.bf16.msrb.mxu2 %v2339_v52  ;;  %v1416_v59 = vpop.f32.mrf.mxu3 }
 0x245   : > { %v1450_v8 = vmul.f32 0.125, %v1416_v59 }
 0x247   : > { %v7151_v12 = vadd.f32 %v7100_v32, %v1450_v8 }
 0x24c   : > { %v1418_v1 = vpop.f32.mrf.mxu3 }
 0x24d   : > { %v1451_v2 = vmul.f32 0.125, %v1418_v1 }
 0x24f   : > { %v7143_v7 = vadd.f32 %v7100_v32, %v1451_v2 }
 0x253   : > { %5721 = vmatmul.msk.bf16.gmra.mxu1 %vm1348_vm0, %v1896_v31 }
 0x254   : > { %v1421_v50 = vpop.f32.mrf.mxu3 }
 0x263   : > { %5722 = vmatmul.msk.bf16.gmra.mxu1 %vm1348_vm0, %v1898_v44 }
 0x273   : > { %5723 = vmatmul.msk.bf16.gmra.mxu1 %vm1348_vm0, %v1900_v47 }
 0x283   : > { %5724 = vmatmul.msk.bf16.gmra.mxu1 %vm1348_vm0, %v1902_v34 }
 0x290   : > { %v2016_v53 = vpop.f32.mrf.mxu1 }
 0x291   : > { %v2056_v54 = vmul.f32 0.125, %v2016_v53 }
 0x293   : > { %v7124_v56 = vadd.f32 %v7100_v32, %v2056_v54  ;;  %v1423_v54 = vpop.f32.mrf.mxu3 }
 0x295   : > { %2088 = vmax.xlane.f32.xlu1 %v7124_v56 }
 0x298   : > { %v2018_v57 = vpop.f32.mrf.mxu1 }
 0x299   : > { %v2057_v58 = vmul.f32 0.125, %v2018_v57 }
 0x29b   : > { %v7128_v60 = vadd.f32 %v7100_v32, %v2057_v58  ;;  %v1426_v1 = vpop.f32.mrf.mxu3 }
 0x29c   : > { %v1479_v40 = vpop.xlane.xlu0 %1478 }
 0x29d   : > { %2090 = vmax.xlane.f32.xlu2 %v7128_v60  ;;  %1484 = vmax.xlane.f32.xlu1 %v7131_v61 }
 0x2a0   : > { %v2021_v62 = vpop.f32.mrf.mxu1 }
 0x2a1   : > { %v2058_v63 = vmul.f32 0.125, %v2021_v62 }
 0x2a3   : > { %v7136_v0 = vadd.f32 %v7100_v32, %v2058_v63 }
 0x2a4   : > { %v1481_v35 = vpop.xlane.xlu1 %1480 }
 0x2a5   : > { %2092 = vmax.xlane.f32.xlu0 %v7136_v0  ;;  %v1511_v59 = vsub.f32 %v7108_v39, %v1481_v35  ;;  %v1452_v39 = vmul.f32 0.125, %v1421_v50  ;;  %v1454_v50 = vmul.f32 0.125, %v1426_v1 }
 0x2a8   : > { %v2023_v3 = vpop.f32.mrf.mxu1 }
 0x2a9   : > { %v2059_v4 = vmul.f32 0.125, %v2023_v3  ;;  %v1528_v3 = vmul.f32 1.442695, %v1511_v59 }
 0x2ab   : > { %v7140_v6 = vadd.f32 %v7100_v32, %v2059_v4 }
 0x2ac   : > { %v7185_v44 = vpop.xlane.xlu0 %1482 }
 0x2ad   : > { %2094 = vmax.xlane.f32.xlu2 %v7140_v6  ;;  %1488 = vmax.xlane.f32.xlu0 %v7143_v7 }
 0x2b0   : > { %v2026_v9 = vpop.f32.mrf.mxu1 }
 0x2b1   : > { %v2060_v10 = vmul.f32 0.125, %v2026_v9  ;;  %v1510_v9 = vsub.f32 %v7104_v26, %v1479_v40 }
 0x2b3   : > { %v7148_v11 = vadd.f32 %v7100_v32, %v2060_v10  ;;  %v1526_v10 = vmul.f32 1.442695, %v1510_v9 }
 0x2b5   : > { %2096 = vmax.xlane.f32.xlu1 %v7148_v11  ;;  %1486 = vmax.xlane.f32.xlu2 %v7151_v12 }
 0x2b8   : > { %v2028_v13 = vpop.f32.mrf.mxu1 }
 0x2b9   : > { %v2061_v14 = vmul.f32 0.125, %v2028_v13 }
 0x2bb   : > { %v7156_v15 = vadd.f32 %v7100_v32, %v2061_v14 }
 0x2bd   : > { %2098 = vmax.xlane.f32.xlu2 %v7156_v15 }
 0x2c0   : > { %v2031_v16 = vpop.f32.mrf.mxu1 }
 0x2c1   : > { %v2062_v17 = vmul.f32 0.125, %v2031_v16  ;;  %v7215_v16 = vadd.f32 %v7100_v32, %v1452_v39 }
 0x2c3   : > { %v7160_v18 = vadd.f32 %v7100_v32, %v2062_v17 }
 0x2c5   : > { %2100 = vmax.xlane.f32.xlu2 %v7160_v18 }
 0x2c8   : > { %v2033_v19 = vpop.f32.mrf.mxu1 }
 0x2c9   : > { %v2063_v20 = vmul.f32 0.125, %v2033_v19  ;;  %v1428_v19 = vpop.f32.mrf.mxu3 }
 0x2cb   : > { %v7164_v22 = vadd.f32 %v7100_v32, %v2063_v20 }
 0x2cd   : > { %2102 = vmax.xlane.f32.xlu0 %v7164_v22 }
 0x2ce   : > { %2336 = vrot.lane.b32.xlu1 %v5998_v23, %s6699_s8  ;;  %v1455_v23 = vmul.f32 0.125, %v1428_v19 }
 0x2d0   : > { %v2036_v24 = vpop.f32.mrf.mxu1 }
 0x2d1   : > { %v2064_v27 = vmul.f32 0.125, %v2036_v24 }
 0x2d3   : > { %v7169_v28 = vadd.f32 %v7100_v32, %v2064_v27 }
 0x2d5   : > { %2104 = vmax.xlane.f32.xlu2 %v7169_v28 }
 0x2d8   : > { %v2038_v29 = vpop.f32.mrf.mxu1 }
 0x2d9   : > { %v2065_v30 = vmul.f32 0.125, %v2038_v29  ;;  %v7229_v29 = vadd.f32 %v7100_v32, %v1455_v23 }
 0x2db   : > { %v7173_v31 = vadd.f32 %v7100_v32, %v2065_v30 }
 0x2dd   : > { %2106 = vmax.xlane.f32.xlu0 %v7173_v31 }
 0x2e0   : > { %v2041_v33 = vpop.f32.mrf.mxu1 }
 0x2e1   : > { %v2066_v25 = vmul.f32 0.125, %v2041_v33 }
 0x2e3   : > { %v7177_v34 = vadd.f32 %v7100_v32, %v2066_v25 }
 0x2e5   : > { %2108 = vmax.xlane.f32.xlu2 %v7177_v34 }
 0x2e8   : > { %v2043_v36 = vpop.f32.mrf.mxu1 }
 0x2e9   : > { %v2067_v37 = vmul.f32 0.125, %v2043_v36 }
 0x2eb   : > { %v7181_v38 = vadd.f32 %v7100_v32, %v2067_v37 }
 0x2ed   : > { %2110 = vmax.xlane.f32.xlu0 %v7181_v38 }
 0x2f0   : > { %v2046_v62 = vpop.f32.mrf.mxu1 }
 0x2f1   : > { %v2068_v25 = vmul.f32 0.125, %v2046_v62 }
 0x2f8   : > { %v2048_v14 = vpop.f32.mrf.mxu1 }
 0x2f9   : > { %v2069_v36 = vmul.f32 0.125, %v2048_v14 }
 0x300   : > { %v2051_v24 = vpop.f32.mrf.mxu1 }
 0x301   : > { %v2070_v33 = vmul.f32 0.125, %v2051_v24 }
 0x303   : > { %v7237_v40 = vadd.f32 %v7100_v32, %v2070_v33 }
 0x308   : > { %v2089_v41 = vpop.xlane.xlu1 %2088 }
 0x309   : > { %v2120_v42 = vsub.f32 %v7124_v56, %v2089_v41 }
 0x30b   : > { %v2136_v43 = vmul.f32 1.442695, %v2120_v42 }
 0x30d   : > { %6332 = vpow2.f32 %v2136_v43  ;;  %v7241_v43 = vadd.f32 %v7100_v32, %v2068_v25 }
 0x310   : > { %v2091_v46 = vpop.xlane.xlu2 %2090  ;;  %v7195_v55 = vpop.xlane.xlu1 %1484 }
 0x311   : > { %v2121_v47 = vsub.f32 %v7128_v60, %v2091_v46  ;;  %v1453_v60 = vmul.f32 0.125, %v1423_v54 }
 0x313   : > { %v7188_v48 = vpop.eup %6332  ;;  %v2138_v49 = vmul.f32 1.442695, %v2121_v47  ;;  %v7206_v4 = vadd.f32 %v7100_v32, %v1453_v60  ;;  %v7244_v47 = vadd.f32 %v7100_v32, %v2069_v36 }
 0x314   : > { %2168 = vadd.xlane.f32.xlu0 %v7188_v48 }
 0x315   : > { %6334 = vpow2.f32 %v2138_v49 }
 0x318   : > { %v2093_v51 = vpop.xlane.xlu0 %2092 }
 0x319   : > { %v2122_v5 = vsub.f32 %v7136_v0, %v2093_v51 }
 0x31b   : > { %v7192_v52 = vpop.eup %6334  ;;  %v2140_v53 = vmul.f32 1.442695, %v2122_v5 }
 0x31c   : > { %2170 = vadd.xlane.f32.xlu2 %v7192_v52 }
 0x31d   : > { %6336 = vpow2.f32 %v2140_v53  ;;  %v7253_v53 = vadd.f32 %v7100_v32, %v1454_v50 }
 0x320   : > { %v2095_v56 = vpop.xlane.xlu2 %2094 }
 0x321   : > { %v2123_v21 = vsub.f32 %v7140_v6, %v2095_v56  ;;  %v1513_v56 = vsub.f32 %v7131_v61, %v7195_v55 }
 0x323   : > { %v7198_v57 = vpop.eup %6336  ;;  %v2142_v58 = vmul.f32 1.442695, %v2123_v21 }
 0x324   : > { %2172 = vadd.xlane.f32.xlu2 %v7198_v57 }
 0x325   : > { %6338 = vpow2.f32 %v2142_v58  ;;  %v2053_v58 = vpop.f32.mrf.mxu1 }
 0x328   : > { %v2097_v63 = vpop.xlane.xlu1 %2096  ;;  %v7202_v0 = vpop.xlane.xlu2 %1486 }
 0x329   : > { %v2124_v2 = vsub.f32 %v7148_v11, %v2097_v63  ;;  %v1514_v61 = vsub.f32 %v7151_v12, %v7202_v0  ;;  %v2071_v63 = vmul.f32 0.125, %v2053_v58 }
 0x32b   : > { %v7208_v6 = vpop.eup %6338  ;;  %v2144_v8 = vmul.f32 1.442695, %v2124_v2  ;;  %v1534_v1 = vmul.f32 1.442695, %v1514_v61 }
 0x32c   : > { %2174 = vadd.xlane.f32.xlu0 %v7208_v6  ;;  %1492 = vmax.xlane.f32.xlu2 %v7206_v4 }
 0x32d   : > { %6340 = vpow2.f32 %v2144_v8 }
 0x32e   : > { %6342 = vpow2.f32 %v1528_v3  ;;  %v7272_v3 = vadd.f32 %v7100_v32, %v2071_v63 }
 0x32f   : > { %6344 = vpow2.f32 %v1526_v10 }
 0x330   : > { %v2099_v13 = vpop.xlane.xlu2 %2098 }
 0x331   : > { %v2125_v11 = vsub.f32 %v7156_v15, %v2099_v13  ;;  %v7224_v15 = vpop.xlane.xlu0 %1488 }
 0x332   : > { %v1515_v12 = vsub.f32 %v7143_v7, %v7224_v15 }
 0x333   : > { %v7217_v17 = vpop.eup %6340  ;;  %v2146_v20 = vmul.f32 1.442695, %v2125_v11 }
 0x334   : > { %v7219_v26 = vpop.eup %6342  ;;  %2176 = vadd.xlane.f32.xlu1 %v7217_v17  ;;  %1490 = vmax.xlane.f32.xlu0 %v7215_v16  ;;  %v1536_v11 = vmul.f32 1.442695, %v1515_v12 }
 0x335   : > { %6346 = vpow2.f32 %v2146_v20  ;;  %1560 = vadd.xlane.f32.xlu2 %v7219_v26  ;;  %v7226_v27 = vpop.eup %6344 }
 0x338   : > { %v2101_v42 = vpop.xlane.xlu2 %2100 }
 0x339   : > { %v2126_v49 = vsub.f32 %v7160_v18, %v2101_v42  ;;  %v1532_v18 = vmul.f32 1.442695, %v1513_v56 }
 0x33b   : > { %v7231_v30 = vpop.eup %6346  ;;  %v2148_v51 = vmul.f32 1.442695, %v2126_v49 }
 0x33c   : > { %1558 = vadd.xlane.f32.xlu0 %v7226_v27  ;;  %1496 = vmax.xlane.f32.xlu1 %v7229_v29 }
 0x33d   : > { %2178 = vadd.xlane.f32.xlu2 %v7231_v30 }
 0x340   : > { %v2337_v37 = vpop.permute.xlu1 %2336  ;;  %v2103_v35 = vpop.xlane.xlu0 %2102 }
 0x341   : > { %v2127_v41 = vsub.f32 %v7164_v22, %v2103_v35  ;;  %2367 = vmatpush.bf16.msrb.mxu2 %v2337_v37  ;;  %v1512_v22 = vsub.f32 %v7114_v45, %v7185_v44 }
 0x343   : > { %v2150_v46 = vmul.f32 1.442695, %v2127_v41  ;;  %v1530_v5 = vmul.f32 1.442695, %v1512_v22 }
 0x344   : > { %2112 = vmax.xlane.f32.xlu0 %v7241_v43  ;;  %2116 = vmax.xlane.f32.xlu1 %v7237_v40 }
 0x345   : > { %6348 = vpow2.f32 %v2150_v46  ;;  %2114 = vmax.xlane.f32.xlu2 %v7244_v47 }
 0x346   : > { %6350 = vpow2.f32 %v2148_v51 }
 0x347   : > { %6352 = vpow2.f32 %v1530_v5 }
 0x348   : > { %v2105_v44 = vpop.xlane.xlu2 %2104  ;;  %6354 = vpow2.f32 %v1532_v18 }
 0x349   : > { %v2128_v55 = vsub.f32 %v7169_v28, %v2105_v44 }
 0x34b   : > { %v7255_v54 = vpop.eup %6348  ;;  %v2152_v2 = vmul.f32 1.442695, %v2128_v55 }
 0x34c   : > { %1494 = vmax.xlane.f32.xlu0 %v7253_v53  ;;  %v7262_v59 = vpop.eup %6350 }
 0x34d   : > { %2182 = vadd.xlane.f32.xlu2 %v7255_v54  ;;  %v7264_v62 = vpop.eup %6352 }
 0x34e   : > { %v7274_v8 = vpop.eup %6354 }
 0x350   : > { %v2107_v21 = vpop.xlane.xlu0 %2106 }
 0x351   : > { %v2129_v45 = vsub.f32 %v7173_v31, %v2107_v21  ;;  %v1431_v31 = vpop.f32.mrf.mxu3 }
 0x352   : > { %v1456_v28 = vmul.f32 0.125, %v1431_v31 }
 0x353   : > { %v2154_v60 = vmul.f32 1.442695, %v2129_v45 }
 0x354   : > { %2180 = vadd.xlane.f32.xlu0 %v7262_v59  ;;  %v7289_v23 = vadd.f32 %v7100_v32, %v1456_v28 }
 0x355   : > { %6356 = vpow2.f32 %v2154_v60  ;;  %1562 = vadd.xlane.f32.xlu2 %v7264_v62 }
 0x356   : > { %6358 = vpow2.f32 %v1534_v1 }
 0x357   : > { %6360 = vpow2.f32 %v2152_v2 }
 0x358   : > { %v2109_v14 = vpop.xlane.xlu2 %2108 }
 0x359   : > { %v1433_v39 = vpop.f32.mrf.mxu3  ;;  %v2130_v7 = vsub.f32 %v7177_v34, %v2109_v14 }
 0x35b   : > { %v7276_v9 = vpop.eup %6356  ;;  %v2156_v24 = vmul.f32 1.442695, %v2130_v7 }
 0x35c   : > { %1564 = vadd.xlane.f32.xlu0 %v7274_v8  ;;  %2186 = vadd.xlane.f32.xlu1 %v7276_v9  ;;  %v7284_v13 = vpop.eup %6358 }
 0x35d   : > { %2118 = vmax.xlane.f32.xlu2 %v7272_v3  ;;  %v7286_v19 = vpop.eup %6360 }
 0x360   : > { %v2111_v0 = vpop.xlane.xlu0 %2110 }
 0x361   : > { %v2131_v10 = vsub.f32 %v7181_v38, %v2111_v0  ;;  %v1457_v38 = vmul.f32 0.125, %v1433_v39  ;;  %v1436_v15 = vpop.f32.mrf.mxu3 }
 0x362   : > { %v1458_v34 = vmul.f32 0.125, %v1436_v15 }
 0x363   : > { %v2158_v20 = vmul.f32 1.442695, %v2131_v10  ;;  %v7296_v33 = vadd.f32 %v7100_v32, %v1457_v38 }
 0x364   : > { %2184 = vadd.xlane.f32.xlu0 %v7286_v19  ;;  %1566 = vadd.xlane.f32.xlu1 %v7284_v13  ;;  %v7308_v41 = vadd.f32 %v7100_v32, %v1458_v34 }
 0x365   : > { %6362 = vpow2.f32 %v2158_v20  ;;  %1498 = vmax.xlane.f32.xlu2 %v7289_v23 }
 0x366   : > { %6364 = vpow2.f32 %v1536_v11 }
 0x367   : > { %6366 = vpow2.f32 %v2156_v24 }
 0x369   : > { %v1438_v35 = vpop.f32.mrf.mxu3 }
 0x36a   : > { %v1459_v42 = vmul.f32 0.125, %v1438_v35 }
 0x36b   : > { %v7298_v25 = vpop.eup %6362 }
 0x36c   : > { %v7300_v36 = vpop.eup %6364  ;;  %2190 = vadd.xlane.f32.xlu1 %v7298_v25  ;;  %1500 = vmax.xlane.f32.xlu0 %v7296_v33  ;;  %v7313_v46 = vadd.f32 %v7100_v32, %v1459_v42 }
 0x36d   : > { %1568 = vadd.xlane.f32.xlu2 %v7300_v36  ;;  %v7305_v37 = vpop.eup %6366 }
 0x371   : > { %v1441_v7 = vpop.f32.mrf.mxu3 }
 0x372   : > { %v1460_v38 = vmul.f32 0.125, %v1441_v7 }
 0x374   : > { %2188 = vadd.xlane.f32.xlu0 %v7305_v37 }
 0x375   : > { %1502 = vmax.xlane.f32.xlu2 %v7308_v41 }
 0x37c   : > { %1504 = vmax.xlane.f32.xlu0 %v7313_v46 }
 0x387   : > { %v2169_v49 = vpop.xlane.xlu0 %2168 }
 0x388   : > { %6368 = vrcp.f32 %v2169_v49  ;;  %v7327_v49 = vadd.f32 %v7100_v32, %v1460_v38 }
 0x38e   : > { %v6369_v50 = vpop.eup %6368 }
 0x38f   : > { %v2171_v22 = vpop.xlane.xlu2 %2170  ;;  %v2216_v51 = vmul.f32 %v6369_v50, %v7188_v48 }
 0x390   : > { %6370 = vrcp.f32 %v2171_v22 }
 0x391   : > { %v2232_v21 = vpack.c.bf16 %v2216_v51, %v2216_v51 }
 0x393   : > { %v2264_v44 = vunpack.c.l.b16 %v2232_v21 }
 0x396   : > { %v6371_v5 = vpop.eup %6370 }
 0x397   : > { %v2173_v56 = vpop.xlane.xlu2 %2172  ;;  %v2217_v18 = vmul.f32 %v6371_v5, %v7192_v52 }
 0x398   : > { %6372 = vrcp.f32 %v2173_v56 }
 0x399   : > { %v2233_v45 = vpack.c.bf16 %v2217_v18, %v2217_v18 }
 0x39b   : > { %v2265_v58 = vunpack.c.l.b16 %v2233_v45 }
 0x39d   : > { %v2280_v60 = vpack.c.b16 %v2265_v58, %v2264_v44 }
 0x39e   : > { %v6373_v63 = vpop.eup %6372 }
 0x39f   : > { %2368 = vmatmul.bf16.vlgmr.msrb.gmra.mxu2 %v2280_v60  ;;  %v2175_v61 = vpop.xlane.xlu0 %2174  ;;  %v1493_v55 = vpop.xlane.xlu2 %1492  ;;  %v2218_v48 = vmul.f32 %v6373_v63, %v7198_v57 }
 0x3a0   : > { %6374 = vrcp.f32 %v2175_v61  ;;  %v1517_v31 = vsub.f32 %v7206_v4, %v1493_v55 }
 0x3a1   : > { %v2234_v0 = vpack.c.bf16 %v2218_v48, %v2218_v48 }
 0x3a2   : > { %v1540_v1 = vmul.f32 1.442695, %v1517_v31 }
 0x3a3   : > { %v2266_v4 = vunpack.c.l.b16 %v2234_v0 }
 0x3a4   : > { %6376 = vpow2.f32 %v1540_v1 }
 0x3a6   : > { %v6375_v2 = vpop.eup %6374 }
 0x3a7   : > { %v2177_v12 = vpop.xlane.xlu1 %2176  ;;  %v1491_v52 = vpop.xlane.xlu0 %1490  ;;  %v2219_v28 = vmul.f32 %v6375_v2, %v7208_v6 }
 0x3a8   : > { %v1516_v39 = vsub.f32 %v7215_v16, %v1491_v52  ;;  %v1561_v10 = vpop.xlane.xlu2 %1560 }
 0x3a9   : > { %v2235_v11 = vpack.c.bf16 %v2219_v28, %v2219_v28  ;;  %6378 = vrcp.f32 %v1561_v10  ;;  %v1443_v10 = vpop.f32.mrf.mxu3 }
 0x3aa   : > { %v7322_v14 = vpop.eup %6376  ;;  %v1538_v20 = vmul.f32 1.442695, %v1516_v39  ;;  %6380 = vrcp.f32 %v2177_v12 }
 0x3ab   : > { %1572 = vadd.xlane.f32.xlu2 %v7322_v14  ;;  %v2267_v57 = vunpack.c.l.b16 %v2235_v11 }
 0x3ac   : > { %6382 = vpow2.f32 %v1538_v20 }
 0x3ad   : > { %v2281_v15 = vpack.c.b16 %v2267_v57, %v2266_v4  ;;  %v1461_v57 = vmul.f32 0.125, %v1443_v10 }
 0x3af   : > { %2373 = vmatmul.bf16.gmra.mxu2 %v2281_v15  ;;  %v1559_v6 = vpop.xlane.xlu0 %1558  ;;  %v1497_v24 = vpop.xlane.xlu1 %1496 }
 0x3b0   : > { %v6379_v34 = vpop.eup %6378  ;;  %6384 = vrcp.f32 %v1559_v6  ;;  %v2179_v16 = vpop.xlane.xlu2 %2178  ;;  %v1519_v35 = vsub.f32 %v7229_v29, %v1497_v24  ;;  %v7351_v6 = vadd.f32 %v7100_v32, %v1461_v57 }
 0x3b1   : > { %v6381_v42 = vpop.eup %6380  ;;  %6386 = vrcp.f32 %v2179_v16  ;;  %v1607_v51 = vmul.f32 %v6379_v34, %v7219_v26 }
 0x3b2   : > { %v7329_v22 = vpop.eup %6382  ;;  %v1544_v50 = vmul.f32 1.442695, %v1519_v35  ;;  %v2220_v5 = vmul.f32 %v6381_v42, %v7217_v17 }
 0x3b3   : > { %1570 = vadd.xlane.f32.xlu1 %v7329_v22  ;;  %1506 = vmax.xlane.f32.xlu2 %v7327_v49  ;;  %v1623_v45 = vpack.c.bf16 %v1607_v51, %v1607_v51 }
 0x3b4   : > { %6388 = vpow2.f32 %v1544_v50  ;;  %v2236_v61 = vpack.c.bf16 %v2220_v5, %v2220_v5 }
 0x3b5   : > { %v1655_v2 = vunpack.c.l.b16 %v1623_v45 }
 0x3b6   : > { %v6385_v56 = vpop.eup %6384 }
 0x3b7   : > { %v6387_v18 = vpop.eup %6386  ;;  %v2113_v29 = vpop.xlane.xlu0 %2112  ;;  %v1606_v21 = vmul.f32 %v6385_v56, %v7226_v27  ;;  %v2268_v27 = vunpack.c.l.b16 %v2236_v61 }
 0x3b8   : > { %v2132_v44 = vsub.f32 %v7241_v43, %v2113_v29  ;;  %v2115_v58 = vpop.xlane.xlu2 %2114  ;;  %v2221_v60 = vmul.f32 %v6387_v18, %v7231_v30  ;;  %v2117_v0 = vpop.xlane.xlu1 %2116 }
 0x3b9   : > { %v2133_v55 = vsub.f32 %v7244_v47, %v2115_v58  ;;  %v1622_v63 = vpack.c.bf16 %v1606_v21, %v1606_v21  ;;  %v2134_v4 = vsub.f32 %v7237_v40, %v2117_v0 }
 0x3ba   : > { %v7339_v31 = vpop.eup %6388  ;;  %v2160_v26 = vmul.f32 1.442695, %v2132_v44  ;;  %v2237_v1 = vpack.c.bf16 %v2221_v60, %v2221_v60 }
 0x3bb   : > { %v2162_v17 = vmul.f32 1.442695, %v2133_v55  ;;  %1576 = vadd.xlane.f32.xlu2 %v7339_v31  ;;  %v1654_v48 = vunpack.c.l.b16 %v1622_v63  ;;  %v2164_v15 = vmul.f32 1.442695, %v2134_v4 }
 0x3bc   : > { %6390 = vpow2.f32 %v2160_v26  ;;  %v2269_v12 = vunpack.c.l.b16 %v2237_v1 }
 0x3bd   : > { %6392 = vpow2.f32 %v2162_v17  ;;  %v1670_v43 = vpack.c.b16 %v1655_v2, %v1654_v48 }
 0x3be   : > { %v2282_v52 = vpack.c.b16 %v2269_v12, %v2268_v27 }
 0x3bf   : > { %1742 = vmatmul.bf16.vlgmr.msrb.gmra.mxu0 %v1670_v43  ;;  %v1495_v30 = vpop.xlane.xlu0 %1494 }
 0x3c0   : > { %2378 = vmatmul.bf16.gmra.mxu2 %v2282_v52  ;;  %v2183_v47 = vpop.xlane.xlu2 %2182  ;;  %v1518_v28 = vsub.f32 %v7253_v53, %v1495_v30 }
 0x3c1   : > { %6394 = vrcp.f32 %v2183_v47 }
 0x3c2   : > { %v7343_v39 = vpop.eup %6390  ;;  %v1542_v11 = vmul.f32 1.442695, %v1518_v28 }
 0x3c3   : > { %v7345_v20 = vpop.eup %6392  ;;  %2192 = vadd.xlane.f32.xlu0 %v7343_v39 }
 0x3c4   : > { %6396 = vpow2.f32 %v1542_v11  ;;  %2194 = vadd.xlane.f32.xlu1 %v7345_v20 }
 0x3c7   : > { %v2181_v7 = vpop.xlane.xlu0 %2180  ;;  %v6395_v38 = vpop.eup %6394 }
 0x3c8   : > { %v1563_v53 = vpop.xlane.xlu2 %1562  ;;  %6398 = vrcp.f32 %v2181_v7  ;;  %v2223_v34 = vmul.f32 %v6395_v38, %v7255_v54 }
 0x3c9   : > { %6400 = vrcp.f32 %v1563_v53 }
 0x3ca   : > { %v7353_v24 = vpop.eup %6396  ;;  %6402 = vpow2.f32 %v2164_v15  ;;  %v2239_v51 = vpack.c.bf16 %v2223_v34, %v2223_v34 }
 0x3cb   : > { %1508 = vmax.xlane.f32.xlu0 %v7351_v6 }
 0x3cc   : > { %1574 = vadd.xlane.f32.xlu1 %v7353_v24  ;;  %v2271_v45 = vunpack.c.l.b16 %v2239_v51 }
 0x3ce   : > { %v6399_v40 = vpop.eup %6398 }
 0x3cf   : > { %v6401_v16 = vpop.eup %6400  ;;  %v1565_v35 = vpop.xlane.xlu0 %1564  ;;  %v2222_v50 = vmul.f32 %v6399_v40, %v7262_v59 }
 0x3d0   : > { %v2187_v42 = vpop.xlane.xlu1 %2186  ;;  %v2119_v5 = vpop.xlane.xlu2 %2118  ;;  %6404 = vrcp.f32 %v1565_v35  ;;  %v1608_v54 = vmul.f32 %v6401_v16, %v7264_v62 }
 0x3d1   : > { %v2135_v32 = vsub.f32 %v7272_v3, %v2119_v5  ;;  %v2238_v56 = vpack.c.bf16 %v2222_v50, %v2222_v50  ;;  %v7360_v18 = vpop.eup %6402  ;;  %6406 = vrcp.f32 %v2187_v42 }
 0x3d2   : > { %v1624_v59 = vpack.c.bf16 %v1608_v54, %v1608_v54 }
 0x3d3   : > { %v2166_v29 = vmul.f32 1.442695, %v2135_v32  ;;  %2196 = vadd.xlane.f32.xlu0 %v7360_v18  ;;  %v2270_v21 = vunpack.c.l.b16 %v2238_v56 }
 0x3d4   : > { %v1656_v1 = vunpack.c.l.b16 %v1624_v59 }
 0x3d5   : > { %6408 = vpow2.f32 %v2166_v29  ;;  %v2283_v44 = vpack.c.b16 %v2271_v45, %v2270_v21 }
 0x3d6   : > { %v6405_v58 = vpop.eup %6404 }
 0x3d7   : > { %2383 = vmatmul.bf16.gmra.mxu2 %v2283_v44  ;;  %v2185_v60 = vpop.xlane.xlu0 %2184  ;;  %v1609_v3 = vmul.f32 %v6405_v58, %v7274_v8  ;;  %v6407_v55 = vpop.eup %6406 }
 0x3d8   : > { %v1567_v61 = vpop.xlane.xlu1 %1566  ;;  %6410 = vrcp.f32 %v2185_v60  ;;  %v1499_v63 = vpop.xlane.xlu2 %1498  ;;  %v2225_v27 = vmul.f32 %v6407_v55, %v7276_v9 }
 0x3d9   : > { %v1520_v26 = vsub.f32 %v7289_v23, %v1499_v63  ;;  %v1625_v62 = vpack.c.bf16 %v1609_v3, %v1609_v3  ;;  %6412 = vrcp.f32 %v1567_v61 }
 0x3da   : > { %v2241_v23 = vpack.c.bf16 %v2225_v27, %v2225_v27 }
 0x3db   : > { %v7366_v17 = vpop.eup %6408  ;;  %v1546_v48 = vmul.f32 1.442695, %v1520_v26  ;;  %v1657_v2 = vunpack.c.l.b16 %v1625_v62 }
 0x3dc   : > { %2198 = vadd.xlane.f32.xlu1 %v7366_v17  ;;  %v2273_v57 = vunpack.c.l.b16 %v2241_v23 }
 0x3dd   : > { %6414 = vpow2.f32 %v1546_v48  ;;  %v1671_v12 = vpack.c.b16 %v1657_v2, %v1656_v1 }
 0x3de   : > { %v6411_v43 = vpop.eup %6410 }
 0x3df   : > { %1747 = vmatmul.bf16.gmra.mxu0 %v1671_v12  ;;  %v1501_v52 = vpop.xlane.xlu0 %1500  ;;  %v2224_v30 = vmul.f32 %v6411_v43, %v7286_v19  ;;  %v6413_v0 = vpop.eup %6412 }
 0x3e0   : > { %v2191_v8 = vpop.xlane.xlu1 %2190  ;;  %v1569_v47 = vpop.xlane.xlu2 %1568  ;;  %v1521_v28 = vsub.f32 %v7296_v33, %v1501_v52  ;;  %v1610_v7 = vmul.f32 %v6413_v0, %v7284_v13 }
 0x3e1   : > { %6416 = vrcp.f32 %v1569_v47  ;;  %v2240_v10 = vpack.c.bf16 %v2224_v30, %v2224_v30  ;;  %v6013_v30 = vld [vmem:[%s6830_s22 + $0x38] sm:$0xff] }
 0x3e2   : > { %6418 = vrcp.f32 %v2191_v8  ;;  %v1548_v11 = vmul.f32 1.442695, %v1521_v28  ;;  %v1626_v40 = vpack.c.bf16 %v1610_v7, %v1610_v7  ;;  %2621 = vmatpush.bf16.msrb.mxu3 %v6013_v30 }
 0x3e3   : > { %v7372_v9 = vpop.eup %6414  ;;  %v2272_v4 = vunpack.c.l.b16 %v2240_v10 }
 0x3e4   : > { %6420 = vpow2.f32 %v1548_v11  ;;  %1578 = vadd.xlane.f32.xlu2 %v7372_v9  ;;  %v1658_v51 = vunpack.c.l.b16 %v1626_v40 }
 0x3e5   : > { %v2284_v38 = vpack.c.b16 %v2273_v57, %v2272_v4 }
 0x3e7   : > { %v6417_v19 = vpop.eup %6416  ;;  %2388 = vmatmul.bf16.gmra.mxu2 %v2284_v38  ;;  %v2189_v15 = vpop.xlane.xlu0 %2188 }
 0x3e8   : > { %v6419_v53 = vpop.eup %6418  ;;  %6422 = vrcp.f32 %v2189_v15  ;;  %v1503_v33 = vpop.xlane.xlu2 %1502  ;;  %v1611_v34 = vmul.f32 %v6417_v19, %v7300_v36 }
 0x3e9   : > { %v1522_v16 = vsub.f32 %v7308_v41, %v1503_v33  ;;  %v2227_v13 = vmul.f32 %v6419_v53, %v7298_v25 }
 0x3ea   : > { %v7378_v35 = vpop.eup %6420  ;;  %v1627_v42 = vpack.c.bf16 %v1611_v34, %v1611_v34 }
 0x3eb   : > { %v1550_v50 = vmul.f32 1.442695, %v1522_v16  ;;  %1580 = vadd.xlane.f32.xlu0 %v7378_v35  ;;  %v2243_v36 = vpack.c.bf16 %v2227_v13, %v2227_v13 }
 0x3ec   : > { %v1659_v5 = vunpack.c.l.b16 %v1627_v42  ;;  %v6012_v42 = vld [vmem:[%s6830_s22 + $0x30] sm:$0xff] }
 0x3ed   : > { %6424 = vpow2.f32 %v1550_v50  ;;  %v2275_v59 = vunpack.c.l.b16 %v2243_v36  ;;  %2622 = vmatpush.bf16.msrb.mxu3 %v6012_v42 }
 0x3ee   : > { %v6423_v32 = vpop.eup %6422  ;;  %v1672_v56 = vpack.c.b16 %v1659_v5, %v1658_v51 }
 0x3ef   : > { %v1505_v54 = vpop.xlane.xlu0 %1504  ;;  %v2226_v29 = vmul.f32 %v6423_v32, %v7305_v37 }
 0x3f0   : > { %1752 = vmatmul.bf16.gmra.mxu0 %v1672_v56  ;;  %v1523_v41 = vsub.f32 %v7313_v46, %v1505_v54 }
 0x3f1   : > { %v2242_v21 = vpack.c.bf16 %v2226_v29, %v2226_v29 }
 0x3f2   : > { %v1552_v45 = vmul.f32 1.442695, %v1523_v41 }
 0x3f3   : > { %v7384_v44 = vpop.eup %6424  ;;  %v2274_v58 = vunpack.c.l.b16 %v2242_v21 }
 0x3f4   : > { %6426 = vpow2.f32 %v1552_v45  ;;  %1582 = vadd.xlane.f32.xlu1 %v7384_v44 }
 0x3f5   : > { %v2285_v25 = vpack.c.b16 %v2275_v59, %v2274_v58 }
 0x3f7   : > { %2393 = vmatmul.bf16.gmra.mxu2 %v2285_v25 }
 0x3fa   : > { %v7387_v60 = vpop.eup %6426 }
 0x3fb   : > { %1584 = vadd.xlane.f32.xlu2 %v7387_v60 }
 0x41e   : > { %v1573_v37 = vpop.xlane.xlu2 %1572 }
 0x41f   : > { %6428 = vrcp.f32 %v1573_v37 }
 0x422   : > { %v2369_v61 = vpop.f32.mrf.mxu2 }
 0x423   : > { %v2409_v26 = vpack.c.bf16 %v2369_v61, %v2369_v61 }
 0x425   : > { %v6429_v55 = vpop.eup %6428  ;;  %v2481_v12 = vunpack.c.l.b16 %v2409_v26 }
 0x426   : > { %v1571_v3 = vpop.xlane.xlu1 %1570  ;;  %v1507_v46 = vpop.xlane.xlu2 %1506  ;;  %v1613_v48 = vmul.f32 %v6429_v55, %v7322_v14  ;;  %v6011_v55 = vld [vmem:[%s6830_s22 + $0x28] sm:$0xff] }
 0x427   : > { %6430 = vrcp.f32 %v1571_v3  ;;  %v1524_v63 = vsub.f32 %v7327_v49, %v1507_v46  ;;  %2623 = vmatpush.bf16.msrb.mxu3 %v6011_v55 }
 0x428   : > { %v1629_v52 = vpack.c.bf16 %v1613_v48, %v1613_v48 }
 0x429   : > { %v1554_v62 = vmul.f32 1.442695, %v1524_v63 }
 0x42a   : > { %v2371_v1 = vpop.f32.mrf.mxu2  ;;  %v1661_v0 = vunpack.c.l.b16 %v1629_v52 }
 0x42b   : > { %6432 = vpow2.f32 %v1554_v62  ;;  %v2410_v2 = vpack.c.bf16 %v2371_v1, %v2371_v1 }
 0x42d   : > { %v6431_v27 = vpop.eup %6430  ;;  %v2482_v43 = vunpack.c.l.b16 %v2410_v2 }
 0x42e   : > { %v1612_v8 = vmul.f32 %v6431_v27, %v7329_v22  ;;  %v1577_v4 = vpop.xlane.xlu2 %1576 }
 0x42f   : > { %v2497_v23 = vpack.c.b16 %v2482_v43, %v2481_v12  ;;  %v6010_v43 = vld [vmem:[%s6830_s22 + $0x20] sm:$0xff] }
 0x430   : > { %v1628_v47 = vpack.c.bf16 %v1612_v8, %v1612_v8  ;;  %2624 = vmatpush.bf16.msrb.mxu3 %v6010_v43 }
 0x431   : > { %v7394_v28 = vpop.eup %6432  ;;  %2505 = vrot.lane.b32.xlu2 %v2497_v23, %s6699_s8 }
 0x432   : > { %v2374_v49 = vpop.f32.mrf.mxu2  ;;  %1586 = vadd.xlane.f32.xlu0 %v7394_v28  ;;  %v1660_v14 = vunpack.c.l.b16 %v1628_v47 }
 0x433   : > { %v2411_v15 = vpack.c.bf16 %v2374_v49, %v2374_v49 }
 0x434   : > { %v1673_v10 = vpack.c.b16 %v1661_v0, %v1660_v14 }
 0x435   : > { %v2483_v56 = vunpack.c.l.b16 %v2411_v15 }
 0x436   : > { %1757 = vmatmul.bf16.gmra.mxu0 %v1673_v10  ;;  %v2193_v11 = vpop.xlane.xlu0 %2192 }
 0x437   : > { %v2195_v22 = vpop.xlane.xlu1 %2194  ;;  %6434 = vrcp.f32 %v2193_v11 }
 0x438   : > { %6436 = vrcp.f32 %v2195_v22  ;;  %v6008_v22 = vld [vmem:[%s6830_s22 + $0x10] sm:$0xff] }
 0x439   : > { %6438 = vrcp.f32 %v1577_v4 }
 0x43a   : > { %v2376_v57 = vpop.f32.mrf.mxu2 }
 0x43b   : > { %v2412_v7 = vpack.c.bf16 %v2376_v57, %v2376_v57 }
 0x43d   : > { %v6435_v38 = vpop.eup %6434  ;;  %v2484_v13 = vunpack.c.l.b16 %v2412_v7 }
 0x43e   : > { %v6437_v19 = vpop.eup %6436  ;;  %v1509_v53 = vpop.xlane.xlu0 %1508  ;;  %v2228_v33 = vmul.f32 %v6435_v38, %v7343_v39 }
 0x43f   : > { %v1575_v34 = vpop.xlane.xlu1 %1574  ;;  %v1525_v40 = vsub.f32 %v7351_v6, %v1509_v53  ;;  %v2229_v16 = vmul.f32 %v6437_v19, %v7345_v20  ;;  %v6439_v50 = vpop.eup %6438  ;;  %v2498_v39 = vpack.c.b16 %v2484_v13, %v2483_v56 }
 0x440   : > { %6440 = vrcp.f32 %v1575_v34  ;;  %v2244_v51 = vpack.c.bf16 %v2228_v33, %v2228_v33  ;;  %v1615_v36 = vmul.f32 %v6439_v50, %v7339_v31  ;;  %v6007_v33 = vld [vmem:[%s6830_s22 + $0x8] sm:$0xff] }
 0x441   : > { %v1556_v5 = vmul.f32 1.442695, %v1525_v40  ;;  %v2245_v32 = vpack.c.bf16 %v2229_v16, %v2229_v16 }
 0x442   : > { %v2276_v54 = vunpack.c.l.b16 %v2244_v51  ;;  %v1631_v45 = vpack.c.bf16 %v1615_v36, %v1615_v36 }
 0x443   : > { %6442 = vpow2.f32 %v1556_v5  ;;  %v2277_v29 = vunpack.c.l.b16 %v2245_v32  ;;  %v2379_v58 = vpop.f32.mrf.mxu2 }
 0x444   : > { %v1663_v31 = vunpack.c.l.b16 %v1631_v45  ;;  %v2413_v8 = vpack.c.bf16 %v2379_v58, %v2379_v58 }
 0x445   : > { %v2286_v41 = vpack.c.b16 %v2277_v29, %v2276_v54 }
 0x446   : > { %v6441_v21 = vpop.eup %6440  ;;  %2507 = vrot.lane.b32.xlu0 %v2498_v39, %s6699_s8  ;;  %v2197_v20 = vpop.xlane.xlu0 %2196  ;;  %v2485_v0 = vunpack.c.l.b16 %v2413_v8 }
 0x447   : > { %2398 = vmatmul.bf16.gmra.mxu2 %v2286_v41  ;;  %v1614_v6 = vmul.f32 %v6441_v21, %v7353_v24  ;;  %6444 = vrcp.f32 %v2197_v20  ;;  %v1743_v39 = vpop.f32.mrf.mxu0 }
 0x449   : > { %v7405_v59 = vpop.eup %6442  ;;  %v1630_v25 = vpack.c.bf16 %v1614_v6, %v1614_v6 }
 0x44a   : > { %1588 = vadd.xlane.f32.xlu1 %v7405_v59 }
 0x44b   : > { %v1662_v37 = vunpack.c.l.b16 %v1630_v25  ;;  %v2381_v63 = vpop.f32.mrf.mxu2 }
 0x44c   : > { %v2414_v2 = vpack.c.bf16 %v2381_v63, %v2381_v63 }
 0x44d   : > { %v1674_v61 = vpack.c.b16 %v1663_v31, %v1662_v37  ;;  %v6445_v46 = vpop.eup %6444 }
 0x44e   : > { %v2230_v24 = vmul.f32 %v6445_v46, %v7360_v18  ;;  %v2486_v23 = vunpack.c.l.b16 %v2414_v2  ;;  %v6009_v18 = vld [vmem:[%s6830_s22 + $0x18] sm:$0xff] }
 0x44f   : > { %v2199_v3 = vpop.xlane.xlu1 %2198  ;;  %1762 = vmatmul.bf16.gmra.mxu0 %v1674_v61  ;;  %2625 = vmatpush.bf16.msrb.mxu3 %v6009_v18 }
 0x450   : > { %6446 = vrcp.f32 %v2199_v3  ;;  %v2246_v48 = vpack.c.bf16 %v2230_v24, %v2230_v24  ;;  %v2499_v10 = vpack.c.b16 %v2486_v23, %v2485_v0  ;;  %v1745_v3 = vpop.f32.mrf.mxu0  ;;  %v1783_v24 = vpack.c.bf16 %v1743_v39, %v1743_v39 }
 0x452   : > { %v2278_v52 = vunpack.c.l.b16 %v2246_v48  ;;  %v2441_v48 = vunpack.c.l.b16 %v1783_v24 }
 0x453   : > { %2626 = vmatpush.bf16.msrb.mxu3 %v6008_v22 }
 0x456   : > { %v6447_v26 = vpop.eup %6446 }
 0x457   : > { %v1579_v62 = vpop.xlane.xlu2 %1578  ;;  %v2231_v1 = vmul.f32 %v6447_v26, %v7366_v17  ;;  %2627 = vmatpush.bf16.msrb.mxu3 %v6007_v33 }
 0x458   : > { %6448 = vrcp.f32 %v1579_v62 }
 0x459   : > { %v2247_v27 = vpack.c.bf16 %v2231_v1, %v2231_v1 }
 0x45a   : > { %v2384_v12 = vpop.f32.mrf.mxu2 }
 0x45b   : > { %v2279_v30 = vunpack.c.l.b16 %v2247_v27  ;;  %v2415_v17 = vpack.c.bf16 %v2384_v12, %v2384_v12 }
 0x45c   : > { %v1748_v43 = vpop.f32.mrf.mxu0 }
 0x45d   : > { %v2287_v47 = vpack.c.b16 %v2279_v30, %v2278_v52  ;;  %v2487_v38 = vunpack.c.l.b16 %v2415_v17  ;;  %v1785_v23 = vpack.c.bf16 %v1748_v43, %v1748_v43 }
 0x45e   : > { %v1581_v49 = vpop.xlane.xlu0 %1580  ;;  %v6449_v14 = vpop.eup %6448 }
 0x45f   : > { %2403 = vmatmul.bf16.gmra.mxu2 %v2287_v47  ;;  %6450 = vrcp.f32 %v1581_v49  ;;  %v1616_v4 = vmul.f32 %v6449_v14, %v7372_v9  ;;  %v6006_v9 = vld [vmem:[%s6830_s22] sm:$0xff]  ;;  %v2443_v49 = vunpack.c.l.b16 %v1785_v23 }
 0x460   : > { %2628 = vmatpush.bf16.msrb.mxu3 %v6006_v9 }
 0x461   : > { %v1632_v53 = vpack.c.bf16 %v1616_v4, %v1616_v4 }
 0x462   : > { %v2386_v11 = vpop.f32.mrf.mxu2 }
 0x463   : > { %v2416_v57 = vpack.c.bf16 %v2386_v11, %v2386_v11  ;;  %2509 = vrot.lane.b32.xlu1 %v2499_v10, %s6699_s8  ;;  %v1664_v50 = vunpack.c.l.b16 %v1632_v53 }
 0x464   : > { %v1750_v8 = vpop.f32.mrf.mxu0 }
 0x465   : > { %v6451_v7 = vpop.eup %6450  ;;  %v2488_v19 = vunpack.c.l.b16 %v2416_v57  ;;  %v1786_v52 = vpack.c.bf16 %v1750_v8, %v1750_v8 }
 0x466   : > { %v1617_v15 = vmul.f32 %v6451_v7, %v7378_v35 }
 0x467   : > { %v1583_v34 = vpop.xlane.xlu1 %1582  ;;  %v2500_v40 = vpack.c.b16 %v2488_v19, %v2487_v38  ;;  %v2444_v47 = vunpack.c.l.b16 %v1786_v52 }
 0x468   : > { %v1633_v16 = vpack.c.bf16 %v1617_v15, %v1617_v15  ;;  %6452 = vrcp.f32 %v1583_v34 }
 0x469   : > { %2511 = vrot.lane.b32.xlu0 %v2500_v40, %s6699_s8  ;;  %v2458_v18 = vpack.c.b16 %v2444_v47, %v2443_v49  ;;  %v6167_v49 = vld [vmem:[%s6892_s9] sm:$0xff]  }
 0x46a   : > { %v2389_v42 = vpop.f32.mrf.mxu2  ;;  %v1665_v13 = vunpack.c.l.b16 %v1633_v16 }
 0x46b   : > { %v2417_v35 = vpack.c.bf16 %v2389_v42, %v2389_v42 }
 0x46c   : > { %v1675_v51 = vpack.c.b16 %v1665_v13, %v1664_v50 }
 0x46d   : > { %v2489_v41 = vunpack.c.l.b16 %v2417_v35  ;;  %v1753_v0 = vpop.f32.mrf.mxu0 }
 0x46e   : > { %v1585_v5 = vpop.xlane.xlu2 %1584  ;;  %1767 = vmatmul.bf16.gmra.mxu0 %v1675_v51  ;;  %v6453_v32 = vpop.eup %6452  ;;  %v1787_v9 = vpack.c.bf16 %v1753_v0, %v1753_v0 }
 0x46f   : > { %6454 = vrcp.f32 %v1585_v5  ;;  %v1618_v54 = vmul.f32 %v6453_v32, %v7384_v44  ;;  %v1784_v44 = vpack.c.bf16 %v1745_v3, %v1745_v3 }
 0x470   : > { %v2445_v13 = vunpack.c.l.b16 %v1787_v9  ;;  %v6259_v9 = vld [vmem:[%s6892_s9 + $0x8] sm:$0xff]  }
 0x471   : > { %v1634_v6 = vpack.c.bf16 %v1618_v54, %v1618_v54  ;;  %v2442_v1 = vunpack.c.l.b16 %v1784_v44 }
 0x472   : > { %v2391_v56 = vpop.f32.mrf.mxu2 }
 0x473   : > { %v2418_v29 = vpack.c.bf16 %v2391_v56, %v2391_v56  ;;  %v1666_v37 = vunpack.c.l.b16 %v1634_v6  ;;  %v2457_v2 = vpack.c.b16 %v2442_v1, %v2441_v48 }
 0x475   : > { %v6455_v36 = vpop.eup %6454  ;;  %v2490_v21 = vunpack.c.l.b16 %v2418_v29  ;;  %v1755_v22 = vpop.f32.mrf.mxu0 }
 0x476   : > { %v1619_v20 = vmul.f32 %v6455_v36, %v7387_v60  ;;  %v1788_v16 = vpack.c.bf16 %v1755_v22, %v1755_v22 }
 0x477   : > { %v2501_v45 = vpack.c.b16 %v2490_v21, %v2489_v41 }
 0x478   : > { %v1635_v58 = vpack.c.bf16 %v1619_v20, %v1619_v20  ;;  %v2446_v42 = vunpack.c.l.b16 %v1788_v16 }
 0x479   : > { %2513 = vrot.lane.b32.xlu2 %v2501_v45, %s6699_s8 }
 0x47a   : > { %v2394_v25 = vpop.f32.mrf.mxu2  ;;  %v1667_v31 = vunpack.c.l.b16 %v1635_v58 }
 0x47b   : > { %v2419_v46 = vpack.c.bf16 %v2394_v25, %v2394_v25 }
 0x47c   : > { %v1676_v61 = vpack.c.b16 %v1667_v31, %v1666_v37 }
 0x47d   : > { %v2491_v26 = vunpack.c.l.b16 %v2419_v46 }
 0x47e   : > { %1772 = vmatmul.bf16.gmra.mxu0 %v1676_v61 }
 0x482   : > { %v2396_v55 = vpop.f32.mrf.mxu2 }
 0x483   : > { %v2420_v63 = vpack.c.bf16 %v2396_v55, %v2396_v55 }
 0x485   : > { %v2492_v62 = vunpack.c.l.b16 %v2420_v63 }
 0x487   : > { %v2502_v60 = vpack.c.b16 %v2492_v62, %v2491_v26 }
 0x489   : > { %2515 = vrot.lane.b32.xlu0 %v2502_v60, %s6699_s8 }
 0x48b   : > { %v2506_v27 = vpop.permute.xlu2 %2505 }
 0x48c   : > { %v2523_v12 = vsel %vm1348_vm0, %v2457_v2, %v2506_v27 }
 0x48d   : > { %2629 = vmatmul.bf16.vlgmr.msrb.gmra.mxu3 %v2523_v12 }
 0x4a5   : > { %v1587_v30 = vpop.xlane.xlu0 %1586 }
 0x4a6   : > { %6456 = vrcp.f32 %v1587_v30 }
 0x4ac   : > { %v6457_v11 = vpop.eup %6456 }
 0x4ad   : > { %v1620_v4 = vmul.f32 %v6457_v11, %v7394_v28  ;;  %v2459_v28 = vpack.c.b16 %v2446_v42, %v2445_v13  ;;  %v6169_v11 = vunpack.c.h.bf16 %v6167_v49  ;;  %v6172_v42 = vunpack.c.l.bf16 %v6259_v9 }
 0x4af   : > { %v1636_v38 = vpack.c.bf16 %v1620_v4, %v1620_v4 }
 0x4b1   : > { %v1668_v15 = vunpack.c.l.b16 %v1636_v38 }
 0x4b3   : > { %v1758_v34 = vpop.f32.mrf.mxu0 }
 0x4b4   : > { %v1789_v41 = vpack.c.bf16 %v1758_v34, %v1758_v34 }
 0x4b6   : > { %v2447_v20 = vunpack.c.l.b16 %v1789_v41 }
 0x4b8   : > { %v2508_v14 = vpop.permute.xlu0 %2507 }
 0x4b9   : > { %v2527_v17 = vsel %vm1348_vm0, %v2458_v18, %v2508_v14  ;;  %v7440_v18 = vld [vmem:[%s9425_s20] ss:$0 sm:$0xff]  ;;  %v6168_v14 = vunpack.c.l.bf16 %v6167_v49 }
 0x4ba   : > { %2634 = vmatmul.bf16.gmra.mxu3 %v2527_v17 }
 0x4bb   : > { %v1760_v32 = vpop.f32.mrf.mxu0 }
 0x4bc   : > { %v1790_v36 = vpack.c.bf16 %v1760_v32, %v1760_v32 }
 0x4bd   : > { %v1589_v10 = vpop.xlane.xlu1 %1588 }
 0x4be   : > { %6458 = vrcp.f32 %v1589_v10  ;;  %v2448_v21 = vunpack.c.l.b16 %v1790_v36 }
 0x4c0   : > { %v2460_v58 = vpack.c.b16 %v2448_v21, %v2447_v20 }
 0x4c4   : > { %v6459_v57 = vpop.eup %6458 }
 0x4c5   : > { %v1621_v7 = vmul.f32 %v6459_v57, %v7405_v59 }
 0x4c7   : > { %v1637_v19 = vpack.c.bf16 %v1621_v7, %v1621_v7 }
 0x4c9   : > { %v1669_v53 = vunpack.c.l.b16 %v1637_v19 }
 0x4ca   : > { %v2399_v33 = vpop.f32.mrf.mxu2 }
 0x4cb   : > { %v1677_v40 = vpack.c.b16 %v1669_v53, %v1668_v15  ;;  %v2421_v50 = vpack.c.bf16 %v2399_v33, %v2399_v33 }
 0x4cc   : > { %v1763_v39 = vpop.f32.mrf.mxu0 }
 0x4cd   : > { %1777 = vmatmul.bf16.gmra.mxu0 %v1677_v40  ;;  %v2493_v35 = vunpack.c.l.b16 %v2421_v50  ;;  %v1791_v44 = vpack.c.bf16 %v1763_v39, %v1763_v39 }
 0x4cf   : > { %v2449_v1 = vunpack.c.l.b16 %v1791_v44  ;;  %v6261_v44 = vld [vmem:[%s6892_s9 + $0x18] sm:$0xff]  }
 0x4d2   : > { %v2401_v51 = vpop.f32.mrf.mxu2 }
 0x4d3   : > { %v2422_v5 = vpack.c.bf16 %v2401_v51, %v2401_v51  ;;  %v2514_v48 = vpop.permute.xlu2 %2513 }
 0x4d4   : > { %v1765_v37 = vpop.f32.mrf.mxu0 }
 0x4d5   : > { %v2494_v56 = vunpack.c.l.b16 %v2422_v5  ;;  %v2510_v59 = vpop.permute.xlu1 %2509  ;;  %v1792_v61 = vpack.c.bf16 %v1765_v37, %v1765_v37  ;;  %v6173_v5 = vunpack.c.h.bf16 %v6259_v9 }
 0x4d6   : > { %v2531_v54 = vsel %vm1348_vm0, %v2459_v28, %v2510_v59  ;;  %v6260_v59 = vld [vmem:[%s6892_s9 + $0x10] sm:$0xff]  }
 0x4d7   : > { %v2503_v29 = vpack.c.b16 %v2494_v56, %v2493_v35  ;;  %2639 = vmatmul.bf16.gmra.mxu3 %v2531_v54  ;;  %v2450_v24 = vunpack.c.l.b16 %v1792_v61 }
 0x4d9   : > { %2517 = vrot.lane.b32.xlu2 %v2503_v29, %s6699_s8  ;;  %v2461_v60 = vpack.c.b16 %v2450_v24, %v2449_v1  ;;  %v6176_v29 = vunpack.c.l.bf16 %v6260_v59 }
 0x4db   : > { %v2512_v45 = vpop.permute.xlu0 %2511  ;;  %v2539_v2 = vsel %vm1348_vm0, %v2461_v60, %v2514_v48 }
 0x4dc   : > { %v2535_v25 = vsel %vm1348_vm0, %v2460_v58, %v2512_v45  ;;  %v6177_v58 = vunpack.c.h.bf16 %v6260_v59 }
 0x4e2   : > { %v2404_v6 = vpop.f32.mrf.mxu2 }
 0x4e3   : > { %v2423_v31 = vpack.c.bf16 %v2404_v6, %v2404_v6 }
 0x4e5   : > { %v2495_v55 = vunpack.c.l.b16 %v2423_v31 }
 0x4e7   : > { %2644 = vmatmul.bf16.gmra.mxu3 %v2535_v25 }
 0x4ea   : > { %v2406_v3 = vpop.f32.mrf.mxu2 }
 0x4eb   : > { %v2424_v46 = vpack.c.bf16 %v2406_v3, %v2406_v3  ;;  %v1768_v62 = vpop.f32.mrf.mxu0 }
 0x4ec   : > { %v1793_v43 = vpack.c.bf16 %v1768_v62, %v1768_v62  ;;  %v6700_v62 = vmov 128.0  }
 0x4ed   : > { %v2496_v63 = vunpack.c.l.b16 %v2424_v46  ;;  %6460 = vrcp.f32 %v6700_v62 }
 0x4ee   : > { %v2451_v52 = vunpack.c.l.b16 %v1793_v43 }
 0x4ef   : > { %v2504_v26 = vpack.c.b16 %v2496_v63, %v2495_v55  ;;  %v6180_v55 = vunpack.c.l.bf16 %v6261_v44 }
 0x4f1   : > { %2519 = vrot.lane.b32.xlu1 %v2504_v26, %s6699_s8 }
 0x4f3   : > { %v1770_v27 = vpop.f32.mrf.mxu0  ;;  %v6461_v1 = vpop.eup %6460 }
 0x4f4   : > { %v1794_v12 = vpack.c.bf16 %v1770_v27, %v1770_v27  ;;  %v2721_v60 = vmul.f32 128.0, %v6461_v1  ;;  %vm2725_vm1 = vweird.f32 %v6461_v1 }
 0x4f6   : > { %v2452_v8 = vunpack.c.l.b16 %v1794_v12  ;;  %v2722_v48 = vsub.f32 1.0, %v2721_v60  ;;  %v6029_v60 = vld [vmem:[%s6862_s0 + $0x74] sm:$0xf0] }
 0x4f7   : > { %2649 = vmatmul.bf16.gmra.mxu3 %v2539_v2 }
 0x4f8   : > { %v2462_v23 = vpack.c.b16 %v2452_v8, %v2451_v52  ;;  %v2723_v2 = vmul.f32 %v6461_v1, %v2722_v48  ;;  %v6028_v48 = vld [vmem:[%s6862_s0 + $0x74] sm:$0xf] }
 0x4fa   : > { %v2724_v27 = vadd.f32 %v6461_v1, %v2723_v2 }
 0x4fb   : > { %v2516_v30 = vpop.permute.xlu0 %2515  ;;  %v1773_v7 = vpop.f32.mrf.mxu0 }
 0x4fc   : > { %v2543_v47 = vsel %vm1348_vm0, %v2462_v23, %v2516_v30  ;;  %v1795_v15 = vpack.c.bf16 %v1773_v7, %v1773_v7  ;;  %v7475_v12 = vsel %vm2725_vm1, %v6461_v1, %v2724_v27  ;;  %v5847_v1 = vld [vmem:[%s6862_s0 + $0x70] sm:$0xf] }
 0x4fd   : > { %v5848_v2 = vor.u32 %v6029_v60, %v5847_v1  ;;  %v5801_v1 = vld [vmem:[%s6862_s0 + $0x18] sm:$0xf0] }
 0x4fe   : > { %v2453_v33 = vunpack.c.l.b16 %v1795_v15 }
 0x4ff   : > { %3163 = vmatpush.bf16.msra.mxu0 %v5848_v2 }
 0x503   : > { %v1775_v38 = vpop.f32.mrf.mxu0 }
 0x504   : > { %v1796_v19 = vpack.c.bf16 %v1775_v38, %v1775_v38 }
 0x506   : > { %v2454_v53 = vunpack.c.l.b16 %v1796_v19 }
 0x507   : > { %2654 = vmatmul.bf16.gmra.mxu3 %v2543_v47 }
 0x508   : > { %v2463_v34 = vpack.c.b16 %v2454_v53, %v2453_v33 }
 0x510   : > { %v2630_v0 = vpop.f32.mrf.mxu3 }
 0x511   : > { %v2631_v17 = vadd.f32 %v7440_v18, %v2630_v0  ;;  %v6181_v0 = vunpack.c.h.bf16 %v6261_v44 }
 0x513   : > { %v7443_v10 = vadd.f32 %v6168_v14, %v2631_v17 }
 0x515   : > { %2688 = vadd.xlane.f32.xlu0 %v7443_v10 }
 0x518   : > { %v2632_v4 = vpop.f32.mrf.mxu3 }
 0x519   : > { %v2633_v22 = vadd.f32 %v7440_v18, %v2632_v4 }
 0x51b   : > { %v7447_v57 = vadd.f32 %v6169_v11, %v2633_v22  ;;  %v6262_v22 = vld [vmem:[%s6892_s9 + $0x20] sm:$0xff]  }
 0x51c   : > { %v6184_v38 = vunpack.c.l.bf16 %v6262_v22 }
 0x51d   : > { %2690 = vadd.xlane.f32.xlu2 %v7447_v57 }
 0x533   : > { %v2518_v40 = vpop.permute.xlu2 %2517 }
 0x534   : > { %v2547_v16 = vsel %vm1348_vm0, %v2463_v34, %v2518_v40 }
 0x535   : > { %2659 = vmatmul.bf16.gmra.mxu3 %v2547_v16 }
 0x53d   : > { %v2635_v50 = vpop.f32.mrf.mxu3 }
 0x53e   : > { %v2636_v13 = vadd.f32 %v7440_v18, %v2635_v50 }
 0x540   : > { %v7453_v51 = vadd.f32 %v6172_v42, %v2636_v13  ;;  %v6185_v42 = vunpack.c.h.bf16 %v6262_v22  ;;  %v7558_v22 = vld [vmem:[%s6892_s9 + $0x38] sm:$0xff]  }
 0x542   : > { %2692 = vadd.xlane.f32.xlu1 %v7453_v51 }
 0x545   : > { %v2637_v28 = vpop.f32.mrf.mxu3 }
 0x546   : > { %v2638_v32 = vadd.f32 %v7440_v18, %v2637_v28  ;;  %v6263_v28 = vld [vmem:[%s6892_s9 + $0x28] sm:$0xff]  }
 0x548   : > { %v7457_v35 = vadd.f32 %v6173_v5, %v2638_v32 }
 0x54a   : > { %2694 = vadd.xlane.f32.xlu0 %v7457_v35  ;;  %v1778_v56 = vpop.f32.mrf.mxu0 }
 0x54b   : > { %v1797_v21 = vpack.c.bf16 %v1778_v56, %v1778_v56  ;;  %v6188_v56 = vunpack.c.l.bf16 %v6263_v28 }
 0x54d   : > { %v2455_v45 = vunpack.c.l.b16 %v1797_v21 }
 0x552   : > { %v1780_v54 = vpop.f32.mrf.mxu0 }
 0x553   : > { %v1798_v36 = vpack.c.bf16 %v1780_v54, %v1780_v54 }
 0x555   : > { %v2456_v6 = vunpack.c.l.b16 %v1798_v36 }
 0x557   : > { %v2464_v25 = vpack.c.b16 %v2456_v6, %v2455_v45  ;;  %v6189_v45 = vunpack.c.h.bf16 %v6263_v28  ;;  %v5825_v28 = vld [vmem:[%s6862_s0 + $0x48] sm:$0xf0] }
 0x55a   : > { %v2640_v39 = vpop.f32.mrf.mxu3 }
 0x55b   : > { %v2641_v41 = vadd.f32 %v7440_v18, %v2640_v39 }
 0x55d   : > { %v7462_v20 = vadd.f32 %v6176_v29, %v2641_v41 }
 0x55f   : > { %2696 = vadd.xlane.f32.xlu2 %v7462_v20 }
 0x562   : > { %v2642_v37 = vpop.f32.mrf.mxu3 }
 0x563   : > { %v2520_v31 = vpop.permute.xlu1 %2519  ;;  %v2643_v61 = vadd.f32 %v7440_v18, %v2642_v37 }
 0x564   : > { %v2551_v3 = vsel %vm1348_vm0, %v2464_v25, %v2520_v31  ;;  %v6264_v31 = vld [vmem:[%s6892_s9 + $0x30] sm:$0xff]  }
 0x565   : > { %2664 = vmatmul.bf16.gmra.mxu3 %v2551_v3  ;;  %v7467_v46 = vadd.f32 %v6177_v58, %v2643_v61  ;;  %v6192_v44 = vunpack.c.l.bf16 %v6264_v31 }
 0x567   : > { %2698 = vadd.xlane.f32.xlu1 %v7467_v46 }
 0x56a   : > { %v2645_v63 = vpop.f32.mrf.mxu3 }
 0x56b   : > { %v2646_v24 = vadd.f32 %v7440_v18, %v2645_v63 }
 0x56d   : > { %v7472_v26 = vadd.f32 %v6180_v55, %v2646_v24 }
 0x56f   : > { %2700 = vadd.xlane.f32.xlu1 %v7472_v26 }
 0x572   : > { %v2647_v30 = vpop.f32.mrf.mxu3 }
 0x573   : > { %v2648_v49 = vadd.f32 %v7440_v18, %v2647_v30  ;;  %v5839_v30 = vld [vmem:[%s6862_s0 + $0x60] sm:$0xf] }
 0x575   : > { %v7490_v4 = vadd.f32 %v6181_v0, %v2648_v49 }
 0x588   : > { %v2689_v43 = vpop.xlane.xlu0 %2688 }
 0x589   : > { %v2727_v8 = vmul.f32 %v7475_v12, %v2689_v43  ;;  %v6193_v43 = vunpack.c.h.bf16 %v6264_v31  ;;  %v5809_v31 = vld [vmem:[%s6862_s0 + $0x28] sm:$0xf0] }
 0x58b   : > { %v7479_v52 = vsub.f32 %v7443_v10, %v2727_v8  ;;  %v2650_v10 = vpop.f32.mrf.mxu3 }
 0x58c   : > { %v2651_v7 = vadd.f32 %v7440_v18, %v2650_v10 }
 0x58d   : > { %v2759_v23 = vmul.f32 %v7479_v52, %v7479_v52 }
 0x58e   : > { %v7495_v19 = vadd.f32 %v6184_v38, %v2651_v7  ;;  %v5831_v7 = vld [vmem:[%s6862_s0 + $0x50] sm:$0xf]  ;;  %v6025_v38 = vld [vmem:[%s6862_s0 + $0x54] sm:$0xf0] }
 0x58f   : > { %2775 = vadd.xlane.f32.xlu0 %v2759_v23  ;;  %v6027_v23 = vld [vmem:[%s6862_s0 + $0x64] sm:$0xf0] }
 0x590   : > { %v2691_v47 = vpop.xlane.xlu2 %2690  ;;  %v5840_v49 = vor.u32 %v6027_v23, %v5839_v30  ;;  %v5793_v30 = vld [vmem:[%s6862_s0 + $0x8] sm:$0xf0] }
 0x591   : > { %v2728_v14 = vmul.f32 %v7475_v12, %v2691_v47  ;;  %v6026_v47 = vld [vmem:[%s6862_s0 + $0x64] sm:$0xf] }
 0x592   : > { %3164 = vmatpush.bf16.msra.mxu0 %v5840_v49 }
 0x593   : > { %v7486_v17 = vsub.f32 %v7447_v57, %v2728_v14  ;;  %v2652_v33 = vpop.f32.mrf.mxu3  ;;  %v5841_v14 = vld [vmem:[%s6862_s0 + $0x68] sm:$0xf0] }
 0x594   : > { %v2653_v16 = vadd.f32 %v7440_v18, %v2652_v33  ;;  %v5833_v33 = vld [vmem:[%s6862_s0 + $0x58] sm:$0xf0] }
 0x595   : > { %v2760_v11 = vmul.f32 %v7486_v17, %v7486_v17 }
 0x596   : > { %v7509_v13 = vadd.f32 %v6185_v42, %v2653_v16  ;;  %v6023_v42 = vld [vmem:[%s6862_s0 + $0x44] sm:$0xf0] }
 0x597   : > { %2777 = vadd.xlane.f32.xlu2 %v2760_v11  ;;  %2702 = vadd.xlane.f32.xlu0 %v7490_v4  ;;  %v5844_v11 = vor.u32 %v6026_v47, %v5841_v14 }
 0x59b   : > { %v2655_v5 = vpop.f32.mrf.mxu3 }
 0x59c   : > { %v2656_v32 = vadd.f32 %v7440_v18, %v2655_v5 }
 0x59e   : > { %v7516_v59 = vadd.f32 %v6188_v56, %v2656_v32 }
 0x59f   : > { %2704 = vadd.xlane.f32.xlu0 %v7495_v19 }
 0x5a3   : > { %v2657_v36 = vpop.f32.mrf.mxu3 }
 0x5a4   : > { %v2658_v21 = vadd.f32 %v7440_v18, %v2657_v36  ;;  %v6020_v36 = vld [vmem:[%s6862_s0 + $0x34] sm:$0xf] }
 0x5a6   : > { %v7532_v37 = vadd.f32 %v6189_v45, %v2658_v21  ;;  %v6019_v45 = vld [vmem:[%s6862_s0 + $0x24] sm:$0xf0] }
 0x5b5   : > { %v2693_v57 = vpop.xlane.xlu1 %2692 }
 0x5b6   : > { %v2729_v15 = vmul.f32 %v7475_v12, %v2693_v57  ;;  %v6024_v57 = vld [vmem:[%s6862_s0 + $0x54] sm:$0xf] }
 0x5b7   : > { %v5836_v16 = vor.u32 %v6024_v57, %v5833_v33 }
 0x5b8   : > { %v7500_v53 = vsub.f32 %v7453_v51, %v2729_v15  ;;  %v2660_v25 = vpop.f32.mrf.mxu3  ;;  %v5832_v15 = vor.u32 %v6025_v38, %v5831_v7 }
 0x5b9   : > { %v2661_v3 = vadd.f32 %v7440_v18, %v2660_v25  ;;  %v6018_v25 = vld [vmem:[%s6862_s0 + $0x24] sm:$0xf] }
 0x5ba   : > { %v2761_v34 = vmul.f32 %v7500_v53, %v7500_v53  ;;  %3165 = vmatpush.bf16.msra.mxu0 %v5832_v15 }
 0x5bb   : > { %v7543_v24 = vadd.f32 %v6192_v44, %v2661_v3  ;;  %v5799_v3 = vld [vmem:[%s6862_s0 + $0x10] sm:$0xf]  ;;  %v6016_v44 = vld [vmem:[%s6862_s0 + $0x14] sm:$0xf] }
 0x5bc   : > { %2779 = vadd.xlane.f32.xlu2 %v2761_v34 }
 0x5bd   : > { %v2695_v40 = vpop.xlane.xlu0 %2694 }
 0x5be   : > { %v2730_v9 = vmul.f32 %v7475_v12, %v2695_v40  ;;  %v6196_v40 = vunpack.c.l.bf16 %v7558_v22 }
 0x5c0   : > { %v7507_v50 = vsub.f32 %v7457_v35, %v2730_v9  ;;  %v2662_v62 = vpop.f32.mrf.mxu3  ;;  %v5823_v9 = vld [vmem:[%s6862_s0 + $0x40] sm:$0xf] }
 0x5c1   : > { %v2663_v27 = vadd.f32 %v7440_v18, %v2662_v62  ;;  %v5824_v5 = vor.u32 %v6023_v42, %v5823_v9 }
 0x5c2   : > { %v2762_v51 = vmul.f32 %v7507_v50, %v7507_v50 }
 0x5c3   : > { %v7555_v0 = vadd.f32 %v6193_v43, %v2663_v27  ;;  %3166 = vmatpush.bf16.msra.mxu0 %v5824_v5  ;;  %v6015_v27 = vld [vmem:[%s6862_s0 + $0x4] sm:$0xf0] }
 0x5c4   : > { %2706 = vadd.xlane.f32.xlu2 %v7509_v13  ;;  %2781 = vadd.xlane.f32.xlu1 %v2762_v51  ;;  %v6022_v51 = vld [vmem:[%s6862_s0 + $0x44] sm:$0xf] }
 0x5c5   : > { %v5828_v56 = vor.u32 %v6022_v51, %v5825_v28 }
 0x5cc   : > { %2708 = vadd.xlane.f32.xlu2 %v7516_v59 }
 0x5d2   : > { %v2697_v35 = vpop.xlane.xlu2 %2696 }
 0x5d3   : > { %v2731_v54 = vmul.f32 %v7475_v12, %v2697_v35  ;;  %v5815_v35 = vld [vmem:[%s6862_s0 + $0x30] sm:$0xf] }
 0x5d5   : > { %v7521_v29 = vsub.f32 %v7462_v20, %v2731_v54  ;;  %v6021_v54 = vld [vmem:[%s6862_s0 + $0x34] sm:$0xf0] }
 0x5d7   : > { %v2763_v39 = vmul.f32 %v7521_v29, %v7521_v29 }
 0x5d9   : > { %2783 = vadd.xlane.f32.xlu1 %v2763_v39  ;;  %v5816_v39 = vor.u32 %v6021_v54, %v5815_v35 }
 0x5da   : > { %v2699_v41 = vpop.xlane.xlu1 %2698 }
 0x5db   : > { %v2732_v6 = vmul.f32 %v7475_v12, %v2699_v41  ;;  %v5817_v41 = vld [vmem:[%s6862_s0 + $0x38] sm:$0xf0]  ;;  %3167 = vmatpush.bf16.msra.mxu0 %v5816_v39 }
 0x5dc   : > { %v5820_v21 = vor.u32 %v6020_v36, %v5817_v41 }
 0x5dd   : > { %v7528_v58 = vsub.f32 %v7467_v46, %v2732_v6  ;;  %v5807_v6 = vld [vmem:[%s6862_s0 + $0x20] sm:$0xf] }
 0x5df   : > { %v2764_v20 = vmul.f32 %v7528_v58, %v7528_v58 }
 0x5e1   : > { %2785 = vadd.xlane.f32.xlu0 %v2764_v20  ;;  %2710 = vadd.xlane.f32.xlu1 %v7532_v37  ;;  %v5808_v20 = vor.u32 %v6019_v45, %v5807_v6 }
 0x5e2   : > { %v2701_v61 = vpop.xlane.xlu1 %2700 }
 0x5e3   : > { %v2733_v46 = vmul.f32 %v7475_v12, %v2701_v61  ;;  %v5812_v61 = vor.u32 %v6018_v25, %v5809_v31  ;;  %3168 = vmatpush.bf16.msra.mxu0 %v5808_v20  ;;  %v7613_v31 = vld [vmem:[%s6856_s16] ss:$0 sm:$0xff] }
 0x5e5   : > { %v7539_v55 = vsub.f32 %v7472_v26, %v2733_v46  ;;  %v5849_v26 = vld [vmem:[%s6862_s0 + $0x78] sm:$0xf0]  ;;  %v6017_v46 = vld [vmem:[%s6862_s0 + $0x14] sm:$0xf0] }
 0x5e6   : > { %v5852_v8 = vor.u32 %v6028_v48, %v5849_v26  ;;  %v5800_v62 = vor.u32 %v6017_v46, %v5799_v3  ;;  %v5804_v48 = vor.u32 %v6016_v44, %v5801_v1  ;;  %v5791_v26 = vld [vmem:[%s6862_s0] sm:$0xf] }
 0x5e7   : > { %v2765_v63 = vmul.f32 %v7539_v55, %v7539_v55  ;;  %v5792_v43 = vor.u32 %v6015_v27, %v5791_v26 }
 0x5e8   : > { %3212 = vmatpush.bf16.msra.mxu1 %v5852_v8  ;;  %v2665_v10 = vpop.f32.mrf.mxu3  ;;  %3169 = vmatpush.bf16.msra.mxu0 %v5800_v62  ;;  %v6014_v8 = vld [vmem:[%s6862_s0 + $0x4] sm:$0xf] }
 0x5e9   : > { %2787 = vadd.xlane.f32.xlu0 %v2765_v63  ;;  %2712 = vadd.xlane.f32.xlu1 %v7543_v24  ;;  %v2666_v34 = vadd.f32 %v7440_v18, %v2665_v10  ;;  %v5796_v23 = vor.u32 %v6014_v8, %v5793_v30 }
 0x5eb   : > { %v7571_v32 = vadd.f32 %v6196_v40, %v2666_v34 }
 0x5ec   : > { %3213 = vmatpush.bf16.msra.mxu1 %v5844_v11  ;;  %3170 = vmatpush.bf16.msra.mxu0 %v5792_v43 }
 0x5f0   : > { %3214 = vmatpush.bf16.msra.mxu1 %v5836_v16 }
 0x5f1   : > { %2714 = vadd.xlane.f32.xlu0 %v7555_v0 }
 0x5f4   : > { %3215 = vmatpush.bf16.msra.mxu1 %v5828_v56  ;;  %v2667_v56 = vpop.f32.mrf.mxu3 }
 0x5f5   : > { %v2668_v39 = vadd.f32 %v7440_v18, %v2667_v56 }
 0x5f8   : > { %3216 = vmatpush.bf16.msra.mxu1 %v5820_v21  ;;  %v7607_v21 = vld [vmem:[%s6850_s18] ss:$0 sm:$0xff] }
 0x5f9   : > { %2716 = vadd.xlane.f32.xlu0 %v7571_v32 }
 0x5fc   : > { %3217 = vmatpush.bf16.msra.mxu1 %v5812_v61 }
 0x600   : > { %3218 = vmatpush.bf16.msra.mxu1 %v5804_v48 }
 0x602   : > { %v2776_v63 = vpop.xlane.xlu0 %2775 }
 0x603   : > { %v2807_v60 = vmul.f32 %v2776_v63, %v7475_v12 }
 0x604   : > { %3219 = vmatpush.bf16.msra.mxu1 %v5796_v23 }
 0x605   : > { %v2823_v2 = vadd.f32 1e-12, %v2807_v60 }
 0x607   : > { %6462 = vrsqrt.f32 %v2823_v2  ;;  %vm2845_vm3 = vweird.f32 %v2823_v2 }
 0x60a   : > { %v2778_v47 = vpop.xlane.xlu2 %2777  ;;  %v2703_v49 = vpop.xlane.xlu0 %2702 }
 0x60b   : > { %v2808_v14 = vmul.f32 %v2778_v47, %v7475_v12  ;;  %v2734_v11 = vmul.f32 %v7475_v12, %v2703_v49 }
 0x60d   : > { %v6463_v10 = vpop.eup %6462  ;;  %v2824_v7 = vadd.f32 1e-12, %v2808_v14  ;;  %v7594_v38 = vsub.f32 %v7490_v4, %v2734_v11 }
 0x60e   : > { %v2840_v57 = vmul.f32 %v6463_v10, %v2823_v2  ;;  %vm2846_vm2 = vweird.f32 %v6463_v10 }
 0x60f   : > { %6464 = vrsqrt.f32 %v2824_v7  ;;  %v2766_v15 = vmul.f32 %v7594_v38, %v7594_v38  ;;  %vm2847_vm4 = vmor %vm2845_vm3, %vm2846_vm2  ;;  %vm2855_vm6 = vweird.f32 %v2824_v7 }
 0x610   : > { %v2841_v33 = vmul.f32 %v6463_v10, %v2840_v57 }
 0x611   : > { %2789 = vadd.xlane.f32.xlu2 %v2766_v15 }
 0x612   : > { %v2842_v34 = vmul.f32 0.5, %v2841_v33  ;;  %v2705_v40 = vpop.xlane.xlu0 %2704 }
 0x613   : > { %v2735_v16 = vmul.f32 %v7475_v12, %v2705_v40 }
 0x614   : > { %v2843_v9 = vsub.f32 1.5, %v2842_v34 }
 0x615   : > { %v6465_v42 = vpop.eup %6464  ;;  %v7600_v51 = vsub.f32 %v7495_v19, %v2735_v16  ;;  %v6197_v19 = vunpack.c.h.bf16 %v7558_v22 }
 0x616   : > { %v2844_v5 = vmul.f32 %v6463_v10, %v2843_v9  ;;  %v2850_v4 = vmul.f32 %v6465_v42, %v2824_v7  ;;  %vm2856_vm5 = vweird.f32 %v6465_v42 }
 0x617   : > { %v2767_v28 = vmul.f32 %v7600_v51, %v7600_v51  ;;  %vm2857_vm7 = vmor %vm2855_vm6, %vm2856_vm5  ;;  %v7610_v25 = vadd.f32 %v6197_v19, %v2668_v39 }
 0x618   : > { %v2851_v35 = vmul.f32 %v6465_v42, %v2850_v4  ;;  %v2848_v54 = vsel %vm2847_vm4, %v6463_v10, %v2844_v5 }
 0x619   : > { %2791 = vadd.xlane.f32.xlu2 %v2767_v28  ;;  %v2999_v6 = vmul.f32 %v2848_v54, %v7479_v52 }
 0x61a   : > { %v2852_v36 = vmul.f32 0.5, %v2851_v35 }
 0x61b   : > { %v3018_v61 = vmul.f32 %v7607_v21, %v2999_v6 }
 0x61c   : > { %v2853_v41 = vsub.f32 1.5, %v2852_v36 }
 0x61d   : > { %v7620_v3 = vadd.f32 %v7613_v31, %v3018_v61 }
 0x61e   : > { %v2854_v45 = vmul.f32 %v6465_v42, %v2853_v41 }
 0x620   : > { %v2858_v20 = vsel %vm2857_vm7, %v6465_v42, %v2854_v45 }
 0x621   : > { %v3000_v18 = vmul.f32 %v2858_v20, %v7486_v17  ;;  %2718 = vadd.xlane.f32.xlu2 %v7610_v25 }
 0x623   : > { %v3019_v22 = vmul.f32 %v7607_v21, %v3000_v18 }
 0x625   : > { %v7623_v52 = vadd.f32 %v7613_v31, %v3019_v22 }
 0x627   : > { %9426 = vst [vmem:[#allocation16_spill] sm:$0xff] %v7623_v52  ;;  %v3053_v46 = vpack.c.bf16 %v7623_v52, %v7620_v3 }
 0x629   : > { %3171 = vmatmul.bf16.vlgmr.msra.gmra.mxu0 %v3053_v46  ;;  %3220 = vmatmul.bf16.vlgmr.msra.gmra.mxu1 %v3053_v46 }
 0x62f   : > { %v2780_v44 = vpop.xlane.xlu2 %2779 }
 0x630   : > { %v2809_v63 = vmul.f32 %v2780_v44, %v7475_v12 }
 0x632   : > { %v2825_v62 = vadd.f32 1e-12, %v2809_v63 }
 0x634   : > { %6466 = vrsqrt.f32 %v2825_v62  ;;  %vm2865_vm9 = vweird.f32 %v2825_v62 }
 0x637   : > { %v2707_v17 = vpop.xlane.xlu2 %2706  ;;  %v2782_v1 = vpop.xlane.xlu1 %2781 }
 0x638   : > { %v2736_v60 = vmul.f32 %v7475_v12, %v2707_v17  ;;  %v2810_v48 = vmul.f32 %v2782_v1, %v7475_v12 }
 0x63a   : > { %v6467_v2 = vpop.eup %6466  ;;  %v7631_v26 = vsub.f32 %v7509_v13, %v2736_v60  ;;  %v2826_v27 = vadd.f32 1e-12, %v2810_v48 }
 0x63b   : > { %v2860_v43 = vmul.f32 %v6467_v2, %v2825_v62  ;;  %vm2866_vm8 = vweird.f32 %v6467_v2 }
 0x63c   : > { %6468 = vrsqrt.f32 %v2826_v27  ;;  %v2768_v8 = vmul.f32 %v7631_v26, %v7631_v26  ;;  %vm2867_vm10 = vmor %vm2865_vm9, %vm2866_vm8  ;;  %vm2875_vm12 = vweird.f32 %v2826_v27 }
 0x63d   : > { %v2861_v30 = vmul.f32 %v6467_v2, %v2860_v43 }
 0x63e   : > { %2793 = vadd.xlane.f32.xlu1 %v2768_v8 }
 0x63f   : > { %v2862_v23 = vmul.f32 0.5, %v2861_v30  ;;  %v2709_v47 = vpop.xlane.xlu2 %2708 }
 0x640   : > { %v2737_v49 = vmul.f32 %v7475_v12, %v2709_v47 }
 0x641   : > { %v2863_v14 = vsub.f32 1.5, %v2862_v23 }
 0x642   : > { %v6469_v11 = vpop.eup %6468  ;;  %v7637_v10 = vsub.f32 %v7516_v59, %v2737_v49 }
 0x643   : > { %v2864_v7 = vmul.f32 %v6467_v2, %v2863_v14  ;;  %v2870_v13 = vmul.f32 %v6469_v11, %v2826_v27  ;;  %vm2876_vm11 = vweird.f32 %v6469_v11 }
 0x644   : > { %v2769_v57 = vmul.f32 %v7637_v10, %v7637_v10  ;;  %vm2877_vm13 = vmor %vm2875_vm12, %vm2876_vm11 }
 0x645   : > { %v2871_v15 = vmul.f32 %v6469_v11, %v2870_v13  ;;  %v2868_v33 = vsel %vm2867_vm10, %v6467_v2, %v2864_v7 }
 0x646   : > { %2795 = vadd.xlane.f32.xlu1 %v2769_v57  ;;  %v3001_v16 = vmul.f32 %v2868_v33, %v7500_v53 }
 0x647   : > { %v2872_v34 = vmul.f32 0.5, %v2871_v15 }
 0x648   : > { %v3020_v28 = vmul.f32 %v7607_v21, %v3001_v16 }
 0x649   : > { %v2873_v40 = vsub.f32 1.5, %v2872_v34 }
 0x64a   : > { %v7647_v54 = vadd.f32 %v7613_v31, %v3020_v28 }
 0x64b   : > { %v2874_v9 = vmul.f32 %v6469_v11, %v2873_v40 }
 0x64c   : > { %v2784_v59 = vpop.xlane.xlu1 %2783 }
 0x64d   : > { %v2878_v42 = vsel %vm2877_vm13, %v6469_v11, %v2874_v9  ;;  %v2811_v5 = vmul.f32 %v2784_v59, %v7475_v12 }
 0x64e   : > { %v3002_v4 = vmul.f32 %v2878_v42, %v7507_v50 }
 0x64f   : > { %v2827_v56 = vadd.f32 1e-12, %v2811_v5 }
 0x650   : > { %v3021_v35 = vmul.f32 %v7607_v21, %v3002_v4 }
 0x651   : > { %6470 = vrsqrt.f32 %v2827_v56  ;;  %vm2885_vm15 = vweird.f32 %v2827_v56 }
 0x652   : > { %v7650_v53 = vadd.f32 %v7613_v31, %v3021_v35 }
 0x654   : > { %9427 = vst [vmem:[#allocation17_spill] sm:$0xff] %v7650_v53  ;;  %v2711_v36 = vpop.xlane.xlu1 %2710  ;;  %v2786_v39 = vpop.xlane.xlu0 %2785  ;;  %v3054_v19 = vpack.c.bf16 %v7650_v53, %v7647_v54 }
 0x655   : > { %v2738_v41 = vmul.f32 %v7475_v12, %v2711_v36  ;;  %v2812_v50 = vmul.f32 %v2786_v39, %v7475_v12 }
 0x656   : > { %3176 = vmatmul.bf16.gmra.mxu0 %v3054_v19  ;;  %3225 = vmatmul.bf16.gmra.mxu1 %v3054_v19 }
 0x657   : > { %v6471_v6 = vpop.eup %6470  ;;  %v7657_v45 = vsub.f32 %v7532_v37, %v2738_v41  ;;  %v2828_v20 = vadd.f32 1e-12, %v2812_v50 }
 0x658   : > { %v2880_v61 = vmul.f32 %v6471_v6, %v2827_v56  ;;  %vm2886_vm14 = vweird.f32 %v6471_v6 }
 0x659   : > { %6472 = vrsqrt.f32 %v2828_v20  ;;  %v2770_v18 = vmul.f32 %v7657_v45, %v7657_v45  ;;  %vm2887_vm0 = vmor %vm2885_vm15, %vm2886_vm14  ;;  %vm2895_vm2 = vweird.f32 %v2828_v20 }
 0x65a   : > { %v2881_v22 = vmul.f32 %v6471_v6, %v2880_v61 }
 0x65b   : > { %2797 = vadd.xlane.f32.xlu0 %v2770_v18 }
 0x65c   : > { %v2882_v46 = vmul.f32 0.5, %v2881_v22  ;;  %v2713_v44 = vpop.xlane.xlu1 %2712  ;;  %v2788_v63 = vpop.xlane.xlu0 %2787 }
 0x65d   : > { %v2739_v62 = vmul.f32 %v7475_v12, %v2713_v44 }
 0x65e   : > { %v2883_v17 = vsub.f32 1.5, %v2882_v46 }
 0x65f   : > { %v6473_v1 = vpop.eup %6472  ;;  %v7663_v60 = vsub.f32 %v7543_v24, %v2739_v62 }
 0x660   : > { %v2884_v37 = vmul.f32 %v6471_v6, %v2883_v17  ;;  %v2890_v48 = vmul.f32 %v6473_v1, %v2828_v20  ;;  %vm2896_vm1 = vweird.f32 %v6473_v1 }
 0x661   : > { %v2771_v2 = vmul.f32 %v7663_v60, %v7663_v60  ;;  %vm2897_vm3 = vmor %vm2895_vm2, %vm2896_vm1 }
 0x662   : > { %v2891_v27 = vmul.f32 %v6473_v1, %v2890_v48  ;;  %v2888_v43 = vsel %vm2887_vm0, %v6471_v6, %v2884_v37 }
 0x663   : > { %2799 = vadd.xlane.f32.xlu2 %v2771_v2  ;;  %v3003_v24 = vmul.f32 %v2888_v43, %v7521_v29 }
 0x664   : > { %v2892_v8 = vmul.f32 0.5, %v2891_v27  ;;  %v2715_v30 = vpop.xlane.xlu0 %2714 }
 0x665   : > { %v2740_v23 = vmul.f32 %v7475_v12, %v2715_v30  ;;  %v3022_v57 = vmul.f32 %v7607_v21, %v3003_v24 }
 0x666   : > { %v2893_v47 = vsub.f32 1.5, %v2892_v8  ;;  %v3077_v8 = vld [vmem:[%s6868_s28] sm:$0x3] }
 0x667   : > { %v7670_v49 = vsub.f32 %v7555_v0, %v2740_v23  ;;  %v2813_v0 = vmul.f32 %v2788_v63, %v7475_v12  ;;  %v7683_v40 = vadd.f32 %v7613_v31, %v3022_v57 }
 0x668   : > { %v2894_v14 = vmul.f32 %v6473_v1, %v2893_v47  ;;  %v7717_v47 = vperm.slane %v3077_v8, 1 }
 0x669   : > { %v2772_v11 = vmul.f32 %v7670_v49, %v7670_v49  ;;  %9428 = vst [vmem:[#allocation18_spill] sm:$0xff] %v7683_v40  ;;  %v2829_v59 = vadd.f32 1e-12, %v2813_v0 }
 0x66a   : > { %v2898_v7 = vsel %vm2897_vm3, %v6473_v1, %v2894_v14 }
 0x66b   : > { %v3004_v13 = vmul.f32 %v2898_v7, %v7528_v58  ;;  %2801 = vadd.xlane.f32.xlu1 %v2772_v11  ;;  %6474 = vrsqrt.f32 %v2829_v59  ;;  %vm2905_vm5 = vweird.f32 %v2829_v59 }
 0x66c   : > { %v2717_v15 = vpop.xlane.xlu0 %2716 }
 0x66d   : > { %v2741_v33 = vmul.f32 %v7475_v12, %v2717_v15  ;;  %v3023_v29 = vmul.f32 %v7607_v21, %v3004_v13 }
 0x66f   : > { %v7680_v34 = vsub.f32 %v7571_v32, %v2741_v33  ;;  %v7686_v16 = vadd.f32 %v7613_v31, %v3023_v29 }
 0x671   : > { %9429 = vst [vmem:[#allocation19_spill] sm:$0xff] %v7686_v16  ;;  %v3055_v58 = vpack.c.bf16 %v7686_v16, %v7683_v40  ;;  %v2773_v9 = vmul.f32 %v7680_v34, %v7680_v34  ;;  %v6475_v42 = vpop.eup %6474 }
 0x672   : > { %v2900_v32 = vmul.f32 %v6475_v42, %v2829_v59  ;;  %vm2906_vm4 = vweird.f32 %v6475_v42 }
 0x673   : > { %3181 = vmatmul.bf16.gmra.mxu0 %v3055_v58  ;;  %3230 = vmatmul.bf16.gmra.mxu1 %v3055_v58  ;;  %vm2907_vm6 = vmor %vm2905_vm5, %vm2906_vm4 }
 0x674   : > { %2803 = vadd.xlane.f32.xlu0 %v2773_v9  ;;  %v2901_v5 = vmul.f32 %v6475_v42, %v2900_v32 }
 0x676   : > { %v2902_v35 = vmul.f32 0.5, %v2901_v5 }
 0x678   : > { %v2903_v36 = vsub.f32 1.5, %v2902_v35 }
 0x67a   : > { %v2904_v41 = vmul.f32 %v6475_v42, %v2903_v36 }
 0x67c   : > { %v2908_v20 = vsel %vm2907_vm6, %v6475_v42, %v2904_v41 }
 0x67d   : > { %v3005_v63 = vmul.f32 %v2908_v20, %v7539_v55 }
 0x67f   : > { %v3024_v27 = vmul.f32 %v7607_v21, %v3005_v63 }
 0x681   : > { %v7705_v55 = vadd.f32 %v7613_v31, %v3024_v27 }
 0x683   : > { %9430 = vst [vmem:[#allocation20_spill] sm:$0xff] %v7705_v55 }
 0x684   : > { %v2790_v4 = vpop.xlane.xlu2 %2789 }
 0x685   : > { %v2814_v28 = vmul.f32 %v2790_v4, %v7475_v12 }
 0x687   : > { %v2830_v56 = vadd.f32 1e-12, %v2814_v28 }
 0x689   : > { %6476 = vrsqrt.f32 %v2830_v56  ;;  %vm2915_vm8 = vweird.f32 %v2830_v56 }
 0x68c   : > { %v2792_v39 = vpop.xlane.xlu2 %2791 }
 0x68d   : > { %v2815_v18 = vmul.f32 %v2792_v39, %v7475_v12  ;;  %v6037_v39 = vld [vmem:[%s6873_s24 + $0x38] sm:$0xff] }
 0x68e   : > { %4689 = vmatpush.bf16.msra.mxu2 %v6037_v39 }
 0x68f   : > { %v6477_v19 = vpop.eup %6476  ;;  %v2831_v1 = vadd.f32 1e-12, %v2815_v18 }
 0x690   : > { %v2910_v50 = vmul.f32 %v6477_v19, %v2830_v56  ;;  %vm2916_vm7 = vweird.f32 %v6477_v19 }
 0x691   : > { %vm2917_vm9 = vmor %vm2915_vm8, %vm2916_vm7  ;;  %6478 = vrsqrt.f32 %v2831_v1  ;;  %vm2925_vm11 = vweird.f32 %v2831_v1 }
 0x692   : > { %v2911_v6 = vmul.f32 %v6477_v19, %v2910_v50 }
 0x694   : > { %v2912_v61 = vmul.f32 0.5, %v2911_v6  ;;  %v2719_v22 = vpop.xlane.xlu2 %2718 }
 0x695   : > { %v2742_v46 = vmul.f32 %v7475_v12, %v2719_v22 }
 0x696   : > { %v2913_v44 = vsub.f32 1.5, %v2912_v61 }
 0x697   : > { %v7697_v62 = vsub.f32 %v7610_v25, %v2742_v46  ;;  %v7713_v23 = vpop.eup %6478 }
 0x698   : > { %v2914_v17 = vmul.f32 %v6477_v19, %v2913_v44  ;;  %v2920_v24 = vmul.f32 %v7713_v23, %v2831_v1  ;;  %vm2926_vm10 = vweird.f32 %v7713_v23  ;;  %v6036_v44 = vld [vmem:[%s6873_s24 + $0x30] sm:$0xff] }
 0x699   : > { %v2774_v37 = vmul.f32 %v7697_v62, %v7697_v62  ;;  %vm7760_vm12 = vmor %vm2925_vm11, %vm2926_vm10  ;;  %4690 = vmatpush.bf16.msra.mxu2 %v6036_v44 }
 0x69a   : > { %v2918_v48 = vsel %vm2917_vm9, %v6477_v19, %v2914_v17  ;;  %v2921_v57 = vmul.f32 %v7713_v23, %v2920_v24 }
 0x69b   : > { %v3006_v2 = vmul.f32 %v2918_v48, %v7594_v38  ;;  %2805 = vadd.xlane.f32.xlu2 %v2774_v37  ;;  %v7715_v38 = vperm.slane %v3077_v8, 0 }
 0x69c   : > { %v2922_v58 = vmul.f32 0.5, %v2921_v57 }
 0x69d   : > { %v3025_v43 = vmul.f32 %v7607_v21, %v3006_v2 }
 0x69e   : > { %v2923_v56 = vsub.f32 1.5, %v2922_v58 }
 0x69f   : > { %v7708_v25 = vadd.f32 %v7613_v31, %v3025_v43 }
 0x6a0   : > { %v2924_v41 = vmul.f32 %v7713_v23, %v2923_v56 }
 0x6a1   : > { %9431 = vst [vmem:[#allocation21_spill] sm:$0xff] %v7708_v25  ;;  %v3056_v30 = vpack.c.bf16 %v7708_v25, %v7705_v55 }
 0x6a2   : > { %v2928_v1 = vsel %vm7760_vm12, %v7713_v23, %v2924_v41 }
 0x6a3   : > { %3186 = vmatmul.bf16.gmra.mxu0 %v3056_v30  ;;  %3235 = vmatmul.bf16.gmra.mxu1 %v3056_v30  ;;  %v3007_v56 = vmul.f32 %v2928_v1, %v7600_v51 }
 0x6a6   : > { %v3172_v14 = vpop.f32.mrf.mxu0  ;;  %v3221_v11 = vpop.f32.mrf.mxu1 }
 0x6a7   : > { %v7721_v7 = vadd.f32 %v3172_v14, %v7715_v38  ;;  %v7724_v13 = vadd.f32 %v3221_v11, %v7717_v47 }
 0x6a9   : > { %v7728_v15 = vmul.f32 0.70710677, %v7721_v7  ;;  %v7731_v33 = vmul.f32 0.70710677, %v7724_v13 }
 0x6ab   : > { %v3325_v29 = vand.u32 2147483647, %v7728_v15  ;;  %v3326_v0 = vand.u32 2147483647, %v7731_v33 }
 0x6ad   : > { %v3357_v9 = vmul.f32 0.3275911, %v3325_v29  ;;  %v3358_v59 = vmul.f32 0.3275911, %v3326_v0  ;;  %v4189_v36 = vsub.f32 0.0, %v3325_v29  ;;  %v4190_v50 = vsub.f32 0.0, %v3326_v0 }
 0x6ae   : > { %v3174_v42 = vpop.f32.mrf.mxu0  ;;  %v3223_v32 = vpop.f32.mrf.mxu1 }
 0x6af   : > { %v3389_v5 = vadd.f32 1.0, %v3357_v9  ;;  %v7735_v4 = vadd.f32 1.0, %v3358_v59  ;;  %v7738_v28 = vadd.f32 %v3174_v42, %v7715_v38  ;;  %v7741_v35 = vadd.f32 %v3223_v32, %v7717_v47  ;;  %v6035_v59 = vld [vmem:[%s6873_s24 + $0x28] sm:$0xff] }
 0x6b0   : > { %v4221_v22 = vmul.f32 %v4189_v36, %v3325_v29  ;;  %v4222_v43 = vmul.f32 %v4190_v50, %v3326_v0  ;;  %4691 = vmatpush.bf16.msra.mxu2 %v6035_v59 }
 0x6b1   : > { %6480 = vrcp.f32 %v3389_v5  ;;  %v7746_v19 = vmul.f32 0.70710677, %v7738_v28  ;;  %v7751_v6 = vmul.f32 0.70710677, %v7741_v35  ;;  %v2794_v20 = vpop.xlane.xlu1 %2793  ;;  %v3430_v24 = vand.u32 2147483647, %v3389_v5 }
 0x6b2   : > { %6482 = vrcp.f32 %v7735_v4  ;;  %v2816_v2 = vmul.f32 %v2794_v20, %v7475_v12  ;;  %v3432_v14 = vand.u32 2147483648, %v3389_v5  ;;  %v4253_v57 = vmul.f32 1.442695, %v4221_v22  ;;  %v6034_v20 = vld [vmem:[%s6873_s24 + $0x20] sm:$0xff] }
 0x6b3   : > { %v7754_v61 = vand.u32 2147483647, %v7746_v19  ;;  %v7757_v46 = vand.u32 2147483647, %v7751_v6  ;;  %v3447_v58 = vand.u32 2147483648, %v7735_v4  ;;  %vm3426_vm15 = vweird.f32 %v3389_v5 }
 0x6b4   : > { %v7778_v23 = vadd.f32 1e-12, %v2816_v2  ;;  %v3445_v32 = vand.u32 2147483647, %v7735_v4  ;;  %v4255_v39 = vmul.f32 1.442695, %v4222_v43  ;;  %vm3441_vm1 = vweird.f32 %v7735_v4  ;;  %4692 = vmatpush.bf16.msra.mxu2 %v6034_v20 }
 0x6b5   : > { %v3359_v48 = vmul.f32 0.3275911, %v7754_v61  ;;  %v3360_v8 = vmul.f32 0.3275911, %v7757_v46  ;;  %v3433_v41 = vor.u32 1.1754944e-38, %v3432_v14  ;;  %vm3431_vm2 = vcmp.eq.f32.partialorder %v3430_v24, 8.507059e+37 }
 0x6b6   : > { %v3448_v44 = vor.u32 1.1754944e-38, %v3447_v58  ;;  %vm3446_vm4 = vcmp.eq.f32.partialorder %v3445_v32, 8.507059e+37  ;;  %v4191_v43 = vsub.f32 0.0, %v7754_v61 }
 0x6b7   : > { %v6481_v18 = vpop.eup %6480  ;;  %v7771_v11 = vadd.f32 1.0, %v3359_v48  ;;  %v7774_v9 = vadd.f32 1.0, %v3360_v8 }
 0x6b8   : > { %v6483_v63 = vpop.eup %6482  ;;  %v3422_v37 = vmul.f32 %v6481_v18, %v3389_v5  ;;  %vm3427_vm13 = vweird.f32 %v6481_v18 }
 0x6b9   : > { %v3437_v27 = vmul.f32 %v6483_v63, %v7735_v4  ;;  %6484 = vrcp.f32 %v7771_v11  ;;  %vm3442_vm14 = vweird.f32 %v6483_v63  ;;  %vm3428_vm0 = vmor %vm3426_vm15, %vm3427_vm13  ;;  %v2796_v5 = vpop.xlane.xlu1 %2795  ;;  %v7793_v4 = vmul.f32 %v7607_v21, %v3007_v56 }
 0x6ba   : > { %v3423_v30 = vsub.f32 1.0, %v3422_v37  ;;  %6486 = vrcp.f32 %v7774_v9  ;;  %vm3443_vm3 = vmor %vm3441_vm1, %vm3442_vm14  ;;  %v2817_v14 = vmul.f32 %v2796_v5, %v7475_v12  ;;  %vm3456_vm5 = vweird.f32 %v7771_v11  ;;  %v6033_v5 = vld [vmem:[%s6873_s24 + $0x18] sm:$0xff] }
 0x6bb   : > { %v3438_v29 = vsub.f32 1.0, %v3437_v27  ;;  %6488 = vrsqrt.f32 %v7778_v23  ;;  %v3462_v58 = vand.u32 2147483648, %v7771_v11  ;;  %v3475_v32 = vand.u32 2147483647, %v7774_v9  ;;  %4693 = vmatpush.bf16.msra.mxu2 %v6033_v5 }
 0x6bc   : > { %v3424_v42 = vmul.f32 %v6481_v18, %v3423_v30  ;;  %6490 = vpow2.f32 %v4253_v57  ;;  %v3460_v30 = vand.u32 2147483647, %v7771_v11  ;;  %v3477_v56 = vand.u32 2147483648, %v7774_v9 }
 0x6bd   : > { %v3439_v0 = vmul.f32 %v6483_v63, %v3438_v29  ;;  %6492 = vpow2.f32 %v4255_v39  ;;  %vm3471_vm9 = vweird.f32 %v7774_v9  ;;  %vm3476_vm11 = vcmp.eq.f32.partialorder %v3475_v32, 8.507059e+37 }
 0x6be   : > { %v3425_v36 = vadd.f32 %v6481_v18, %v3424_v42  ;;  %vm7813_vm7 = vcmp.eq.f32.partialorder %v3460_v30, 8.507059e+37  ;;  %vm2935_vm14 = vweird.f32 %v7778_v23  ;;  %vm4382_vm1 = vcmp.ge.f32.partialorder %v7731_v33, 0.0 }
 0x6bf   : > { %v3440_v50 = vadd.f32 %v6483_v63, %v3439_v0  ;;  %v6485_v37 = vpop.eup %6484 }
 0x6c0   : > { %v3429_v22 = vsel %vm3428_vm0, %v6481_v18, %v3425_v36  ;;  %v6487_v18 = vpop.eup %6486  ;;  %v3452_v27 = vmul.f32 %v6485_v37, %v7771_v11  ;;  %vm3457_vm6 = vweird.f32 %v6485_v37  ;;  %vm4381_vm0 = vcmp.ge.f32.partialorder %v7728_v15, 0.0 }
 0x6c1   : > { %v7787_v17 = vsel %vm3431_vm2, %v3433_v41, %v3429_v22  ;;  %v3444_v51 = vsel %vm3443_vm3, %v6483_v63, %v3440_v50  ;;  %v4192_v63 = vsub.f32 0.0, %v7757_v46  ;;  %v3467_v24 = vmul.f32 %v6487_v18, %v7774_v9  ;;  %v6489_v59 = vpop.eup %6488  ;;  %vm3458_vm10 = vmor %vm3456_vm5, %vm3457_vm6 }
 0x6c2   : > { %v3901_v48 = vmul.f32 1.0614054, %v7787_v17  ;;  %v7790_v2 = vsel %vm3446_vm4, %v3448_v44, %v3444_v51  ;;  %v3453_v29 = vsub.f32 1.0, %v3452_v27  ;;  %v7807_v36 = vpop.eup %6490  ;;  %v2930_v50 = vmul.f32 %v6489_v59, %v7778_v23 }
 0x6c3   : > { %v3902_v1 = vmul.f32 1.0614054, %v7790_v2  ;;  %v3468_v0 = vsub.f32 1.0, %v3467_v24  ;;  %v7811_v20 = vpop.eup %6492  ;;  %vm3472_vm8 = vweird.f32 %v6487_v18  ;;  %v3463_v24 = vor.u32 1.1754944e-38, %v3462_v58 }
 0x6c4   : > { %v3933_v8 = vadd.f32 -1.4531521, %v3901_v48  ;;  %v3454_v41 = vmul.f32 %v6485_v37, %v3453_v29  ;;  %v2931_v27 = vmul.f32 %v6489_v59, %v2930_v50  ;;  %vm3473_vm12 = vmor %vm3471_vm9, %vm3472_vm8  ;;  %vm2936_vm13 = vweird.f32 %v6489_v59 }
 0x6c5   : > { %v3934_v57 = vadd.f32 -1.4531521, %v3902_v1  ;;  %v3469_v51 = vmul.f32 %v6487_v18, %v3468_v0  ;;  %vm2937_vm15 = vmor %vm2935_vm14, %vm2936_vm13  ;;  %vm4383_vm2 = vcmp.ge.f32.partialorder %v7746_v19, 0.0  ;;  %vm4384_vm3 = vcmp.ge.f32.partialorder %v7751_v6, 0.0 }
 0x6c6   : > { %v3965_v42 = vmul.f32 %v3933_v8, %v7787_v17  ;;  %v3455_v1 = vadd.f32 %v6485_v37, %v3454_v41  ;;  %v2932_v0 = vmul.f32 0.5, %v2931_v27  ;;  %v4223_v27 = vmul.f32 %v4191_v43, %v7754_v61 }
 0x6c7   : > { %v3966_v39 = vmul.f32 %v3934_v57, %v7790_v2  ;;  %v3470_v57 = vadd.f32 %v6487_v18, %v3469_v51  ;;  %v7851_v43 = vadd.f32 %v7613_v31, %v7793_v4 }
 0x6c8   : > { %v3997_v22 = vadd.f32 1.4214138, %v3965_v42  ;;  %v3459_v29 = vsel %vm3458_vm10, %v6485_v37, %v3455_v1  ;;  %v3478_v42 = vor.u32 1.1754944e-38, %v3477_v56  ;;  %v2933_v32 = vsub.f32 1.5, %v2932_v0 }
 0x6c9   : > { %v3998_v48 = vadd.f32 1.4214138, %v3966_v39  ;;  %v7825_v9 = vsel %vm7813_vm7, %v3463_v24, %v3459_v29  ;;  %v3474_v41 = vsel %vm3473_vm12, %v6487_v18, %v3470_v57  ;;  %v7833_v56 = vadd.f32 1e-12, %v2817_v14  ;;  %v6032_v29 = vld [vmem:[%s6873_s24 + $0x10] sm:$0xff]  ;;  %9436 = vst [vmem:[#allocation22_spill] sm:$0xff] %v7851_v43 }
 0x6ca   : > { %v4029_v8 = vmul.f32 %v3997_v22, %v7787_v17  ;;  %v3903_v11 = vmul.f32 1.0614054, %v7825_v9  ;;  %v7828_v58 = vsel %vm3476_vm11, %v3478_v42, %v3474_v41  ;;  %v2934_v5 = vmul.f32 %v6489_v59, %v2933_v32  ;;  %4694 = vmatpush.bf16.msra.mxu2 %v6032_v29 }
 0x6cb   : > { %v4030_v30 = vmul.f32 %v3998_v48, %v7790_v2  ;;  %v3904_v37 = vmul.f32 1.0614054, %v7828_v58  ;;  %v4224_v24 = vmul.f32 %v4192_v63, %v7757_v46  ;;  %6494 = vrsqrt.f32 %v7833_v56 }
 0x6cc   : > { %v4061_v39 = vadd.f32 -0.28449672, %v4029_v8  ;;  %v3935_v18 = vadd.f32 -1.4531521, %v3903_v11  ;;  %v2938_v14 = vsel %vm2937_vm15, %v6489_v59, %v2934_v5  ;;  %v4257_v41 = vmul.f32 1.442695, %v4223_v27 }
 0x6cd   : > { %v4062_v50 = vadd.f32 -0.28449672, %v4030_v30  ;;  %v3936_v8 = vadd.f32 -1.4531521, %v3904_v37  ;;  %vm2945_vm5 = vweird.f32 %v7833_v56 }
 0x6ce   : > { %v4093_v22 = vmul.f32 %v4061_v39, %v7787_v17  ;;  %v2798_v44 = vpop.xlane.xlu0 %2797  ;;  %v3967_v23 = vmul.f32 %v3935_v18, %v7825_v9  ;;  %v3008_v39 = vmul.f32 %v2938_v14, %v7631_v26 }
 0x6cf   : > { %v4094_v51 = vmul.f32 %v4062_v50, %v7790_v2  ;;  %v2818_v48 = vmul.f32 %v2798_v44, %v7475_v12  ;;  %v3968_v0 = vmul.f32 %v3936_v8, %v7828_v58 }
 0x6d0   : > { %v4125_v1 = vadd.f32 0.2548296, %v4093_v22  ;;  %v3999_v46 = vadd.f32 1.4214138, %v3967_v23  ;;  %v3027_v11 = vmul.f32 %v7607_v21, %v3008_v39  ;;  %v6031_v21 = vld [vmem:[%s6873_s24 + $0x8] sm:$0xff] }
 0x6d1   : > { %v4126_v57 = vadd.f32 0.2548296, %v4094_v51  ;;  %v7841_v30 = vadd.f32 1e-12, %v2818_v48  ;;  %v4000_v50 = vadd.f32 1.4214138, %v3968_v0  ;;  %v7869_v51 = vpop.eup %6494  ;;  %4695 = vmatpush.bf16.msra.mxu2 %v6031_v21 }
 0x6d2   : > { %v4157_v42 = vmul.f32 %v4125_v1, %v7787_v17  ;;  %v4259_v17 = vmul.f32 1.442695, %v4224_v24  ;;  %v4031_v32 = vmul.f32 %v3999_v46, %v7825_v9  ;;  %v7863_v37 = vadd.f32 %v7613_v31, %v3027_v11  ;;  %v6030_v24 = vld [vmem:[%s6873_s24] sm:$0xff] }
 0x6d3   : > { %v4158_v61 = vmul.f32 %v4126_v57, %v7790_v2  ;;  %v3177_v63 = vpop.f32.mrf.mxu0  ;;  %v3226_v59 = vpop.f32.mrf.mxu1  ;;  %6496 = vrsqrt.f32 %v7841_v30  ;;  %v4032_v22 = vmul.f32 %v4000_v50, %v7828_v58  ;;  %v2940_v14 = vmul.f32 %v7869_v51, %v7833_v56 }
 0x6d4   : > { %v4317_v26 = vmul.f32 %v7807_v36, %v4157_v42  ;;  %v7858_v2 = vadd.f32 %v3177_v63, %v7715_v38  ;;  %9437 = vst [vmem:[#allocation23_spill] sm:$0xff] %v7863_v37  ;;  %v7866_v44 = vadd.f32 %v3226_v59, %v7717_v47  ;;  %v4063_v36 = vadd.f32 -0.28449672, %v4031_v32 }
 0x6d5   : > { %v4318_v4 = vmul.f32 %v7811_v20, %v4158_v61  ;;  %6498 = vpow2.f32 %v4257_v41  ;;  %v4064_v18 = vadd.f32 -0.28449672, %v4032_v22  ;;  %v3057_v5 = vpack.c.bf16 %v7863_v37, %v7851_v43  ;;  %4696 = vmatpush.bf16.msra.mxu2 %v6030_v24 }
 0x6d6   : > { %v7874_v20 = vmul.f32 0.70710677, %v7858_v2  ;;  %v4349_v48 = vsub.f32 1.0, %v4317_v26  ;;  %v4095_v31 = vmul.f32 %v4063_v36, %v7825_v9  ;;  %6500 = vpow2.f32 %v4259_v17 }
 0x6d7   : > { %v4350_v1 = vsub.f32 1.0, %v4318_v4  ;;  %v4096_v27 = vmul.f32 %v4064_v18, %v7828_v58  ;;  %3191 = vmatmul.bf16.gmra.mxu0 %v3057_v5  ;;  %3240 = vmatmul.bf16.gmra.mxu1 %v3057_v5  ;;  %v7879_v8 = vmul.f32 0.70710677, %v7866_v44  ;;  %v2941_v26 = vmul.f32 %v7869_v51, %v2940_v14  ;;  %v2800_v14 = vpop.xlane.xlu2 %2799 }
 0x6d8   : > { %v4127_v23 = vadd.f32 0.2548296, %v4095_v31  ;;  %v7887_v29 = vand.u32 2147483647, %v7874_v20  ;;  %v4413_v0 = vsub.f32 0.0, %v4349_v48  ;;  %v3261_v21 = vmul.f32 0.5, %v7721_v7 }
 0x6d9   : > { %v7882_v57 = vpop.eup %6496  ;;  %v4128_v42 = vadd.f32 0.2548296, %v4096_v27  ;;  %v4414_v63 = vsub.f32 0.0, %v4350_v1  ;;  %v7895_v50 = vand.u32 2147483647, %v7879_v8  ;;  %v3262_v31 = vmul.f32 0.5, %v7724_v13 }
 0x6da   : > { %v4159_v39 = vmul.f32 %v4127_v23, %v7825_v9  ;;  %v3361_v61 = vmul.f32 0.3275911, %v7887_v29  ;;  %v2950_v41 = vmul.f32 %v7882_v57, %v7841_v30  ;;  %v4445_v22 = vsel %vm4381_vm0, %v4349_v48, %v4413_v0 }
 0x6db   : > { %v6499_v46 = vpop.eup %6498  ;;  %v4160_v59 = vmul.f32 %v4128_v42, %v7828_v58  ;;  %v3362_v4 = vmul.f32 0.3275911, %v7895_v50  ;;  %v4446_v36 = vsel %vm4382_vm1, %v4350_v1, %v4414_v63  ;;  %v7907_v24 = vmul.f32 0.5, %v2941_v26  ;;  %v3179_v42 = vpop.f32.mrf.mxu0 }
 0x6dc   : > { %v6501_v17 = vpop.eup %6500  ;;  %v4319_v11 = vmul.f32 %v6499_v46, %v4159_v39  ;;  %v7898_v32 = vadd.f32 1.0, %v3361_v61  ;;  %v2951_v5 = vmul.f32 %v7882_v57, %v2950_v41  ;;  %v4477_v23 = vadd.f32 1.0, %v4445_v22  ;;  %v3228_v26 = vpop.f32.mrf.mxu1 }
 0x6dd   : > { %v4320_v9 = vmul.f32 %v6501_v17, %v4160_v59  ;;  %v7909_v15 = vadd.f32 1.0, %v3362_v4  ;;  %v3263_v48 = vmul.f32 0.5, %v7738_v28  ;;  %v4478_v7 = vadd.f32 1.0, %v4446_v36 }
 0x6de   : > { %v4351_v58 = vsub.f32 1.0, %v4319_v11  ;;  %6502 = vrcp.f32 %v7898_v32  ;;  %v3264_v0 = vmul.f32 0.5, %v7741_v35  ;;  %v2952_v61 = vmul.f32 0.5, %v2951_v5 }
 0x6df   : > { %v4352_v18 = vsub.f32 1.0, %v4320_v9  ;;  %6504 = vrcp.f32 %v7909_v15  ;;  %v2943_v28 = vsub.f32 1.5, %v7907_v24  ;;  %v2819_v19 = vmul.f32 %v2800_v14, %v7475_v12 }
 0x6e0   : > { %v4415_v27 = vsub.f32 0.0, %v4351_v58  ;;  %v7919_v59 = vadd.f32 %v3179_v42, %v7715_v38  ;;  %v4509_v41 = vmul.f32 %v4477_v23, %v3261_v21  ;;  %v4193_v11 = vsub.f32 0.0, %v7887_v29 }
 0x6e1   : > { %v4416_v33 = vsub.f32 0.0, %v4352_v18  ;;  %v7923_v9 = vmul.f32 %v4478_v7, %v3262_v31  ;;  %v3490_v4 = vand.u32 2147483647, %v7898_v32  ;;  %v3492_v22 = vand.u32 2147483648, %v7898_v32 }
 0x6e2   : > { %v4447_v1 = vsel %vm4383_vm2, %v4351_v58, %v4415_v27  ;;  %vm2946_vm4 = vweird.f32 %v7869_v51  ;;  %v2953_v36 = vsub.f32 1.5, %v2952_v61  ;;  %v7931_v21 = vmul.f32 0.70710677, %v7919_v59 }
 0x6e3   : > { %v4479_v13 = vadd.f32 1.0, %v4447_v1  ;;  %v4448_v39 = vsel %vm4384_vm3, %v4352_v18, %v4416_v33  ;;  %v4194_v31 = vsub.f32 0.0, %v7895_v50  ;;  %v7936_v24 = vadd.f32 1e-12, %v2819_v19  ;;  %vm7986_vm15 = vmor %vm2945_vm5, %vm2946_vm4 }
 0x6e4   : > { %v6503_v46 = vpop.eup %6502  ;;  %v4480_v63 = vadd.f32 1.0, %v4448_v39  ;;  %v7939_v23 = vadd.f32 %v3228_v26, %v7717_v47  ;;  %v7944_v14 = vand.u32 2147483647, %v7931_v21  ;;  %vm3486_vm7 = vweird.f32 %v7898_v32 }
 0x6e5   : > { %v4511_v17 = vmul.f32 %v4479_v13, %v3263_v48  ;;  %v3482_v6 = vmul.f32 %v6503_v46, %v7898_v32  ;;  %v6505_v5 = vpop.eup %6504  ;;  %vm3487_vm6 = vweird.f32 %v6503_v46  ;;  %vm7947_vm8 = vcmp.eq.f32.partialorder %v3490_v4, 8.507059e+37  ;;  %v2802_v13 = vpop.xlane.xlu1 %2801 }
 0x6e6   : > { %v7925_v35 = vmul.f32 %v4480_v63, %v3264_v0  ;;  %v3497_v33 = vmul.f32 %v6505_v5, %v7909_v15  ;;  %v3493_v7 = vor.u32 1.1754944e-38, %v3492_v22  ;;  %v7952_v1 = vmul.f32 0.70710677, %v7939_v23  ;;  %vm3488_vm9 = vmor %vm3486_vm7, %vm3487_vm6 }
 0x6e7   : > { %v4541_v58 = vpack.c.bf16 %v4511_v17, %v4509_v41  ;;  %v3483_v18 = vsub.f32 1.0, %v3482_v6  ;;  %v3505_v61 = vand.u32 2147483647, %v7909_v15  ;;  %v3363_v63 = vmul.f32 0.3275911, %v7944_v14 }
 0x6e8   : > { %v3498_v39 = vsub.f32 1.0, %v3497_v33  ;;  %vm3502_vm10 = vweird.f32 %v6505_v5  ;;  %v3507_v19 = vand.u32 2147483648, %v7909_v15  ;;  %6506 = vrsqrt.f32 %v7936_v24 }
 0x6e9   : > { %v3484_v48 = vmul.f32 %v6503_v46, %v3483_v18  ;;  %4697 = vmatmul.bf16.vlgmr.msra.gmra.mxu2 %v4541_v58  ;;  %v7959_v32 = vand.u32 2147483647, %v7952_v1  ;;  %v7961_v6 = vadd.f32 1.0, %v3363_v63  ;;  %v2820_v26 = vmul.f32 %v2802_v13, %v7475_v12 }
 0x6ea   : > { %v3499_v17 = vmul.f32 %v6505_v5, %v3498_v39  ;;  %v2944_v4 = vmul.f32 %v7869_v51, %v2943_v28  ;;  %vm2956_vm11 = vweird.f32 %v7882_v57  ;;  %vm3501_vm12 = vweird.f32 %v7909_v15 }
 0x6eb   : > { %v3485_v0 = vadd.f32 %v6503_v46, %v3484_v48  ;;  %v3364_v58 = vmul.f32 0.3275911, %v7959_v32  ;;  %v4225_v48 = vmul.f32 %v4193_v11, %v7887_v29  ;;  %v2954_v33 = vmul.f32 %v7882_v57, %v2953_v36  ;;  %vm3503_vm13 = vmor %vm3501_vm12, %vm3502_vm10 }
 0x6ec   : > { %v3508_v28 = vor.u32 1.1754944e-38, %v3507_v19  ;;  %v4226_v13 = vmul.f32 %v4194_v31, %v7895_v50  ;;  %6508 = vrcp.f32 %v7961_v6  ;;  %vm3506_vm14 = vcmp.eq.f32.partialorder %v3505_v61, 8.507059e+37 }
 0x6ed   : > { %v3489_v41 = vsel %vm3488_vm9, %v6503_v46, %v3485_v0  ;;  %v3500_v46 = vadd.f32 %v6505_v5, %v3499_v17  ;;  %v7978_v0 = vadd.f32 1e-12, %v2820_v26  ;;  %vm2955_vm0 = vweird.f32 %v7841_v30 }
 0x6ee   : > { %v7968_v22 = vsel %vm7947_vm8, %v3493_v7, %v3489_v41  ;;  %v7980_v39 = vpop.eup %6506  ;;  %v7993_v15 = vadd.f32 1.0, %v3364_v58  ;;  %v2948_v11 = vsel %vm7986_vm15, %v7869_v51, %v2944_v4  ;;  %vm8002_vm1 = vmor %vm2955_vm0, %vm2956_vm11  ;;  %v4263_v30 = vmul.f32 1.442695, %v4226_v13  ;;  %v2804_v4 = vpop.xlane.xlu0 %2803 }
 0x6ef   : > { %v3905_v18 = vmul.f32 1.0614054, %v7968_v22  ;;  %v3504_v7 = vsel %vm3503_vm13, %v6505_v5, %v3500_v46  ;;  %v4261_v5 = vmul.f32 1.442695, %v4225_v48  ;;  %v2958_v61 = vsel %vm8002_vm1, %v7882_v57, %v2954_v33 }
 0x6f0   : > { %v7991_v50 = vsel %vm3506_vm14, %v3508_v28, %v3504_v7  ;;  %6510 = vrcp.f32 %v7993_v15  ;;  %v3009_v41 = vmul.f32 %v2948_v11, %v7637_v10  ;;  %v2960_v17 = vmul.f32 %v7980_v39, %v7936_v24 }
 0x6f1   : > { %v3937_v42 = vadd.f32 -1.4531521, %v3905_v18  ;;  %v3906_v31 = vmul.f32 1.0614054, %v7991_v50  ;;  %6512 = vrsqrt.f32 %v7978_v0  ;;  %v4195_v26 = vsub.f32 0.0, %v7944_v14 }
 0x6f2   : > { %v6509_v19 = vpop.eup %6508  ;;  %6514 = vpow2.f32 %v4261_v5  ;;  %v3010_v48 = vmul.f32 %v2958_v61, %v7657_v45  ;;  %v3520_v46 = vand.u32 2147483647, %v7961_v6  ;;  %v3522_v10 = vand.u32 2147483648, %v7961_v6  ;;  %v8057_v45 = vld [vmem:[%s6856_s16] ss:$0 sm:$0xff] }
 0x6f3   : > { %v3969_v36 = vmul.f32 %v3937_v42, %v7968_v22  ;;  %v3938_v51 = vadd.f32 -1.4531521, %v3906_v31  ;;  %v3512_v57 = vmul.f32 %v6509_v19, %v7961_v6  ;;  %6516 = vpow2.f32 %v4263_v30 }
 0x6f4   : > { %v2821_v42 = vmul.f32 %v2804_v4, %v7475_v12  ;;  %v2961_v29 = vmul.f32 %v7980_v39, %v2960_v17  ;;  %vm3516_vm2 = vweird.f32 %v7961_v6  ;;  %v8025_v11 = vmul.f32 %v4195_v26, %v7944_v14 }
 0x6f5   : > { %v4001_v63 = vadd.f32 1.4214138, %v3969_v36  ;;  %v3970_v18 = vmul.f32 %v3938_v51, %v7991_v50  ;;  %v3513_v13 = vsub.f32 1.0, %v3512_v57  ;;  %vm3517_vm3 = vweird.f32 %v6509_v19  ;;  %v3182_v51 = vpop.f32.mrf.mxu0 }
 0x6f6   : > { %v6511_v7 = vpop.eup %6510  ;;  %vm8033_vm4 = vcmp.eq.f32.partialorder %v3520_v46, 8.507059e+37  ;;  %v3535_v14 = vand.u32 2147483647, %v7993_v15  ;;  %vm3518_vm5 = vmor %vm3516_vm2, %vm3517_vm3  ;;  %vm3531_vm7 = vweird.f32 %v7993_v15  ;;  %vm2966_vm10 = vweird.f32 %v7980_v39 }
 0x6f7   : > { %v4033_v58 = vmul.f32 %v4001_v63, %v7968_v22  ;;  %v4002_v28 = vadd.f32 1.4214138, %v3970_v18  ;;  %v8028_v36 = vpop.eup %6512  ;;  %v3514_v31 = vmul.f32 %v6509_v19, %v3513_v13  ;;  %v3527_v56 = vmul.f32 %v6511_v7, %v7993_v15 }
 0x6f8   : > { %v3523_v63 = vor.u32 1.1754944e-38, %v3522_v10  ;;  %v6515_v17 = vpop.eup %6514  ;;  %v3537_v18 = vand.u32 2147483648, %v7993_v15  ;;  %v2970_v46 = vmul.f32 %v8028_v36, %v7978_v0  ;;  %v8049_v13 = vadd.f32 %v3182_v51, %v7715_v38 }
 0x6f9   : > { %v4065_v33 = vadd.f32 -0.28449672, %v4033_v58  ;;  %v4034_v5 = vmul.f32 %v4002_v28, %v7991_v50  ;;  %v3515_v4 = vadd.f32 %v6509_v19, %v3514_v31  ;;  %v3528_v58 = vsub.f32 1.0, %v3527_v56  ;;  %v6517_v57 = vpop.eup %6516 }
 0x6fa   : > { %vm3532_vm6 = vweird.f32 %v6511_v7  ;;  %v2962_v51 = vmul.f32 0.5, %v2961_v29  ;;  %v3538_v61 = vor.u32 1.1754944e-38, %v3537_v18  ;;  %vm3536_vm9 = vcmp.eq.f32.partialorder %v3535_v14, 8.507059e+37 }
 0x6fb   : > { %v4097_v30 = vmul.f32 %v4065_v33, %v7968_v22  ;;  %v4066_v26 = vadd.f32 -0.28449672, %v4034_v5  ;;  %v8044_v33 = vld [vmem:[%s6850_s18] ss:$0 sm:$0xff]  ;;  %v3519_v31 = vsel %vm3518_vm5, %v6509_v19, %v3515_v4  ;;  %v3529_v56 = vmul.f32 %v6511_v7, %v3528_v58  ;;  %v6045_v19 = vld [vmem:[%s6873_s24 + $0x78] sm:$0xff]  ;;  %vm3533_vm8 = vmor %vm3531_vm7, %vm3532_vm6 }
 0x6fc   : > { %v3028_v10 = vmul.f32 %v8044_v33, %v3009_v41  ;;  %v3029_v28 = vmul.f32 %v8044_v33, %v3010_v48  ;;  %v8054_v27 = vsel %vm8033_vm4, %v3523_v63, %v3519_v31  ;;  %v8071_v4 = vmul.f32 0.70710677, %v8049_v13  ;;  %6273 = vmatpush.bf16.msra.mxu3 %v6045_v19  ;;  %4738 = vmatpush.bf16.msrb.mxu0 %v6045_v19  ;;  %v3231_v31 = vpop.f32.mrf.mxu1 }
 0x6fd   : > { %v4098_v5 = vmul.f32 %v4066_v26, %v7991_v50  ;;  %v4129_v6 = vadd.f32 0.2548296, %v4097_v30  ;;  %v3907_v37 = vmul.f32 1.0614054, %v8054_v27  ;;  %v3530_v26 = vadd.f32 %v6511_v7, %v3529_v56 }
 0x6fe   : > { %v8060_v41 = vadd.f32 %v8057_v45, %v3028_v10  ;;  %v8063_v48 = vadd.f32 %v8057_v45, %v3029_v28  ;;  %v8073_v29 = vadd.f32 1e-12, %v2821_v42  ;;  %v2971_v18 = vmul.f32 %v8028_v36, %v2970_v46  ;;  %v6044_v42 = vld [vmem:[%s6873_s24 + $0x70] sm:$0xff] }
 0x6ff   : > { %v4130_v30 = vadd.f32 0.2548296, %v4098_v5  ;;  %v3939_v58 = vadd.f32 -1.4531521, %v3907_v37  ;;  %v3534_v10 = vsel %vm3533_vm8, %v6511_v7, %v3530_v26  ;;  %v4161_v15 = vmul.f32 %v4129_v6, %v7968_v22 }
 0x700   : > { %9446 = vst [vmem:[#allocation24_spill] sm:$0xff] %v8060_v41  ;;  %v3058_v63 = vpack.c.bf16 %v8063_v48, %v8060_v41  ;;  %v8076_v28 = vsel %vm3536_vm9, %v3538_v61, %v3534_v10  ;;  %v8080_v5 = vand.u32 2147483647, %v8071_v4  ;;  %v2963_v56 = vsub.f32 1.5, %v2962_v51  ;;  %6274 = vmatpush.bf16.msra.mxu3 %v6044_v42  ;;  %4739 = vmatpush.bf16.msrb.mxu0 %v6044_v42  ;;  %v6042_v41 = vld [vmem:[%s6873_s24 + $0x60] sm:$0xff] }
 0x701   : > { %9447 = vst [vmem:[#allocation25_spill] sm:$0xff] %v8063_v48  ;;  %v3971_v37 = vmul.f32 %v3939_v58, %v8054_v27  ;;  %v3908_v7 = vmul.f32 1.0614054, %v8076_v28  ;;  %v4162_v14 = vmul.f32 %v4130_v30, %v7991_v50  ;;  %v9448_v46 = vsub.f32 0.0, %v7959_v32 }
 0x702   : > { %3196 = vmatmul.bf16.gmra.mxu0 %v3058_v63  ;;  %3245 = vmatmul.bf16.gmra.mxu1 %v3058_v63  ;;  %v3365_v22 = vmul.f32 0.3275911, %v8080_v5  ;;  %6518 = vrsqrt.f32 %v8073_v29  ;;  %v8091_v61 = vmul.f32 %v6515_v17, %v4161_v15  ;;  %v4265_v63 = vmul.f32 1.442695, %v8025_v11 }
 0x703   : > { %v4003_v6 = vadd.f32 1.4214138, %v3971_v37  ;;  %v3940_v26 = vadd.f32 -1.4531521, %v3908_v7  ;;  %v4228_v19 = vmul.f32 %v9448_v46, %v7959_v32  ;;  %v2972_v58 = vmul.f32 0.5, %v2971_v18 }
 0x704   : > { %v8094_v10 = vadd.f32 1.0, %v3365_v22  ;;  %v8097_v50 = vmul.f32 0.5, %v7858_v2  ;;  %v8100_v51 = vmul.f32 0.5, %v7866_v44  ;;  %v8104_v37 = vmul.f32 %v6517_v57, %v4162_v14  ;;  %v3184_v22 = vpop.f32.mrf.mxu0 }
 0x705   : > { %v4035_v30 = vmul.f32 %v4003_v6, %v8054_v27  ;;  %v3972_v32 = vmul.f32 %v3940_v26, %v8076_v28  ;;  %v8107_v17 = vmul.f32 %v7980_v39, %v2963_v56  ;;  %v4267_v2 = vmul.f32 1.442695, %v4228_v19 }
 0x706   : > { %6520 = vrcp.f32 %v8094_v10  ;;  %v8112_v18 = vadd.f32 %v3231_v31, %v7717_v47  ;;  %v4353_v44 = vsub.f32 1.0, %v8091_v61  ;;  %vm2965_vm11 = vweird.f32 %v7936_v24 }
 0x707   : > { %v4067_v11 = vadd.f32 -0.28449672, %v4035_v30  ;;  %v4004_v15 = vadd.f32 1.4214138, %v3972_v32  ;;  %6522 = vpow2.f32 %v4265_v63  ;;  %v2973_v57 = vsub.f32 1.5, %v2972_v58  ;;  %vm8120_vm14 = vmor %vm2965_vm11, %vm2966_vm10 }
 0x708   : > { %v8116_v7 = vpop.eup %6518  ;;  %vm4385_vm12 = vcmp.ge.f32.partialorder %v7874_v20, 0.0  ;;  %vm4386_vm13 = vcmp.ge.f32.partialorder %v7879_v8, 0.0  ;;  %v8125_v14 = vmul.f32 0.5, %v7919_v59  ;;  %v8129_v56 = vmul.f32 0.5, %v7939_v23  ;;  %v3233_v59 = vpop.f32.mrf.mxu1 }
 0x709   : > { %v4099_v31 = vmul.f32 %v4067_v11, %v8054_v27  ;;  %v4036_v24 = vmul.f32 %v4004_v15, %v8076_v28  ;;  %v4354_v6 = vsub.f32 1.0, %v8104_v37  ;;  %vm2975_vm15 = vweird.f32 %v7978_v0  ;;  %v6043_v37 = vld [vmem:[%s6873_s24 + $0x68] sm:$0xff] }
 0x70a   : > { %vm2976_vm0 = vweird.f32 %v8028_v36  ;;  %6524 = vpow2.f32 %v4267_v2  ;;  %v8140_v23 = vmul.f32 0.70710677, %v8112_v18  ;;  %v4417_v63 = vsub.f32 0.0, %v4353_v44  ;;  %6275 = vmatpush.bf16.msra.mxu3 %v6043_v37  ;;  %4740 = vmatpush.bf16.msrb.mxu0 %v6043_v37 }
 0x70b   : > { %v4131_v46 = vadd.f32 0.2548296, %v4099_v31  ;;  %v4068_v19 = vadd.f32 -0.28449672, %v4036_v24  ;;  %v8143_v58 = vmul.f32 %v8028_v36, %v2973_v57  ;;  %v2980_v30 = vmul.f32 %v8116_v7, %v8073_v29  ;;  %vm8188_vm5 = vmor %vm2975_vm15, %vm2976_vm0 }
 0x70c   : > { %v6521_v61 = vpop.eup %6520  ;;  %v8148_v32 = vadd.f32 %v3184_v22, %v7715_v38  ;;  %v8155_v31 = vadd.f32 %v3233_v59, %v7717_v47  ;;  %v4418_v57 = vsub.f32 0.0, %v4354_v6  ;;  %vm4387_vm1 = vcmp.ge.f32.partialorder %v7931_v21, 0.0 }
 0x70d   : > { %v4163_v11 = vmul.f32 %v4131_v46, %v8054_v27  ;;  %v4100_v15 = vmul.f32 %v4068_v19, %v8076_v28  ;;  %v3542_v2 = vmul.f32 %v6521_v61, %v8094_v10  ;;  %v6523_v24 = vpop.eup %6522  ;;  %v4197_v26 = vsub.f32 0.0, %v8080_v5 }
 0x70e   : > { %v8160_v22 = vand.u32 2147483647, %v8140_v23  ;;  %v8163_v48 = vmul.f32 0.70710677, %v8148_v32  ;;  %v3550_v59 = vand.u32 2147483647, %v8094_v10  ;;  %vm3547_vm3 = vweird.f32 %v6521_v61  ;;  %6276 = vmatpush.bf16.msra.mxu3 %v6042_v41  ;;  %4741 = vmatpush.bf16.msrb.mxu0 %v6042_v41 }
 0x70f   : > { %v4323_v27 = vmul.f32 %v6523_v24, %v4163_v11  ;;  %v4132_v46 = vadd.f32 0.2548296, %v4100_v15  ;;  %v3543_v19 = vsub.f32 1.0, %v3542_v2  ;;  %vm4388_vm2 = vcmp.ge.f32.partialorder %v7952_v1, 0.0 }
 0x710   : > { %v3552_v43 = vand.u32 2147483648, %v8094_v10  ;;  %v3366_v25 = vmul.f32 0.3275911, %v8160_v22  ;;  %v8171_v55 = vand.u32 2147483647, %v8163_v48  ;;  %v6525_v40 = vpop.eup %6524  ;;  %v4449_v2 = vsel %vm4385_vm12, %v4353_v44, %v4417_v63  ;;  %v6041_v44 = vld [vmem:[%s6873_s24 + $0x58] sm:$0xff] }
 0x711   : > { %v4355_v53 = vsub.f32 1.0, %v4323_v27  ;;  %v4164_v37 = vmul.f32 %v4132_v46, %v8076_v28  ;;  %v3544_v11 = vmul.f32 %v6521_v61, %v3543_v19  ;;  %v8175_v15 = vmul.f32 0.70710677, %v8155_v31  ;;  %v6039_v28 = vld [vmem:[%s6873_s24 + $0x48] sm:$0xff] }
 0x712   : > { %v4450_v24 = vsel %vm4386_vm13, %v4354_v6, %v4418_v57  ;;  %vm3546_vm4 = vweird.f32 %v8094_v10  ;;  %v8182_v52 = vadd.f32 1.0, %v3366_v25  ;;  %v3367_v8 = vmul.f32 0.3275911, %v8171_v55  ;;  %6277 = vmatpush.bf16.msra.mxu3 %v6041_v44  ;;  %4742 = vmatpush.bf16.msrb.mxu0 %v6041_v44 }
 0x713   : > { %v4419_v16 = vsub.f32 0.0, %v4355_v53  ;;  %v4324_v27 = vmul.f32 %v6525_v40, %v4164_v37  ;;  %v3545_v20 = vadd.f32 %v6521_v61, %v3544_v11  ;;  %vm3548_vm6 = vmor %vm3546_vm4, %vm3547_vm3  ;;  %v3553_v25 = vor.u32 1.1754944e-38, %v3552_v43  ;;  %v6040_v11 = vld [vmem:[%s6873_s24 + $0x50] sm:$0xff] }
 0x714   : > { %v4229_v10 = vmul.f32 %v4197_v26, %v8080_v5  ;;  %6526 = vrcp.f32 %v8182_v52  ;;  %v8198_v40 = vand.u32 2147483647, %v8175_v15  ;;  %v2978_v41 = vsel %vm8188_vm5, %v8028_v36, %v8143_v58 }
 0x715   : > { %v4356_v0 = vsub.f32 1.0, %v4324_v27  ;;  %v3549_v6 = vsel %vm3548_vm6, %v6521_v61, %v3545_v20  ;;  %vm3551_vm7 = vcmp.eq.f32.partialorder %v3550_v59, 8.507059e+37  ;;  %v4481_v63 = vadd.f32 1.0, %v4449_v2 }
 0x716   : > { %v4482_v57 = vadd.f32 1.0, %v4450_v24  ;;  %v2981_v43 = vmul.f32 %v8116_v7, %v2980_v30  ;;  %v8205_v46 = vsel %vm3551_vm7, %v3553_v25, %v3549_v6  ;;  %v4451_v5 = vsel %vm4387_vm1, %v4355_v53, %v4419_v16  ;;  %6278 = vmatpush.bf16.msra.mxu3 %v6040_v11  ;;  %4743 = vmatpush.bf16.msrb.mxu0 %v6040_v11 }
 0x717   : > { %v4420_v26 = vsub.f32 0.0, %v4356_v0  ;;  %v3909_v19 = vmul.f32 1.0614054, %v8205_v46  ;;  %v8210_v37 = vadd.f32 1.0, %v3367_v8  ;;  %v9453_v36 = vsel %vm8120_vm14, %v7980_v39, %v8107_v17 }
 0x718   : > { %v3011_v61 = vmul.f32 %v9453_v36, %v7663_v60  ;;  %v3012_v58 = vmul.f32 %v2978_v41, %v7670_v49  ;;  %v4269_v30 = vmul.f32 1.442695, %v4229_v10  ;;  %v3368_v59 = vmul.f32 0.3275911, %v8198_v40 }
 0x719   : > { %v4452_v53 = vsel %vm4388_vm2, %v4356_v0, %v4420_v26  ;;  %v3941_v16 = vadd.f32 -1.4531521, %v3909_v19  ;;  %v4198_v21 = vsub.f32 0.0, %v8160_v22  ;;  %6528 = vrcp.f32 %v8210_v37 }
 0x71a   : > { %v6527_v2 = vpop.eup %6526  ;;  %v4513_v42 = vmul.f32 %v4481_v63, %v8097_v50  ;;  %v4483_v24 = vadd.f32 1.0, %v4451_v5  ;;  %v4484_v39 = vadd.f32 1.0, %v4452_v53  ;;  %v8226_v60 = vmul.f32 0.5, %v2981_v43  ;;  %6279 = vmatpush.bf16.msra.mxu3 %v6039_v28  ;;  %4744 = vmatpush.bf16.msrb.mxu0 %v6039_v28  ;;  %v2806_v43 = vpop.xlane.xlu2 %2805  ;;  %v6038_v5 = vld [vmem:[%s6873_s24 + $0x40] sm:$0xff] }
 0x71b   : > { %v4514_v49 = vmul.f32 %v4482_v57, %v8100_v51  ;;  %v3973_v1 = vmul.f32 %v3941_v16, %v8205_v46  ;;  %v3557_v17 = vmul.f32 %v6527_v2, %v8182_v52  ;;  %v8231_v27 = vadd.f32 1.0, %v3368_v59 }
 0x71c   : > { %6530 = vpow2.f32 %v4269_v30  ;;  %v3567_v20 = vand.u32 2147483648, %v8182_v52  ;;  %v3030_v50 = vmul.f32 %v8044_v33, %v3011_v61  ;;  %v3031_v8 = vmul.f32 %v8044_v33, %v3012_v58 }
 0x71d   : > { %v4005_v44 = vadd.f32 1.4214138, %v3973_v1  ;;  %v3558_v25 = vsub.f32 1.0, %v3557_v17  ;;  %v8238_v10 = vmul.f32 %v4198_v21, %v8160_v22  ;;  %6532 = vrcp.f32 %v8231_v27 }
 0x71e   : > { %v4515_v51 = vmul.f32 %v4483_v24, %v8125_v14  ;;  %v4516_v0 = vmul.f32 %v4484_v39, %v8129_v56  ;;  %vm3561_vm8 = vweird.f32 %v8182_v52  ;;  %v4199_v41 = vsub.f32 0.0, %v8171_v55  ;;  %6280 = vmatpush.bf16.msra.mxu3 %v6038_v5  ;;  %4745 = vmatpush.bf16.msrb.mxu0 %v6038_v5 }
 0x71f   : > { %v6529_v6 = vpop.eup %6528  ;;  %v4037_v63 = vmul.f32 %v4005_v44, %v8205_v46  ;;  %v3559_v57 = vmul.f32 %v6527_v2, %v3558_v25  ;;  %vm3562_vm9 = vweird.f32 %v6527_v2  ;;  %v3565_v22 = vand.u32 2147483647, %v8182_v52 }
 0x720   : > { %v3568_v26 = vor.u32 1.1754944e-38, %v3567_v20  ;;  %v3572_v14 = vmul.f32 %v6529_v6, %v8210_v37  ;;  %v3580_v56 = vand.u32 2147483647, %v8210_v37  ;;  %v3582_v19 = vand.u32 2147483648, %v8210_v37  ;;  %vm3563_vm10 = vmor %vm3561_vm8, %vm3562_vm9 }
 0x721   : > { %v4069_v11 = vadd.f32 -0.28449672, %v4037_v63  ;;  %v3560_v36 = vadd.f32 %v6527_v2, %v3559_v57  ;;  %v8252_v61 = vadd.f32 %v8057_v45, %v3030_v50  ;;  %v8255_v58 = vadd.f32 %v8057_v45, %v3031_v8 }
 0x722   : > { %v6531_v30 = vpop.eup %6530  ;;  %v4544_v59 = vpack.c.bf16 %v4516_v0, %v4514_v49  ;;  %v3573_v53 = vsub.f32 1.0, %v3572_v14  ;;  %v2822_v16 = vmul.f32 %v2806_v43, %v7475_v12  ;;  %v4543_v21 = vpack.c.bf16 %v4515_v51, %v4513_v42 }
 0x723   : > { %v6533_v24 = vpop.eup %6532  ;;  %v4101_v39 = vmul.f32 %v4069_v11, %v8205_v46  ;;  %v3564_v1 = vsel %vm3563_vm10, %v6527_v2, %v3560_v36  ;;  %vm3566_vm11 = vcmp.eq.f32.partialorder %v3565_v22, 8.507059e+37  ;;  %v3059_v17 = vpack.c.bf16 %v8255_v58, %v8252_v61 }
 0x724   : > { %v8263_v28 = vsel %vm3566_vm11, %v3568_v26, %v3564_v1  ;;  %v3574_v49 = vmul.f32 %v6529_v6, %v3573_v53  ;;  %vm3577_vm12 = vweird.f32 %v6529_v6  ;;  %v3587_v52 = vmul.f32 %v6533_v24, %v8231_v27  ;;  %4702 = vmatmul.bf16.gmra.mxu2 %v4543_v21  ;;  %4751 = vmatmul.bf16.vlgmr.msra.gmra.mxu3 %v4544_v59 }
 0x725   : > { %v4133_v20 = vadd.f32 0.2548296, %v4101_v39  ;;  %v3910_v50 = vmul.f32 1.0614054, %v8263_v28  ;;  %vm3576_vm13 = vweird.f32 %v8210_v37  ;;  %3201 = vmatmul.bf16.gmra.mxu0 %v3059_v17  ;;  %3250 = vmatmul.bf16.gmra.mxu1 %v3059_v17  ;;  %v8268_v42 = vadd.f32 1e-12, %v2822_v16 }
 0x726   : > { %v3575_v2 = vadd.f32 %v6529_v6, %v3574_v49  ;;  %vm8270_vm14 = vcmp.eq.f32.partialorder %v3580_v56, 8.507059e+37  ;;  %v3583_v44 = vor.u32 1.1754944e-38, %v3582_v19  ;;  %v3588_v25 = vsub.f32 1.0, %v3587_v52  ;;  %vm3578_vm0 = vmor %vm3576_vm13, %vm3577_vm12  ;;  %v3187_v56 = vpop.f32.mrf.mxu0 }
 0x727   : > { %vm2986_vm15 = vweird.f32 %v8116_v7  ;;  %v3942_v51 = vadd.f32 -1.4531521, %v3910_v50  ;;  %v3595_v0 = vand.u32 2147483647, %v8231_v27  ;;  %v3597_v37 = vand.u32 2147483648, %v8231_v27 }
 0x728   : > { %6534 = vrsqrt.f32 %v8268_v42  ;;  %v4165_v63 = vmul.f32 %v4133_v20, %v8205_v46  ;;  %v3579_v57 = vsel %vm3578_vm0, %v6529_v6, %v3575_v2  ;;  %v3589_v22 = vmul.f32 %v6533_v24, %v3588_v25 }
 0x729   : > { %vm3592_vm1 = vweird.f32 %v6533_v24  ;;  %v2983_v43 = vsub.f32 1.5, %v8226_v60  ;;  %vm2985_vm2 = vweird.f32 %v8073_v29  ;;  %v3974_v5 = vmul.f32 %v3942_v51, %v8263_v28 }
 0x72a   : > { %v4271_v26 = vmul.f32 1.442695, %v8238_v10  ;;  %v8286_v14 = vsel %vm8270_vm14, %v3583_v44, %v3579_v57  ;;  %v3590_v11 = vadd.f32 %v6533_v24, %v3589_v22  ;;  %vm3591_vm3 = vweird.f32 %v8231_v27  ;;  %vm8327_vm6 = vmor %vm2985_vm2, %vm2986_vm15 }
 0x72b   : > { %v3911_v19 = vmul.f32 1.0614054, %v8286_v14  ;;  %v8291_v46 = vadd.f32 %v3187_v56, %v7715_v38  ;;  %v4006_v60 = vadd.f32 1.4214138, %v3974_v5  ;;  %v4231_v6 = vmul.f32 %v4199_v41, %v8171_v55  ;;  %vm3593_vm4 = vmor %vm3591_vm3, %vm3592_vm1 }
 0x72c   : > { %vm3596_vm5 = vcmp.eq.f32.partialorder %v3595_v0, 8.507059e+37  ;;  %v3598_v10 = vor.u32 1.1754944e-38, %v3597_v37  ;;  %v4325_v36 = vmul.f32 %v6531_v30, %v4165_v63  ;;  %v3594_v53 = vsel %vm3593_vm4, %v6533_v24, %v3590_v11  ;;  %v3236_v24 = vpop.f32.mrf.mxu1 }
 0x72d   : > { %v3943_v59 = vadd.f32 -1.4531521, %v3911_v19  ;;  %v8297_v16 = vmul.f32 0.70710677, %v8291_v46  ;;  %v2984_v27 = vmul.f32 %v8116_v7, %v2983_v43  ;;  %v4038_v39 = vmul.f32 %v4006_v60, %v8263_v28 }
 0x72e   : > { %v8299_v21 = vpop.eup %6534  ;;  %v8303_v1 = vsel %vm3596_vm5, %v3598_v10, %v3594_v53  ;;  %v4200_v17 = vsub.f32 0.0, %v8198_v40  ;;  %6536 = vpow2.f32 %v4271_v26  ;;  %v4273_v52 = vmul.f32 1.442695, %v4231_v6 }
 0x72f   : > { %v3975_v55 = vmul.f32 %v3943_v59, %v8286_v14  ;;  %v3912_v41 = vmul.f32 1.0614054, %v8303_v1  ;;  %v2990_v30 = vmul.f32 %v8299_v21, %v8268_v42  ;;  %v4070_v49 = vadd.f32 -0.28449672, %v4038_v39 }
 0x730   : > { %v8311_v20 = vand.u32 2147483647, %v8297_v16  ;;  %v8314_v50 = vadd.f32 %v3236_v24, %v7717_v47  ;;  %v4357_v2 = vsub.f32 1.0, %v4325_v36  ;;  %v4232_v0 = vmul.f32 %v4200_v17, %v8198_v40 }
 0x731   : > { %v4007_v8 = vadd.f32 1.4214138, %v3975_v55  ;;  %v3944_v44 = vadd.f32 -1.4531521, %v3912_v41  ;;  %v2991_v25 = vmul.f32 %v8299_v21, %v2990_v30  ;;  %v4102_v51 = vmul.f32 %v4070_v49, %v8263_v28 }
 0x732   : > { %v3369_v37 = vmul.f32 0.3275911, %v8311_v20  ;;  %v8321_v63 = vmul.f32 0.70710677, %v8314_v50  ;;  %v2988_v40 = vsel %vm8327_vm6, %v8116_v7, %v2984_v27  ;;  %v4421_v11 = vsub.f32 0.0, %v4357_v2 }
 0x733   : > { %v4039_v22 = vmul.f32 %v4007_v8, %v8286_v14  ;;  %v3976_v43 = vmul.f32 %v3944_v44, %v8303_v1  ;;  %v2992_v5 = vmul.f32 0.5, %v2991_v25  ;;  %v4134_v26 = vadd.f32 0.2548296, %v4102_v51  ;;  %v3189_v44 = vpop.f32.mrf.mxu0 }
 0x734   : > { %v8336_v56 = vadd.f32 1.0, %v3369_v37  ;;  %v8339_v19 = vand.u32 2147483647, %v8321_v63  ;;  %v6537_v29 = vpop.eup %6536  ;;  %6538 = vpow2.f32 %v4273_v52  ;;  %v3269_v10 = vmul.f32 0.5, %v8049_v13 }
 0x735   : > { %v4071_v60 = vadd.f32 -0.28449672, %v4039_v22  ;;  %v4008_v6 = vadd.f32 1.4214138, %v3976_v43  ;;  %v4166_v36 = vmul.f32 %v4134_v26, %v8263_v28  ;;  %v4275_v59 = vmul.f32 1.442695, %v4232_v0 }
 0x736   : > { %6540 = vrcp.f32 %v8336_v56  ;;  %vm4389_vm7 = vcmp.ge.f32.partialorder %v8071_v4, 0.0  ;;  %v2993_v27 = vsub.f32 1.5, %v2992_v5  ;;  %v3013_v39 = vmul.f32 %v2988_v40, %v7680_v34 }
 0x737   : > { %v4103_v7 = vmul.f32 %v4071_v60, %v8286_v14  ;;  %v4040_v53 = vmul.f32 %v4008_v6, %v8303_v1  ;;  %v8349_v17 = vmul.f32 0.5, %v8112_v18  ;;  %v4326_v55 = vmul.f32 %v6537_v29, %v4166_v36 }
 0x738   : > { %v3370_v13 = vmul.f32 0.3275911, %v8339_v19  ;;  %v4453_v41 = vsel %vm4389_vm7, %v4357_v2, %v4421_v11  ;;  %vm4390_vm8 = vcmp.ge.f32.partialorder %v8140_v23, 0.0  ;;  %v3271_v28 = vmul.f32 0.5, %v8148_v32 }
 0x739   : > { %v4135_v30 = vadd.f32 0.2548296, %v4103_v7  ;;  %v4072_v4 = vadd.f32 -0.28449672, %v4040_v53  ;;  %v4358_v24 = vsub.f32 1.0, %v4326_v55  ;;  %v8355_v49 = vmul.f32 0.5, %v8155_v31 }
 0x73a   : > { %6542 = vpow2.f32 %v4275_v59  ;;  %v8357_v52 = vadd.f32 1.0, %v3370_v13  ;;  %v6539_v34 = vpop.eup %6538  ;;  %v2994_v2 = vmul.f32 %v8299_v21, %v2993_v27  ;;  %vm2996_vm9 = vweird.f32 %v8299_v21 }
 0x73b   : > { %v4167_v18 = vmul.f32 %v4135_v30, %v8286_v14  ;;  %v4104_v8 = vmul.f32 %v4072_v4, %v8303_v1  ;;  %v4485_v25 = vadd.f32 1.0, %v4453_v41  ;;  %vm4391_vm10 = vcmp.ge.f32.partialorder %v8163_v48, 0.0 }
 0x73c   : > { %v6541_v32 = vpop.eup %6540  ;;  %v3610_v31 = vand.u32 2147483647, %v8336_v56  ;;  %6544 = vrcp.f32 %v8357_v52  ;;  %vm2995_vm11 = vweird.f32 %v8268_v42  ;;  %v4422_v37 = vsub.f32 0.0, %v4358_v24 }
 0x73d   : > { %v4327_v51 = vmul.f32 %v6539_v34, %v4167_v18  ;;  %v4136_v0 = vadd.f32 0.2548296, %v4104_v8  ;;  %v3602_v14 = vmul.f32 %v6541_v32, %v8336_v56  ;;  %vm4392_vm12 = vcmp.ge.f32.partialorder %v8175_v15, 0.0  ;;  %vm8369_vm13 = vmor %vm2995_vm11, %vm2996_vm9 }
 0x73e   : > { %v3612_v22 = vand.u32 2147483648, %v8336_v56  ;;  %v8375_v43 = vadd.f32 %v3189_v44, %v7715_v38  ;;  %v2998_v42 = vsel %vm8369_vm13, %v8299_v21, %v2994_v2  ;;  %v4517_v11 = vmul.f32 %v4485_v25, %v3269_v10 }
 0x73f   : > { %v4359_v5 = vsub.f32 1.0, %v4327_v51  ;;  %v4168_v40 = vmul.f32 %v4136_v0, %v8303_v1  ;;  %v3603_v26 = vsub.f32 1.0, %v3602_v14  ;;  %vm3606_vm14 = vweird.f32 %v8336_v56  ;;  %v3238_v1 = vpop.f32.mrf.mxu1 }
 0x740   : > { %v6543_v29 = vpop.eup %6542  ;;  %vm8382_vm15 = vcmp.eq.f32.partialorder %v3610_v31, 8.507059e+37  ;;  %v3032_v6 = vmul.f32 %v8044_v33, %v3013_v39  ;;  %vm3607_vm0 = vweird.f32 %v6541_v32  ;;  %v4454_v21 = vsel %vm4390_vm8, %v4358_v24, %v4422_v37 }
 0x741   : > { %v4423_v36 = vsub.f32 0.0, %v4359_v5  ;;  %v4328_v59 = vmul.f32 %v6543_v29, %v4168_v40  ;;  %v3604_v7 = vmul.f32 %v6541_v32, %v3603_v26  ;;  %v3014_v27 = vmul.f32 %v2998_v42, %v7697_v62  ;;  %vm3608_vm1 = vmor %vm3606_vm14, %vm3607_vm0 }
 0x742   : > { %v6545_v53 = vpop.eup %6544  ;;  %v3613_v10 = vor.u32 1.1754944e-38, %v3612_v22  ;;  %v8391_v55 = vmul.f32 0.70710677, %v8375_v43  ;;  %v3625_v23 = vand.u32 2147483647, %v8357_v52  ;;  %v8403_v62 = vadd.f32 %v3238_v1, %v7717_v47 }
 0x743   : > { %v4455_v13 = vsel %vm4391_vm10, %v4359_v5, %v4423_v36  ;;  %v4360_v41 = vsub.f32 1.0, %v4328_v59  ;;  %v3605_v39 = vadd.f32 %v6541_v32, %v3604_v7  ;;  %v3617_v30 = vmul.f32 %v6545_v53, %v8357_v52 }
 0x744   : > { %v4487_v4 = vadd.f32 1.0, %v4455_v13  ;;  %v8400_v24 = vand.u32 2147483647, %v8391_v55  ;;  %v3627_v8 = vand.u32 2147483648, %v8357_v52  ;;  %v3033_v25 = vmul.f32 %v8044_v33, %v3014_v27 }
 0x745   : > { %v4424_v34 = vsub.f32 0.0, %v4360_v41  ;;  %v3609_v18 = vsel %vm3608_vm1, %v6541_v32, %v3605_v39  ;;  %v3618_v48 = vsub.f32 1.0, %v3617_v30  ;;  %vm3622_vm2 = vweird.f32 %v6545_v53 }
 0x746   : > { %v4519_v2 = vmul.f32 %v4487_v4, %v3271_v28  ;;  %v8408_v44 = vsel %vm8382_vm15, %v3613_v10, %v3609_v18  ;;  %v3371_v56 = vmul.f32 0.3275911, %v8400_v24  ;;  %v4486_v32 = vadd.f32 1.0, %v4454_v21 }
 0x747   : > { %v4456_v31 = vsel %vm4392_vm12, %v4360_v41, %v4424_v34  ;;  %v3913_v51 = vmul.f32 1.0614054, %v8408_v44  ;;  %v3619_v0 = vmul.f32 %v6545_v53, %v3618_v48  ;;  %v8416_v28 = vmul.f32 0.70710677, %v8403_v62 }
 0x748   : > { %v4488_v14 = vadd.f32 1.0, %v4456_v31  ;;  %v3403_v37 = vadd.f32 1.0, %v3371_v56  ;;  %vm3621_vm3 = vweird.f32 %v8357_v52  ;;  %v4545_v5 = vpack.c.bf16 %v4519_v2, %v4517_v11 }
 0x749   : > { %v3945_v57 = vadd.f32 -1.4531521, %v3913_v51  ;;  %v3620_v22 = vadd.f32 %v6545_v53, %v3619_v0  ;;  %vm3623_vm4 = vmor %vm3621_vm3, %vm3622_vm2  ;;  %v3628_v15 = vor.u32 1.1754944e-38, %v3627_v8  ;;  %v8421_v40 = vadd.f32 %v8057_v45, %v3033_v25 }
 0x74a   : > { %v4520_v33 = vmul.f32 %v4488_v14, %v8355_v49  ;;  %6546 = vrcp.f32 %v3403_v37  ;;  %vm3626_vm5 = vcmp.eq.f32.partialorder %v3625_v23, 8.507059e+37  ;;  %v8425_v29 = vadd.f32 %v8057_v45, %v3032_v6  ;;  %4707 = vmatmul.bf16.gmra.mxu2 %v4545_v5 }
 0x74b   : > { %v3977_v42 = vmul.f32 %v3945_v57, %v8408_v44  ;;  %v3624_v26 = vsel %vm3623_vm4, %v6545_v53, %v3620_v22  ;;  %v4518_v60 = vmul.f32 %v4486_v32, %v8349_v17  ;;  %v4201_v52 = vsub.f32 0.0, %v8311_v20 }
 0x74c   : > { %v3629_v11 = vsel %vm3626_vm5, %v3628_v15, %v3624_v26  ;;  %v8430_v49 = vand.u32 2147483647, %v8416_v28  ;;  %v4202_v7 = vsub.f32 0.0, %v8339_v19  ;;  %v3060_v53 = vpack.c.bf16 %v8421_v40, %v8425_v29 }
 0x74d   : > { %v4009_v36 = vadd.f32 1.4214138, %v3977_v42  ;;  %v3914_v59 = vmul.f32 1.0614054, %v3629_v11  ;;  %v4546_v45 = vpack.c.bf16 %v4520_v33, %v4518_v60  ;;  %v4233_v27 = vmul.f32 %v4201_v52, %v8311_v20 }
 0x74e   : > { %v3372_v1 = vmul.f32 0.3275911, %v8430_v49  ;;  %3206 = vmatmul.bf16.gmra.mxu0 %v3060_v53  ;;  %3255 = vmatmul.bf16.gmra.mxu1 %v3060_v53  ;;  %v4234_v30 = vmul.f32 %v4202_v7, %v8339_v19  ;;  %v3642_v48 = vand.u32 2147483648, %v3403_v37  ;;  %v3640_v2 = vand.u32 2147483647, %v3403_v37 }
 0x74f   : > { %v4041_v6 = vmul.f32 %v4009_v36, %v8408_v44  ;;  %v3946_v21 = vadd.f32 -1.4531521, %v3914_v59  ;;  %4756 = vmatmul.bf16.gmra.mxu3 %v4546_v45  ;;  %v4277_v18 = vmul.f32 1.442695, %v4233_v27  ;;  %vm3636_vm7 = vweird.f32 %v3403_v37 }
 0x750   : > { %v6547_v17 = vpop.eup %6546  ;;  %v8438_v10 = vadd.f32 1.0, %v3372_v1  ;;  %v4279_v56 = vmul.f32 1.442695, %v4234_v30  ;;  %v3643_v19 = vor.u32 1.1754944e-38, %v3642_v48  ;;  %v4203_v32 = vsub.f32 0.0, %v8400_v24 }
 0x751   : > { %v4073_v13 = vadd.f32 -0.28449672, %v4041_v6  ;;  %v3978_v41 = vmul.f32 %v3946_v21, %v3629_v11  ;;  %v3632_v39 = vmul.f32 %v6547_v17, %v3403_v37  ;;  %vm3637_vm6 = vweird.f32 %v6547_v17 }
 0x752   : > { %6548 = vrcp.f32 %v8438_v10  ;;  %vm3638_vm8 = vmor %vm3636_vm7, %vm3637_vm6  ;;  %vm3641_vm9 = vcmp.eq.f32.partialorder %v3640_v2, 8.507059e+37  ;;  %v4235_v37 = vmul.f32 %v4203_v32, %v8400_v24  ;;  %v3657_v60 = vand.u32 2147483648, %v8438_v10 }
 0x753   : > { %v4105_v4 = vmul.f32 %v4073_v13, %v8408_v44  ;;  %v4010_v23 = vadd.f32 1.4214138, %v3978_v41  ;;  %v3633_v34 = vsub.f32 1.0, %v3632_v39  ;;  %6550 = vpow2.f32 %v4277_v18 }
 0x754   : > { %6552 = vpow2.f32 %v4279_v56  ;;  %v3192_v52 = vpop.f32.mrf.mxu0  ;;  %v3241_v36 = vpop.f32.mrf.mxu1  ;;  %v3655_v1 = vand.u32 2147483647, %v8438_v10  ;;  %vm3651_vm11 = vweird.f32 %v8438_v10  ;;  %v4281_v13 = vmul.f32 1.442695, %v4235_v37 }
 0x755   : > { %v4042_v8 = vmul.f32 %v4010_v23, %v3629_v11  ;;  %v3634_v20 = vmul.f32 %v6547_v17, %v3633_v34  ;;  %v4137_v25 = vadd.f32 0.2548296, %v4105_v4  ;;  %v8450_v6 = vadd.f32 %v3192_v52, %v7715_v38 }
 0x756   : > { %v3658_v41 = vor.u32 1.1754944e-38, %v3657_v60  ;;  %v9462_v39 = vpack.c.bf16 %v7925_v35, %v7923_v9  ;;  %vm3656_vm13 = vcmp.eq.f32.partialorder %v3655_v1, 8.507059e+37  ;;  %6554 = vpow2.f32 %v4281_v13 }
 0x757   : > { %v4074_v31 = vadd.f32 -0.28449672, %v4042_v8  ;;  %v3635_v51 = vadd.f32 %v6547_v17, %v3634_v20  ;;  %v4169_v33 = vmul.f32 %v4137_v25, %v8408_v44  ;;  %v8453_v44 = vadd.f32 %v3241_v36, %v7717_v47 }
 0x758   : > { %v6549_v0 = vpop.eup %6548  ;;  %vm4393_vm14 = vcmp.ge.f32.partialorder %v8297_v16, 0.0  ;;  %vm4394_vm15 = vcmp.ge.f32.partialorder %v8321_v63, 0.0  ;;  %v3275_v1 = vmul.f32 0.5, %v8375_v43  ;;  %vm4395_vm0 = vcmp.ge.f32.partialorder %v8391_v55, 0.0 }
 0x759   : > { %v4106_v14 = vmul.f32 %v4074_v31, %v3629_v11  ;;  %v3639_v57 = vsel %vm3638_vm8, %v6547_v17, %v3635_v51  ;;  %v3647_v22 = vmul.f32 %v6549_v0, %v8438_v10  ;;  %vm3652_vm10 = vweird.f32 %v6549_v0  ;;  %v6551_v53 = vpop.eup %6550 }
 0x75a   : > { %v3644_v5 = vsel %vm3641_vm9, %v3643_v19, %v3639_v57  ;;  %v4329_v21 = vmul.f32 %v6551_v53, %v4169_v33  ;;  %v6553_v27 = vpop.eup %6552  ;;  %vm3653_vm12 = vmor %vm3651_vm11, %vm3652_vm10  ;;  %v8463_v23 = vmul.f32 0.70710677, %v8453_v44  ;;  %v4204_v10 = vsub.f32 0.0, %v8430_v49 }
 0x75b   : > { %v4138_v15 = vadd.f32 0.2548296, %v4106_v14  ;;  %v3915_v42 = vmul.f32 1.0614054, %v3644_v5  ;;  %v3648_v26 = vsub.f32 1.0, %v3647_v22  ;;  %vm4396_vm9 = vcmp.ge.f32.partialorder %v8416_v28, 0.0 }
 0x75c   : > { %v4361_v8 = vsub.f32 1.0, %v4329_v21  ;;  %v8473_v20 = vand.u32 2147483647, %v8463_v23  ;;  %v3194_v32 = vpop.f32.mrf.mxu0  ;;  %v3243_v53 = vpop.f32.mrf.mxu1 }
 0x75d   : > { %v3947_v59 = vadd.f32 -1.4531521, %v3915_v42  ;;  %v3649_v7 = vmul.f32 %v6549_v0, %v3648_v26  ;;  %v4170_v45 = vmul.f32 %v4138_v15, %v3629_v11  ;;  %v8460_v11 = vmul.f32 0.70710677, %v8450_v6 }
 0x75e   : > { %4746 = vmatmul.bf16.vlgmr.msrb.gmra.mxu0 %v9462_v39  ;;  %v3374_v31 = vmul.f32 0.3275911, %v8473_v20  ;;  %v4425_v14 = vsub.f32 0.0, %v4361_v8  ;;  %v8483_v26 = vadd.f32 %v3194_v32, %v7715_v38  ;;  %v8496_v43 = vadd.f32 %v3243_v53, %v7717_v47 }
 0x75f   : > { %v3979_v17 = vmul.f32 %v3947_v59, %v3644_v5  ;;  %v3650_v24 = vadd.f32 %v6549_v0, %v3649_v7  ;;  %v4330_v34 = vmul.f32 %v6553_v27, %v4170_v45  ;;  %v8469_v48 = vand.u32 2147483647, %v8460_v11  ;;  %v6555_v59 = vpop.eup %6554 }
 0x760   : > { %v8479_v33 = vadd.f32 1.0, %v3374_v31  ;;  %v4457_v60 = vsel %vm4393_vm14, %v4361_v8, %v4425_v14  ;;  %v3273_v7 = vmul.f32 0.5, %v8291_v46  ;;  %v8492_v16 = vmul.f32 0.70710677, %v8483_v26 }
 0x761   : > { %v4011_v30 = vadd.f32 1.4214138, %v3979_v17  ;;  %v3654_v4 = vsel %vm3653_vm12, %v6549_v0, %v3650_v24  ;;  %v3373_v2 = vmul.f32 0.3275911, %v8469_v48  ;;  %v4362_v51 = vsub.f32 1.0, %v4330_v34 }
 0x762   : > { %v8465_v18 = vsel %vm3656_vm13, %v3658_v41, %v3654_v4  ;;  %v4236_v0 = vmul.f32 %v4204_v10, %v8430_v49  ;;  %v4489_v24 = vadd.f32 1.0, %v4457_v60  ;;  %v8500_v4 = vand.u32 2147483647, %v8492_v16 }
 0x763   : > { %v4043_v9 = vmul.f32 %v4011_v30, %v3644_v5  ;;  %v3916_v35 = vmul.f32 1.0614054, %v8465_v18  ;;  %v3405_v19 = vadd.f32 1.0, %v3373_v2  ;;  %v4426_v37 = vsub.f32 0.0, %v4362_v51 }
 0x764   : > { %v4283_v49 = vmul.f32 1.442695, %v4236_v0  ;;  %v3687_v2 = vand.u32 2147483648, %v8479_v33  ;;  %v8509_v0 = vmul.f32 0.70710677, %v8496_v43  ;;  %vm3681_vm6 = vweird.f32 %v8479_v33 }
 0x765   : > { %v4075_v56 = vadd.f32 -0.28449672, %v4043_v9  ;;  %v3948_v25 = vadd.f32 -1.4531521, %v3916_v35  ;;  %6556 = vrcp.f32 %v3405_v19  ;;  %vm3666_vm1 = vweird.f32 %v3405_v19 }
 0x766   : > { %6558 = vrcp.f32 %v8479_v33  ;;  %v3670_v41 = vand.u32 2147483647, %v3405_v19  ;;  %v3672_v39 = vand.u32 2147483648, %v3405_v19  ;;  %v3685_v9 = vand.u32 2147483647, %v8479_v33 }
 0x767   : > { %v4107_v57 = vmul.f32 %v4075_v56, %v3644_v5  ;;  %v3980_v22 = vmul.f32 %v3948_v25, %v8465_v18  ;;  %6560 = vpow2.f32 %v4283_v49  ;;  %v3375_v56 = vmul.f32 0.3275911, %v8500_v4 }
 0x768   : > { %vm3671_vm4 = vcmp.eq.f32.partialorder %v3670_v41, 8.507059e+37  ;;  %v3673_v55 = vor.u32 1.1754944e-38, %v3672_v39  ;;  %vm3686_vm8 = vcmp.eq.f32.partialorder %v3685_v9, 8.507059e+37  ;;  %v4205_v28 = vsub.f32 0.0, %v8469_v48 }
 0x769   : > { %v4139_v15 = vadd.f32 0.2548296, %v4107_v57  ;;  %v4012_v42 = vadd.f32 1.4214138, %v3980_v22  ;;  %v8511_v22 = vadd.f32 1.0, %v3375_v56 }
 0x76b   : > { %v4171_v52 = vmul.f32 %v4139_v15, %v3644_v5  ;;  %v4044_v36 = vmul.f32 %v4012_v42, %v8465_v18  ;;  %v6557_v17 = vpop.eup %6556  ;;  %v4458_v5 = vsel %vm4394_vm15, %v4362_v51, %v4426_v37  ;;  %v8514_v37 = vand.u32 2147483647, %v8509_v0 }
 0x76c   : > { %v6559_v27 = vpop.eup %6558  ;;  %v3662_v63 = vmul.f32 %v6557_v17, %v3405_v19  ;;  %vm3667_vm2 = vweird.f32 %v6557_v17  ;;  %6562 = vrcp.f32 %v8511_v22  ;;  %vm3696_vm11 = vweird.f32 %v8511_v22 }
 0x76d   : > { %v4331_v45 = vmul.f32 %v6555_v59, %v4171_v52  ;;  %v4076_v21 = vadd.f32 -0.28449672, %v4044_v36  ;;  %v3677_v30 = vmul.f32 %v6559_v27, %v8479_v33  ;;  %v6561_v32 = vpop.eup %6560  ;;  %vm3682_vm3 = vweird.f32 %v6559_v27  ;;  %vm3668_vm5 = vmor %vm3666_vm1, %vm3667_vm2 }
 0x76e   : > { %v3663_v8 = vsub.f32 1.0, %v3662_v63  ;;  %vm3683_vm7 = vmor %vm3681_vm6, %vm3682_vm3  ;;  %v3688_v36 = vor.u32 1.1754944e-38, %v3687_v2  ;;  %v4490_v33 = vadd.f32 1.0, %v4458_v5  ;;  %v3274_v63 = vmul.f32 0.5, %v8314_v50 }
 0x76f   : > { %v4363_v13 = vsub.f32 1.0, %v4331_v45  ;;  %v4108_v46 = vmul.f32 %v4076_v21, %v8465_v18  ;;  %v3678_v35 = vsub.f32 1.0, %v3677_v30  ;;  %v3376_v45 = vmul.f32 0.3275911, %v8514_v37 }
 0x770   : > { %v3664_v51 = vmul.f32 %v6557_v17, %v3663_v8  ;;  %v4521_v21 = vmul.f32 %v4489_v24, %v3273_v7  ;;  %v3276_v7 = vmul.f32 0.5, %v8403_v62  ;;  %v4522_v8 = vmul.f32 %v4490_v33, %v3274_v63 }
 0x771   : > { %v4427_v34 = vsub.f32 0.0, %v4363_v13  ;;  %v4140_v10 = vadd.f32 0.2548296, %v4108_v46  ;;  %v3679_v57 = vmul.f32 %v6559_v27, %v3678_v35  ;;  %v4206_v35 = vsub.f32 0.0, %v8473_v20 }
 0x772   : > { %v3665_v42 = vadd.f32 %v6557_v17, %v3664_v51  ;;  %v6563_v30 = vpop.eup %6562 }
 0x773   : > { %v4459_v25 = vsel %vm4395_vm0, %v4363_v13, %v4427_v34  ;;  %v4172_v31 = vmul.f32 %v4140_v10, %v8465_v18  ;;  %v3680_v18 = vadd.f32 %v6559_v27, %v3679_v57  ;;  %v3692_v10 = vmul.f32 %v6563_v30, %v8511_v22 }
 0x774   : > { %v4491_v14 = vadd.f32 1.0, %v4459_v25  ;;  %v3669_v52 = vsel %vm3668_vm5, %v6557_v17, %v3665_v42  ;;  %v8528_v17 = vadd.f32 1.0, %v3376_v45  ;;  %vm3697_vm10 = vweird.f32 %v6563_v30 }
 0x775   : > { %v4332_v15 = vmul.f32 %v6561_v32, %v4172_v31  ;;  %v8520_v59 = vsel %vm3671_vm4, %v3673_v55, %v3669_v52  ;;  %v3684_v53 = vsel %vm3683_vm7, %v6559_v27, %v3680_v18  ;;  %v3693_v62 = vsub.f32 1.0, %v3692_v10  ;;  %vm3698_vm12 = vmor %vm3696_vm11, %vm3697_vm10 }
 0x776   : > { %v4523_v49 = vmul.f32 %v4491_v14, %v3275_v1  ;;  %v3917_v13 = vmul.f32 1.0614054, %v8520_v59  ;;  %v8524_v46 = vsel %vm3686_vm8, %v3688_v36, %v3684_v53  ;;  %6564 = vrcp.f32 %v8528_v17 }
 0x777   : > { %v4364_v60 = vsub.f32 1.0, %v4332_v15  ;;  %v3918_v1 = vmul.f32 1.0614054, %v8524_v46  ;;  %v3700_v32 = vand.u32 2147483647, %v8511_v22  ;;  %v3702_v14 = vand.u32 2147483648, %v8511_v22 }
 0x778   : > { %v3949_v27 = vadd.f32 -1.4531521, %v3917_v13  ;;  %v4547_v39 = vpack.c.bf16 %v4523_v49, %v4521_v21  ;;  %v3694_v42 = vmul.f32 %v6563_v30, %v3693_v62  ;;  %v4237_v49 = vmul.f32 %v4205_v28, %v8469_v48 }
 0x779   : > { %v4428_v19 = vsub.f32 0.0, %v4364_v60  ;;  %v3950_v34 = vadd.f32 -1.4531521, %v3918_v1  ;;  %vm3701_vm13 = vcmp.eq.f32.partialorder %v3700_v32, 8.507059e+37  ;;  %v3703_v21 = vor.u32 1.1754944e-38, %v3702_v14 }
 0x77a   : > { %v3981_v5 = vmul.f32 %v3949_v27, %v8520_v59  ;;  %4712 = vmatmul.bf16.gmra.mxu2 %v4547_v39  ;;  %v3695_v53 = vadd.f32 %v6563_v30, %v3694_v42  ;;  %v3717_v22 = vand.u32 2147483648, %v8528_v17  ;;  %vm3711_vm15 = vweird.f32 %v8528_v17 }
 0x77b   : > { %v4460_v41 = vsel %vm4396_vm9, %v4364_v60, %v4428_v19  ;;  %v3982_v50 = vmul.f32 %v3950_v34, %v8524_v46  ;;  %v4238_v60 = vmul.f32 %v4206_v35, %v8473_v20  ;;  %v3715_v19 = vand.u32 2147483647, %v8528_v17 }
 0x77c   : > { %v4492_v24 = vadd.f32 1.0, %v4460_v41  ;;  %v4013_v56 = vadd.f32 1.4214138, %v3981_v5  ;;  %v6565_v18 = vpop.eup %6564  ;;  %v3699_v13 = vsel %vm3698_vm12, %v6563_v30, %v3695_v53  ;;  %v4285_v34 = vmul.f32 1.442695, %v4237_v49 }
 0x77d   : > { %v4014_v51 = vadd.f32 1.4214138, %v3982_v50  ;;  %v3707_v45 = vmul.f32 %v6565_v18, %v8528_v17  ;;  %v8562_v63 = vsel %vm3701_vm13, %v3703_v21, %v3699_v13  ;;  %vm3712_vm14 = vweird.f32 %v6565_v18 }
 0x77e   : > { %v4524_v9 = vmul.f32 %v4492_v24, %v3276_v7  ;;  %v4045_v15 = vmul.f32 %v4013_v56, %v8520_v59  ;;  %v3919_v39 = vmul.f32 1.0614054, %v8562_v63  ;;  %v4287_v30 = vmul.f32 1.442695, %v4238_v60  ;;  %vm3713_vm0 = vmor %vm3711_vm15, %vm3712_vm14 }
 0x77f   : > { %v3197_v2 = vpop.f32.mrf.mxu0  ;;  %v3246_v31 = vpop.f32.mrf.mxu1  ;;  %v4046_v36 = vmul.f32 %v4014_v51, %v8524_v46  ;;  %v3708_v33 = vsub.f32 1.0, %v3707_v45  ;;  %v3718_v50 = vor.u32 1.1754944e-38, %v3717_v22  ;;  %vm3716_vm1 = vcmp.eq.f32.partialorder %v3715_v19, 8.507059e+37 }
 0x780   : > { %v8539_v25 = vadd.f32 %v3197_v2, %v7715_v38  ;;  %v4548_v57 = vpack.c.bf16 %v4524_v9, %v4522_v8  ;;  %v8550_v52 = vadd.f32 %v3246_v31, %v7717_v47  ;;  %v4077_v20 = vadd.f32 -0.28449672, %v4045_v15 }
 0x781   : > { %v4078_v27 = vadd.f32 -0.28449672, %v4046_v36  ;;  %v3709_v7 = vmul.f32 %v6565_v18, %v3708_v33  ;;  %v3951_v10 = vadd.f32 -1.4531521, %v3919_v39  ;;  %v4207_v9 = vsub.f32 0.0, %v8500_v4 }
 0x782   : > { %v8545_v55 = vmul.f32 0.70710677, %v8539_v25  ;;  %4761 = vmatmul.bf16.gmra.mxu3 %v4548_v57  ;;  %v8560_v1 = vmul.f32 0.70710677, %v8550_v52  ;;  %v4109_v28 = vmul.f32 %v4077_v20, %v8520_v59  ;;  %v4208_v57 = vsub.f32 0.0, %v8514_v37 }
 0x783   : > { %v3710_v8 = vadd.f32 %v6565_v18, %v3709_v7  ;;  %v4110_v2 = vmul.f32 %v4078_v27, %v8524_v46  ;;  %v3983_v56 = vmul.f32 %v3951_v10, %v8562_v63  ;;  %v4239_v14 = vmul.f32 %v4207_v9, %v8500_v4 }
 0x784   : > { %v8557_v48 = vand.u32 2147483647, %v8545_v55  ;;  %v8568_v24 = vand.u32 2147483647, %v8560_v1  ;;  %v4141_v51 = vadd.f32 0.2548296, %v4109_v28  ;;  %v4240_v20 = vmul.f32 %v4208_v57, %v8514_v37 }
 0x785   : > { %v3714_v62 = vsel %vm3713_vm0, %v6565_v18, %v3710_v8  ;;  %v4015_v32 = vadd.f32 1.4214138, %v3983_v56  ;;  %v4142_v42 = vadd.f32 0.2548296, %v4110_v2  ;;  %v8593_v4 = vmul.f32 0.5, %v8450_v6 }
 0x786   : > { %v3377_v41 = vmul.f32 0.3275911, %v8557_v48  ;;  %v3378_v35 = vmul.f32 0.3275911, %v8568_v24  ;;  %v8580_v31 = vsel %vm3716_vm1, %v3718_v50, %v3714_v62  ;;  %v4173_v53 = vmul.f32 %v4141_v51, %v8520_v59 }
 0x787   : > { %v3920_v17 = vmul.f32 1.0614054, %v8580_v31  ;;  %v3199_v60 = vpop.f32.mrf.mxu0  ;;  %v4047_v18 = vmul.f32 %v4015_v32, %v8562_v63  ;;  %v4289_v19 = vmul.f32 1.442695, %v4239_v14  ;;  %v8600_v33 = vmul.f32 0.5, %v8453_v44  ;;  %v3248_v2 = vpop.f32.mrf.mxu1 }
 0x788   : > { %v8570_v5 = vadd.f32 1.0, %v3377_v41  ;;  %v8585_v15 = vadd.f32 1.0, %v3378_v35  ;;  %v8597_v13 = vadd.f32 %v3199_v60, %v7715_v38  ;;  %v4174_v22 = vmul.f32 %v4142_v42, %v8524_v46 }
 0x789   : > { %v3952_v49 = vadd.f32 -1.4531521, %v3920_v17  ;;  %v8604_v39 = vmul.f32 0.5, %v8483_v26  ;;  %v4079_v7 = vadd.f32 -0.28449672, %v4047_v18  ;;  %v4209_v8 = vsub.f32 0.0, %v8557_v48 }
 0x78a   : > { %6566 = vrcp.f32 %v8570_v5  ;;  %v3730_v6 = vand.u32 2147483647, %v8570_v5  ;;  %v4291_v46 = vmul.f32 1.442695, %v4240_v20  ;;  %v8613_v26 = vmul.f32 0.70710677, %v8597_v13 }
 0x78b   : > { %6568 = vpow2.f32 %v4285_v34  ;;  %v3984_v45 = vmul.f32 %v3952_v49, %v8580_v31  ;;  %v3732_v34 = vand.u32 2147483648, %v8570_v5  ;;  %vm3726_vm3 = vweird.f32 %v8570_v5 }
 0x78c   : > { %6570 = vpow2.f32 %v4287_v30  ;;  %v4111_v56 = vmul.f32 %v4079_v7, %v8562_v63  ;;  %v8621_v32 = vand.u32 2147483647, %v8613_v26  ;;  %vm4397_vm5 = vcmp.ge.f32.partialorder %v8460_v11, 0.0 }
 0x78d   : > { %6572 = vrcp.f32 %v8585_v15  ;;  %v4016_v41 = vadd.f32 1.4214138, %v3984_v45  ;;  %v3733_v51 = vor.u32 1.1754944e-38, %v3732_v34  ;;  %vm3731_vm6 = vcmp.eq.f32.partialorder %v3730_v6, 8.507059e+37 }
 0x78e   : > { %6574 = vpow2.f32 %v4289_v19  ;;  %v3379_v49 = vmul.f32 0.3275911, %v8621_v32  ;;  %v8630_v60 = vadd.f32 %v3248_v2, %v7717_v47  ;;  %vm4398_vm7 = vcmp.ge.f32.partialorder %v8463_v23, 0.0 }
 0x78f   : > { %v4048_v28 = vmul.f32 %v4016_v41, %v8580_v31  ;;  %v3745_v45 = vand.u32 2147483647, %v8585_v15  ;;  %v4143_v19 = vadd.f32 0.2548296, %v4111_v56  ;;  %vm3741_vm9 = vweird.f32 %v8585_v15 }
 0x790   : > { %v6567_v36 = vpop.eup %6566  ;;  %v8643_v34 = vmul.f32 0.70710677, %v8630_v60  ;;  %vm4399_vm12 = vcmp.ge.f32.partialorder %v8492_v16, 0.0  ;;  %vm4400_vm14 = vcmp.ge.f32.partialorder %v8509_v0, 0.0 }
 0x791   : > { %v3722_v21 = vmul.f32 %v6567_v36, %v8570_v5  ;;  %v6569_v27 = vpop.eup %6568  ;;  %vm3727_vm2 = vweird.f32 %v6567_v36  ;;  %v4080_v62 = vadd.f32 -0.28449672, %v4048_v28  ;;  %v3747_v5 = vand.u32 2147483648, %v8585_v15 }
 0x792   : > { %v6571_v37 = vpop.eup %6570  ;;  %v8608_v30 = vmul.f32 %v6569_v27, %v4173_v53  ;;  %vm3728_vm4 = vmor %vm3726_vm3, %vm3727_vm2  ;;  %vm3746_vm11 = vcmp.eq.f32.partialorder %v3745_v45, 8.507059e+37  ;;  %vm4401_vm3 = vcmp.ge.f32.partialorder %v8545_v55, 0.0 }
 0x793   : > { %v3723_v59 = vsub.f32 1.0, %v3722_v21  ;;  %v6573_v10 = vpop.eup %6572  ;;  %v8615_v9 = vmul.f32 %v6571_v37, %v4174_v22  ;;  %v4112_v20 = vmul.f32 %v4080_v62, %v8580_v31  ;;  %v8637_v22 = vadd.f32 1.0, %v3379_v49 }
 0x794   : > { %v3737_v35 = vmul.f32 %v6573_v10, %v8585_v15  ;;  %v4365_v17 = vsub.f32 1.0, %v8608_v30  ;;  %vm3742_vm8 = vweird.f32 %v6573_v10  ;;  %v3748_v6 = vor.u32 1.1754944e-38, %v3747_v5 }
 0x795   : > { %v3724_v44 = vmul.f32 %v6567_v36, %v3723_v59  ;;  %v4366_v21 = vsub.f32 1.0, %v8615_v9  ;;  %v4241_v59 = vmul.f32 %v4209_v8, %v8557_v48  ;;  %vm3743_vm10 = vmor %vm3741_vm9, %vm3742_vm8  ;;  %6576 = vrcp.f32 %v8637_v22 }
 0x796   : > { %v3738_v57 = vsub.f32 1.0, %v3737_v35  ;;  %v4429_v7 = vsub.f32 0.0, %v4365_v17  ;;  %v8646_v37 = vmul.f32 0.5, %v8496_v43  ;;  %v4175_v15 = vmul.f32 %v4143_v19, %v8562_v63 }
 0x797   : > { %v3725_v50 = vadd.f32 %v6567_v36, %v3724_v44  ;;  %v8650_v44 = vld [vmem:[%s6879_s3] ss:$0 sm:$0xff]  ;;  %v4430_v48 = vsub.f32 0.0, %v4366_v21  ;;  %v4144_v8 = vadd.f32 0.2548296, %v4112_v20  ;;  %6578 = vpow2.f32 %v4291_v46 }
 0x798   : > { %v3739_v53 = vmul.f32 %v6573_v10, %v3738_v57  ;;  %v8656_v35 = vmul.f32 0.5, %v8539_v25  ;;  %v4293_v56 = vmul.f32 1.442695, %v4241_v59  ;;  %v4210_v62 = vsub.f32 0.0, %v8568_v24 }
 0x799   : > { %v3729_v14 = vsel %vm3728_vm4, %v6567_v36, %v3725_v50  ;;  %v6575_v36 = vpop.eup %6574  ;;  %v4698_v50 = vpop.f32.mrf.mxu2  ;;  %v4462_v11 = vsel %vm4398_vm7, %v4366_v21, %v4430_v48  ;;  %v4176_v49 = vmul.f32 %v4144_v8, %v8580_v31  ;;  %vm3756_vm15 = vweird.f32 %v8637_v22 }
 0x79a   : > { %v8625_v42 = vsel %vm3731_vm6, %v3733_v51, %v3729_v14  ;;  %v3740_v27 = vadd.f32 %v6573_v10, %v3739_v53  ;;  %v8663_v51 = vand.u32 2147483647, %v8643_v34  ;;  %v8667_v14 = vmul.f32 0.5, %v8550_v52 }
 0x79b   : > { %v3921_v18 = vmul.f32 1.0614054, %v8625_v42  ;;  %v8670_v25 = vadd.f32 %v8650_v44, %v4698_v50  ;;  %v6577_v5 = vpop.eup %6576  ;;  %6580 = vpow2.f32 %v4293_v56  ;;  %v4242_v20 = vmul.f32 %v4210_v62, %v8568_v24 }
 0x79c   : > { %v3744_v28 = vsel %vm3743_vm10, %v6573_v10, %v3740_v27  ;;  %v4461_v10 = vsel %vm4397_vm5, %v4365_v17, %v4429_v7  ;;  %v4335_v17 = vmul.f32 %v6575_v36, %v4175_v15  ;;  %v3752_v52 = vmul.f32 %v6577_v5, %v8637_v22 }
 0x79d   : > { %v3953_v41 = vadd.f32 -1.4531521, %v3921_v18  ;;  %v8653_v9 = vsel %vm3746_vm11, %v3748_v6, %v3744_v28  ;;  %v3380_v18 = vmul.f32 0.3275911, %v8663_v51  ;;  %v4493_v53 = vadd.f32 1.0, %v4461_v10  ;;  %v6579_v23 = vpop.eup %6578 }
 0x79e   : > { %v3922_v43 = vmul.f32 1.0614054, %v8653_v9  ;;  %v4494_v36 = vadd.f32 1.0, %v4462_v11  ;;  %v3753_v27 = vsub.f32 1.0, %v3752_v52  ;;  %v4367_v6 = vsub.f32 1.0, %v4335_v17 }
 0x79f   : > { %v3985_v30 = vmul.f32 %v3953_v41, %v8625_v42  ;;  %v8679_v41 = vadd.f32 1.0, %v3380_v18  ;;  %v3762_v28 = vand.u32 2147483648, %v8637_v22  ;;  %v8689_v24 = vmul.f32 %v4493_v53, %v8593_v4 }
 0x7a0   : > { %v3954_v46 = vadd.f32 -1.4531521, %v3922_v43  ;;  %v3754_v48 = vmul.f32 %v6577_v5, %v3753_v27  ;;  %vm3757_vm13 = vweird.f32 %v6577_v5  ;;  %v3760_v15 = vand.u32 2147483647, %v8637_v22 }
 0x7a1   : > { %v4017_v2 = vadd.f32 1.4214138, %v3985_v30  ;;  %v4336_v30 = vmul.f32 %v6579_v23, %v4176_v49  ;;  %6582 = vrcp.f32 %v8679_v41  ;;  %v4295_v50 = vmul.f32 1.442695, %v4242_v20  ;;  %v6581_v62 = vpop.eup %6580  ;;  %vm3758_vm0 = vmor %vm3756_vm15, %vm3757_vm13 }
 0x7a2   : > { %v3202_v57 = vpop.f32.mrf.mxu0  ;;  %v3986_v19 = vmul.f32 %v3954_v46, %v8653_v9  ;;  %v3251_v7 = vpop.f32.mrf.mxu1  ;;  %v3755_v56 = vadd.f32 %v6577_v5, %v3754_v48  ;;  %v4211_v4 = vsub.f32 0.0, %v8621_v32  ;;  %v8706_v17 = vmul.f32 0.5, %v8597_v13 }
 0x7a3   : > { %v4049_v63 = vmul.f32 %v4017_v2, %v8625_v42  ;;  %v8682_v59 = vadd.f32 %v3202_v57, %v7715_v38  ;;  %v8696_v43 = vadd.f32 %v3251_v7, %v7717_v47  ;;  %v4368_v46 = vsub.f32 1.0, %v4336_v30 }
 0x7a4   : > { %v4018_v21 = vadd.f32 1.4214138, %v3986_v19  ;;  %v3763_v57 = vor.u32 1.1754944e-38, %v3762_v28  ;;  %v3759_v49 = vsel %vm3758_vm0, %v6577_v5, %v3755_v56  ;;  %vm3761_vm1 = vcmp.eq.f32.partialorder %v3760_v15, 8.507059e+37 }
 0x7a5   : > { %v4081_v45 = vadd.f32 -0.28449672, %v4049_v63  ;;  %v8693_v2 = vmul.f32 0.70710677, %v8682_v59  ;;  %v4431_v63 = vsub.f32 0.0, %v4367_v6  ;;  %v8712_v22 = vmul.f32 %v4494_v36, %v8600_v33 }
 0x7a6   : > { %v4050_v10 = vmul.f32 %v4018_v21, %v8653_v9  ;;  %v8709_v18 = vmul.f32 0.70710677, %v8696_v43  ;;  %v8715_v19 = vsel %vm3761_vm1, %v3763_v57, %v3759_v49  ;;  %6584 = vpow2.f32 %v4295_v50 }
 0x7a7   : > { %v4113_v31 = vmul.f32 %v4081_v45, %v8625_v42  ;;  %v8703_v11 = vand.u32 2147483647, %v8693_v2  ;;  %v6583_v53 = vpop.eup %6582  ;;  %v3923_v13 = vmul.f32 1.0614054, %v8715_v19  ;;  %v4463_v23 = vsel %vm4399_vm12, %v4367_v6, %v4431_v63 }
 0x7a8   : > { %v4082_v20 = vadd.f32 -0.28449672, %v4050_v10  ;;  %v3767_v5 = vmul.f32 %v6583_v53, %v8679_v41  ;;  %v4243_v21 = vmul.f32 %v4211_v4, %v8621_v32  ;;  %v4212_v27 = vsub.f32 0.0, %v8663_v51 }
 0x7a9   : > { %v4145_v8 = vadd.f32 0.2548296, %v4113_v31  ;;  %v3381_v52 = vmul.f32 0.3275911, %v8703_v11  ;;  %v4432_v31 = vsub.f32 0.0, %v4368_v46  ;;  %v3777_v15 = vand.u32 2147483648, %v8679_v41 }
 0x7aa   : > { %v3955_v36 = vadd.f32 -1.4531521, %v3923_v13  ;;  %v8727_v7 = vand.u32 2147483647, %v8709_v18  ;;  %v3204_v30 = vpop.f32.mrf.mxu0  ;;  %v3775_v48 = vand.u32 2147483647, %v8679_v41  ;;  %v4114_v16 = vmul.f32 %v4082_v20, %v8653_v9 }
 0x7ab   : > { %v4177_v45 = vmul.f32 %v4145_v8, %v8625_v42  ;;  %v8723_v33 = vadd.f32 1.0, %v3381_v52  ;;  %v3768_v42 = vsub.f32 1.0, %v3767_v5  ;;  %vm3772_vm2 = vweird.f32 %v6583_v53 }
 0x7ac   : > { %v3987_v32 = vmul.f32 %v3955_v36, %v8715_v19  ;;  %v4495_v8 = vadd.f32 1.0, %v4463_v23  ;;  %v4464_v50 = vsel %vm4400_vm14, %v4368_v46, %v4432_v31  ;;  %v4297_v10 = vmul.f32 1.442695, %v4243_v21  ;;  %v6585_v4 = vpop.eup %6584 }
 0x7ad   : > { %v4337_v28 = vmul.f32 %v6581_v62, %v4177_v45  ;;  %6586 = vrcp.f32 %v8723_v33  ;;  %v3769_v6 = vmul.f32 %v6583_v53, %v3768_v42  ;;  %v8737_v56 = vadd.f32 %v3204_v30, %v7715_v38 }
 0x7ae   : > { %v4019_v62 = vadd.f32 1.4214138, %v3987_v32  ;;  %vm3771_vm4 = vweird.f32 %v8679_v41  ;;  %v3382_v57 = vmul.f32 0.3275911, %v8727_v7  ;;  %vm3776_vm6 = vcmp.eq.f32.partialorder %v3775_v48, 8.507059e+37 }
 0x7af   : > { %v3770_v63 = vadd.f32 %v6583_v53, %v3769_v6  ;;  %v4369_v49 = vsub.f32 1.0, %v4337_v28  ;;  %vm3773_vm5 = vmor %vm3771_vm4, %vm3772_vm2  ;;  %v3778_v45 = vor.u32 1.1754944e-38, %v3777_v15  ;;  %v4244_v0 = vmul.f32 %v4212_v27, %v8663_v51 }
 0x7b0   : > { %v4146_v46 = vadd.f32 0.2548296, %v4114_v16  ;;  %v4051_v52 = vmul.f32 %v4019_v62, %v8715_v19  ;;  %v8744_v13 = vadd.f32 1.0, %v3382_v57  ;;  %v4527_v23 = vmul.f32 %v4495_v8, %v8604_v39 }
 0x7b1   : > { %v3774_v20 = vsel %vm3773_vm5, %v6583_v53, %v3770_v63  ;;  %v4496_v31 = vadd.f32 1.0, %v4464_v50  ;;  %v8750_v41 = vmul.f32 0.70710677, %v8737_v56  ;;  %6588 = vpow2.f32 %v4297_v10 }
 0x7b2   : > { %v8747_v21 = vsel %vm3776_vm6, %v3778_v45, %v3774_v20  ;;  %v4083_v36 = vadd.f32 -0.28449672, %v4051_v52  ;;  %v4433_v27 = vsub.f32 0.0, %v4369_v49  ;;  %v4299_v30 = vmul.f32 1.442695, %v4244_v0  ;;  %v3253_v20 = vpop.f32.mrf.mxu1 }
 0x7b3   : > { %v6587_v5 = vpop.eup %6586  ;;  %v3924_v42 = vmul.f32 1.0614054, %v8747_v21  ;;  %v4213_v53 = vsub.f32 0.0, %v8703_v11  ;;  %6590 = vrcp.f32 %v8744_v13  ;;  %v4178_v39 = vmul.f32 %v4146_v46, %v8653_v9 }
 0x7b4   : > { %v3782_v51 = vmul.f32 %v6587_v5, %v8723_v33  ;;  %v4115_v28 = vmul.f32 %v4083_v36, %v8715_v19  ;;  %v8759_v16 = vmul.f32 %v4496_v31, %v8646_v37  ;;  %v3790_v32 = vand.u32 2147483647, %v8723_v33 }
 0x7b5   : > { %v3956_v48 = vadd.f32 -1.4531521, %v3924_v42  ;;  %v3792_v6 = vand.u32 2147483648, %v8723_v33  ;;  %v8764_v8 = vand.u32 2147483647, %v8750_v41  ;;  %vm3787_vm7 = vweird.f32 %v6587_v5  ;;  %v8779_v42 = vpop.f32.mrf.mxu2 }
 0x7b6   : > { %v3783_v15 = vsub.f32 1.0, %v3782_v51  ;;  %v4147_v50 = vadd.f32 0.2548296, %v4115_v28  ;;  %v4465_v9 = vsel %vm4401_vm3, %v4369_v49, %v4433_v27  ;;  %vm3786_vm8 = vweird.f32 %v8723_v33 }
 0x7b7   : > { %v3988_v10 = vmul.f32 %v3956_v48, %v8747_v21  ;;  %v4245_v37 = vmul.f32 %v4213_v53, %v8703_v11  ;;  %v3383_v63 = vmul.f32 0.3275911, %v8764_v8  ;;  %v6589_v57 = vpop.eup %6588  ;;  %v8772_v45 = vmul.f32 %v6585_v4, %v4178_v39  ;;  %vm3788_vm9 = vmor %vm3786_vm8, %vm3787_vm7 }
 0x7b8   : > { %v3784_v62 = vmul.f32 %v6587_v5, %v3783_v15  ;;  %v4179_v0 = vmul.f32 %v4147_v50, %v8715_v19  ;;  %vm3791_vm10 = vcmp.eq.f32.partialorder %v3790_v32, 8.507059e+37  ;;  %v3793_v36 = vor.u32 1.1754944e-38, %v3792_v6 }
 0x7b9   : > { %v4020_v46 = vadd.f32 1.4214138, %v3988_v10  ;;  %v6591_v31 = vpop.eup %6590  ;;  %v8775_v55 = vadd.f32 1.0, %v3383_v63  ;;  %v4549_v33 = vpack.c.bf16 %v4527_v23, %v8689_v24  ;;  %v4497_v19 = vadd.f32 1.0, %v4465_v9 }
 0x7ba   : > { %v3785_v52 = vadd.f32 %v6587_v5, %v3784_v62  ;;  %v4339_v49 = vmul.f32 %v6589_v57, %v4179_v0  ;;  %v3797_v51 = vmul.f32 %v6591_v31, %v8744_v13  ;;  %v8786_v53 = vadd.f32 %v3253_v20, %v7717_v47 }
 0x7bb   : > { %v4052_v11 = vmul.f32 %v4020_v46, %v8747_v21  ;;  %6592 = vrcp.f32 %v8775_v55  ;;  %4717 = vmatmul.bf16.gmra.mxu2 %v4549_v33  ;;  %vm4403_vm11 = vcmp.ge.f32.partialorder %v8613_v26, 0.0  ;;  %v3805_v48 = vand.u32 2147483647, %v8744_v13 }
 0x7bc   : > { %v3789_v4 = vsel %vm3788_vm9, %v6587_v5, %v3785_v52  ;;  %6594 = vpow2.f32 %v4299_v30  ;;  %v3798_v39 = vsub.f32 1.0, %v3797_v51  ;;  %v4371_v28 = vsub.f32 1.0, %v4339_v49 }
 0x7bd   : > { %v8782_v27 = vsel %vm3791_vm10, %v3793_v36, %v3789_v4  ;;  %v4084_v24 = vadd.f32 -0.28449672, %v4052_v11  ;;  %v8790_v5 = vmul.f32 1.442695, %v4245_v37  ;;  %v3807_v15 = vand.u32 2147483648, %v8744_v13  ;;  %v4703_v4 = vpop.f32.mrf.mxu2 }
 0x7be   : > { %v3925_v23 = vmul.f32 1.0614054, %v8782_v27  ;;  %v3799_v50 = vmul.f32 %v6591_v31, %v3798_v39  ;;  %vm3802_vm12 = vweird.f32 %v6591_v31  ;;  %v8796_v10 = vmul.f32 %v4497_v19, %v8656_v35 }
 0x7bf   : > { %v4116_v32 = vmul.f32 %v4084_v24, %v8747_v21  ;;  %v4370_v30 = vsub.f32 1.0, %v8772_v45  ;;  %v4214_v62 = vsub.f32 0.0, %v8727_v7  ;;  %v8801_v9 = vmul.f32 0.70710677, %v8786_v53 }
 0x7c0   : > { %v3957_v6 = vadd.f32 -1.4531521, %v3925_v23  ;;  %v3800_v57 = vadd.f32 %v6591_v31, %v3799_v50  ;;  %vm3801_vm13 = vweird.f32 %v8744_v13  ;;  %v4435_v46 = vsub.f32 0.0, %v4371_v28 }
 0x7c1   : > { %v4148_v37 = vadd.f32 0.2548296, %v4116_v32  ;;  %v6593_v0 = vpop.eup %6592  ;;  %vm3803_vm14 = vmor %vm3801_vm13, %vm3802_vm12  ;;  %v3808_v52 = vor.u32 1.1754944e-38, %v3807_v15  ;;  %v8806_v35 = vand.u32 2147483647, %v8801_v9  ;;  %v4550_v20 = vpack.c.bf16 %v8759_v16, %v8712_v22 }
 0x7c2   : > { %v3989_v63 = vmul.f32 %v3957_v6, %v8782_v27  ;;  %v6595_v36 = vpop.eup %6594  ;;  %v3804_v49 = vsel %vm3803_vm14, %v6591_v31, %v3800_v57  ;;  %vm3806_vm15 = vcmp.eq.f32.partialorder %v3805_v48, 8.507059e+37  ;;  %v3812_v11 = vmul.f32 %v6593_v0, %v8775_v55 }
 0x7c3   : > { %vm4402_vm0 = vcmp.ge.f32.partialorder %v8560_v1, 0.0  ;;  %v8812_v13 = vsel %vm3806_vm15, %v3808_v52, %v3804_v49  ;;  %v3820_v51 = vand.u32 2147483647, %v8775_v55  ;;  %v4215_v19 = vsub.f32 0.0, %v8764_v8  ;;  %4766 = vmatmul.bf16.gmra.mxu3 %v4550_v20  ;;  %v4752_v52 = vpop.f32.mrf.mxu3 }
 0x7c4   : > { %v4021_v33 = vadd.f32 1.4214138, %v3989_v63  ;;  %v3384_v24 = vmul.f32 0.3275911, %v8806_v35  ;;  %v4180_v22 = vmul.f32 %v4148_v37, %v8747_v21  ;;  %v3926_v31 = vmul.f32 1.0614054, %v8812_v13 }
 0x7c5   : > { %v3813_v23 = vsub.f32 1.0, %v3812_v11  ;;  %v4467_v39 = vsel %vm4403_vm11, %v4371_v28, %v4435_v46  ;;  %v3822_v48 = vand.u32 2147483648, %v8775_v55  ;;  %v4704_v32 = vadd.f32 %v8650_v44, %v4703_v4 }
 0x7c6   : > { %v4053_v16 = vmul.f32 %v4021_v33, %v8782_v27  ;;  %v8823_v15 = vadd.f32 1.0, %v3384_v24  ;;  %v3958_v50 = vadd.f32 -1.4531521, %v3926_v31  ;;  %vm3817_vm1 = vweird.f32 %v6593_v0 }
 0x7c7   : > { %v3814_v63 = vmul.f32 %v6593_v0, %v3813_v23  ;;  %v4434_v21 = vsub.f32 0.0, %v4370_v30  ;;  %v4246_v37 = vmul.f32 %v4214_v62, %v8727_v7  ;;  %vm3816_vm2 = vweird.f32 %v8775_v55 }
 0x7c8   : > { %v4085_v6 = vadd.f32 -0.28449672, %v4053_v16  ;;  %6596 = vrcp.f32 %v8823_v15  ;;  %v4340_v26 = vmul.f32 %v6595_v36, %v4180_v22  ;;  %v3990_v57 = vmul.f32 %v3958_v50, %v8812_v13  ;;  %vm3818_vm3 = vmor %vm3816_vm2, %vm3817_vm1 }
 0x7c9   : > { %v3815_v46 = vadd.f32 %v6593_v0, %v3814_v63  ;;  %v4499_v20 = vadd.f32 1.0, %v4467_v39  ;;  %v3823_v33 = vor.u32 1.1754944e-38, %v3822_v48  ;;  %v4247_v49 = vmul.f32 %v4215_v19, %v8764_v8 }
 0x7ca   : > { %v4117_v28 = vmul.f32 %v4085_v6, %v8782_v27  ;;  %v4753_v11 = vadd.f32 %v4752_v52, %v4704_v32  ;;  %v4022_v24 = vadd.f32 1.4214138, %v3990_v57  ;;  %vm3821_vm4 = vcmp.eq.f32.partialorder %v3820_v51, 8.507059e+37 }
 0x7cb   : > { %v3819_v7 = vsel %vm3818_vm3, %v6593_v0, %v3815_v46  ;;  %v3207_v55 = vpop.f32.mrf.mxu0  ;;  %v3256_v62 = vpop.f32.mrf.mxu1  ;;  %vm4404_vm5 = vcmp.ge.f32.partialorder %v8643_v34, 0.0  ;;  %6598 = vpow2.f32 %v8790_v5  ;;  %v4303_v36 = vmul.f32 1.442695, %v4246_v37 }
 0x7cc   : > { %v4149_v4 = vadd.f32 0.2548296, %v4117_v28  ;;  %v8836_v22 = vsel %vm3821_vm4, %v3823_v33, %v3819_v7  ;;  %v8839_v16 = vadd.f32 %v4753_v11, %v7647_v54  ;;  %v4466_v8 = vsel %vm4402_vm0, %v4370_v30, %v4434_v21 }
 0x7cd   : > { %v4372_v19 = vsub.f32 1.0, %v4340_v26  ;;  %v4054_v0 = vmul.f32 %v4022_v24, %v8812_v13  ;;  %v3927_v51 = vmul.f32 1.0614054, %v8836_v22  ;;  %v4531_v23 = vmul.f32 %v4499_v20, %v8706_v17 }
 0x7ce   : > { %v6597_v31 = vpop.eup %6596  ;;  %v4305_v5 = vmul.f32 1.442695, %v4247_v49  ;;  %4809 = vadd.xlane.f32.xlu2 %v8839_v16  ;;  %v8850_v39 = vadd.f32 %v3207_v55, %v7715_v38  ;;  %v8853_v54 = vadd.f32 %v3256_v62, %v7717_v47  ;;  %v4181_v1 = vmul.f32 %v4149_v4, %v8782_v27 }
 0x7cf   : > { %v4086_v45 = vadd.f32 -0.28449672, %v4054_v0  ;;  %v3959_v30 = vadd.f32 -1.4531521, %v3927_v51  ;;  %v3827_v48 = vmul.f32 %v6597_v31, %v8823_v15  ;;  %6600 = vpow2.f32 %v4303_v36 }
 0x7d0   : > { %v3835_v32 = vand.u32 2147483647, %v8823_v15  ;;  %v4216_v17 = vsub.f32 0.0, %v8806_v35  ;;  %v8860_v6 = vmul.f32 0.70710677, %v8850_v39  ;;  %v4436_v50 = vsub.f32 0.0, %v4372_v19 }
 0x7d1   : > { %v4118_v63 = vmul.f32 %v4086_v45, %v8812_v13  ;;  %v3991_v21 = vmul.f32 %v3959_v30, %v8836_v22  ;;  %v3828_v37 = vsub.f32 1.0, %v3827_v48  ;;  %v6599_v26 = vpop.eup %6598  ;;  %v3837_v27 = vand.u32 2147483648, %v8823_v15 }
 0x7d2   : > { %v8866_v28 = vand.u32 2147483647, %v8860_v6  ;;  %v8869_v57 = vmul.f32 0.70710677, %v8853_v54  ;;  %v4551_v46 = vpack.c.bf16 %v4531_v23, %v8796_v10  ;;  %v4341_v52 = vmul.f32 %v6599_v26, %v4181_v1 }
 0x7d3   : > { %v4023_v20 = vadd.f32 1.4214138, %v3991_v21  ;;  %v3829_v33 = vmul.f32 %v6597_v31, %v3828_v37  ;;  %vm3832_vm6 = vweird.f32 %v6597_v31  ;;  %v4150_v49 = vadd.f32 0.2548296, %v4118_v63  ;;  %v4705_v21 = vpop.f32.mrf.mxu2 }
 0x7d4   : > { %6602 = vpow2.f32 %v4305_v5  ;;  %v3385_v11 = vmul.f32 0.3275911, %v8866_v28  ;;  %v8874_v4 = vand.u32 2147483647, %v8869_v57  ;;  %4722 = vmatmul.bf16.gmra.mxu2 %v4551_v46  ;;  %v4468_v24 = vsel %vm4404_vm5, %v4372_v19, %v4436_v50 }
 0x7d5   : > { %v4055_v7 = vmul.f32 %v4023_v20, %v8836_v22  ;;  %v3830_v55 = vadd.f32 %v6597_v31, %v3829_v33  ;;  %vm3831_vm7 = vweird.f32 %v8823_v15  ;;  %v6601_v10 = vpop.eup %6600  ;;  %v3838_v62 = vor.u32 1.1754944e-38, %v3837_v27 }
 0x7d6   : > { %vm3833_vm8 = vmor %vm3831_vm7, %vm3832_vm6  ;;  %v4248_v36 = vmul.f32 %v4216_v17, %v8806_v35  ;;  %v8881_v0 = vadd.f32 1.0, %v3385_v11  ;;  %v3386_v51 = vmul.f32 0.3275911, %v8874_v4  ;;  %v4373_v23 = vsub.f32 1.0, %v4341_v52 }
 0x7d7   : > { %v4087_v5 = vadd.f32 -0.28449672, %v4055_v7  ;;  %v3834_v1 = vsel %vm3833_vm8, %v6597_v31, %v3830_v55  ;;  %vm3836_vm9 = vcmp.eq.f32.partialorder %v3835_v32, 8.507059e+37  ;;  %v4500_v34 = vadd.f32 1.0, %v4468_v24  ;;  %v3258_v24 = vpop.f32.mrf.mxu1 }
 0x7d8   : > { %v4182_v19 = vmul.f32 %v4150_v49, %v8812_v13  ;;  %v8885_v45 = vsel %vm3836_vm9, %v3838_v62, %v3834_v1  ;;  %6604 = vrcp.f32 %v8881_v0  ;;  %v4498_v15 = vadd.f32 1.0, %v4466_v8 }
 0x7d9   : > { %v3284_v30 = vmul.f32 0.5, %v8630_v60  ;;  %v4119_v35 = vmul.f32 %v4087_v5, %v8836_v22  ;;  %v3928_v48 = vmul.f32 1.0614054, %v8885_v45  ;;  %v8893_v50 = vadd.f32 %v8650_v44, %v8779_v42 }
 0x7da   : > { %v6603_v17 = vpop.eup %6602  ;;  %v8896_v31 = vmul.f32 0.5, %v8682_v59  ;;  %v4307_v13 = vmul.f32 1.442695, %v4248_v36  ;;  %v8898_v32 = vadd.f32 1.0, %v3386_v51  ;;  %vm4405_vm10 = vcmp.ge.f32.partialorder %v8693_v2, 0.0  ;;  %v8927_v51 = vpop.f32.mrf.mxu3 }
 0x7db   : > { %v4437_v8 = vsub.f32 0.0, %v4373_v23  ;;  %v4151_v63 = vadd.f32 0.2548296, %v4119_v35  ;;  %v3960_v60 = vadd.f32 -1.4531521, %v3928_v48  ;;  %v4532_v37 = vmul.f32 %v4500_v34, %v3284_v30  ;;  %v8938_v48 = vpop.f32.mrf.mxu2 }
 0x7dc   : > { %v8902_v26 = vmul.f32 0.5, %v8696_v43  ;;  %v8904_v27 = vmul.f32 %v6601_v10, %v4182_v19  ;;  %v8907_v42 = vmul.f32 0.5, %v8737_v56  ;;  %v4530_v59 = vmul.f32 %v4498_v15, %v8667_v14  ;;  %v3209_v56 = vpop.f32.mrf.mxu0 }
 0x7dd   : > { %v4183_v46 = vmul.f32 %v4151_v63, %v8836_v22  ;;  %v3992_v52 = vmul.f32 %v3960_v60, %v8885_v45  ;;  %6606 = vrcp.f32 %v8898_v32  ;;  %vm4407_vm11 = vcmp.ge.f32.partialorder %v8750_v41, 0.0 }
 0x7de   : > { %v6605_v20 = vpop.eup %6604  ;;  %v8915_v33 = vmul.f32 0.5, %v8786_v53  ;;  %6608 = vpow2.f32 %v4307_v13  ;;  %v8918_v43 = vadd.f32 %v8650_v44, %v4705_v21  ;;  %v4469_v14 = vsel %vm4405_vm10, %v4373_v23, %v4437_v8 }
 0x7df   : > { %v4343_v49 = vmul.f32 %v6603_v17, %v4183_v46  ;;  %v4024_v22 = vadd.f32 1.4214138, %v3992_v52  ;;  %v3842_v11 = vmul.f32 %v6605_v20, %v8881_v0  ;;  %v4374_v7 = vsub.f32 1.0, %v8904_v27 }
 0x7e0   : > { %v3850_v55 = vand.u32 2147483647, %v8881_v0  ;;  %v3852_v53 = vand.u32 2147483648, %v8881_v0  ;;  %v4552_v10 = vpack.c.bf16 %v4532_v37, %v4530_v59  ;;  %v8930_v2 = vadd.f32 %v3209_v56, %v7715_v38 }
 0x7e1   : > { %v4375_v62 = vsub.f32 1.0, %v4343_v49  ;;  %v4056_v36 = vmul.f32 %v4024_v22, %v8885_v45  ;;  %v3843_v5 = vsub.f32 1.0, %v3842_v11  ;;  %v4501_v23 = vadd.f32 1.0, %v4469_v14 }
 0x7e2   : > { %vm3846_vm12 = vweird.f32 %v8881_v0  ;;  %v4217_v1 = vsub.f32 0.0, %v8866_v28  ;;  %4771 = vmatmul.bf16.gmra.mxu3 %v4552_v10  ;;  %v8935_v34 = vadd.f32 %v3258_v24, %v7717_v47  ;;  %vm4406_vm13 = vcmp.ge.f32.partialorder %v8709_v18, 0.0  ;;  %v8972_v10 = vpop.f32.mrf.mxu3 }
 0x7e3   : > { %v6607_v19 = vpop.eup %6606  ;;  %v4439_v15 = vsub.f32 0.0, %v4375_v62  ;;  %v4088_v30 = vadd.f32 -0.28449672, %v4056_v36  ;;  %v3844_v35 = vmul.f32 %v6605_v20, %v3843_v5  ;;  %vm3847_vm14 = vweird.f32 %v6605_v20 }
 0x7e4   : > { %v6609_v38 = vpop.eup %6608  ;;  %v4438_v17 = vsub.f32 0.0, %v4374_v7  ;;  %vm8940_vm15 = vcmp.eq.f32.partialorder %v3850_v55, 8.507059e+37  ;;  %v3857_v8 = vmul.f32 %v6607_v19, %v8898_v32  ;;  %v8946_v47 = vmul.f32 0.70710677, %v8930_v2  ;;  %vm3848_vm0 = vmor %vm3846_vm12, %vm3847_vm14 }
 0x7e5   : > { %v4120_v63 = vmul.f32 %v4088_v30, %v8885_v45  ;;  %v3845_v60 = vadd.f32 %v6605_v20, %v3844_v35  ;;  %v3853_v21 = vor.u32 1.1754944e-38, %v3852_v53  ;;  %v8950_v37 = vmul.f32 0.70710677, %v8935_v34 }
 0x7e6   : > { %v4471_v27 = vsel %vm4407_vm11, %v4375_v62, %v4439_v15  ;;  %v3858_v59 = vsub.f32 1.0, %v3857_v8  ;;  %v3865_v46 = vand.u32 2147483647, %v8898_v32  ;;  %v8958_v52 = vand.u32 2147483647, %v8946_v47  ;;  %v4747_v62 = vpop.f32.mrf.mxu0 }
 0x7e7   : > { %v4152_v56 = vadd.f32 0.2548296, %v4120_v63  ;;  %v3849_v14 = vsel %vm3848_vm0, %v6605_v20, %v3845_v60  ;;  %v3867_v49 = vand.u32 2147483648, %v8898_v32  ;;  %v8962_v22 = vand.u32 2147483647, %v8950_v37 }
 0x7e8   : > { %v8966_v41 = vsel %vm8940_vm15, %v3853_v21, %v3849_v14  ;;  %v3859_v11 = vmul.f32 %v6607_v19, %v3858_v59  ;;  %vm3862_vm1 = vweird.f32 %v6607_v19  ;;  %v3387_v0 = vmul.f32 0.3275911, %v8958_v52 }
 0x7e9   : > { %v4503_v24 = vadd.f32 1.0, %v4471_v27  ;;  %v4184_v55 = vmul.f32 %v4152_v56, %v8885_v45  ;;  %v3929_v53 = vmul.f32 1.0614054, %v8966_v41  ;;  %v3388_v20 = vmul.f32 0.3275911, %v8962_v22 }
 0x7ea   : > { %v3860_v36 = vadd.f32 %v6607_v19, %v3859_v11  ;;  %vm3861_vm2 = vweird.f32 %v8898_v32  ;;  %v4218_v5 = vsub.f32 0.0, %v8874_v4  ;;  %v8976_v15 = vadd.f32 1.0, %v3387_v0 }
 0x7eb   : > { %v4344_v30 = vmul.f32 %v6609_v38, %v4184_v55  ;;  %v3961_v35 = vadd.f32 -1.4531521, %v3929_v53  ;;  %vm3863_vm3 = vmor %vm3861_vm2, %vm3862_vm1  ;;  %v3868_v13 = vor.u32 1.1754944e-38, %v3867_v49  ;;  %v8978_v8 = vadd.f32 1.0, %v3388_v20  ;;  %v4710_v38 = vpop.f32.mrf.mxu2 }
 0x7ec   : > { %v4470_v45 = vsel %vm4406_vm13, %v4374_v7, %v4438_v17  ;;  %v3864_v63 = vsel %vm3863_vm3, %v6607_v19, %v3860_v36  ;;  %vm3866_vm4 = vcmp.eq.f32.partialorder %v3865_v46, 8.507059e+37  ;;  %6610 = vrcp.f32 %v8976_v15 }
 0x7ed   : > { %v4535_v60 = vmul.f32 %v4503_v24, %v8907_v42  ;;  %v4376_v32 = vsub.f32 1.0, %v4344_v30  ;;  %v3993_v21 = vmul.f32 %v3961_v35, %v8966_v41  ;;  %v8985_v27 = vsel %vm3866_vm4, %v3868_v13, %v3864_v63 }
 0x7ee   : > { %v4249_v59 = vmul.f32 %v4217_v1, %v8866_v28  ;;  %v3930_v56 = vmul.f32 1.0614054, %v8985_v27  ;;  %v4250_v14 = vmul.f32 %v4218_v5, %v8874_v4  ;;  %6612 = vrcp.f32 %v8978_v8 }
 0x7ef   : > { %v4533_v18 = vmul.f32 %v4501_v23, %v8896_v31  ;;  %v4502_v7 = vadd.f32 1.0, %v4470_v45  ;;  %v4440_v19 = vsub.f32 0.0, %v4376_v32  ;;  %v4025_v17 = vadd.f32 1.4214138, %v3993_v21 }
 0x7f0   : > { %vm4408_vm5 = vcmp.ge.f32.partialorder %v8801_v9, 0.0  ;;  %v3962_v42 = vadd.f32 -1.4531521, %v3930_v56  ;;  %v4748_v46 = vadd.f32 %v4747_v62, %v8670_v25  ;;  %v4711_v49 = vadd.f32 %v8650_v44, %v4710_v38 }
 0x7f1   : > { %v4472_v11 = vsel %vm4408_vm5, %v4376_v32, %v4440_v19  ;;  %v4755_v28 = vadd.f32 %v8927_v51, %v8918_v43  ;;  %v4057_v4 = vmul.f32 %v4025_v17, %v8966_v41  ;;  %v4553_v1 = vpack.c.bf16 %v4535_v60, %v4533_v18  ;;  %v4759_v43 = vpop.f32.mrf.mxu3  ;;  %v4749_v51 = vpop.f32.mrf.mxu0  ;;  %v9466_v18 = vld [vmem:[#allocation16_spill] sm:$0xff] }
 0x7f2   : > { %v6611_v0 = vpop.eup %6610  ;;  %v4504_v24 = vadd.f32 1.0, %v4472_v11  ;;  %v4309_v31 = vmul.f32 1.442695, %v4249_v59  ;;  %v3994_v23 = vmul.f32 %v3962_v42, %v8985_v27  ;;  %v8999_v55 = vmul.f32 1.442695, %v4250_v14 }
 0x7f3   : > { %v4534_v9 = vmul.f32 %v4502_v7, %v8902_v26  ;;  %v3872_v25 = vmul.f32 %v6611_v0, %v8976_v15  ;;  %vm3876_vm6 = vweird.f32 %v8976_v15  ;;  %v4709_v53 = vadd.f32 %v8650_v44, %v8938_v48  ;;  %4727 = vmatmul.bf16.gmra.mxu2 %v4553_v1 }
 0x7f4   : > { %v6613_v20 = vpop.eup %6612  ;;  %v4536_v62 = vmul.f32 %v4504_v24, %v8915_v33  ;;  %v4026_v36 = vadd.f32 1.4214138, %v3994_v23  ;;  %v4760_v5 = vadd.f32 %v4759_v43, %v4711_v49  ;;  %v9008_v30 = vadd.f32 %v4748_v46, %v7620_v3  ;;  %v9465_v3 = vld [vmem:[#allocation19_spill] sm:$0xff] }
 0x7f5   : > { %v4089_v35 = vadd.f32 -0.28449672, %v4057_v4  ;;  %v3873_v26 = vsub.f32 1.0, %v3872_v25  ;;  %v3880_v13 = vand.u32 2147483647, %v8976_v15  ;;  %v3887_v45 = vmul.f32 %v6613_v20, %v8978_v8 }
 0x7f6   : > { %v4058_v63 = vmul.f32 %v4026_v36, %v8985_v27  ;;  %v3882_v48 = vand.u32 2147483648, %v8976_v15  ;;  %v4554_v60 = vpack.c.bf16 %v4536_v62, %v4534_v9  ;;  %4805 = vadd.xlane.f32.xlu1 %v9008_v30  ;;  %v4750_v33 = vadd.f32 %v4749_v51, %v8893_v50  ;;  %v9467_v15 = vld [vmem:[#allocation17_spill] sm:$0xff] }
 0x7f7   : > { %v3874_v32 = vmul.f32 %v6611_v0, %v3873_v26  ;;  %vm3877_vm7 = vweird.f32 %v6611_v0  ;;  %v3888_v21 = vsub.f32 1.0, %v3887_v45  ;;  %v9017_v38 = vadd.f32 %v4760_v5, %v9465_v3  ;;  %v9468_v26 = vld [vmem:[#allocation18_spill] sm:$0xff] }
 0x7f8   : > { %v4090_v59 = vadd.f32 -0.28449672, %v4058_v63  ;;  %v3895_v56 = vand.u32 2147483647, %v8978_v8  ;;  %v3897_v14 = vand.u32 2147483648, %v8978_v8  ;;  %4776 = vmatmul.bf16.gmra.mxu3 %v4554_v60  ;;  %v9022_v7 = vadd.f32 %v4750_v33, %v9466_v18  ;;  %vm3878_vm9 = vmor %vm3876_vm6, %vm3877_vm7  ;;  %v9469_v60 = vld [vmem:[#allocation20_spill] sm:$0xff] }
 0x7f9   : > { %v4121_v19 = vmul.f32 %v4089_v35, %v8966_v41  ;;  %v3875_v17 = vadd.f32 %v6611_v0, %v3874_v32  ;;  %v3889_v42 = vmul.f32 %v6613_v20, %v3888_v21  ;;  %vm3892_vm8 = vweird.f32 %v6613_v20  ;;  %4815 = vadd.xlane.f32.xlu2 %v9017_v38 }
 0x7fa   : > { %vm3881_vm10 = vcmp.eq.f32.partialorder %v3880_v13, 8.507059e+37  ;;  %v3883_v50 = vor.u32 1.1754944e-38, %v3882_v48  ;;  %v4219_v46 = vsub.f32 0.0, %v8958_v52  ;;  %v4758_v49 = vadd.f32 %v8972_v10, %v4709_v53  ;;  %4807 = vadd.xlane.f32.xlu0 %v9022_v7 }
 0x7fb   : > { %v4122_v4 = vmul.f32 %v4090_v59, %v8985_v27  ;;  %v3879_v1 = vsel %vm3878_vm9, %v6611_v0, %v3875_v17  ;;  %v3890_v24 = vadd.f32 %v6613_v20, %v3889_v42  ;;  %vm3891_vm11 = vweird.f32 %v8978_v8 }
 0x7fc   : > { %v3884_v23 = vsel %vm3881_vm10, %v3883_v50, %v3879_v1  ;;  %vm3893_vm12 = vmor %vm3891_vm11, %vm3892_vm8  ;;  %v3898_v9 = vor.u32 1.1754944e-38, %v3897_v14  ;;  %v9034_v25 = vadd.f32 %v4755_v28, %v9467_v15  ;;  %v4153_v51 = vadd.f32 0.2548296, %v4121_v19  ;;  %v9470_v1 = vld [vmem:[#allocation21_spill] sm:$0xff] }
 0x7fd   : > { %v4713_v11 = vpop.f32.mrf.mxu2  ;;  %v3931_v62 = vmul.f32 1.0614054, %v3884_v23  ;;  %v3894_v10 = vsel %vm3893_vm12, %v6613_v20, %v3890_v24  ;;  %vm3896_vm13 = vcmp.eq.f32.partialorder %v3895_v56, 8.507059e+37  ;;  %6614 = vpow2.f32 %v4309_v31 }
 0x7fe   : > { %v4714_v43 = vadd.f32 %v8650_v44, %v4713_v11  ;;  %v3899_v53 = vsel %vm3896_vm13, %v3898_v9, %v3894_v10  ;;  %v4220_v36 = vsub.f32 0.0, %v8962_v22  ;;  %4811 = vadd.xlane.f32.xlu1 %v9034_v25  ;;  %v4154_v0 = vadd.f32 0.2548296, %v4122_v4 }
 0x7ff   : > { %v3963_v8 = vadd.f32 -1.4531521, %v3931_v62  ;;  %v3932_v5 = vmul.f32 1.0614054, %v3899_v53  ;;  %6616 = vpow2.f32 %v8999_v55  ;;  %v4251_v28 = vmul.f32 %v4219_v46, %v8958_v52 }
 0x800   : > { %v9042_v13 = vadd.f32 %v4758_v49, %v9468_v26  ;;  %v4185_v20 = vmul.f32 %v4153_v51, %v8966_v41  ;;  %v4252_v48 = vmul.f32 %v4220_v36, %v8962_v22  ;;  %v4186_v55 = vmul.f32 %v4154_v0, %v8985_v27 }
 0x801   : > { %v3995_v31 = vmul.f32 %v3963_v8, %v3884_v23  ;;  %v3964_v63 = vadd.f32 -1.4531521, %v3932_v5  ;;  %v4313_v59 = vmul.f32 1.442695, %v4251_v28  ;;  %vm4409_vm14 = vcmp.ge.f32.partialorder %v8860_v6, 0.0 }
 0x802   : > { %4813 = vadd.xlane.f32.xlu0 %v9042_v13  ;;  %v4315_v17 = vmul.f32 1.442695, %v4252_v48  ;;  %vm4410_vm15 = vcmp.ge.f32.partialorder %v8869_v57, 0.0  ;;  %vm4411_vm0 = vcmp.ge.f32.partialorder %v8946_v47, 0.0  ;;  %vm4412_vm1 = vcmp.ge.f32.partialorder %v8950_v37, 0.0 }
 0x803   : > { %v4027_v21 = vadd.f32 1.4214138, %v3995_v31  ;;  %v3996_v52 = vmul.f32 %v3964_v63, %v3899_v53  ;;  %v6615_v3 = vpop.eup %6614  ;;  %6618 = vpow2.f32 %v4313_v59 }
 0x804   : > { %v4345_v14 = vmul.f32 %v6615_v3, %v4185_v20  ;;  %6620 = vpow2.f32 %v4315_v17  ;;  %v3292_v3 = vmul.f32 0.5, %v8935_v34 }
 0x805   : > { %v4762_v35 = vpop.f32.mrf.mxu3  ;;  %v4715_v32 = vpop.f32.mrf.mxu2  ;;  %v4059_v41 = vmul.f32 %v4027_v21, %v3884_v23  ;;  %v4028_v18 = vadd.f32 1.4214138, %v3996_v52 }
 0x806   : > { %v4763_v45 = vadd.f32 %v4762_v35, %v4714_v43  ;;  %v4716_v56 = vadd.f32 %v8650_v44, %v4715_v32  ;;  %v6617_v19 = vpop.eup %6616  ;;  %v4377_v27 = vsub.f32 1.0, %v4345_v14 }
 0x807   : > { %v4346_v22 = vmul.f32 %v6617_v19, %v4186_v55  ;;  %v4091_v42 = vadd.f32 -0.28449672, %v4059_v41  ;;  %v4060_v50 = vmul.f32 %v4028_v18, %v3899_v53  ;;  %v3290_v55 = vmul.f32 0.5, %v8853_v54 }
 0x808   : > { %v9048_v33 = vadd.f32 %v4763_v45, %v9469_v60  ;;  %v4441_v43 = vsub.f32 0.0, %v4377_v27 }
 0x809   : > { %v4123_v11 = vmul.f32 %v4091_v42, %v3884_v23  ;;  %v4092_v4 = vadd.f32 -0.28449672, %v4060_v50  ;;  %v4378_v44 = vsub.f32 1.0, %v4346_v22  ;;  %v6619_v10 = vpop.eup %6618  ;;  %v9471_v22 = vld [vmem:[#allocation22_spill] sm:$0xff] }
 0x80a   : > { %4817 = vadd.xlane.f32.xlu1 %v9048_v33  ;;  %v6621_v5 = vpop.eup %6620  ;;  %v4473_v35 = vsel %vm4409_vm14, %v4377_v27, %v4441_v43 }
 0x80b   : > { %v4155_v9 = vadd.f32 0.2548296, %v4123_v11  ;;  %v4124_v15 = vmul.f32 %v4092_v4, %v3899_v53  ;;  %v4442_v36 = vsub.f32 0.0, %v4378_v44  ;;  %v4505_v63 = vadd.f32 1.0, %v4473_v35 }
 0x80d   : > { %v4764_v46 = vpop.f32.mrf.mxu3  ;;  %v4187_v51 = vmul.f32 %v4155_v9, %v3884_v23  ;;  %v4156_v62 = vadd.f32 0.2548296, %v4124_v15  ;;  %v4474_v45 = vsel %vm4410_vm15, %v4378_v44, %v4442_v36  ;;  %v3289_v23 = vmul.f32 0.5, %v8850_v39  ;;  %v9473_v9 = vld [vmem:[#allocation24_spill] sm:$0xff] }
 0x80e   : > { %v4765_v49 = vadd.f32 %v4764_v46, %v4716_v56  ;;  %v4506_v32 = vadd.f32 1.0, %v4474_v45  ;;  %v9472_v46 = vld [vmem:[#allocation23_spill] sm:$0xff] }
 0x80f   : > { %v4347_v0 = vmul.f32 %v6619_v10, %v4187_v51  ;;  %v4188_v8 = vmul.f32 %v4156_v62, %v3899_v53  ;;  %v3291_v53 = vmul.f32 0.5, %v8930_v2  ;;  %v4537_v21 = vmul.f32 %v4505_v63, %v3289_v23  ;;  %v6656_v2 = vld [vmem:[%s6879_s3] ss:$0 sm:$0xff]  ;;  %v9474_v10 = vld [vmem:[#allocation25_spill] sm:$0xff] }
 0x810   : > { %v9054_v24 = vadd.f32 %v4765_v49, %v9470_v1  ;;  %v4538_v47 = vmul.f32 %v4506_v32, %v3290_v55 }
 0x811   : > { %v4379_v28 = vsub.f32 1.0, %v4347_v0  ;;  %v4348_v26 = vmul.f32 %v6621_v5, %v4188_v8 }
 0x812   : > { %4819 = vadd.xlane.f32.xlu0 %v9054_v24 }
 0x813   : > { %v4443_v20 = vsub.f32 0.0, %v4379_v28  ;;  %v4380_v31 = vsub.f32 1.0, %v4348_v26 }
 0x815   : > { %v4475_v48 = vsel %vm4411_vm0, %v4379_v28, %v4443_v20  ;;  %v4444_v60 = vsub.f32 0.0, %v4380_v31 }
 0x816   : > { %v4507_v6 = vadd.f32 1.0, %v4475_v48 }
 0x817   : > { %v4476_v57 = vsel %vm4412_vm1, %v4380_v31, %v4444_v60 }
 0x818   : > { %v4539_v52 = vmul.f32 %v4507_v6, %v3291_v53  ;;  %v4508_v59 = vadd.f32 1.0, %v4476_v57 }
 0x81a   : > { %v4540_v56 = vmul.f32 %v4508_v59, %v3292_v3  ;;  %v4555_v39 = vpack.c.bf16 %v4539_v52, %v4537_v21 }
 0x81c   : > { %v4556_v14 = vpack.c.bf16 %v4540_v56, %v4538_v47  ;;  %4732 = vmatmul.bf16.gmra.mxu2 %v4555_v39 }
 0x81e   : > { %4781 = vmatmul.bf16.gmra.mxu3 %v4556_v14 }
 0x83e   : > { %v4718_v41 = vpop.f32.mrf.mxu2 }
 0x83f   : > { %v4719_v18 = vadd.f32 %v6656_v2, %v4718_v41 }
 0x841   : > { %v4810_v41 = vpop.xlane.xlu2 %4809 }
 0x846   : > { %v4767_v19 = vpop.f32.mrf.mxu3  ;;  %v4720_v37 = vpop.f32.mrf.mxu2 }
 0x847   : > { %v4768_v17 = vadd.f32 %v4767_v19, %v4719_v18  ;;  %v4721_v42 = vadd.f32 %v6656_v2, %v4720_v37 }
 0x849   : > { %v9067_v54 = vadd.f32 %v4768_v17, %v9471_v22  ;;  %v4839_v22 = vmul.f32 %v4810_v41, %v7475_v12 }
 0x84b   : > { %4821 = vadd.xlane.f32.xlu2 %v9067_v54 }
 0x84e   : > { %v4769_v34 = vpop.f32.mrf.mxu3 }
 0x84f   : > { %v4770_v50 = vadd.f32 %v4769_v34, %v4721_v42 }
 0x851   : > { %v9071_v49 = vadd.f32 %v4770_v50, %v9472_v46 }
 0x853   : > { %4823 = vadd.xlane.f32.xlu1 %v9071_v49 }
 0x857   : > { %v4723_v27 = vpop.f32.mrf.mxu2 }
 0x858   : > { %v4724_v11 = vadd.f32 %v6656_v2, %v4723_v27 }
 0x85f   : > { %v4725_v44 = vpop.f32.mrf.mxu2 }
 0x860   : > { %v4726_v43 = vadd.f32 %v6656_v2, %v4725_v44 }
 0x865   : > { %v4772_v4 = vpop.f32.mrf.mxu3 }
 0x866   : > { %v4773_v1 = vadd.f32 %v4772_v4, %v4724_v11 }
 0x868   : > { %v9075_v15 = vadd.f32 %v4773_v1, %v9473_v9 }
 0x869   : > { %v4806_v45 = vpop.xlane.xlu1 %4805 }
 0x86a   : > { %4825 = vadd.xlane.f32.xlu0 %v9075_v15  ;;  %v4837_v23 = vmul.f32 %v4806_v45, %v7475_v12 }
 0x86c   : > { %v9092_v32 = vsub.f32 %v9008_v30, %v4837_v23  ;;  %v4816_v50 = vpop.xlane.xlu2 %4815 }
 0x86d   : > { %v4774_v51 = vpop.f32.mrf.mxu3  ;;  %v4808_v52 = vpop.xlane.xlu0 %4807  ;;  %v4842_v27 = vmul.f32 %v4816_v50, %v7475_v12 }
 0x86e   : > { %v4775_v62 = vadd.f32 %v4774_v51, %v4726_v43  ;;  %v4869_v53 = vmul.f32 %v9092_v32, %v9092_v32 }
 0x870   : > { %v9079_v36 = vadd.f32 %v4775_v62, %v9474_v10 }
 0x871   : > { %v4812_v60 = vpop.xlane.xlu1 %4811 }
 0x872   : > { %4827 = vadd.xlane.f32.xlu2 %v9079_v36 }
 0x875   : > { %v4814_v19 = vpop.xlane.xlu0 %4813 }
 0x876   : > { %v4728_v0 = vpop.f32.mrf.mxu2  ;;  %v4841_v42 = vmul.f32 %v4814_v19, %v7475_v12 }
 0x877   : > { %v4729_v8 = vadd.f32 %v6656_v2, %v4728_v0 }
 0x87b   : > { %v4777_v5 = vpop.f32.mrf.mxu3 }
 0x87c   : > { %v4778_v35 = vadd.f32 %v4777_v5, %v4729_v8 }
 0x87d   : > { %v4818_v6 = vpop.xlane.xlu1 %4817 }
 0x87e   : > { %v9083_v28 = vadd.f32 %v4778_v35, %v8252_v61  ;;  %v4730_v26 = vpop.f32.mrf.mxu2  ;;  %v4840_v61 = vmul.f32 %v4812_v60, %v7475_v12  ;;  %v4843_v57 = vmul.f32 %v4818_v6, %v7475_v12 }
 0x87f   : > { %v4731_v20 = vadd.f32 %v6656_v2, %v4730_v26 }
 0x880   : > { %4829 = vadd.xlane.f32.xlu1 %v9083_v28  ;;  %v9098_v55 = vsub.f32 %v9034_v25, %v4840_v61  ;;  %v9104_v21 = vsub.f32 %v9048_v33, %v4843_v57  ;;  %v4838_v25 = vmul.f32 %v4808_v52, %v7475_v12 }
 0x882   : > { %v4875_v30 = vmul.f32 %v9104_v21, %v9104_v21  ;;  %v9114_v33 = vsub.f32 %v9022_v7, %v4838_v25  ;;  %v9125_v7 = vsub.f32 %v8839_v16, %v4839_v22  ;;  %v9137_v16 = vsub.f32 %v9017_v38, %v4842_v27 }
 0x883   : > { %v4779_v31 = vpop.f32.mrf.mxu3 }
 0x884   : > { %v4780_v63 = vadd.f32 %v4779_v31, %v4731_v20  ;;  %v4874_v1 = vmul.f32 %v9137_v16, %v9137_v16 }
 0x885   : > { %v4820_v46 = vpop.xlane.xlu0 %4819 }
 0x886   : > { %v9088_v48 = vadd.f32 %v4780_v63, %v8255_v58  ;;  %v4872_v58 = vmul.f32 %v9098_v55, %v9098_v55  ;;  %v4844_v11 = vmul.f32 %v4820_v46, %v7475_v12 }
 0x888   : > { %4831 = vadd.xlane.f32.xlu0 %v9088_v48 }
 0x890   : > { %4885 = vadd.xlane.f32.xlu0 %v4869_v53 }
 0x898   : > { %4891 = vadd.xlane.f32.xlu0 %v4872_v58 }
 0x89f   : > { %v4733_v3 = vpop.f32.mrf.mxu2 }
 0x8a0   : > { %4897 = vadd.xlane.f32.xlu0 %v4875_v30  ;;  %v4734_v59 = vadd.f32 %v6656_v2, %v4733_v3 }
 0x8a1   : > { %v4782_v47 = vpop.f32.mrf.mxu3 }
 0x8a2   : > { %v4783_v56 = vadd.f32 %v4782_v47, %v4734_v59 }
 0x8a4   : > { %v9110_v39 = vadd.f32 %v4783_v56, %v8425_v29  ;;  %v4870_v29 = vmul.f32 %v9114_v33, %v9114_v33 }
 0x8a6   : > { %4833 = vadd.xlane.f32.xlu2 %v9110_v39 }
 0x8a7   : > { %v4735_v14 = vpop.f32.mrf.mxu2 }
 0x8a8   : > { %v4736_v18 = vadd.f32 %v6656_v2, %v4735_v14  ;;  %v9128_v2 = vsub.f32 %v9042_v13, %v4841_v42  ;;  %v9140_v13 = vsub.f32 %v9054_v24, %v4844_v11 }
 0x8a9   : > { %v4784_v17 = vpop.f32.mrf.mxu3 }
 0x8aa   : > { %v4785_v37 = vadd.f32 %v4784_v17, %v4736_v18  ;;  %v4873_v4 = vmul.f32 %v9128_v2, %v9128_v2  ;;  %v4876_v44 = vmul.f32 %v9140_v13, %v9140_v13 }
 0x8ac   : > { %v9119_v34 = vadd.f32 %v4785_v37, %v8421_v40  ;;  %v4871_v40 = vmul.f32 %v9125_v7, %v9125_v7 }
 0x8ae   : > { %4835 = vadd.xlane.f32.xlu1 %v9119_v34  ;;  %4887 = vadd.xlane.f32.xlu2 %v4870_v29 }
 0x8b6   : > { %4889 = vadd.xlane.f32.xlu1 %v4871_v40  ;;  %4893 = vadd.xlane.f32.xlu2 %v4873_v4 }
 0x8be   : > { %4895 = vadd.xlane.f32.xlu1 %v4874_v1  ;;  %4899 = vadd.xlane.f32.xlu2 %v4876_v44  ;;  %v4822_v9 = vpop.xlane.xlu2 %4821 }
 0x8bf   : > { %v4845_v43 = vmul.f32 %v4822_v9, %v7475_v12 }
 0x8c1   : > { %v9148_v51 = vsub.f32 %v9067_v54, %v4845_v43 }
 0x8c3   : > { %v4877_v38 = vmul.f32 %v9148_v51, %v9148_v51 }
 0x8c6   : > { %4901 = vadd.xlane.f32.xlu1 %v4877_v38  ;;  %v4824_v24 = vpop.xlane.xlu1 %4823 }
 0x8c7   : > { %v4846_v62 = vmul.f32 %v4824_v24, %v7475_v12 }
 0x8c9   : > { %v9154_v10 = vsub.f32 %v9071_v49, %v4846_v62 }
 0x8cb   : > { %v4878_v0 = vmul.f32 %v9154_v10, %v9154_v10 }
 0x8cd   : > { %4903 = vadd.xlane.f32.xlu0 %v4878_v0 }
 0x8dd   : > { %v4826_v8 = vpop.xlane.xlu0 %4825 }
 0x8de   : > { %v4847_v5 = vmul.f32 %v4826_v8, %v7475_v12 }
 0x8e0   : > { %v9160_v54 = vsub.f32 %v9075_v15, %v4847_v5 }
 0x8e2   : > { %v4879_v35 = vmul.f32 %v9160_v54, %v9160_v54 }
 0x8e4   : > { %4905 = vadd.xlane.f32.xlu2 %v4879_v35 }
 0x8e5   : > { %v4828_v26 = vpop.xlane.xlu2 %4827 }
 0x8e6   : > { %v4848_v45 = vmul.f32 %v4828_v26, %v7475_v12 }
 0x8e8   : > { %v9166_v49 = vsub.f32 %v9079_v36, %v4848_v45 }
 0x8ea   : > { %v4880_v20 = vmul.f32 %v9166_v49, %v9166_v49 }
 0x8ec   : > { %4907 = vadd.xlane.f32.xlu1 %v4880_v20 }
 0x8f3   : > { %v4830_v31 = vpop.xlane.xlu1 %4829 }
 0x8f4   : > { %v4849_v63 = vmul.f32 %v4830_v31, %v7475_v12 }
 0x8f6   : > { %v9172_v15 = vsub.f32 %v9083_v28, %v4849_v63 }
 0x8f8   : > { %v4881_v23 = vmul.f32 %v9172_v15, %v9172_v15 }
 0x8fa   : > { %4909 = vadd.xlane.f32.xlu0 %v4881_v23 }
 0x8fb   : > { %v4832_v60 = vpop.xlane.xlu0 %4831 }
 0x8fc   : > { %v4850_v61 = vmul.f32 %v4832_v60, %v7475_v12 }
 0x8fe   : > { %v9178_v36 = vsub.f32 %v9088_v48, %v4850_v61 }
 0x900   : > { %v4882_v53 = vmul.f32 %v9178_v36, %v9178_v36 }
 0x902   : > { %4911 = vadd.xlane.f32.xlu2 %v4882_v53 }
 0x903   : > { %v4886_v6 = vpop.xlane.xlu0 %4885 }
 0x904   : > { %v4917_v57 = vmul.f32 %v4886_v6, %v7475_v12 }
 0x906   : > { %v4933_v28 = vadd.f32 1e-12, %v4917_v57  ;;  %v9227_v57 = vld [vmem:[%s644_s23] ss:$0 sm:$0xff] }
 0x908   : > { %6622 = vrsqrt.f32 %v4933_v28  ;;  %vm4955_vm3 = vweird.f32 %v4933_v28 }
 0x90b   : > { %v4892_v58 = vpop.xlane.xlu0 %4891 }
 0x90c   : > { %v4920_v30 = vmul.f32 %v4892_v58, %v7475_v12 }
 0x90e   : > { %v4936_v52 = vadd.f32 1e-12, %v4920_v30  ;;  %v6623_v3 = vpop.eup %6622 }
 0x90f   : > { %v4950_v56 = vmul.f32 %v6623_v3, %v4933_v28  ;;  %vm4956_vm2 = vweird.f32 %v6623_v3 }
 0x910   : > { %6624 = vrsqrt.f32 %v4936_v52  ;;  %vm4957_vm4 = vmor %vm4955_vm3, %vm4956_vm2  ;;  %vm4985_vm6 = vweird.f32 %v4936_v52 }
 0x911   : > { %v4951_v19 = vmul.f32 %v6623_v3, %v4950_v56 }
 0x913   : > { %v4898_v47 = vpop.xlane.xlu0 %4897  ;;  %v4952_v50 = vmul.f32 0.5, %v4951_v19  ;;  %v9252_v19 = vld [vmem:[%s647_s1] ss:$0 sm:$0xff] }
 0x914   : > { %v4923_v14 = vmul.f32 %v4898_v47, %v7475_v12 }
 0x915   : > { %v4953_v4 = vsub.f32 1.5, %v4952_v50 }
 0x916   : > { %v9189_v41 = vpop.eup %6624  ;;  %v9194_v37 = vadd.f32 1e-12, %v4923_v14 }
 0x917   : > { %v4980_v17 = vmul.f32 %v9189_v41, %v4936_v52  ;;  %v4954_v62 = vmul.f32 %v6623_v3, %v4953_v4  ;;  %vm4986_vm5 = vweird.f32 %v9189_v41 }
 0x918   : > { %6626 = vrsqrt.f32 %v9194_v37  ;;  %vm9230_vm8 = vmor %vm4985_vm6, %vm4986_vm5  ;;  %vm5015_vm1 = vweird.f32 %v9194_v37 }
 0x919   : > { %v4834_v59 = vpop.xlane.xlu2 %4833  ;;  %v4981_v11 = vmul.f32 %v9189_v41, %v4980_v17  ;;  %v4958_v20 = vsel %vm4957_vm4, %v6623_v3, %v4954_v62 }
 0x91a   : > { %v4851_v48 = vmul.f32 %v4834_v59, %v7475_v12  ;;  %v5109_v58 = vmul.f32 %v4958_v20, %v9092_v32 }
 0x91b   : > { %v4982_v1 = vmul.f32 0.5, %v4981_v11 }
 0x91c   : > { %v9186_v25 = vsub.f32 %v9110_v39, %v4851_v48  ;;  %v5128_v17 = vmul.f32 %v9227_v57, %v5109_v58 }
 0x91d   : > { %v4983_v5 = vsub.f32 1.5, %v4982_v1 }
 0x91e   : > { %v4883_v18 = vmul.f32 %v9186_v25, %v9186_v25 }
 0x91f   : > { %v4984_v31 = vmul.f32 %v9189_v41, %v4983_v5 }
 0x920   : > { %4913 = vadd.xlane.f32.xlu1 %v4883_v18 }
 0x921   : > { %v4836_v22 = vpop.xlane.xlu1 %4835  ;;  %v4888_v42 = vpop.xlane.xlu2 %4887  ;;  %v4988_v56 = vsel %vm9230_vm8, %v9189_v41, %v4984_v31 }
 0x922   : > { %v4852_v29 = vmul.f32 %v4836_v22, %v7475_v12  ;;  %v4918_v39 = vmul.f32 %v4888_v42, %v7475_v12  ;;  %v5112_v42 = vmul.f32 %v4988_v56, %v9098_v55 }
 0x924   : > { %v9199_v46 = vsub.f32 %v9119_v34, %v4852_v29  ;;  %v4934_v27 = vadd.f32 1e-12, %v4918_v39  ;;  %v9207_v34 = vpop.eup %6626  ;;  %v5131_v55 = vmul.f32 %v9227_v57, %v5112_v42 }
 0x925   : > { %v5010_v26 = vmul.f32 %v9207_v34, %v9194_v37  ;;  %vm5016_vm11 = vweird.f32 %v9207_v34 }
 0x926   : > { %6628 = vrsqrt.f32 %v4934_v27  ;;  %v4884_v40 = vmul.f32 %v9199_v46, %v9199_v46  ;;  %vm4965_vm9 = vweird.f32 %v4934_v27  ;;  %vm9280_vm3 = vmor %vm5015_vm1, %vm5016_vm11 }
 0x927   : > { %v5011_v61 = vmul.f32 %v9207_v34, %v5010_v26 }
 0x928   : > { %4915 = vadd.xlane.f32.xlu0 %v4884_v40 }
 0x929   : > { %v4890_v44 = vpop.xlane.xlu1 %4889  ;;  %v4894_v9 = vpop.xlane.xlu2 %4893  ;;  %v5012_v14 = vmul.f32 0.5, %v5011_v61 }
 0x92a   : > { %v4919_v43 = vmul.f32 %v4890_v44, %v7475_v12  ;;  %v4921_v38 = vmul.f32 %v4894_v9, %v7475_v12  ;;  %v5147_v44 = vadd.f32 %v9252_v19, %v5128_v17 }
 0x92b   : > { %v5013_v11 = vsub.f32 1.5, %v5012_v14 }
 0x92c   : > { %v6629_v24 = vpop.eup %6628  ;;  %v9209_v0 = vadd.f32 1e-12, %v4919_v43  ;;  %v9211_v8 = vadd.f32 1e-12, %v4921_v38 }
 0x92d   : > { %v4960_v35 = vmul.f32 %v6629_v24, %v4934_v27  ;;  %vm4966_vm7 = vweird.f32 %v6629_v24  ;;  %v5014_v26 = vmul.f32 %v9207_v34, %v5013_v11 }
 0x92e   : > { %6630 = vrsqrt.f32 %v9209_v0  ;;  %vm4967_vm10 = vmor %vm4965_vm9, %vm4966_vm7  ;;  %vm4975_vm13 = vweird.f32 %v9209_v0  ;;  %vm4995_vm0 = vweird.f32 %v9211_v8 }
 0x92f   : > { %v4961_v45 = vmul.f32 %v6629_v24, %v4960_v35  ;;  %6632 = vrsqrt.f32 %v9211_v8  ;;  %v5018_v58 = vsel %vm9280_vm3, %v9207_v34, %v5014_v26 }
 0x930   : > { %v5115_v34 = vmul.f32 %v5018_v58, %v9104_v21 }
 0x931   : > { %v4962_v63 = vmul.f32 0.5, %v4961_v45  ;;  %v4896_v23 = vpop.xlane.xlu1 %4895  ;;  %v4900_v60 = vpop.xlane.xlu2 %4899 }
 0x932   : > { %v4922_v53 = vmul.f32 %v4896_v23, %v7475_v12  ;;  %v4924_v6 = vmul.f32 %v4900_v60, %v7475_v12 }
 0x933   : > { %v4963_v28 = vsub.f32 1.5, %v4962_v63 }
 0x934   : > { %v6631_v30 = vpop.eup %6630  ;;  %v9234_v59 = vadd.f32 1e-12, %v4922_v53  ;;  %v9236_v47 = vadd.f32 1e-12, %v4924_v6 }
 0x935   : > { %v9238_v48 = vpop.eup %6632  ;;  %v4964_v32 = vmul.f32 %v6629_v24, %v4963_v28  ;;  %v4970_v52 = vmul.f32 %v6631_v30, %v9209_v0  ;;  %vm4976_vm12 = vweird.f32 %v6631_v30 }
 0x936   : > { %v4990_v18 = vmul.f32 %v9238_v48, %v9211_v8  ;;  %6634 = vrsqrt.f32 %v9234_v59  ;;  %vm4996_vm14 = vweird.f32 %v9238_v48  ;;  %vm4977_vm15 = vmor %vm4975_vm13, %vm4976_vm12  ;;  %vm5005_vm6 = vweird.f32 %v9234_v59 }
 0x937   : > { %v4968_v41 = vsel %vm4967_vm10, %v6629_v24, %v4964_v32  ;;  %v4971_v22 = vmul.f32 %v6631_v30, %v4970_v52  ;;  %6636 = vrsqrt.f32 %v9236_v47  ;;  %vm4997_vm2 = vmor %vm4995_vm0, %vm4996_vm14  ;;  %vm5025_vm8 = vweird.f32 %v9236_v47 }
 0x938   : > { %v5110_v29 = vmul.f32 %v4968_v41, %v9114_v33  ;;  %v4991_v39 = vmul.f32 %v9238_v48, %v4990_v18 }
 0x939   : > { %v4972_v50 = vmul.f32 0.5, %v4971_v22  ;;  %v4902_v27 = vpop.xlane.xlu1 %4901 }
 0x93a   : > { %v5129_v40 = vmul.f32 %v9227_v57, %v5110_v29  ;;  %v4992_v4 = vmul.f32 0.5, %v4991_v39  ;;  %v4925_v1 = vmul.f32 %v4902_v27, %v7475_v12 }
 0x93b   : > { %v4973_v9 = vsub.f32 1.5, %v4972_v50 }
 0x93c   : > { %v6635_v43 = vpop.eup %6634  ;;  %v5148_v33 = vadd.f32 %v9252_v19, %v5129_v40  ;;  %v4993_v38 = vsub.f32 1.5, %v4992_v4  ;;  %v9265_v24 = vadd.f32 1e-12, %v4925_v1 }
 0x93d   : > { %v6637_v62 = vpop.eup %6636  ;;  %v4974_v5 = vmul.f32 %v6631_v30, %v4973_v9  ;;  %v5000_v35 = vmul.f32 %v6635_v43, %v9234_v59  ;;  %vm5006_vm4 = vweird.f32 %v6635_v43  ;;  %v5134_v59 = vmul.f32 %v9227_v57, %v5115_v34 }
 0x93e   : > { %v6201_v45 = vpack.c.bf16 %v5148_v33, %v5147_v44  ;;  %v4994_v20 = vmul.f32 %v9238_v48, %v4993_v38  ;;  %v5020_v31 = vmul.f32 %v6637_v62, %v9236_v47  ;;  %6638 = vrsqrt.f32 %v9265_v24  ;;  %vm5007_vm7 = vmor %vm5005_vm6, %vm5006_vm4 }
 0x93f   : > { %v4978_v63 = vsel %vm4977_vm15, %v6631_v30, %v4974_v5  ;;  %v5001_v23 = vmul.f32 %v6635_v43, %v5000_v35  ;;  %v5150_v30 = vadd.f32 %v9252_v19, %v5131_v55  ;;  %vm5026_vm5 = vweird.f32 %v6637_v62 }
 0x940   : > { %6202 = vst [vmem:[%s6892_s9] sm:$0xff] %v6201_v45   ;;  %v5111_v0 = vmul.f32 %v4978_v63, %v9125_v7  ;;  %v5021_v60 = vmul.f32 %v6637_v62, %v5020_v31  ;;  %v4998_v53 = vsel %vm4997_vm2, %v9238_v48, %v4994_v20  ;;  %v4904_v8 = vpop.xlane.xlu0 %4903  ;;  %vm5027_vm9 = vmor %vm5025_vm8, %vm5026_vm5  ;;  %vm5035_vm11 = vweird.f32 %v9265_v24 }
 0x941   : > { %v5002_v6 = vmul.f32 0.5, %v5001_v23  ;;  %v4926_v7 = vmul.f32 %v4904_v8, %v7475_v12  ;;  %v5113_v48 = vmul.f32 %v4998_v53, %v9128_v2 }
 0x942   : > { %v5130_v37 = vmul.f32 %v9227_v57, %v5111_v0  ;;  %v5022_v28 = vmul.f32 0.5, %v5021_v60 }
 0x943   : > { %v5003_v3 = vsub.f32 1.5, %v5002_v6  ;;  %v4942_v52 = vadd.f32 1e-12, %v4926_v7  ;;  %v5132_v2 = vmul.f32 %v9227_v57, %v5113_v48 }
 0x944   : > { %v5149_v56 = vadd.f32 %v9252_v19, %v5130_v37  ;;  %v5023_v32 = vsub.f32 1.5, %v5022_v28  ;;  %v6639_v14 = vpop.eup %6638 }
 0x945   : > { %v5004_v18 = vmul.f32 %v6635_v43, %v5003_v3  ;;  %v5030_v22 = vmul.f32 %v6639_v14, %v9265_v24  ;;  %6640 = vrsqrt.f32 %v4942_v52  ;;  %v5151_v40 = vadd.f32 %v9252_v19, %v5132_v2 }
 0x946   : > { %v6206_v17 = vpack.c.bf16 %v5150_v30, %v5149_v56  ;;  %v5024_v41 = vmul.f32 %v6637_v62, %v5023_v32  ;;  %vm5036_vm10 = vweird.f32 %v6639_v14  ;;  %vm5045_vm14 = vweird.f32 %v4942_v52 }
 0x947   : > { %v5008_v42 = vsel %vm5007_vm7, %v6635_v43, %v5004_v18  ;;  %v5031_v39 = vmul.f32 %v6639_v14, %v5030_v22  ;;  %vm5037_vm12 = vmor %vm5035_vm11, %vm5036_vm10 }
 0x948   : > { %6266 = vst [vmem:[%s6892_s9 + $0x8] sm:$0xff] %v6206_v17   ;;  %v5114_v29 = vmul.f32 %v5008_v42, %v9137_v16  ;;  %v5028_v21 = vsel %vm5027_vm9, %v6637_v62, %v5024_v41  ;;  %v5153_v16 = vadd.f32 %v9252_v19, %v5134_v59 }
 0x949   : > { %v5116_v50 = vmul.f32 %v5028_v21, %v9140_v13  ;;  %v5032_v27 = vmul.f32 0.5, %v5031_v39 }
 0x94a   : > { %v5133_v47 = vmul.f32 %v9227_v57, %v5114_v29 }
 0x94b   : > { %v5135_v11 = vmul.f32 %v9227_v57, %v5116_v50  ;;  %v5033_v1 = vsub.f32 1.5, %v5032_v27  ;;  %v6641_v44 = vpop.eup %6640 }
 0x94c   : > { %v5152_v4 = vadd.f32 %v9252_v19, %v5133_v47  ;;  %v5040_v13 = vmul.f32 %v6641_v44, %v4942_v52  ;;  %vm5046_vm13 = vweird.f32 %v6641_v44 }
 0x94d   : > { %v5154_v9 = vadd.f32 %v9252_v19, %v5135_v11  ;;  %v5034_v55 = vmul.f32 %v6639_v14, %v5033_v1  ;;  %vm5047_vm15 = vmor %vm5045_vm14, %vm5046_vm13 }
 0x94e   : > { %v6211_v43 = vpack.c.bf16 %v5152_v4, %v5151_v40  ;;  %v5041_v38 = vmul.f32 %v6641_v44, %v5040_v13 }
 0x94f   : > { %v6216_v33 = vpack.c.bf16 %v5154_v9, %v5153_v16  ;;  %v5038_v62 = vsel %vm5037_vm12, %v6639_v14, %v5034_v55 }
 0x950   : > { %6267 = vst [vmem:[%s6892_s9 + $0x10] sm:$0xff] %v6211_v43   ;;  %v5042_v5 = vmul.f32 0.5, %v5041_v38  ;;  %v5117_v26 = vmul.f32 %v5038_v62, %v9148_v51 }
 0x951   : > { %6268 = vst [vmem:[%s6892_s9 + $0x18] sm:$0xff] %v6216_v33  }
 0x952   : > { %v5043_v35 = vsub.f32 1.5, %v5042_v5  ;;  %v5136_v23 = vmul.f32 %v9227_v57, %v5117_v26 }
 0x954   : > { %v5044_v45 = vmul.f32 %v6641_v44, %v5043_v35  ;;  %v5155_v61 = vadd.f32 %v9252_v19, %v5136_v23 }
 0x956   : > { %v5048_v31 = vsel %vm5047_vm15, %v6641_v44, %v5044_v45 }
 0x957   : > { %v4906_v20 = vpop.xlane.xlu2 %4905  ;;  %v5118_v24 = vmul.f32 %v5048_v31, %v9154_v10 }
 0x958   : > { %v4927_v63 = vmul.f32 %v4906_v20, %v7475_v12 }
 0x959   : > { %v5137_v60 = vmul.f32 %v9227_v57, %v5118_v24 }
 0x95a   : > { %v4943_v0 = vadd.f32 1e-12, %v4927_v63 }
 0x95b   : > { %v5156_v51 = vadd.f32 %v9252_v19, %v5137_v60 }
 0x95c   : > { %6642 = vrsqrt.f32 %v4943_v0  ;;  %vm5055_vm1 = vweird.f32 %v4943_v0 }
 0x95d   : > { %v6221_v53 = vpack.c.bf16 %v5156_v51, %v5155_v61 }
 0x95f   : > { %v4908_v6 = vpop.xlane.xlu1 %4907  ;;  %6269 = vst [vmem:[%s6892_s9 + $0x20] sm:$0xff] %v6221_v53  }
 0x960   : > { %v4928_v8 = vmul.f32 %v4908_v6, %v7475_v12 }
 0x962   : > { %v6643_v58 = vpop.eup %6642  ;;  %v4944_v37 = vadd.f32 1e-12, %v4928_v8 }
 0x963   : > { %v5050_v28 = vmul.f32 %v6643_v58, %v4943_v0  ;;  %vm5056_vm0 = vweird.f32 %v6643_v58 }
 0x964   : > { %6644 = vrsqrt.f32 %v4944_v37  ;;  %vm5057_vm2 = vmor %vm5055_vm1, %vm5056_vm0  ;;  %vm5065_vm4 = vweird.f32 %v4944_v37 }
 0x965   : > { %v5051_v7 = vmul.f32 %v6643_v58, %v5050_v28 }
 0x967   : > { %v5052_v30 = vmul.f32 0.5, %v5051_v7 }
 0x969   : > { %v5053_v10 = vsub.f32 1.5, %v5052_v30 }
 0x96a   : > { %v6645_v3 = vpop.eup %6644 }
 0x96b   : > { %v5054_v56 = vmul.f32 %v6643_v58, %v5053_v10  ;;  %v5060_v48 = vmul.f32 %v6645_v3, %v4944_v37  ;;  %vm5066_vm3 = vweird.f32 %v6645_v3 }
 0x96c   : > { %vm5067_vm5 = vmor %vm5065_vm4, %vm5066_vm3 }
 0x96d   : > { %v5061_v32 = vmul.f32 %v6645_v3, %v5060_v48  ;;  %v4910_v52 = vpop.xlane.xlu0 %4909  ;;  %v5058_v34 = vsel %vm5057_vm2, %v6643_v58, %v5054_v56 }
 0x96e   : > { %v4929_v14 = vmul.f32 %v4910_v52, %v7475_v12  ;;  %v5119_v22 = vmul.f32 %v5058_v34, %v9160_v54 }
 0x96f   : > { %v5062_v18 = vmul.f32 0.5, %v5061_v32 }
 0x970   : > { %v4945_v17 = vadd.f32 1e-12, %v4929_v14  ;;  %v5138_v21 = vmul.f32 %v9227_v57, %v5119_v22 }
 0x971   : > { %v5063_v41 = vsub.f32 1.5, %v5062_v18 }
 0x972   : > { %6646 = vrsqrt.f32 %v4945_v17  ;;  %v5157_v54 = vadd.f32 %v9252_v19, %v5138_v21  ;;  %vm5075_vm7 = vweird.f32 %v4945_v17 }
 0x973   : > { %v5064_v42 = vmul.f32 %v6645_v3, %v5063_v41 }
 0x975   : > { %v5068_v2 = vsel %vm5067_vm5, %v6645_v3, %v5064_v42  ;;  %v4912_v29 = vpop.xlane.xlu2 %4911 }
 0x976   : > { %v5120_v39 = vmul.f32 %v5068_v2, %v9166_v49  ;;  %v4930_v59 = vmul.f32 %v4912_v29, %v7475_v12 }
 0x978   : > { %v6647_v50 = vpop.eup %6646  ;;  %v5139_v47 = vmul.f32 %v9227_v57, %v5120_v39  ;;  %v4946_v27 = vadd.f32 1e-12, %v4930_v59 }
 0x979   : > { %v5070_v11 = vmul.f32 %v6647_v50, %v4945_v17  ;;  %vm5076_vm6 = vweird.f32 %v6647_v50 }
 0x97a   : > { %v5158_v40 = vadd.f32 %v9252_v19, %v5139_v47  ;;  %6648 = vrsqrt.f32 %v4946_v27  ;;  %vm5077_vm8 = vmor %vm5075_vm7, %vm5076_vm6  ;;  %vm5085_vm10 = vweird.f32 %v4946_v27 }
 0x97b   : > { %v5071_v4 = vmul.f32 %v6647_v50, %v5070_v11 }
 0x97c   : > { %v6226_v1 = vpack.c.bf16 %v5158_v40, %v5157_v54 }
 0x97d   : > { %v5072_v44 = vmul.f32 0.5, %v5071_v4 }
 0x97e   : > { %6270 = vst [vmem:[%s6892_s9 + $0x28] sm:$0xff] %v6226_v1  }
 0x97f   : > { %v5073_v16 = vsub.f32 1.5, %v5072_v44 }
 0x980   : > { %v6649_v9 = vpop.eup %6648 }
 0x981   : > { %v5074_v43 = vmul.f32 %v6647_v50, %v5073_v16  ;;  %v5080_v49 = vmul.f32 %v6649_v9, %v4946_v27  ;;  %vm5086_vm9 = vweird.f32 %v6649_v9 }
 0x982   : > { %vm5087_vm11 = vmor %vm5085_vm10, %vm5086_vm9 }
 0x983   : > { %v5081_v55 = vmul.f32 %v6649_v9, %v5080_v49  ;;  %v5078_v13 = vsel %vm5077_vm8, %v6647_v50, %v5074_v43 }
 0x984   : > { %v5121_v62 = vmul.f32 %v5078_v13, %v9172_v15 }
 0x985   : > { %v5082_v33 = vmul.f32 0.5, %v5081_v55 }
 0x986   : > { %v5140_v26 = vmul.f32 %v9227_v57, %v5121_v62 }
 0x987   : > { %v5083_v38 = vsub.f32 1.5, %v5082_v33 }
 0x988   : > { %v5159_v31 = vadd.f32 %v9252_v19, %v5140_v26 }
 0x989   : > { %v5084_v5 = vmul.f32 %v6649_v9, %v5083_v38 }
 0x98b   : > { %v5088_v35 = vsel %vm5087_vm11, %v6649_v9, %v5084_v5 }
 0x98c   : > { %v5122_v45 = vmul.f32 %v5088_v35, %v9178_v36 }
 0x98e   : > { %v5141_v20 = vmul.f32 %v9227_v57, %v5122_v45 }
 0x990   : > { %v5160_v63 = vadd.f32 %v9252_v19, %v5141_v20 }
 0x992   : > { %v6231_v23 = vpack.c.bf16 %v5160_v63, %v5159_v31 }
 0x993   : > { %v4914_v24 = vpop.xlane.xlu1 %4913 }
 0x994   : > { %6271 = vst [vmem:[%s6892_s9 + $0x30] sm:$0xff] %v6231_v23   ;;  %v4931_v0 = vmul.f32 %v4914_v24, %v7475_v12 }
 0x996   : > { %v4947_v15 = vadd.f32 1e-12, %v4931_v0 }
 0x998   : > { %6650 = vrsqrt.f32 %v4947_v15  ;;  %vm5095_vm13 = vweird.f32 %v4947_v15 }
 0x99b   : > { %v4916_v60 = vpop.xlane.xlu0 %4915 }
 0x99c   : > { %v4932_v61 = vmul.f32 %v4916_v60, %v7475_v12 }
 0x99e   : > { %v6651_v51 = vpop.eup %6650  ;;  %v4948_v53 = vadd.f32 1e-12, %v4932_v61 }
 0x99f   : > { %v5090_v6 = vmul.f32 %v6651_v51, %v4947_v15  ;;  %vm5096_vm12 = vweird.f32 %v6651_v51 }
 0x9a0   : > { %6652 = vrsqrt.f32 %v4948_v53  ;;  %vm5097_vm14 = vmor %vm5095_vm13, %vm5096_vm12  ;;  %vm5105_vm0 = vweird.f32 %v4948_v53 }
 0x9a1   : > { %v5091_v36 = vmul.f32 %v6651_v51, %v5090_v6 }
 0x9a3   : > { %v5092_v8 = vmul.f32 0.5, %v5091_v36 }
 0x9a5   : > { %v5093_v58 = vsub.f32 1.5, %v5092_v8 }
 0x9a6   : > { %v6653_v37 = vpop.eup %6652 }
 0x9a7   : > { %v5094_v28 = vmul.f32 %v6651_v51, %v5093_v58  ;;  %v5100_v7 = vmul.f32 %v6653_v37, %v4948_v53  ;;  %vm5106_vm15 = vweird.f32 %v6653_v37 }
 0x9a8   : > { %vm5107_vm1 = vmor %vm5105_vm0, %vm5106_vm15 }
 0x9a9   : > { %v5101_v30 = vmul.f32 %v6653_v37, %v5100_v7  ;;  %v5098_v10 = vsel %vm5097_vm14, %v6651_v51, %v5094_v28 }
 0x9aa   : > { %v5123_v12 = vmul.f32 %v5098_v10, %v9186_v25 }
 0x9ab   : > { %v5102_v3 = vmul.f32 0.5, %v5101_v30 }
 0x9ac   : > { %v5142_v52 = vmul.f32 %v9227_v57, %v5123_v12 }
 0x9ad   : > { %v5103_v56 = vsub.f32 1.5, %v5102_v3 }
 0x9ae   : > { %v5161_v18 = vadd.f32 %v9252_v19, %v5142_v52 }
 0x9af   : > { %v5104_v48 = vmul.f32 %v6653_v37, %v5103_v56 }
 0x9b1   : > { %v5108_v32 = vsel %vm5107_vm1, %v6653_v37, %v5104_v48 }
 0x9b2   : > { %v5124_v14 = vmul.f32 %v5108_v32, %v9199_v46 }
 0x9b4   : > { %v5143_v34 = vmul.f32 %v9227_v57, %v5124_v14 }
 0x9b6   : > { %v5162_v17 = vadd.f32 %v9252_v19, %v5143_v34 }
 0x9b8   : > { %v6236_v41 = vpack.c.bf16 %v5162_v17, %v5161_v18 }
 0x9ba   : > { %6272 = vst [vmem:[%s6892_s9 + $0x38] sm:$0xff] %v6236_v41  }
 0x9bb PF: > { %s9479_s21 = sld [smem:[#allocation12_spill]] }
 0x9bc   : > { %s9480_s29 = sld [smem:[#allocation10_spill]] }
 0x9bd   : > { %s9481_s30 = sld [smem:[#allocation11_spill]] }
 0x9be   : > { %s9482_s15 = sld [smem:[#allocation13_spill]] }
 0x9bf   : > { %s9483_s16 = sld [smem:[#allocation14_spill]] }
 0x9c1   : > { %s24_s17 = sadd.s32 1, %s9479_s21  }
 0x9c2   : > { %p21_p8 = scmp.ge.s32.totalorder %s24_s17, 6  }
 0x9c4   :  { %23 = sbr.rel (!%p21_p8) target bundleno = 11 (0xb), region = 172 }
 0x9c9   :  { %5216 = vsyncmov [#allocation5] }
 0x9cc   :  { %s5217_s9 = vpop.sfrf %5216 }
 0x9cd   :  { %p5919_p9 = scmp.ne.s32.totalorder %s5217_s9, 0 }
 0x9cf   :  { %5221 = shalt.err (%p5919_p9)  }

</bundles_post_ra>
